<compile_context>
chip_gen: v7x
topology: tpu7x:2x2x1
jax: 0.10.0
libtpu: 0.0.40
codegen_flags: <defaults>
</compile_context>

<pallas_src>
import jax
import jax.numpy as jnp
from jax.experimental import pallas as pl
from jax.experimental.pallas import tpu as pltpu

C_PAD = 128      # lane padding for every channel / feature axis
K1_PAD = 128     # conv1 im2col contraction: 5*5*3 = 75 -> 128
B_BLK = 16       # batch rows per grid step (multiple of 8 sublanes; sweepable)


# ------------------------------- fused kernel --------------------------------

def _cifar10_fused_kernel(xcol_ref, w1_ref, b1_ref, w2_ref, b2_ref,
                          f1w_ref, f1b_ref, f2w_ref, f2b_ref, f3w_ref, f3b_ref,
                          o_ref, h1_ref, h2_ref):
    """Whole network for one batch block.

    xcol_ref : (28, 28, TB, 128) bf16  conv1 im2col patches (k=(kh*5+kw)*3+cin)
    w1_ref   : (128, 128)        bf16  conv1 weight, im2col layout
    w2_ref   : (5, 5, 128, 128)  bf16  conv2 weight [kh, kw, cin, cout]
    f1w_ref  : (25, 128, 128)    bf16  fc1 weight [p=h*5+w, c, n]
    f2w_ref, f3w_ref : (128,128) bf16 ; b*/f*b : (1,128) f32
    o_ref    : (TB, 128) f32 logits (lane-dense)
    h1_ref   : (14, 14, TB, 128) bf16 VMEM scratch (pooled conv1)
    h2_ref   : (5, 5, TB, 128)   bf16 VMEM scratch (pooled conv2)
    """
    TB = o_ref.shape[0]
    C = C_PAD

    # ---- conv1 (single K=128 im2col matmul per row) + bias + ReLU + pool ----
    w1 = w1_ref[...]
    b1 = b1_ref[...].reshape(1, 1, C)

    @pl.loop(0, 14)                                    # pooled conv1 rows
    def _(p):
        def conv1_row(r):
            lhs = xcol_ref[pl.ds(2 * p + r, 1), :, :, :].reshape(28 * TB, K1_PAD)
            y = jnp.dot(lhs, w1, preferred_element_type=jnp.float32)
            y = jnp.maximum(y.reshape(28, TB, C) + b1, 0.0)
            y = y.reshape(14, 2, TB, C)
            return jnp.maximum(y[:, 0], y[:, 1])        # 2x maxpool along W
        pooled = jnp.maximum(conv1_row(0), conv1_row(1))  # 2x maxpool along H
        h1_ref[pl.ds(p, 1), :, :, :] = (
            pooled.reshape(1, 14, TB, C).astype(h1_ref.dtype))

    # ---- conv2 (25 taps, lane-dense K=128) + bias + ReLU + pool --------------
    b2 = b2_ref[...].reshape(1, 1, C)

    @pl.loop(0, 5)                                     # pooled conv2 rows
    def _(q):
        def conv2_row(r):
            acc = None                                  # register accumulator
            for kh in range(5):
                row = h1_ref[pl.ds(2 * q + r + kh, 1), :, :, :].reshape(14, TB, C)
                for kw in range(5):
                    lhs = row[kw:kw + 10].reshape(10 * TB, C)   # bf16 already
                    t = jnp.dot(lhs, w2_ref[kh, kw],
                                preferred_element_type=jnp.float32)
                    acc = t if acc is None else acc + t
            y = jnp.maximum(acc.reshape(10, TB, C) + b2, 0.0)
            y = y.reshape(5, 2, TB, C)
            return jnp.maximum(y[:, 0], y[:, 1])
        pooled = jnp.maximum(conv2_row(0), conv2_row(1))
        h2_ref[pl.ds(q, 1), :, :, :] = (
            pooled.reshape(1, 5, TB, C).astype(h2_ref.dtype))

    # ---- flatten + fc1 + ReLU + fc2 + ReLU + fc3 -----------------------------
    # TODO(synk): fc1 could be a single K=3200 matmul, but with fused stages and
    # TB<=32 its 25 accumulated (TB,128)@(128,128) dots are negligible MXU work.
    x2 = h2_ref[...].reshape(25, TB, C)                 # bf16, p = h*5 + w
    h = jnp.dot(x2[0], f1w_ref[0], preferred_element_type=jnp.float32)
    for pp in range(1, 25):
        h = h + jnp.dot(x2[pp], f1w_ref[pp], preferred_element_type=jnp.float32)
    h = jnp.maximum(h + f1b_ref[...], 0.0)
    h = jnp.dot(h.astype(jnp.bfloat16), f2w_ref[...],
                preferred_element_type=jnp.float32)
    h = jnp.maximum(h + f2b_ref[...], 0.0)
    h = jnp.dot(h.astype(jnp.bfloat16), f3w_ref[...],
                preferred_element_type=jnp.float32)
    o_ref[...] = h + f3b_ref[...]


# ---------------------------------- wrapper -----------------------------------

def _conv1_im2col(x_nchw, Bp):
    """(B,3,32,32) f32 -> (28,28,Bp,128) bf16 patches, k = (kh*5+kw)*3 + cin."""
    B = x_nchw.shape[0]
    cols = [x_nchw[:, :, kh:kh + 28, kw:kw + 28]
            for kh in range(5) for kw in range(5)]            # each (B,3,28,28)
    xp = jnp.stack(cols, axis=1)                              # (B,25,3,28,28)
    xp = jnp.transpose(xp, (3, 4, 0, 1, 2)).reshape(28, 28, B, 75)
    xp = jnp.pad(xp, ((0, 0), (0, 0), (0, Bp - B), (0, K1_PAD - 75)))
    return xp.astype(jnp.bfloat16)


def cifar10_fused(xcol, kp, n_blocks):
    TB = B_BLK
    const2 = lambda i: (0, 0)
    return pl.pallas_call(
        _cifar10_fused_kernel,
        out_shape=jax.ShapeDtypeStruct((n_blocks * TB, C_PAD), jnp.float32),
        grid=(n_blocks,),
        in_specs=[
            pl.BlockSpec((28, 28, TB, K1_PAD), lambda i: (0, 0, i, 0)),
            pl.BlockSpec((K1_PAD, C_PAD), const2),
            pl.BlockSpec((1, C_PAD), const2),
            pl.BlockSpec((5, 5, C_PAD, C_PAD), lambda i: (0, 0, 0, 0)),
            pl.BlockSpec((1, C_PAD), const2),
            pl.BlockSpec((25, C_PAD, C_PAD), lambda i: (0, 0, 0)),
            pl.BlockSpec((1, C_PAD), const2),
            pl.BlockSpec((C_PAD, C_PAD), const2),
            pl.BlockSpec((1, C_PAD), const2),
            pl.BlockSpec((C_PAD, C_PAD), const2),
            pl.BlockSpec((1, C_PAD), const2),
        ],
        out_specs=pl.BlockSpec((TB, C_PAD), lambda i: (i, 0)),
        scratch_shapes=[
            pltpu.VMEM((14, 14, TB, C_PAD), jnp.bfloat16),    # pooled conv1
            pltpu.VMEM((5, 5, TB, C_PAD), jnp.bfloat16),      # pooled conv2
        ],
        compiler_params=pltpu.CompilerParams(
            dimension_semantics=("parallel",),
            vmem_limit_bytes=48 * 1024 * 1024),
    )(xcol, kp["c1w"], kp["c1b"], kp["c2w"], kp["c2b"],
      kp["f1w"], kp["f1b"], kp["f2w"], kp["f2b"], kp["f3w"], kp["f3b"])


def cifar10_forward(x_nchw, kp):
    """x_nchw: (B, 3, 32, 32) float32 -> logits (B, 10)."""
    B = x_nchw.shape[0]
    # >= 2 grid steps so both v7x TensorCores are used even for tiny batches.
    n_blocks = max(2, (B + B_BLK - 1) // B_BLK)
    Bp = n_blocks * B_BLK
    xcol = _conv1_im2col(x_nchw, Bp)
    logits = cifar10_fused(xcol, kp, n_blocks)
    return logits[:B, :10]


# --------------------------- deterministic params -----------------------------

def init_params(key):
    """PyTorch-layout parameters with nn.init-style uniform(-1/sqrt(fan_in))."""
    ks = jax.random.split(key, 10)

    def u(k, shape, fan_in):
        bound = 1.0 / jnp.sqrt(jnp.float32(fan_in))
        return jax.random.uniform(k, shape, jnp.float32, -bound, bound)

    # TODO(synk): the original module declares fc1 in_features = 16*5*5/2 == 200.0
    # (a PyTorch bug -- the forward actually produces 400 features after flatten);
    # we use in_features = 400 so the forward pass is well-defined.
    return {
        "conv1_w": u(ks[0], (6, 3, 5, 5), 3 * 25),
        "conv1_b": u(ks[1], (6,), 3 * 25),
        "conv2_w": u(ks[2], (16, 6, 5, 5), 6 * 25),
        "conv2_b": u(ks[3], (16,), 6 * 25),
        "fc1_w":   u(ks[4], (120, 400), 400),
        "fc1_b":   u(ks[5], (120,), 400),
        "fc2_w":   u(ks[6], (84, 120), 120),
        "fc2_b":   u(ks[7], (84,), 120),
        "fc3_w":   u(ks[8], (10, 84), 84),
        "fc3_b":   u(ks[9], (10,), 84),
    }


def prepare_params(p):
    """Permute / zero-pad torch-layout params into kernel layouts (done once)."""
    # conv1: (6,3,5,5)[o,i,kh,kw] -> im2col (75,6) -> (128,128) bf16
    w = jnp.transpose(p["conv1_w"], (2, 3, 1, 0)).reshape(75, 6)
    c1w = jnp.pad(w, ((0, K1_PAD - 75), (0, C_PAD - 6))).astype(jnp.bfloat16)
    c1b = jnp.pad(p["conv1_b"], ((0, C_PAD - 6),)).reshape(1, C_PAD)
    # conv2: (16,6,5,5) -> (5,5,128,128) bf16
    w = jnp.transpose(p["conv2_w"], (2, 3, 1, 0))                   # (5,5,6,16)
    c2w = jnp.pad(w, ((0, 0), (0, 0), (0, C_PAD - 6), (0, C_PAD - 16))
                  ).astype(jnp.bfloat16)
    c2b = jnp.pad(p["conv2_b"], ((0, C_PAD - 16),)).reshape(1, C_PAD)
    # fc1: torch flatten index = c*25 + h*5 + w  ->  (p=h*5+w, c, n), pad to 128
    w = p["fc1_w"].reshape(120, 16, 5, 5)                           # (n,c,h,w)
    w = jnp.transpose(w, (2, 3, 1, 0)).reshape(25, 16, 120)         # (p,c,n)
    f1w = jnp.pad(w, ((0, 0), (0, C_PAD - 16), (0, C_PAD - 120))).astype(jnp.bfloat16)
    f1b = jnp.pad(p["fc1_b"], ((0, C_PAD - 120),)).reshape(1, C_PAD)
    # fc2 / fc3: transpose to (in,out), zero-pad to (128,128)
    f2w = jnp.pad(p["fc2_w"].T, ((0, C_PAD - 120), (0, C_PAD - 84))).astype(jnp.bfloat16)
    f2b = jnp.pad(p["fc2_b"], ((0, C_PAD - 84),)).reshape(1, C_PAD)
    f3w = jnp.pad(p["fc3_w"].T, ((0, C_PAD - 84), (0, C_PAD - 10))).astype(jnp.bfloat16)
    f3b = jnp.pad(p["fc3_b"], ((0, C_PAD - 10),)).reshape(1, C_PAD)
    return {"c1w": c1w, "c1b": c1b, "c2w": c2w, "c2b": c2b,
            "f1w": f1w, "f1b": f1b, "f2w": f2w, "f2b": f2b,
            "f3w": f3w, "f3b": f3b}


# ------------------------------ pure-JAX reference ----------------------------

def reference_forward(x, p):
    """Plain-JAX f32 reference matching the PyTorch module semantics."""
    dn = ("NCHW", "OIHW", "NCHW")
    y = jax.lax.conv_general_dilated(x, p["conv1_w"], (1, 1), "VALID",
                                     dimension_numbers=dn)
    y = jax.nn.relu(y + p["conv1_b"].reshape(1, -1, 1, 1))
    y = jax.lax.reduce_window(y, -jnp.inf, jax.lax.max,
                              (1, 1, 2, 2), (1, 1, 2, 2), "VALID")
    y = jax.lax.conv_general_dilated(y, p["conv2_w"], (1, 1), "VALID",
                                     dimension_numbers=dn)
    y = jax.nn.relu(y + p["conv2_b"].reshape(1, -1, 1, 1))
    y = jax.lax.reduce_window(y, -jnp.inf, jax.lax.max,
                              (1, 1, 2, 2), (1, 1, 2, 2), "VALID")
    y = y.reshape(y.shape[0], -1)
    y = jax.nn.relu(y @ p["fc1_w"].T + p["fc1_b"])
    y = jax.nn.relu(y @ p["fc2_w"].T + p["fc2_b"])
    return y @ p["fc3_w"].T + p["fc3_b"]


if __name__ == "__main__":
    key = jax.random.PRNGKey(0)
    k_x, k_p = jax.random.split(key)
    # CIFAR-10 sized input (32x32 is required for the 16*5*5 flatten); small batch.
    x = jax.random.normal(k_x, (2, 3, 32, 32), jnp.float32)        # NCHW
    torch_params = init_params(k_p)
    kparams = prepare_params(torch_params)

    out = jax.jit(cifar10_forward)(x, kparams)
    out = jax.block_until_ready(out)
    assert out.shape == (2, 10) and out.dtype == jnp.float32

    ref = reference_forward(x, torch_params)
    # bf16 matmul inputs with f32 accumulation -> loose tolerance vs f32 reference.
    assert jnp.allclose(out, ref, rtol=1e-1, atol=1e-1), (
        "max abs err vs reference: " + str(jnp.max(jnp.abs(out - ref))))
    print("KERNEL_OK")
</pallas_src>

<mosaic_0001>
module attributes {stable_mosaic.version = 11 : i64} {
  func.func @_cifar10_fused_kernel(%arg0: i32, %arg1: memref<28x28x16x128xbf16, #tpu.memory_space<vmem>>, %arg2: memref<128x128xbf16, #tpu.memory_space<vmem>>, %arg3: memref<1x128xf32, #tpu.memory_space<vmem>>, %arg4: memref<5x5x128x128xbf16, #tpu.memory_space<vmem>>, %arg5: memref<1x128xf32, #tpu.memory_space<vmem>>, %arg6: memref<25x128x128xbf16, #tpu.memory_space<vmem>>, %arg7: memref<1x128xf32, #tpu.memory_space<vmem>>, %arg8: memref<128x128xbf16, #tpu.memory_space<vmem>>, %arg9: memref<1x128xf32, #tpu.memory_space<vmem>>, %arg10: memref<128x128xbf16, #tpu.memory_space<vmem>>, %arg11: memref<1x128xf32, #tpu.memory_space<vmem>>, %arg12: memref<16x128xf32, #tpu.memory_space<vmem>>, %arg13: memref<14x14x16x128xbf16, #tpu.memory_space<vmem>>, %arg14: memref<5x5x16x128xbf16, #tpu.memory_space<vmem>>) attributes {dimension_semantics = [#tpu.dimension_semantics<parallel>], iteration_bounds = array<i64: 2>, scalar_prefetch = 0 : i64, scratch_operands = 2 : i64, tpu.core_type = #tpu.core_type<tc>, window_params = [{transform_indices = @transform_0, window_bounds = array<i64: 28, 28, 16, 128>}, {pipeline_mode = #tpu.pipeline_mode<synchronous>, transform_indices = @transform_1, window_bounds = array<i64: 128, 128>}, {pipeline_mode = #tpu.pipeline_mode<synchronous>, transform_indices = @transform_2, window_bounds = array<i64: 1, 128>}, {pipeline_mode = #tpu.pipeline_mode<synchronous>, transform_indices = @transform_3, window_bounds = array<i64: 5, 5, 128, 128>}, {pipeline_mode = #tpu.pipeline_mode<synchronous>, transform_indices = @transform_4, window_bounds = array<i64: 1, 128>}, {pipeline_mode = #tpu.pipeline_mode<synchronous>, transform_indices = @transform_5, window_bounds = array<i64: 25, 128, 128>}, {pipeline_mode = #tpu.pipeline_mode<synchronous>, transform_indices = @transform_6, window_bounds = array<i64: 1, 128>}, {pipeline_mode = #tpu.pipeline_mode<synchronous>, transform_indices = @transform_7, window_bounds = array<i64: 128, 128>}, {pipeline_mode = #tpu.pipeline_mode<synchronous>, transform_indices = @transform_8, window_bounds = array<i64: 1, 128>}, {pipeline_mode = #tpu.pipeline_mode<synchronous>, transform_indices = @transform_9, window_bounds = array<i64: 128, 128>}, {pipeline_mode = #tpu.pipeline_mode<synchronous>, transform_indices = @transform_10, window_bounds = array<i64: 1, 128>}, {transform_indices = @transform_11, window_bounds = array<i64: 16, 128>}]} {
    %c0 = arith.constant 0 : index
    %c0_0 = arith.constant 0 : index
    %0 = vector.load %arg2[%c0, %c0_0] : memref<128x128xbf16, #tpu.memory_space<vmem>>, vector<128x128xbf16>
    %c0_1 = arith.constant 0 : index
    %c0_2 = arith.constant 0 : index
    %1 = vector.load %arg3[%c0_1, %c0_2] : memref<1x128xf32, #tpu.memory_space<vmem>>, vector<1x128xf32>
    %2 = vector.shape_cast %1 : vector<1x128xf32> to vector<1x1x128xf32>
    %c0_i32 = arith.constant 0 : i32
    %c14_i32 = arith.constant 14 : i32
    %3 = arith.addi %c0_i32, %c14_i32 : i32
    %c1_i32 = arith.constant 1 : i32
    scf.for %arg15 = %c0_i32 to %3 step %c1_i32  : i32 {
      %c1_i32_104 = arith.constant 1 : i32
      %178 = arith.muli %arg15, %c1_i32_104 : i32
      %c0_i32_105 = arith.constant 0 : i32
      %179 = arith.addi %c0_i32_105, %178 : i32
      %c2_i32 = arith.constant 2 : i32
      %180 = arith.muli %c2_i32, %179 : i32
      %c0_i32_106 = arith.constant 0 : i32
      %181 = arith.addi %180, %c0_i32_106 : i32
      %182 = arith.index_cast %181 : i32 to index
      %c0_107 = arith.constant 0 : index
      %c0_108 = arith.constant 0 : index
      %c0_109 = arith.constant 0 : index
      %183 = vector.load %arg1[%182, %c0_107, %c0_108, %c0_109] : memref<28x28x16x128xbf16, #tpu.memory_space<vmem>>, vector<1x28x16x128xbf16>
      %184 = vector.shape_cast %183 : vector<1x28x16x128xbf16> to vector<448x128xbf16>
      %cst_110 = arith.constant dense<0.000000e+00> : vector<448x128xf32>
      %185 = tpu.matmul %184, %0, %cst_110 {dimension_numbers = #tpu.dot_dimension_numbers<[1], [0], [0], [1], [0, 0, 1, 1], [], []>} : vector<448x128xbf16>, vector<128x128xbf16>, vector<448x128xf32> -> vector<448x128xf32>
      %186 = vector.shape_cast %185 : vector<448x128xf32> to vector<28x16x128xf32>
      %187 = vector.broadcast %2 : vector<1x1x128xf32> to vector<28x16x128xf32>
      %188 = arith.addf %186, %187 : vector<28x16x128xf32>
      %cst_111 = arith.constant 0.000000e+00 : f32
      %189 = vector.broadcast %cst_111 : f32 to vector<28x16x128xf32>
      %190 = arith.maximumf %188, %189 : vector<28x16x128xf32>
      %191 = vector.shape_cast %190 : vector<28x16x128xf32> to vector<14x2x16x128xf32>
      %192 = vector.extract_strided_slice %191 {offsets = [0, 0, 0, 0], sizes = [14, 1, 16, 128], strides = [1, 1, 1, 1]} : vector<14x2x16x128xf32> to vector<14x1x16x128xf32>
      %193 = vector.shape_cast %192 : vector<14x1x16x128xf32> to vector<14x16x128xf32>
      %194 = vector.extract_strided_slice %191 {offsets = [0, 1, 0, 0], sizes = [14, 1, 16, 128], strides = [1, 1, 1, 1]} : vector<14x2x16x128xf32> to vector<14x1x16x128xf32>
      %195 = vector.shape_cast %194 : vector<14x1x16x128xf32> to vector<14x16x128xf32>
      %196 = arith.maximumf %193, %195 : vector<14x16x128xf32>
      %c2_i32_112 = arith.constant 2 : i32
      %197 = arith.muli %c2_i32_112, %179 : i32
      %c1_i32_113 = arith.constant 1 : i32
      %198 = arith.addi %197, %c1_i32_113 : i32
      %199 = arith.index_cast %198 : i32 to index
      %c0_114 = arith.constant 0 : index
      %c0_115 = arith.constant 0 : index
      %c0_116 = arith.constant 0 : index
      %200 = vector.load %arg1[%199, %c0_114, %c0_115, %c0_116] : memref<28x28x16x128xbf16, #tpu.memory_space<vmem>>, vector<1x28x16x128xbf16>
      %201 = vector.shape_cast %200 : vector<1x28x16x128xbf16> to vector<448x128xbf16>
      %cst_117 = arith.constant dense<0.000000e+00> : vector<448x128xf32>
      %202 = tpu.matmul %201, %0, %cst_117 {dimension_numbers = #tpu.dot_dimension_numbers<[1], [0], [0], [1], [0, 0, 1, 1], [], []>} : vector<448x128xbf16>, vector<128x128xbf16>, vector<448x128xf32> -> vector<448x128xf32>
      %203 = vector.shape_cast %202 : vector<448x128xf32> to vector<28x16x128xf32>
      %204 = vector.broadcast %2 : vector<1x1x128xf32> to vector<28x16x128xf32>
      %205 = arith.addf %203, %204 : vector<28x16x128xf32>
      %cst_118 = arith.constant 0.000000e+00 : f32
      %206 = vector.broadcast %cst_118 : f32 to vector<28x16x128xf32>
      %207 = arith.maximumf %205, %206 : vector<28x16x128xf32>
      %208 = vector.shape_cast %207 : vector<28x16x128xf32> to vector<14x2x16x128xf32>
      %209 = vector.extract_strided_slice %208 {offsets = [0, 0, 0, 0], sizes = [14, 1, 16, 128], strides = [1, 1, 1, 1]} : vector<14x2x16x128xf32> to vector<14x1x16x128xf32>
      %210 = vector.shape_cast %209 : vector<14x1x16x128xf32> to vector<14x16x128xf32>
      %211 = vector.extract_strided_slice %208 {offsets = [0, 1, 0, 0], sizes = [14, 1, 16, 128], strides = [1, 1, 1, 1]} : vector<14x2x16x128xf32> to vector<14x1x16x128xf32>
      %212 = vector.shape_cast %211 : vector<14x1x16x128xf32> to vector<14x16x128xf32>
      %213 = arith.maximumf %210, %212 : vector<14x16x128xf32>
      %214 = arith.maximumf %196, %213 : vector<14x16x128xf32>
      %215 = vector.shape_cast %214 : vector<14x16x128xf32> to vector<1x14x16x128xf32>
      %216 = arith.truncf %215 : vector<1x14x16x128xf32> to vector<1x14x16x128xbf16>
      %217 = arith.index_cast %179 : i32 to index
      %c0_119 = arith.constant 0 : index
      %c0_120 = arith.constant 0 : index
      %c0_121 = arith.constant 0 : index
      %218 = vector.load %arg13[%217, %c0_119, %c0_120, %c0_121] : memref<14x14x16x128xbf16, #tpu.memory_space<vmem>>, vector<1x14x16x128xbf16>
      tpu.vector_store %arg13[%217, %c0_119, %c0_120, %c0_121], %216 {strides = array<i32>} : memref<14x14x16x128xbf16, #tpu.memory_space<vmem>>, vector<1x14x16x128xbf16>,
    }
    %c14_i32_3 = arith.constant 14 : i32
    %c0_4 = arith.constant 0 : index
    %c0_5 = arith.constant 0 : index
    %4 = vector.load %arg5[%c0_4, %c0_5] : memref<1x128xf32, #tpu.memory_space<vmem>>, vector<1x128xf32>
    %5 = vector.shape_cast %4 : vector<1x128xf32> to vector<1x1x128xf32>
    %c0_i32_6 = arith.constant 0 : i32
    %c5_i32 = arith.constant 5 : i32
    %6 = arith.addi %c0_i32_6, %c5_i32 : i32
    %c1_i32_7 = arith.constant 1 : i32
    scf.for %arg15 = %c0_i32_6 to %6 step %c1_i32_7  : i32 {
      %c1_i32_104 = arith.constant 1 : i32
      %178 = arith.muli %arg15, %c1_i32_104 : i32
      %c0_i32_105 = arith.constant 0 : i32
      %179 = arith.addi %c0_i32_105, %178 : i32
      %c2_i32 = arith.constant 2 : i32
      %180 = arith.muli %c2_i32, %179 : i32
      %c0_i32_106 = arith.constant 0 : i32
      %181 = arith.addi %180, %c0_i32_106 : i32
      %c0_i32_107 = arith.constant 0 : i32
      %182 = arith.addi %181, %c0_i32_107 : i32
      %183 = arith.index_cast %182 : i32 to index
      %c0_108 = arith.constant 0 : index
      %c0_109 = arith.constant 0 : index
      %c0_110 = arith.constant 0 : index
      %184 = vector.load %arg13[%183, %c0_108, %c0_109, %c0_110] : memref<14x14x16x128xbf16, #tpu.memory_space<vmem>>, vector<1x14x16x128xbf16>
      %185 = vector.shape_cast %184 : vector<1x14x16x128xbf16> to vector<14x16x128xbf16>
      %186 = vector.extract_strided_slice %185 {offsets = [0, 0, 0], sizes = [10, 16, 128], strides = [1, 1, 1]} : vector<14x16x128xbf16> to vector<10x16x128xbf16>
      %187 = vector.shape_cast %186 : vector<10x16x128xbf16> to vector<160x128xbf16>
      %c0_111 = arith.constant 0 : index
      %c0_112 = arith.constant 0 : index
      %c0_113 = arith.constant 0 : index
      %c0_114 = arith.constant 0 : index
      %188 = vector.load %arg4[%c0_111, %c0_112, %c0_113, %c0_114] : memref<5x5x128x128xbf16, #tpu.memory_space<vmem>>, vector<1x1x128x128xbf16>
      %189 = vector.shape_cast %188 : vector<1x1x128x128xbf16> to vector<128x128xbf16>
      %cst_115 = arith.constant dense<0.000000e+00> : vector<160x128xf32>
      %190 = tpu.matmul %187, %189, %cst_115 {dimension_numbers = #tpu.dot_dimension_numbers<[1], [0], [0], [1], [0, 0, 1, 1], [], []>} : vector<160x128xbf16>, vector<128x128xbf16>, vector<160x128xf32> -> vector<160x128xf32>
      %191 = vector.extract_strided_slice %185 {offsets = [1, 0, 0], sizes = [10, 16, 128], strides = [1, 1, 1]} : vector<14x16x128xbf16> to vector<10x16x128xbf16>
      %192 = vector.shape_cast %191 : vector<10x16x128xbf16> to vector<160x128xbf16>
      %c0_116 = arith.constant 0 : index
      %c1_117 = arith.constant 1 : index
      %c0_118 = arith.constant 0 : index
      %c0_119 = arith.constant 0 : index
      %193 = vector.load %arg4[%c0_116, %c1_117, %c0_118, %c0_119] : memref<5x5x128x128xbf16, #tpu.memory_space<vmem>>, vector<1x1x128x128xbf16>
      %194 = vector.shape_cast %193 : vector<1x1x128x128xbf16> to vector<128x128xbf16>
      %cst_120 = arith.constant dense<0.000000e+00> : vector<160x128xf32>
      %195 = tpu.matmul %192, %194, %cst_120 {dimension_numbers = #tpu.dot_dimension_numbers<[1], [0], [0], [1], [0, 0, 1, 1], [], []>} : vector<160x128xbf16>, vector<128x128xbf16>, vector<160x128xf32> -> vector<160x128xf32>
      %196 = arith.addf %190, %195 : vector<160x128xf32>
      %197 = vector.extract_strided_slice %185 {offsets = [2, 0, 0], sizes = [10, 16, 128], strides = [1, 1, 1]} : vector<14x16x128xbf16> to vector<10x16x128xbf16>
      %198 = vector.shape_cast %197 : vector<10x16x128xbf16> to vector<160x128xbf16>
      %c0_121 = arith.constant 0 : index
      %c2_122 = arith.constant 2 : index
      %c0_123 = arith.constant 0 : index
      %c0_124 = arith.constant 0 : index
      %199 = vector.load %arg4[%c0_121, %c2_122, %c0_123, %c0_124] : memref<5x5x128x128xbf16, #tpu.memory_space<vmem>>, vector<1x1x128x128xbf16>
      %200 = vector.shape_cast %199 : vector<1x1x128x128xbf16> to vector<128x128xbf16>
      %cst_125 = arith.constant dense<0.000000e+00> : vector<160x128xf32>
      %201 = tpu.matmul %198, %200, %cst_125 {dimension_numbers = #tpu.dot_dimension_numbers<[1], [0], [0], [1], [0, 0, 1, 1], [], []>} : vector<160x128xbf16>, vector<128x128xbf16>, vector<160x128xf32> -> vector<160x128xf32>
      %202 = arith.addf %196, %201 : vector<160x128xf32>
      %203 = vector.extract_strided_slice %185 {offsets = [3, 0, 0], sizes = [10, 16, 128], strides = [1, 1, 1]} : vector<14x16x128xbf16> to vector<10x16x128xbf16>
      %204 = vector.shape_cast %203 : vector<10x16x128xbf16> to vector<160x128xbf16>
      %c0_126 = arith.constant 0 : index
      %c3_127 = arith.constant 3 : index
      %c0_128 = arith.constant 0 : index
      %c0_129 = arith.constant 0 : index
      %205 = vector.load %arg4[%c0_126, %c3_127, %c0_128, %c0_129] : memref<5x5x128x128xbf16, #tpu.memory_space<vmem>>, vector<1x1x128x128xbf16>
      %206 = vector.shape_cast %205 : vector<1x1x128x128xbf16> to vector<128x128xbf16>
      %cst_130 = arith.constant dense<0.000000e+00> : vector<160x128xf32>
      %207 = tpu.matmul %204, %206, %cst_130 {dimension_numbers = #tpu.dot_dimension_numbers<[1], [0], [0], [1], [0, 0, 1, 1], [], []>} : vector<160x128xbf16>, vector<128x128xbf16>, vector<160x128xf32> -> vector<160x128xf32>
      %208 = arith.addf %202, %207 : vector<160x128xf32>
      %209 = vector.extract_strided_slice %185 {offsets = [4, 0, 0], sizes = [10, 16, 128], strides = [1, 1, 1]} : vector<14x16x128xbf16> to vector<10x16x128xbf16>
      %210 = vector.shape_cast %209 : vector<10x16x128xbf16> to vector<160x128xbf16>
      %c0_131 = arith.constant 0 : index
      %c4_132 = arith.constant 4 : index
      %c0_133 = arith.constant 0 : index
      %c0_134 = arith.constant 0 : index
      %211 = vector.load %arg4[%c0_131, %c4_132, %c0_133, %c0_134] : memref<5x5x128x128xbf16, #tpu.memory_space<vmem>>, vector<1x1x128x128xbf16>
      %212 = vector.shape_cast %211 : vector<1x1x128x128xbf16> to vector<128x128xbf16>
      %cst_135 = arith.constant dense<0.000000e+00> : vector<160x128xf32>
      %213 = tpu.matmul %210, %212, %cst_135 {dimension_numbers = #tpu.dot_dimension_numbers<[1], [0], [0], [1], [0, 0, 1, 1], [], []>} : vector<160x128xbf16>, vector<128x128xbf16>, vector<160x128xf32> -> vector<160x128xf32>
      %214 = arith.addf %208, %213 : vector<160x128xf32>
      %c2_i32_136 = arith.constant 2 : i32
      %215 = arith.muli %c2_i32_136, %179 : i32
      %c0_i32_137 = arith.constant 0 : i32
      %216 = arith.addi %215, %c0_i32_137 : i32
      %c1_i32_138 = arith.constant 1 : i32
      %217 = arith.addi %216, %c1_i32_138 : i32
      %218 = arith.index_cast %217 : i32 to index
      %c0_139 = arith.constant 0 : index
      %c0_140 = arith.constant 0 : index
      %c0_141 = arith.constant 0 : index
      %219 = vector.load %arg13[%218, %c0_139, %c0_140, %c0_141] : memref<14x14x16x128xbf16, #tpu.memory_space<vmem>>, vector<1x14x16x128xbf16>
      %220 = vector.shape_cast %219 : vector<1x14x16x128xbf16> to vector<14x16x128xbf16>
      %221 = vector.extract_strided_slice %220 {offsets = [0, 0, 0], sizes = [10, 16, 128], strides = [1, 1, 1]} : vector<14x16x128xbf16> to vector<10x16x128xbf16>
      %222 = vector.shape_cast %221 : vector<10x16x128xbf16> to vector<160x128xbf16>
      %c1_142 = arith.constant 1 : index
      %c0_143 = arith.constant 0 : index
      %c0_144 = arith.constant 0 : index
      %c0_145 = arith.constant 0 : index
      %223 = vector.load %arg4[%c1_142, %c0_143, %c0_144, %c0_145] : memref<5x5x128x128xbf16, #tpu.memory_space<vmem>>, vector<1x1x128x128xbf16>
      %224 = vector.shape_cast %223 : vector<1x1x128x128xbf16> to vector<128x128xbf16>
      %cst_146 = arith.constant dense<0.000000e+00> : vector<160x128xf32>
      %225 = tpu.matmul %222, %224, %cst_146 {dimension_numbers = #tpu.dot_dimension_numbers<[1], [0], [0], [1], [0, 0, 1, 1], [], []>} : vector<160x128xbf16>, vector<128x128xbf16>, vector<160x128xf32> -> vector<160x128xf32>
      %226 = arith.addf %214, %225 : vector<160x128xf32>
      %227 = vector.extract_strided_slice %220 {offsets = [1, 0, 0], sizes = [10, 16, 128], strides = [1, 1, 1]} : vector<14x16x128xbf16> to vector<10x16x128xbf16>
      %228 = vector.shape_cast %227 : vector<10x16x128xbf16> to vector<160x128xbf16>
      %c1_147 = arith.constant 1 : index
      %c1_148 = arith.constant 1 : index
      %c0_149 = arith.constant 0 : index
      %c0_150 = arith.constant 0 : index
      %229 = vector.load %arg4[%c1_147, %c1_148, %c0_149, %c0_150] : memref<5x5x128x128xbf16, #tpu.memory_space<vmem>>, vector<1x1x128x128xbf16>
      %230 = vector.shape_cast %229 : vector<1x1x128x128xbf16> to vector<128x128xbf16>
      %cst_151 = arith.constant dense<0.000000e+00> : vector<160x128xf32>
      %231 = tpu.matmul %228, %230, %cst_151 {dimension_numbers = #tpu.dot_dimension_numbers<[1], [0], [0], [1], [0, 0, 1, 1], [], []>} : vector<160x128xbf16>, vector<128x128xbf16>, vector<160x128xf32> -> vector<160x128xf32>
      %232 = arith.addf %226, %231 : vector<160x128xf32>
      %233 = vector.extract_strided_slice %220 {offsets = [2, 0, 0], sizes = [10, 16, 128], strides = [1, 1, 1]} : vector<14x16x128xbf16> to vector<10x16x128xbf16>
      %234 = vector.shape_cast %233 : vector<10x16x128xbf16> to vector<160x128xbf16>
      %c1_152 = arith.constant 1 : index
      %c2_153 = arith.constant 2 : index
      %c0_154 = arith.constant 0 : index
      %c0_155 = arith.constant 0 : index
      %235 = vector.load %arg4[%c1_152, %c2_153, %c0_154, %c0_155] : memref<5x5x128x128xbf16, #tpu.memory_space<vmem>>, vector<1x1x128x128xbf16>
      %236 = vector.shape_cast %235 : vector<1x1x128x128xbf16> to vector<128x128xbf16>
      %cst_156 = arith.constant dense<0.000000e+00> : vector<160x128xf32>
      %237 = tpu.matmul %234, %236, %cst_156 {dimension_numbers = #tpu.dot_dimension_numbers<[1], [0], [0], [1], [0, 0, 1, 1], [], []>} : vector<160x128xbf16>, vector<128x128xbf16>, vector<160x128xf32> -> vector<160x128xf32>
      %238 = arith.addf %232, %237 : vector<160x128xf32>
      %239 = vector.extract_strided_slice %220 {offsets = [3, 0, 0], sizes = [10, 16, 128], strides = [1, 1, 1]} : vector<14x16x128xbf16> to vector<10x16x128xbf16>
      %240 = vector.shape_cast %239 : vector<10x16x128xbf16> to vector<160x128xbf16>
      %c1_157 = arith.constant 1 : index
      %c3_158 = arith.constant 3 : index
      %c0_159 = arith.constant 0 : index
      %c0_160 = arith.constant 0 : index
      %241 = vector.load %arg4[%c1_157, %c3_158, %c0_159, %c0_160] : memref<5x5x128x128xbf16, #tpu.memory_space<vmem>>, vector<1x1x128x128xbf16>
      %242 = vector.shape_cast %241 : vector<1x1x128x128xbf16> to vector<128x128xbf16>
      %cst_161 = arith.constant dense<0.000000e+00> : vector<160x128xf32>
      %243 = tpu.matmul %240, %242, %cst_161 {dimension_numbers = #tpu.dot_dimension_numbers<[1], [0], [0], [1], [0, 0, 1, 1], [], []>} : vector<160x128xbf16>, vector<128x128xbf16>, vector<160x128xf32> -> vector<160x128xf32>
      %244 = arith.addf %238, %243 : vector<160x128xf32>
      %245 = vector.extract_strided_slice %220 {offsets = [4, 0, 0], sizes = [10, 16, 128], strides = [1, 1, 1]} : vector<14x16x128xbf16> to vector<10x16x128xbf16>
      %246 = vector.shape_cast %245 : vector<10x16x128xbf16> to vector<160x128xbf16>
      %c1_162 = arith.constant 1 : index
      %c4_163 = arith.constant 4 : index
      %c0_164 = arith.constant 0 : index
      %c0_165 = arith.constant 0 : index
      %247 = vector.load %arg4[%c1_162, %c4_163, %c0_164, %c0_165] : memref<5x5x128x128xbf16, #tpu.memory_space<vmem>>, vector<1x1x128x128xbf16>
      %248 = vector.shape_cast %247 : vector<1x1x128x128xbf16> to vector<128x128xbf16>
      %cst_166 = arith.constant dense<0.000000e+00> : vector<160x128xf32>
      %249 = tpu.matmul %246, %248, %cst_166 {dimension_numbers = #tpu.dot_dimension_numbers<[1], [0], [0], [1], [0, 0, 1, 1], [], []>} : vector<160x128xbf16>, vector<128x128xbf16>, vector<160x128xf32> -> vector<160x128xf32>
      %250 = arith.addf %244, %249 : vector<160x128xf32>
      %c2_i32_167 = arith.constant 2 : i32
      %251 = arith.muli %c2_i32_167, %179 : i32
      %c0_i32_168 = arith.constant 0 : i32
      %252 = arith.addi %251, %c0_i32_168 : i32
      %c2_i32_169 = arith.constant 2 : i32
      %253 = arith.addi %252, %c2_i32_169 : i32
      %254 = arith.index_cast %253 : i32 to index
      %c0_170 = arith.constant 0 : index
      %c0_171 = arith.constant 0 : index
      %c0_172 = arith.constant 0 : index
      %255 = vector.load %arg13[%254, %c0_170, %c0_171, %c0_172] : memref<14x14x16x128xbf16, #tpu.memory_space<vmem>>, vector<1x14x16x128xbf16>
      %256 = vector.shape_cast %255 : vector<1x14x16x128xbf16> to vector<14x16x128xbf16>
      %257 = vector.extract_strided_slice %256 {offsets = [0, 0, 0], sizes = [10, 16, 128], strides = [1, 1, 1]} : vector<14x16x128xbf16> to vector<10x16x128xbf16>
      %258 = vector.shape_cast %257 : vector<10x16x128xbf16> to vector<160x128xbf16>
      %c2_173 = arith.constant 2 : index
      %c0_174 = arith.constant 0 : index
      %c0_175 = arith.constant 0 : index
      %c0_176 = arith.constant 0 : index
      %259 = vector.load %arg4[%c2_173, %c0_174, %c0_175, %c0_176] : memref<5x5x128x128xbf16, #tpu.memory_space<vmem>>, vector<1x1x128x128xbf16>
      %260 = vector.shape_cast %259 : vector<1x1x128x128xbf16> to vector<128x128xbf16>
      %cst_177 = arith.constant dense<0.000000e+00> : vector<160x128xf32>
      %261 = tpu.matmul %258, %260, %cst_177 {dimension_numbers = #tpu.dot_dimension_numbers<[1], [0], [0], [1], [0, 0, 1, 1], [], []>} : vector<160x128xbf16>, vector<128x128xbf16>, vector<160x128xf32> -> vector<160x128xf32>
      %262 = arith.addf %250, %261 : vector<160x128xf32>
      %263 = vector.extract_strided_slice %256 {offsets = [1, 0, 0], sizes = [10, 16, 128], strides = [1, 1, 1]} : vector<14x16x128xbf16> to vector<10x16x128xbf16>
      %264 = vector.shape_cast %263 : vector<10x16x128xbf16> to vector<160x128xbf16>
      %c2_178 = arith.constant 2 : index
      %c1_179 = arith.constant 1 : index
      %c0_180 = arith.constant 0 : index
      %c0_181 = arith.constant 0 : index
      %265 = vector.load %arg4[%c2_178, %c1_179, %c0_180, %c0_181] : memref<5x5x128x128xbf16, #tpu.memory_space<vmem>>, vector<1x1x128x128xbf16>
      %266 = vector.shape_cast %265 : vector<1x1x128x128xbf16> to vector<128x128xbf16>
      %cst_182 = arith.constant dense<0.000000e+00> : vector<160x128xf32>
      %267 = tpu.matmul %264, %266, %cst_182 {dimension_numbers = #tpu.dot_dimension_numbers<[1], [0], [0], [1], [0, 0, 1, 1], [], []>} : vector<160x128xbf16>, vector<128x128xbf16>, vector<160x128xf32> -> vector<160x128xf32>
      %268 = arith.addf %262, %267 : vector<160x128xf32>
      %269 = vector.extract_strided_slice %256 {offsets = [2, 0, 0], sizes = [10, 16, 128], strides = [1, 1, 1]} : vector<14x16x128xbf16> to vector<10x16x128xbf16>
      %270 = vector.shape_cast %269 : vector<10x16x128xbf16> to vector<160x128xbf16>
      %c2_183 = arith.constant 2 : index
      %c2_184 = arith.constant 2 : index
      %c0_185 = arith.constant 0 : index
      %c0_186 = arith.constant 0 : index
      %271 = vector.load %arg4[%c2_183, %c2_184, %c0_185, %c0_186] : memref<5x5x128x128xbf16, #tpu.memory_space<vmem>>, vector<1x1x128x128xbf16>
      %272 = vector.shape_cast %271 : vector<1x1x128x128xbf16> to vector<128x128xbf16>
      %cst_187 = arith.constant dense<0.000000e+00> : vector<160x128xf32>
      %273 = tpu.matmul %270, %272, %cst_187 {dimension_numbers = #tpu.dot_dimension_numbers<[1], [0], [0], [1], [0, 0, 1, 1], [], []>} : vector<160x128xbf16>, vector<128x128xbf16>, vector<160x128xf32> -> vector<160x128xf32>
      %274 = arith.addf %268, %273 : vector<160x128xf32>
      %275 = vector.extract_strided_slice %256 {offsets = [3, 0, 0], sizes = [10, 16, 128], strides = [1, 1, 1]} : vector<14x16x128xbf16> to vector<10x16x128xbf16>
      %276 = vector.shape_cast %275 : vector<10x16x128xbf16> to vector<160x128xbf16>
      %c2_188 = arith.constant 2 : index
      %c3_189 = arith.constant 3 : index
      %c0_190 = arith.constant 0 : index
      %c0_191 = arith.constant 0 : index
      %277 = vector.load %arg4[%c2_188, %c3_189, %c0_190, %c0_191] : memref<5x5x128x128xbf16, #tpu.memory_space<vmem>>, vector<1x1x128x128xbf16>
      %278 = vector.shape_cast %277 : vector<1x1x128x128xbf16> to vector<128x128xbf16>
      %cst_192 = arith.constant dense<0.000000e+00> : vector<160x128xf32>
      %279 = tpu.matmul %276, %278, %cst_192 {dimension_numbers = #tpu.dot_dimension_numbers<[1], [0], [0], [1], [0, 0, 1, 1], [], []>} : vector<160x128xbf16>, vector<128x128xbf16>, vector<160x128xf32> -> vector<160x128xf32>
      %280 = arith.addf %274, %279 : vector<160x128xf32>
      %281 = vector.extract_strided_slice %256 {offsets = [4, 0, 0], sizes = [10, 16, 128], strides = [1, 1, 1]} : vector<14x16x128xbf16> to vector<10x16x128xbf16>
      %282 = vector.shape_cast %281 : vector<10x16x128xbf16> to vector<160x128xbf16>
      %c2_193 = arith.constant 2 : index
      %c4_194 = arith.constant 4 : index
      %c0_195 = arith.constant 0 : index
      %c0_196 = arith.constant 0 : index
      %283 = vector.load %arg4[%c2_193, %c4_194, %c0_195, %c0_196] : memref<5x5x128x128xbf16, #tpu.memory_space<vmem>>, vector<1x1x128x128xbf16>
      %284 = vector.shape_cast %283 : vector<1x1x128x128xbf16> to vector<128x128xbf16>
      %cst_197 = arith.constant dense<0.000000e+00> : vector<160x128xf32>
      %285 = tpu.matmul %282, %284, %cst_197 {dimension_numbers = #tpu.dot_dimension_numbers<[1], [0], [0], [1], [0, 0, 1, 1], [], []>} : vector<160x128xbf16>, vector<128x128xbf16>, vector<160x128xf32> -> vector<160x128xf32>
      %286 = arith.addf %280, %285 : vector<160x128xf32>
      %c2_i32_198 = arith.constant 2 : i32
      %287 = arith.muli %c2_i32_198, %179 : i32
      %c0_i32_199 = arith.constant 0 : i32
      %288 = arith.addi %287, %c0_i32_199 : i32
      %c3_i32 = arith.constant 3 : i32
      %289 = arith.addi %288, %c3_i32 : i32
      %290 = arith.index_cast %289 : i32 to index
      %c0_200 = arith.constant 0 : index
      %c0_201 = arith.constant 0 : index
      %c0_202 = arith.constant 0 : index
      %291 = vector.load %arg13[%290, %c0_200, %c0_201, %c0_202] : memref<14x14x16x128xbf16, #tpu.memory_space<vmem>>, vector<1x14x16x128xbf16>
      %292 = vector.shape_cast %291 : vector<1x14x16x128xbf16> to vector<14x16x128xbf16>
      %293 = vector.extract_strided_slice %292 {offsets = [0, 0, 0], sizes = [10, 16, 128], strides = [1, 1, 1]} : vector<14x16x128xbf16> to vector<10x16x128xbf16>
      %294 = vector.shape_cast %293 : vector<10x16x128xbf16> to vector<160x128xbf16>
      %c3_203 = arith.constant 3 : index
      %c0_204 = arith.constant 0 : index
      %c0_205 = arith.constant 0 : index
      %c0_206 = arith.constant 0 : index
      %295 = vector.load %arg4[%c3_203, %c0_204, %c0_205, %c0_206] : memref<5x5x128x128xbf16, #tpu.memory_space<vmem>>, vector<1x1x128x128xbf16>
      %296 = vector.shape_cast %295 : vector<1x1x128x128xbf16> to vector<128x128xbf16>
      %cst_207 = arith.constant dense<0.000000e+00> : vector<160x128xf32>
      %297 = tpu.matmul %294, %296, %cst_207 {dimension_numbers = #tpu.dot_dimension_numbers<[1], [0], [0], [1], [0, 0, 1, 1], [], []>} : vector<160x128xbf16>, vector<128x128xbf16>, vector<160x128xf32> -> vector<160x128xf32>
      %298 = arith.addf %286, %297 : vector<160x128xf32>
      %299 = vector.extract_strided_slice %292 {offsets = [1, 0, 0], sizes = [10, 16, 128], strides = [1, 1, 1]} : vector<14x16x128xbf16> to vector<10x16x128xbf16>
      %300 = vector.shape_cast %299 : vector<10x16x128xbf16> to vector<160x128xbf16>
      %c3_208 = arith.constant 3 : index
      %c1_209 = arith.constant 1 : index
      %c0_210 = arith.constant 0 : index
      %c0_211 = arith.constant 0 : index
      %301 = vector.load %arg4[%c3_208, %c1_209, %c0_210, %c0_211] : memref<5x5x128x128xbf16, #tpu.memory_space<vmem>>, vector<1x1x128x128xbf16>
      %302 = vector.shape_cast %301 : vector<1x1x128x128xbf16> to vector<128x128xbf16>
      %cst_212 = arith.constant dense<0.000000e+00> : vector<160x128xf32>
      %303 = tpu.matmul %300, %302, %cst_212 {dimension_numbers = #tpu.dot_dimension_numbers<[1], [0], [0], [1], [0, 0, 1, 1], [], []>} : vector<160x128xbf16>, vector<128x128xbf16>, vector<160x128xf32> -> vector<160x128xf32>
      %304 = arith.addf %298, %303 : vector<160x128xf32>
      %305 = vector.extract_strided_slice %292 {offsets = [2, 0, 0], sizes = [10, 16, 128], strides = [1, 1, 1]} : vector<14x16x128xbf16> to vector<10x16x128xbf16>
      %306 = vector.shape_cast %305 : vector<10x16x128xbf16> to vector<160x128xbf16>
      %c3_213 = arith.constant 3 : index
      %c2_214 = arith.constant 2 : index
      %c0_215 = arith.constant 0 : index
      %c0_216 = arith.constant 0 : index
      %307 = vector.load %arg4[%c3_213, %c2_214, %c0_215, %c0_216] : memref<5x5x128x128xbf16, #tpu.memory_space<vmem>>, vector<1x1x128x128xbf16>
      %308 = vector.shape_cast %307 : vector<1x1x128x128xbf16> to vector<128x128xbf16>
      %cst_217 = arith.constant dense<0.000000e+00> : vector<160x128xf32>
      %309 = tpu.matmul %306, %308, %cst_217 {dimension_numbers = #tpu.dot_dimension_numbers<[1], [0], [0], [1], [0, 0, 1, 1], [], []>} : vector<160x128xbf16>, vector<128x128xbf16>, vector<160x128xf32> -> vector<160x128xf32>
      %310 = arith.addf %304, %309 : vector<160x128xf32>
      %311 = vector.extract_strided_slice %292 {offsets = [3, 0, 0], sizes = [10, 16, 128], strides = [1, 1, 1]} : vector<14x16x128xbf16> to vector<10x16x128xbf16>
      %312 = vector.shape_cast %311 : vector<10x16x128xbf16> to vector<160x128xbf16>
      %c3_218 = arith.constant 3 : index
      %c3_219 = arith.constant 3 : index
      %c0_220 = arith.constant 0 : index
      %c0_221 = arith.constant 0 : index
      %313 = vector.load %arg4[%c3_218, %c3_219, %c0_220, %c0_221] : memref<5x5x128x128xbf16, #tpu.memory_space<vmem>>, vector<1x1x128x128xbf16>
      %314 = vector.shape_cast %313 : vector<1x1x128x128xbf16> to vector<128x128xbf16>
      %cst_222 = arith.constant dense<0.000000e+00> : vector<160x128xf32>
      %315 = tpu.matmul %312, %314, %cst_222 {dimension_numbers = #tpu.dot_dimension_numbers<[1], [0], [0], [1], [0, 0, 1, 1], [], []>} : vector<160x128xbf16>, vector<128x128xbf16>, vector<160x128xf32> -> vector<160x128xf32>
      %316 = arith.addf %310, %315 : vector<160x128xf32>
      %317 = vector.extract_strided_slice %292 {offsets = [4, 0, 0], sizes = [10, 16, 128], strides = [1, 1, 1]} : vector<14x16x128xbf16> to vector<10x16x128xbf16>
      %318 = vector.shape_cast %317 : vector<10x16x128xbf16> to vector<160x128xbf16>
      %c3_223 = arith.constant 3 : index
      %c4_224 = arith.constant 4 : index
      %c0_225 = arith.constant 0 : index
      %c0_226 = arith.constant 0 : index
      %319 = vector.load %arg4[%c3_223, %c4_224, %c0_225, %c0_226] : memref<5x5x128x128xbf16, #tpu.memory_space<vmem>>, vector<1x1x128x128xbf16>
      %320 = vector.shape_cast %319 : vector<1x1x128x128xbf16> to vector<128x128xbf16>
      %cst_227 = arith.constant dense<0.000000e+00> : vector<160x128xf32>
      %321 = tpu.matmul %318, %320, %cst_227 {dimension_numbers = #tpu.dot_dimension_numbers<[1], [0], [0], [1], [0, 0, 1, 1], [], []>} : vector<160x128xbf16>, vector<128x128xbf16>, vector<160x128xf32> -> vector<160x128xf32>
      %322 = arith.addf %316, %321 : vector<160x128xf32>
      %c2_i32_228 = arith.constant 2 : i32
      %323 = arith.muli %c2_i32_228, %179 : i32
      %c0_i32_229 = arith.constant 0 : i32
      %324 = arith.addi %323, %c0_i32_229 : i32
      %c4_i32 = arith.constant 4 : i32
      %325 = arith.addi %324, %c4_i32 : i32
      %326 = arith.index_cast %325 : i32 to index
      %c0_230 = arith.constant 0 : index
      %c0_231 = arith.constant 0 : index
      %c0_232 = arith.constant 0 : index
      %327 = vector.load %arg13[%326, %c0_230, %c0_231, %c0_232] : memref<14x14x16x128xbf16, #tpu.memory_space<vmem>>, vector<1x14x16x128xbf16>
      %328 = vector.shape_cast %327 : vector<1x14x16x128xbf16> to vector<14x16x128xbf16>
      %329 = vector.extract_strided_slice %328 {offsets = [0, 0, 0], sizes = [10, 16, 128], strides = [1, 1, 1]} : vector<14x16x128xbf16> to vector<10x16x128xbf16>
      %330 = vector.shape_cast %329 : vector<10x16x128xbf16> to vector<160x128xbf16>
      %c4_233 = arith.constant 4 : index
      %c0_234 = arith.constant 0 : index
      %c0_235 = arith.constant 0 : index
      %c0_236 = arith.constant 0 : index
      %331 = vector.load %arg4[%c4_233, %c0_234, %c0_235, %c0_236] : memref<5x5x128x128xbf16, #tpu.memory_space<vmem>>, vector<1x1x128x128xbf16>
      %332 = vector.shape_cast %331 : vector<1x1x128x128xbf16> to vector<128x128xbf16>
      %cst_237 = arith.constant dense<0.000000e+00> : vector<160x128xf32>
      %333 = tpu.matmul %330, %332, %cst_237 {dimension_numbers = #tpu.dot_dimension_numbers<[1], [0], [0], [1], [0, 0, 1, 1], [], []>} : vector<160x128xbf16>, vector<128x128xbf16>, vector<160x128xf32> -> vector<160x128xf32>
      %334 = arith.addf %322, %333 : vector<160x128xf32>
      %335 = vector.extract_strided_slice %328 {offsets = [1, 0, 0], sizes = [10, 16, 128], strides = [1, 1, 1]} : vector<14x16x128xbf16> to vector<10x16x128xbf16>
      %336 = vector.shape_cast %335 : vector<10x16x128xbf16> to vector<160x128xbf16>
      %c4_238 = arith.constant 4 : index
      %c1_239 = arith.constant 1 : index
      %c0_240 = arith.constant 0 : index
      %c0_241 = arith.constant 0 : index
      %337 = vector.load %arg4[%c4_238, %c1_239, %c0_240, %c0_241] : memref<5x5x128x128xbf16, #tpu.memory_space<vmem>>, vector<1x1x128x128xbf16>
      %338 = vector.shape_cast %337 : vector<1x1x128x128xbf16> to vector<128x128xbf16>
      %cst_242 = arith.constant dense<0.000000e+00> : vector<160x128xf32>
      %339 = tpu.matmul %336, %338, %cst_242 {dimension_numbers = #tpu.dot_dimension_numbers<[1], [0], [0], [1], [0, 0, 1, 1], [], []>} : vector<160x128xbf16>, vector<128x128xbf16>, vector<160x128xf32> -> vector<160x128xf32>
      %340 = arith.addf %334, %339 : vector<160x128xf32>
      %341 = vector.extract_strided_slice %328 {offsets = [2, 0, 0], sizes = [10, 16, 128], strides = [1, 1, 1]} : vector<14x16x128xbf16> to vector<10x16x128xbf16>
      %342 = vector.shape_cast %341 : vector<10x16x128xbf16> to vector<160x128xbf16>
      %c4_243 = arith.constant 4 : index
      %c2_244 = arith.constant 2 : index
      %c0_245 = arith.constant 0 : index
      %c0_246 = arith.constant 0 : index
      %343 = vector.load %arg4[%c4_243, %c2_244, %c0_245, %c0_246] : memref<5x5x128x128xbf16, #tpu.memory_space<vmem>>, vector<1x1x128x128xbf16>
      %344 = vector.shape_cast %343 : vector<1x1x128x128xbf16> to vector<128x128xbf16>
      %cst_247 = arith.constant dense<0.000000e+00> : vector<160x128xf32>
      %345 = tpu.matmul %342, %344, %cst_247 {dimension_numbers = #tpu.dot_dimension_numbers<[1], [0], [0], [1], [0, 0, 1, 1], [], []>} : vector<160x128xbf16>, vector<128x128xbf16>, vector<160x128xf32> -> vector<160x128xf32>
      %346 = arith.addf %340, %345 : vector<160x128xf32>
      %347 = vector.extract_strided_slice %328 {offsets = [3, 0, 0], sizes = [10, 16, 128], strides = [1, 1, 1]} : vector<14x16x128xbf16> to vector<10x16x128xbf16>
      %348 = vector.shape_cast %347 : vector<10x16x128xbf16> to vector<160x128xbf16>
      %c4_248 = arith.constant 4 : index
      %c3_249 = arith.constant 3 : index
      %c0_250 = arith.constant 0 : index
      %c0_251 = arith.constant 0 : index
      %349 = vector.load %arg4[%c4_248, %c3_249, %c0_250, %c0_251] : memref<5x5x128x128xbf16, #tpu.memory_space<vmem>>, vector<1x1x128x128xbf16>
      %350 = vector.shape_cast %349 : vector<1x1x128x128xbf16> to vector<128x128xbf16>
      %cst_252 = arith.constant dense<0.000000e+00> : vector<160x128xf32>
      %351 = tpu.matmul %348, %350, %cst_252 {dimension_numbers = #tpu.dot_dimension_numbers<[1], [0], [0], [1], [0, 0, 1, 1], [], []>} : vector<160x128xbf16>, vector<128x128xbf16>, vector<160x128xf32> -> vector<160x128xf32>
      %352 = arith.addf %346, %351 : vector<160x128xf32>
      %353 = vector.extract_strided_slice %328 {offsets = [4, 0, 0], sizes = [10, 16, 128], strides = [1, 1, 1]} : vector<14x16x128xbf16> to vector<10x16x128xbf16>
      %354 = vector.shape_cast %353 : vector<10x16x128xbf16> to vector<160x128xbf16>
      %c4_253 = arith.constant 4 : index
      %c4_254 = arith.constant 4 : index
      %c0_255 = arith.constant 0 : index
      %c0_256 = arith.constant 0 : index
      %355 = vector.load %arg4[%c4_253, %c4_254, %c0_255, %c0_256] : memref<5x5x128x128xbf16, #tpu.memory_space<vmem>>, vector<1x1x128x128xbf16>
      %356 = vector.shape_cast %355 : vector<1x1x128x128xbf16> to vector<128x128xbf16>
      %cst_257 = arith.constant dense<0.000000e+00> : vector<160x128xf32>
      %357 = tpu.matmul %354, %356, %cst_257 {dimension_numbers = #tpu.dot_dimension_numbers<[1], [0], [0], [1], [0, 0, 1, 1], [], []>} : vector<160x128xbf16>, vector<128x128xbf16>, vector<160x128xf32> -> vector<160x128xf32>
      %358 = arith.addf %352, %357 : vector<160x128xf32>
      %359 = vector.shape_cast %358 : vector<160x128xf32> to vector<10x16x128xf32>
      %360 = vector.broadcast %5 : vector<1x1x128xf32> to vector<10x16x128xf32>
      %361 = arith.addf %359, %360 : vector<10x16x128xf32>
      %cst_258 = arith.constant 0.000000e+00 : f32
      %362 = vector.broadcast %cst_258 : f32 to vector<10x16x128xf32>
      %363 = arith.maximumf %361, %362 : vector<10x16x128xf32>
      %364 = vector.shape_cast %363 : vector<10x16x128xf32> to vector<5x2x16x128xf32>
      %365 = vector.extract_strided_slice %364 {offsets = [0, 0, 0, 0], sizes = [5, 1, 16, 128], strides = [1, 1, 1, 1]} : vector<5x2x16x128xf32> to vector<5x1x16x128xf32>
      %366 = vector.shape_cast %365 : vector<5x1x16x128xf32> to vector<5x16x128xf32>
      %367 = vector.extract_strided_slice %364 {offsets = [0, 1, 0, 0], sizes = [5, 1, 16, 128], strides = [1, 1, 1, 1]} : vector<5x2x16x128xf32> to vector<5x1x16x128xf32>
      %368 = vector.shape_cast %367 : vector<5x1x16x128xf32> to vector<5x16x128xf32>
      %369 = arith.maximumf %366, %368 : vector<5x16x128xf32>
      %c2_i32_259 = arith.constant 2 : i32
      %370 = arith.muli %c2_i32_259, %179 : i32
      %c1_i32_260 = arith.constant 1 : i32
      %371 = arith.addi %370, %c1_i32_260 : i32
      %c0_i32_261 = arith.constant 0 : i32
      %372 = arith.addi %371, %c0_i32_261 : i32
      %373 = arith.index_cast %372 : i32 to index
      %c0_262 = arith.constant 0 : index
      %c0_263 = arith.constant 0 : index
      %c0_264 = arith.constant 0 : index
      %374 = vector.load %arg13[%373, %c0_262, %c0_263, %c0_264] : memref<14x14x16x128xbf16, #tpu.memory_space<vmem>>, vector<1x14x16x128xbf16>
      %375 = vector.shape_cast %374 : vector<1x14x16x128xbf16> to vector<14x16x128xbf16>
      %376 = vector.extract_strided_slice %375 {offsets = [0, 0, 0], sizes = [10, 16, 128], strides = [1, 1, 1]} : vector<14x16x128xbf16> to vector<10x16x128xbf16>
      %377 = vector.shape_cast %376 : vector<10x16x128xbf16> to vector<160x128xbf16>
      %c0_265 = arith.constant 0 : index
      %c0_266 = arith.constant 0 : index
      %c0_267 = arith.constant 0 : index
      %c0_268 = arith.constant 0 : index
      %378 = vector.load %arg4[%c0_265, %c0_266, %c0_267, %c0_268] : memref<5x5x128x128xbf16, #tpu.memory_space<vmem>>, vector<1x1x128x128xbf16>
      %379 = vector.shape_cast %378 : vector<1x1x128x128xbf16> to vector<128x128xbf16>
      %cst_269 = arith.constant dense<0.000000e+00> : vector<160x128xf32>
      %380 = tpu.matmul %377, %379, %cst_269 {dimension_numbers = #tpu.dot_dimension_numbers<[1], [0], [0], [1], [0, 0, 1, 1], [], []>} : vector<160x128xbf16>, vector<128x128xbf16>, vector<160x128xf32> -> vector<160x128xf32>
      %381 = vector.extract_strided_slice %375 {offsets = [1, 0, 0], sizes = [10, 16, 128], strides = [1, 1, 1]} : vector<14x16x128xbf16> to vector<10x16x128xbf16>
      %382 = vector.shape_cast %381 : vector<10x16x128xbf16> to vector<160x128xbf16>
      %c0_270 = arith.constant 0 : index
      %c1_271 = arith.constant 1 : index
      %c0_272 = arith.constant 0 : index
      %c0_273 = arith.constant 0 : index
      %383 = vector.load %arg4[%c0_270, %c1_271, %c0_272, %c0_273] : memref<5x5x128x128xbf16, #tpu.memory_space<vmem>>, vector<1x1x128x128xbf16>
      %384 = vector.shape_cast %383 : vector<1x1x128x128xbf16> to vector<128x128xbf16>
      %cst_274 = arith.constant dense<0.000000e+00> : vector<160x128xf32>
      %385 = tpu.matmul %382, %384, %cst_274 {dimension_numbers = #tpu.dot_dimension_numbers<[1], [0], [0], [1], [0, 0, 1, 1], [], []>} : vector<160x128xbf16>, vector<128x128xbf16>, vector<160x128xf32> -> vector<160x128xf32>
      %386 = arith.addf %380, %385 : vector<160x128xf32>
      %387 = vector.extract_strided_slice %375 {offsets = [2, 0, 0], sizes = [10, 16, 128], strides = [1, 1, 1]} : vector<14x16x128xbf16> to vector<10x16x128xbf16>
      %388 = vector.shape_cast %387 : vector<10x16x128xbf16> to vector<160x128xbf16>
      %c0_275 = arith.constant 0 : index
      %c2_276 = arith.constant 2 : index
      %c0_277 = arith.constant 0 : index
      %c0_278 = arith.constant 0 : index
      %389 = vector.load %arg4[%c0_275, %c2_276, %c0_277, %c0_278] : memref<5x5x128x128xbf16, #tpu.memory_space<vmem>>, vector<1x1x128x128xbf16>
      %390 = vector.shape_cast %389 : vector<1x1x128x128xbf16> to vector<128x128xbf16>
      %cst_279 = arith.constant dense<0.000000e+00> : vector<160x128xf32>
      %391 = tpu.matmul %388, %390, %cst_279 {dimension_numbers = #tpu.dot_dimension_numbers<[1], [0], [0], [1], [0, 0, 1, 1], [], []>} : vector<160x128xbf16>, vector<128x128xbf16>, vector<160x128xf32> -> vector<160x128xf32>
      %392 = arith.addf %386, %391 : vector<160x128xf32>
      %393 = vector.extract_strided_slice %375 {offsets = [3, 0, 0], sizes = [10, 16, 128], strides = [1, 1, 1]} : vector<14x16x128xbf16> to vector<10x16x128xbf16>
      %394 = vector.shape_cast %393 : vector<10x16x128xbf16> to vector<160x128xbf16>
      %c0_280 = arith.constant 0 : index
      %c3_281 = arith.constant 3 : index
      %c0_282 = arith.constant 0 : index
      %c0_283 = arith.constant 0 : index
      %395 = vector.load %arg4[%c0_280, %c3_281, %c0_282, %c0_283] : memref<5x5x128x128xbf16, #tpu.memory_space<vmem>>, vector<1x1x128x128xbf16>
      %396 = vector.shape_cast %395 : vector<1x1x128x128xbf16> to vector<128x128xbf16>
      %cst_284 = arith.constant dense<0.000000e+00> : vector<160x128xf32>
      %397 = tpu.matmul %394, %396, %cst_284 {dimension_numbers = #tpu.dot_dimension_numbers<[1], [0], [0], [1], [0, 0, 1, 1], [], []>} : vector<160x128xbf16>, vector<128x128xbf16>, vector<160x128xf32> -> vector<160x128xf32>
      %398 = arith.addf %392, %397 : vector<160x128xf32>
      %399 = vector.extract_strided_slice %375 {offsets = [4, 0, 0], sizes = [10, 16, 128], strides = [1, 1, 1]} : vector<14x16x128xbf16> to vector<10x16x128xbf16>
      %400 = vector.shape_cast %399 : vector<10x16x128xbf16> to vector<160x128xbf16>
      %c0_285 = arith.constant 0 : index
      %c4_286 = arith.constant 4 : index
      %c0_287 = arith.constant 0 : index
      %c0_288 = arith.constant 0 : index
      %401 = vector.load %arg4[%c0_285, %c4_286, %c0_287, %c0_288] : memref<5x5x128x128xbf16, #tpu.memory_space<vmem>>, vector<1x1x128x128xbf16>
      %402 = vector.shape_cast %401 : vector<1x1x128x128xbf16> to vector<128x128xbf16>
      %cst_289 = arith.constant dense<0.000000e+00> : vector<160x128xf32>
      %403 = tpu.matmul %400, %402, %cst_289 {dimension_numbers = #tpu.dot_dimension_numbers<[1], [0], [0], [1], [0, 0, 1, 1], [], []>} : vector<160x128xbf16>, vector<128x128xbf16>, vector<160x128xf32> -> vector<160x128xf32>
      %404 = arith.addf %398, %403 : vector<160x128xf32>
      %c2_i32_290 = arith.constant 2 : i32
      %405 = arith.muli %c2_i32_290, %179 : i32
      %c1_i32_291 = arith.constant 1 : i32
      %406 = arith.addi %405, %c1_i32_291 : i32
      %c1_i32_292 = arith.constant 1 : i32
      %407 = arith.addi %406, %c1_i32_292 : i32
      %408 = arith.index_cast %407 : i32 to index
      %c0_293 = arith.constant 0 : index
      %c0_294 = arith.constant 0 : index
      %c0_295 = arith.constant 0 : index
      %409 = vector.load %arg13[%408, %c0_293, %c0_294, %c0_295] : memref<14x14x16x128xbf16, #tpu.memory_space<vmem>>, vector<1x14x16x128xbf16>
      %410 = vector.shape_cast %409 : vector<1x14x16x128xbf16> to vector<14x16x128xbf16>
      %411 = vector.extract_strided_slice %410 {offsets = [0, 0, 0], sizes = [10, 16, 128], strides = [1, 1, 1]} : vector<14x16x128xbf16> to vector<10x16x128xbf16>
      %412 = vector.shape_cast %411 : vector<10x16x128xbf16> to vector<160x128xbf16>
      %c1_296 = arith.constant 1 : index
      %c0_297 = arith.constant 0 : index
      %c0_298 = arith.constant 0 : index
      %c0_299 = arith.constant 0 : index
      %413 = vector.load %arg4[%c1_296, %c0_297, %c0_298, %c0_299] : memref<5x5x128x128xbf16, #tpu.memory_space<vmem>>, vector<1x1x128x128xbf16>
      %414 = vector.shape_cast %413 : vector<1x1x128x128xbf16> to vector<128x128xbf16>
      %cst_300 = arith.constant dense<0.000000e+00> : vector<160x128xf32>
      %415 = tpu.matmul %412, %414, %cst_300 {dimension_numbers = #tpu.dot_dimension_numbers<[1], [0], [0], [1], [0, 0, 1, 1], [], []>} : vector<160x128xbf16>, vector<128x128xbf16>, vector<160x128xf32> -> vector<160x128xf32>
      %416 = arith.addf %404, %415 : vector<160x128xf32>
      %417 = vector.extract_strided_slice %410 {offsets = [1, 0, 0], sizes = [10, 16, 128], strides = [1, 1, 1]} : vector<14x16x128xbf16> to vector<10x16x128xbf16>
      %418 = vector.shape_cast %417 : vector<10x16x128xbf16> to vector<160x128xbf16>
      %c1_301 = arith.constant 1 : index
      %c1_302 = arith.constant 1 : index
      %c0_303 = arith.constant 0 : index
      %c0_304 = arith.constant 0 : index
      %419 = vector.load %arg4[%c1_301, %c1_302, %c0_303, %c0_304] : memref<5x5x128x128xbf16, #tpu.memory_space<vmem>>, vector<1x1x128x128xbf16>
      %420 = vector.shape_cast %419 : vector<1x1x128x128xbf16> to vector<128x128xbf16>
      %cst_305 = arith.constant dense<0.000000e+00> : vector<160x128xf32>
      %421 = tpu.matmul %418, %420, %cst_305 {dimension_numbers = #tpu.dot_dimension_numbers<[1], [0], [0], [1], [0, 0, 1, 1], [], []>} : vector<160x128xbf16>, vector<128x128xbf16>, vector<160x128xf32> -> vector<160x128xf32>
      %422 = arith.addf %416, %421 : vector<160x128xf32>
      %423 = vector.extract_strided_slice %410 {offsets = [2, 0, 0], sizes = [10, 16, 128], strides = [1, 1, 1]} : vector<14x16x128xbf16> to vector<10x16x128xbf16>
      %424 = vector.shape_cast %423 : vector<10x16x128xbf16> to vector<160x128xbf16>
      %c1_306 = arith.constant 1 : index
      %c2_307 = arith.constant 2 : index
      %c0_308 = arith.constant 0 : index
      %c0_309 = arith.constant 0 : index
      %425 = vector.load %arg4[%c1_306, %c2_307, %c0_308, %c0_309] : memref<5x5x128x128xbf16, #tpu.memory_space<vmem>>, vector<1x1x128x128xbf16>
      %426 = vector.shape_cast %425 : vector<1x1x128x128xbf16> to vector<128x128xbf16>
      %cst_310 = arith.constant dense<0.000000e+00> : vector<160x128xf32>
      %427 = tpu.matmul %424, %426, %cst_310 {dimension_numbers = #tpu.dot_dimension_numbers<[1], [0], [0], [1], [0, 0, 1, 1], [], []>} : vector<160x128xbf16>, vector<128x128xbf16>, vector<160x128xf32> -> vector<160x128xf32>
      %428 = arith.addf %422, %427 : vector<160x128xf32>
      %429 = vector.extract_strided_slice %410 {offsets = [3, 0, 0], sizes = [10, 16, 128], strides = [1, 1, 1]} : vector<14x16x128xbf16> to vector<10x16x128xbf16>
      %430 = vector.shape_cast %429 : vector<10x16x128xbf16> to vector<160x128xbf16>
      %c1_311 = arith.constant 1 : index
      %c3_312 = arith.constant 3 : index
      %c0_313 = arith.constant 0 : index
      %c0_314 = arith.constant 0 : index
      %431 = vector.load %arg4[%c1_311, %c3_312, %c0_313, %c0_314] : memref<5x5x128x128xbf16, #tpu.memory_space<vmem>>, vector<1x1x128x128xbf16>
      %432 = vector.shape_cast %431 : vector<1x1x128x128xbf16> to vector<128x128xbf16>
      %cst_315 = arith.constant dense<0.000000e+00> : vector<160x128xf32>
      %433 = tpu.matmul %430, %432, %cst_315 {dimension_numbers = #tpu.dot_dimension_numbers<[1], [0], [0], [1], [0, 0, 1, 1], [], []>} : vector<160x128xbf16>, vector<128x128xbf16>, vector<160x128xf32> -> vector<160x128xf32>
      %434 = arith.addf %428, %433 : vector<160x128xf32>
      %435 = vector.extract_strided_slice %410 {offsets = [4, 0, 0], sizes = [10, 16, 128], strides = [1, 1, 1]} : vector<14x16x128xbf16> to vector<10x16x128xbf16>
      %436 = vector.shape_cast %435 : vector<10x16x128xbf16> to vector<160x128xbf16>
      %c1_316 = arith.constant 1 : index
      %c4_317 = arith.constant 4 : index
      %c0_318 = arith.constant 0 : index
      %c0_319 = arith.constant 0 : index
      %437 = vector.load %arg4[%c1_316, %c4_317, %c0_318, %c0_319] : memref<5x5x128x128xbf16, #tpu.memory_space<vmem>>, vector<1x1x128x128xbf16>
      %438 = vector.shape_cast %437 : vector<1x1x128x128xbf16> to vector<128x128xbf16>
      %cst_320 = arith.constant dense<0.000000e+00> : vector<160x128xf32>
      %439 = tpu.matmul %436, %438, %cst_320 {dimension_numbers = #tpu.dot_dimension_numbers<[1], [0], [0], [1], [0, 0, 1, 1], [], []>} : vector<160x128xbf16>, vector<128x128xbf16>, vector<160x128xf32> -> vector<160x128xf32>
      %440 = arith.addf %434, %439 : vector<160x128xf32>
      %c2_i32_321 = arith.constant 2 : i32
      %441 = arith.muli %c2_i32_321, %179 : i32
      %c1_i32_322 = arith.constant 1 : i32
      %442 = arith.addi %441, %c1_i32_322 : i32
      %c2_i32_323 = arith.constant 2 : i32
      %443 = arith.addi %442, %c2_i32_323 : i32
      %444 = arith.index_cast %443 : i32 to index
      %c0_324 = arith.constant 0 : index
      %c0_325 = arith.constant 0 : index
      %c0_326 = arith.constant 0 : index
      %445 = vector.load %arg13[%444, %c0_324, %c0_325, %c0_326] : memref<14x14x16x128xbf16, #tpu.memory_space<vmem>>, vector<1x14x16x128xbf16>
      %446 = vector.shape_cast %445 : vector<1x14x16x128xbf16> to vector<14x16x128xbf16>
      %447 = vector.extract_strided_slice %446 {offsets = [0, 0, 0], sizes = [10, 16, 128], strides = [1, 1, 1]} : vector<14x16x128xbf16> to vector<10x16x128xbf16>
      %448 = vector.shape_cast %447 : vector<10x16x128xbf16> to vector<160x128xbf16>
      %c2_327 = arith.constant 2 : index
      %c0_328 = arith.constant 0 : index
      %c0_329 = arith.constant 0 : index
      %c0_330 = arith.constant 0 : index
      %449 = vector.load %arg4[%c2_327, %c0_328, %c0_329, %c0_330] : memref<5x5x128x128xbf16, #tpu.memory_space<vmem>>, vector<1x1x128x128xbf16>
      %450 = vector.shape_cast %449 : vector<1x1x128x128xbf16> to vector<128x128xbf16>
      %cst_331 = arith.constant dense<0.000000e+00> : vector<160x128xf32>
      %451 = tpu.matmul %448, %450, %cst_331 {dimension_numbers = #tpu.dot_dimension_numbers<[1], [0], [0], [1], [0, 0, 1, 1], [], []>} : vector<160x128xbf16>, vector<128x128xbf16>, vector<160x128xf32> -> vector<160x128xf32>
      %452 = arith.addf %440, %451 : vector<160x128xf32>
      %453 = vector.extract_strided_slice %446 {offsets = [1, 0, 0], sizes = [10, 16, 128], strides = [1, 1, 1]} : vector<14x16x128xbf16> to vector<10x16x128xbf16>
      %454 = vector.shape_cast %453 : vector<10x16x128xbf16> to vector<160x128xbf16>
      %c2_332 = arith.constant 2 : index
      %c1_333 = arith.constant 1 : index
      %c0_334 = arith.constant 0 : index
      %c0_335 = arith.constant 0 : index
      %455 = vector.load %arg4[%c2_332, %c1_333, %c0_334, %c0_335] : memref<5x5x128x128xbf16, #tpu.memory_space<vmem>>, vector<1x1x128x128xbf16>
      %456 = vector.shape_cast %455 : vector<1x1x128x128xbf16> to vector<128x128xbf16>
      %cst_336 = arith.constant dense<0.000000e+00> : vector<160x128xf32>
      %457 = tpu.matmul %454, %456, %cst_336 {dimension_numbers = #tpu.dot_dimension_numbers<[1], [0], [0], [1], [0, 0, 1, 1], [], []>} : vector<160x128xbf16>, vector<128x128xbf16>, vector<160x128xf32> -> vector<160x128xf32>
      %458 = arith.addf %452, %457 : vector<160x128xf32>
      %459 = vector.extract_strided_slice %446 {offsets = [2, 0, 0], sizes = [10, 16, 128], strides = [1, 1, 1]} : vector<14x16x128xbf16> to vector<10x16x128xbf16>
      %460 = vector.shape_cast %459 : vector<10x16x128xbf16> to vector<160x128xbf16>
      %c2_337 = arith.constant 2 : index
      %c2_338 = arith.constant 2 : index
      %c0_339 = arith.constant 0 : index
      %c0_340 = arith.constant 0 : index
      %461 = vector.load %arg4[%c2_337, %c2_338, %c0_339, %c0_340] : memref<5x5x128x128xbf16, #tpu.memory_space<vmem>>, vector<1x1x128x128xbf16>
      %462 = vector.shape_cast %461 : vector<1x1x128x128xbf16> to vector<128x128xbf16>
      %cst_341 = arith.constant dense<0.000000e+00> : vector<160x128xf32>
      %463 = tpu.matmul %460, %462, %cst_341 {dimension_numbers = #tpu.dot_dimension_numbers<[1], [0], [0], [1], [0, 0, 1, 1], [], []>} : vector<160x128xbf16>, vector<128x128xbf16>, vector<160x128xf32> -> vector<160x128xf32>
      %464 = arith.addf %458, %463 : vector<160x128xf32>
      %465 = vector.extract_strided_slice %446 {offsets = [3, 0, 0], sizes = [10, 16, 128], strides = [1, 1, 1]} : vector<14x16x128xbf16> to vector<10x16x128xbf16>
      %466 = vector.shape_cast %465 : vector<10x16x128xbf16> to vector<160x128xbf16>
      %c2_342 = arith.constant 2 : index
      %c3_343 = arith.constant 3 : index
      %c0_344 = arith.constant 0 : index
      %c0_345 = arith.constant 0 : index
      %467 = vector.load %arg4[%c2_342, %c3_343, %c0_344, %c0_345] : memref<5x5x128x128xbf16, #tpu.memory_space<vmem>>, vector<1x1x128x128xbf16>
      %468 = vector.shape_cast %467 : vector<1x1x128x128xbf16> to vector<128x128xbf16>
      %cst_346 = arith.constant dense<0.000000e+00> : vector<160x128xf32>
      %469 = tpu.matmul %466, %468, %cst_346 {dimension_numbers = #tpu.dot_dimension_numbers<[1], [0], [0], [1], [0, 0, 1, 1], [], []>} : vector<160x128xbf16>, vector<128x128xbf16>, vector<160x128xf32> -> vector<160x128xf32>
      %470 = arith.addf %464, %469 : vector<160x128xf32>
      %471 = vector.extract_strided_slice %446 {offsets = [4, 0, 0], sizes = [10, 16, 128], strides = [1, 1, 1]} : vector<14x16x128xbf16> to vector<10x16x128xbf16>
      %472 = vector.shape_cast %471 : vector<10x16x128xbf16> to vector<160x128xbf16>
      %c2_347 = arith.constant 2 : index
      %c4_348 = arith.constant 4 : index
      %c0_349 = arith.constant 0 : index
      %c0_350 = arith.constant 0 : index
      %473 = vector.load %arg4[%c2_347, %c4_348, %c0_349, %c0_350] : memref<5x5x128x128xbf16, #tpu.memory_space<vmem>>, vector<1x1x128x128xbf16>
      %474 = vector.shape_cast %473 : vector<1x1x128x128xbf16> to vector<128x128xbf16>
      %cst_351 = arith.constant dense<0.000000e+00> : vector<160x128xf32>
      %475 = tpu.matmul %472, %474, %cst_351 {dimension_numbers = #tpu.dot_dimension_numbers<[1], [0], [0], [1], [0, 0, 1, 1], [], []>} : vector<160x128xbf16>, vector<128x128xbf16>, vector<160x128xf32> -> vector<160x128xf32>
      %476 = arith.addf %470, %475 : vector<160x128xf32>
      %c2_i32_352 = arith.constant 2 : i32
      %477 = arith.muli %c2_i32_352, %179 : i32
      %c1_i32_353 = arith.constant 1 : i32
      %478 = arith.addi %477, %c1_i32_353 : i32
      %c3_i32_354 = arith.constant 3 : i32
      %479 = arith.addi %478, %c3_i32_354 : i32
      %480 = arith.index_cast %479 : i32 to index
      %c0_355 = arith.constant 0 : index
      %c0_356 = arith.constant 0 : index
      %c0_357 = arith.constant 0 : index
      %481 = vector.load %arg13[%480, %c0_355, %c0_356, %c0_357] : memref<14x14x16x128xbf16, #tpu.memory_space<vmem>>, vector<1x14x16x128xbf16>
      %482 = vector.shape_cast %481 : vector<1x14x16x128xbf16> to vector<14x16x128xbf16>
      %483 = vector.extract_strided_slice %482 {offsets = [0, 0, 0], sizes = [10, 16, 128], strides = [1, 1, 1]} : vector<14x16x128xbf16> to vector<10x16x128xbf16>
      %484 = vector.shape_cast %483 : vector<10x16x128xbf16> to vector<160x128xbf16>
      %c3_358 = arith.constant 3 : index
      %c0_359 = arith.constant 0 : index
      %c0_360 = arith.constant 0 : index
      %c0_361 = arith.constant 0 : index
      %485 = vector.load %arg4[%c3_358, %c0_359, %c0_360, %c0_361] : memref<5x5x128x128xbf16, #tpu.memory_space<vmem>>, vector<1x1x128x128xbf16>
      %486 = vector.shape_cast %485 : vector<1x1x128x128xbf16> to vector<128x128xbf16>
      %cst_362 = arith.constant dense<0.000000e+00> : vector<160x128xf32>
      %487 = tpu.matmul %484, %486, %cst_362 {dimension_numbers = #tpu.dot_dimension_numbers<[1], [0], [0], [1], [0, 0, 1, 1], [], []>} : vector<160x128xbf16>, vector<128x128xbf16>, vector<160x128xf32> -> vector<160x128xf32>
      %488 = arith.addf %476, %487 : vector<160x128xf32>
      %489 = vector.extract_strided_slice %482 {offsets = [1, 0, 0], sizes = [10, 16, 128], strides = [1, 1, 1]} : vector<14x16x128xbf16> to vector<10x16x128xbf16>
      %490 = vector.shape_cast %489 : vector<10x16x128xbf16> to vector<160x128xbf16>
      %c3_363 = arith.constant 3 : index
      %c1_364 = arith.constant 1 : index
      %c0_365 = arith.constant 0 : index
      %c0_366 = arith.constant 0 : index
      %491 = vector.load %arg4[%c3_363, %c1_364, %c0_365, %c0_366] : memref<5x5x128x128xbf16, #tpu.memory_space<vmem>>, vector<1x1x128x128xbf16>
      %492 = vector.shape_cast %491 : vector<1x1x128x128xbf16> to vector<128x128xbf16>
      %cst_367 = arith.constant dense<0.000000e+00> : vector<160x128xf32>
      %493 = tpu.matmul %490, %492, %cst_367 {dimension_numbers = #tpu.dot_dimension_numbers<[1], [0], [0], [1], [0, 0, 1, 1], [], []>} : vector<160x128xbf16>, vector<128x128xbf16>, vector<160x128xf32> -> vector<160x128xf32>
      %494 = arith.addf %488, %493 : vector<160x128xf32>
      %495 = vector.extract_strided_slice %482 {offsets = [2, 0, 0], sizes = [10, 16, 128], strides = [1, 1, 1]} : vector<14x16x128xbf16> to vector<10x16x128xbf16>
      %496 = vector.shape_cast %495 : vector<10x16x128xbf16> to vector<160x128xbf16>
      %c3_368 = arith.constant 3 : index
      %c2_369 = arith.constant 2 : index
      %c0_370 = arith.constant 0 : index
      %c0_371 = arith.constant 0 : index
      %497 = vector.load %arg4[%c3_368, %c2_369, %c0_370, %c0_371] : memref<5x5x128x128xbf16, #tpu.memory_space<vmem>>, vector<1x1x128x128xbf16>
      %498 = vector.shape_cast %497 : vector<1x1x128x128xbf16> to vector<128x128xbf16>
      %cst_372 = arith.constant dense<0.000000e+00> : vector<160x128xf32>
      %499 = tpu.matmul %496, %498, %cst_372 {dimension_numbers = #tpu.dot_dimension_numbers<[1], [0], [0], [1], [0, 0, 1, 1], [], []>} : vector<160x128xbf16>, vector<128x128xbf16>, vector<160x128xf32> -> vector<160x128xf32>
      %500 = arith.addf %494, %499 : vector<160x128xf32>
      %501 = vector.extract_strided_slice %482 {offsets = [3, 0, 0], sizes = [10, 16, 128], strides = [1, 1, 1]} : vector<14x16x128xbf16> to vector<10x16x128xbf16>
      %502 = vector.shape_cast %501 : vector<10x16x128xbf16> to vector<160x128xbf16>
      %c3_373 = arith.constant 3 : index
      %c3_374 = arith.constant 3 : index
      %c0_375 = arith.constant 0 : index
      %c0_376 = arith.constant 0 : index
      %503 = vector.load %arg4[%c3_373, %c3_374, %c0_375, %c0_376] : memref<5x5x128x128xbf16, #tpu.memory_space<vmem>>, vector<1x1x128x128xbf16>
      %504 = vector.shape_cast %503 : vector<1x1x128x128xbf16> to vector<128x128xbf16>
      %cst_377 = arith.constant dense<0.000000e+00> : vector<160x128xf32>
      %505 = tpu.matmul %502, %504, %cst_377 {dimension_numbers = #tpu.dot_dimension_numbers<[1], [0], [0], [1], [0, 0, 1, 1], [], []>} : vector<160x128xbf16>, vector<128x128xbf16>, vector<160x128xf32> -> vector<160x128xf32>
      %506 = arith.addf %500, %505 : vector<160x128xf32>
      %507 = vector.extract_strided_slice %482 {offsets = [4, 0, 0], sizes = [10, 16, 128], strides = [1, 1, 1]} : vector<14x16x128xbf16> to vector<10x16x128xbf16>
      %508 = vector.shape_cast %507 : vector<10x16x128xbf16> to vector<160x128xbf16>
      %c3_378 = arith.constant 3 : index
      %c4_379 = arith.constant 4 : index
      %c0_380 = arith.constant 0 : index
      %c0_381 = arith.constant 0 : index
      %509 = vector.load %arg4[%c3_378, %c4_379, %c0_380, %c0_381] : memref<5x5x128x128xbf16, #tpu.memory_space<vmem>>, vector<1x1x128x128xbf16>
      %510 = vector.shape_cast %509 : vector<1x1x128x128xbf16> to vector<128x128xbf16>
      %cst_382 = arith.constant dense<0.000000e+00> : vector<160x128xf32>
      %511 = tpu.matmul %508, %510, %cst_382 {dimension_numbers = #tpu.dot_dimension_numbers<[1], [0], [0], [1], [0, 0, 1, 1], [], []>} : vector<160x128xbf16>, vector<128x128xbf16>, vector<160x128xf32> -> vector<160x128xf32>
      %512 = arith.addf %506, %511 : vector<160x128xf32>
      %c2_i32_383 = arith.constant 2 : i32
      %513 = arith.muli %c2_i32_383, %179 : i32
      %c1_i32_384 = arith.constant 1 : i32
      %514 = arith.addi %513, %c1_i32_384 : i32
      %c4_i32_385 = arith.constant 4 : i32
      %515 = arith.addi %514, %c4_i32_385 : i32
      %516 = arith.index_cast %515 : i32 to index
      %c0_386 = arith.constant 0 : index
      %c0_387 = arith.constant 0 : index
      %c0_388 = arith.constant 0 : index
      %517 = vector.load %arg13[%516, %c0_386, %c0_387, %c0_388] : memref<14x14x16x128xbf16, #tpu.memory_space<vmem>>, vector<1x14x16x128xbf16>
      %518 = vector.shape_cast %517 : vector<1x14x16x128xbf16> to vector<14x16x128xbf16>
      %519 = vector.extract_strided_slice %518 {offsets = [0, 0, 0], sizes = [10, 16, 128], strides = [1, 1, 1]} : vector<14x16x128xbf16> to vector<10x16x128xbf16>
      %520 = vector.shape_cast %519 : vector<10x16x128xbf16> to vector<160x128xbf16>
      %c4_389 = arith.constant 4 : index
      %c0_390 = arith.constant 0 : index
      %c0_391 = arith.constant 0 : index
      %c0_392 = arith.constant 0 : index
      %521 = vector.load %arg4[%c4_389, %c0_390, %c0_391, %c0_392] : memref<5x5x128x128xbf16, #tpu.memory_space<vmem>>, vector<1x1x128x128xbf16>
      %522 = vector.shape_cast %521 : vector<1x1x128x128xbf16> to vector<128x128xbf16>
      %cst_393 = arith.constant dense<0.000000e+00> : vector<160x128xf32>
      %523 = tpu.matmul %520, %522, %cst_393 {dimension_numbers = #tpu.dot_dimension_numbers<[1], [0], [0], [1], [0, 0, 1, 1], [], []>} : vector<160x128xbf16>, vector<128x128xbf16>, vector<160x128xf32> -> vector<160x128xf32>
      %524 = arith.addf %512, %523 : vector<160x128xf32>
      %525 = vector.extract_strided_slice %518 {offsets = [1, 0, 0], sizes = [10, 16, 128], strides = [1, 1, 1]} : vector<14x16x128xbf16> to vector<10x16x128xbf16>
      %526 = vector.shape_cast %525 : vector<10x16x128xbf16> to vector<160x128xbf16>
      %c4_394 = arith.constant 4 : index
      %c1_395 = arith.constant 1 : index
      %c0_396 = arith.constant 0 : index
      %c0_397 = arith.constant 0 : index
      %527 = vector.load %arg4[%c4_394, %c1_395, %c0_396, %c0_397] : memref<5x5x128x128xbf16, #tpu.memory_space<vmem>>, vector<1x1x128x128xbf16>
      %528 = vector.shape_cast %527 : vector<1x1x128x128xbf16> to vector<128x128xbf16>
      %cst_398 = arith.constant dense<0.000000e+00> : vector<160x128xf32>
      %529 = tpu.matmul %526, %528, %cst_398 {dimension_numbers = #tpu.dot_dimension_numbers<[1], [0], [0], [1], [0, 0, 1, 1], [], []>} : vector<160x128xbf16>, vector<128x128xbf16>, vector<160x128xf32> -> vector<160x128xf32>
      %530 = arith.addf %524, %529 : vector<160x128xf32>
      %531 = vector.extract_strided_slice %518 {offsets = [2, 0, 0], sizes = [10, 16, 128], strides = [1, 1, 1]} : vector<14x16x128xbf16> to vector<10x16x128xbf16>
      %532 = vector.shape_cast %531 : vector<10x16x128xbf16> to vector<160x128xbf16>
      %c4_399 = arith.constant 4 : index
      %c2_400 = arith.constant 2 : index
      %c0_401 = arith.constant 0 : index
      %c0_402 = arith.constant 0 : index
      %533 = vector.load %arg4[%c4_399, %c2_400, %c0_401, %c0_402] : memref<5x5x128x128xbf16, #tpu.memory_space<vmem>>, vector<1x1x128x128xbf16>
      %534 = vector.shape_cast %533 : vector<1x1x128x128xbf16> to vector<128x128xbf16>
      %cst_403 = arith.constant dense<0.000000e+00> : vector<160x128xf32>
      %535 = tpu.matmul %532, %534, %cst_403 {dimension_numbers = #tpu.dot_dimension_numbers<[1], [0], [0], [1], [0, 0, 1, 1], [], []>} : vector<160x128xbf16>, vector<128x128xbf16>, vector<160x128xf32> -> vector<160x128xf32>
      %536 = arith.addf %530, %535 : vector<160x128xf32>
      %537 = vector.extract_strided_slice %518 {offsets = [3, 0, 0], sizes = [10, 16, 128], strides = [1, 1, 1]} : vector<14x16x128xbf16> to vector<10x16x128xbf16>
      %538 = vector.shape_cast %537 : vector<10x16x128xbf16> to vector<160x128xbf16>
      %c4_404 = arith.constant 4 : index
      %c3_405 = arith.constant 3 : index
      %c0_406 = arith.constant 0 : index
      %c0_407 = arith.constant 0 : index
      %539 = vector.load %arg4[%c4_404, %c3_405, %c0_406, %c0_407] : memref<5x5x128x128xbf16, #tpu.memory_space<vmem>>, vector<1x1x128x128xbf16>
      %540 = vector.shape_cast %539 : vector<1x1x128x128xbf16> to vector<128x128xbf16>
      %cst_408 = arith.constant dense<0.000000e+00> : vector<160x128xf32>
      %541 = tpu.matmul %538, %540, %cst_408 {dimension_numbers = #tpu.dot_dimension_numbers<[1], [0], [0], [1], [0, 0, 1, 1], [], []>} : vector<160x128xbf16>, vector<128x128xbf16>, vector<160x128xf32> -> vector<160x128xf32>
      %542 = arith.addf %536, %541 : vector<160x128xf32>
      %543 = vector.extract_strided_slice %518 {offsets = [4, 0, 0], sizes = [10, 16, 128], strides = [1, 1, 1]} : vector<14x16x128xbf16> to vector<10x16x128xbf16>
      %544 = vector.shape_cast %543 : vector<10x16x128xbf16> to vector<160x128xbf16>
      %c4_409 = arith.constant 4 : index
      %c4_410 = arith.constant 4 : index
      %c0_411 = arith.constant 0 : index
      %c0_412 = arith.constant 0 : index
      %545 = vector.load %arg4[%c4_409, %c4_410, %c0_411, %c0_412] : memref<5x5x128x128xbf16, #tpu.memory_space<vmem>>, vector<1x1x128x128xbf16>
      %546 = vector.shape_cast %545 : vector<1x1x128x128xbf16> to vector<128x128xbf16>
      %cst_413 = arith.constant dense<0.000000e+00> : vector<160x128xf32>
      %547 = tpu.matmul %544, %546, %cst_413 {dimension_numbers = #tpu.dot_dimension_numbers<[1], [0], [0], [1], [0, 0, 1, 1], [], []>} : vector<160x128xbf16>, vector<128x128xbf16>, vector<160x128xf32> -> vector<160x128xf32>
      %548 = arith.addf %542, %547 : vector<160x128xf32>
      %549 = vector.shape_cast %548 : vector<160x128xf32> to vector<10x16x128xf32>
      %550 = vector.broadcast %5 : vector<1x1x128xf32> to vector<10x16x128xf32>
      %551 = arith.addf %549, %550 : vector<10x16x128xf32>
      %cst_414 = arith.constant 0.000000e+00 : f32
      %552 = vector.broadcast %cst_414 : f32 to vector<10x16x128xf32>
      %553 = arith.maximumf %551, %552 : vector<10x16x128xf32>
      %554 = vector.shape_cast %553 : vector<10x16x128xf32> to vector<5x2x16x128xf32>
      %555 = vector.extract_strided_slice %554 {offsets = [0, 0, 0, 0], sizes = [5, 1, 16, 128], strides = [1, 1, 1, 1]} : vector<5x2x16x128xf32> to vector<5x1x16x128xf32>
      %556 = vector.shape_cast %555 : vector<5x1x16x128xf32> to vector<5x16x128xf32>
      %557 = vector.extract_strided_slice %554 {offsets = [0, 1, 0, 0], sizes = [5, 1, 16, 128], strides = [1, 1, 1, 1]} : vector<5x2x16x128xf32> to vector<5x1x16x128xf32>
      %558 = vector.shape_cast %557 : vector<5x1x16x128xf32> to vector<5x16x128xf32>
      %559 = arith.maximumf %556, %558 : vector<5x16x128xf32>
      %560 = arith.maximumf %369, %559 : vector<5x16x128xf32>
      %561 = vector.shape_cast %560 : vector<5x16x128xf32> to vector<1x5x16x128xf32>
      %562 = arith.truncf %561 : vector<1x5x16x128xf32> to vector<1x5x16x128xbf16>
      %563 = arith.index_cast %179 : i32 to index
      %c0_415 = arith.constant 0 : index
      %c0_416 = arith.constant 0 : index
      %c0_417 = arith.constant 0 : index
      %564 = vector.load %arg14[%563, %c0_415, %c0_416, %c0_417] : memref<5x5x16x128xbf16, #tpu.memory_space<vmem>>, vector<1x5x16x128xbf16>
      tpu.vector_store %arg14[%563, %c0_415, %c0_416, %c0_417], %562 {strides = array<i32>} : memref<5x5x16x128xbf16, #tpu.memory_space<vmem>>, vector<1x5x16x128xbf16>,
    }
    %c5_i32_8 = arith.constant 5 : i32
    %c0_9 = arith.constant 0 : index
    %c0_10 = arith.constant 0 : index
    %c0_11 = arith.constant 0 : index
    %c0_12 = arith.constant 0 : index
    %7 = vector.load %arg14[%c0_9, %c0_10, %c0_11, %c0_12] : memref<5x5x16x128xbf16, #tpu.memory_space<vmem>>, vector<5x5x16x128xbf16>
    %8 = vector.shape_cast %7 : vector<5x5x16x128xbf16> to vector<25x16x128xbf16>
    %9 = vector.extract_strided_slice %8 {offsets = [0, 0, 0], sizes = [1, 16, 128], strides = [1, 1, 1]} : vector<25x16x128xbf16> to vector<1x16x128xbf16>
    %10 = vector.shape_cast %9 : vector<1x16x128xbf16> to vector<16x128xbf16>
    %c0_13 = arith.constant 0 : index
    %c0_14 = arith.constant 0 : index
    %c0_15 = arith.constant 0 : index
    %11 = vector.load %arg6[%c0_13, %c0_14, %c0_15] : memref<25x128x128xbf16, #tpu.memory_space<vmem>>, vector<1x128x128xbf16>
    %12 = vector.shape_cast %11 : vector<1x128x128xbf16> to vector<128x128xbf16>
    %cst = arith.constant dense<0.000000e+00> : vector<16x128xf32>
    %13 = tpu.matmul %10, %12, %cst {dimension_numbers = #tpu.dot_dimension_numbers<[1], [0], [0], [1], [0, 0, 1, 1], [], []>} : vector<16x128xbf16>, vector<128x128xbf16>, vector<16x128xf32> -> vector<16x128xf32>
    %14 = vector.extract_strided_slice %8 {offsets = [1, 0, 0], sizes = [1, 16, 128], strides = [1, 1, 1]} : vector<25x16x128xbf16> to vector<1x16x128xbf16>
    %15 = vector.shape_cast %14 : vector<1x16x128xbf16> to vector<16x128xbf16>
    %c1 = arith.constant 1 : index
    %c0_16 = arith.constant 0 : index
    %c0_17 = arith.constant 0 : index
    %16 = vector.load %arg6[%c1, %c0_16, %c0_17] : memref<25x128x128xbf16, #tpu.memory_space<vmem>>, vector<1x128x128xbf16>
    %17 = vector.shape_cast %16 : vector<1x128x128xbf16> to vector<128x128xbf16>
    %cst_18 = arith.constant dense<0.000000e+00> : vector<16x128xf32>
    %18 = tpu.matmul %15, %17, %cst_18 {dimension_numbers = #tpu.dot_dimension_numbers<[1], [0], [0], [1], [0, 0, 1, 1], [], []>} : vector<16x128xbf16>, vector<128x128xbf16>, vector<16x128xf32> -> vector<16x128xf32>
    %19 = arith.addf %13, %18 : vector<16x128xf32>
    %20 = vector.extract_strided_slice %8 {offsets = [2, 0, 0], sizes = [1, 16, 128], strides = [1, 1, 1]} : vector<25x16x128xbf16> to vector<1x16x128xbf16>
    %21 = vector.shape_cast %20 : vector<1x16x128xbf16> to vector<16x128xbf16>
    %c2 = arith.constant 2 : index
    %c0_19 = arith.constant 0 : index
    %c0_20 = arith.constant 0 : index
    %22 = vector.load %arg6[%c2, %c0_19, %c0_20] : memref<25x128x128xbf16, #tpu.memory_space<vmem>>, vector<1x128x128xbf16>
    %23 = vector.shape_cast %22 : vector<1x128x128xbf16> to vector<128x128xbf16>
    %cst_21 = arith.constant dense<0.000000e+00> : vector<16x128xf32>
    %24 = tpu.matmul %21, %23, %cst_21 {dimension_numbers = #tpu.dot_dimension_numbers<[1], [0], [0], [1], [0, 0, 1, 1], [], []>} : vector<16x128xbf16>, vector<128x128xbf16>, vector<16x128xf32> -> vector<16x128xf32>
    %25 = arith.addf %19, %24 : vector<16x128xf32>
    %26 = vector.extract_strided_slice %8 {offsets = [3, 0, 0], sizes = [1, 16, 128], strides = [1, 1, 1]} : vector<25x16x128xbf16> to vector<1x16x128xbf16>
    %27 = vector.shape_cast %26 : vector<1x16x128xbf16> to vector<16x128xbf16>
    %c3 = arith.constant 3 : index
    %c0_22 = arith.constant 0 : index
    %c0_23 = arith.constant 0 : index
    %28 = vector.load %arg6[%c3, %c0_22, %c0_23] : memref<25x128x128xbf16, #tpu.memory_space<vmem>>, vector<1x128x128xbf16>
    %29 = vector.shape_cast %28 : vector<1x128x128xbf16> to vector<128x128xbf16>
    %cst_24 = arith.constant dense<0.000000e+00> : vector<16x128xf32>
    %30 = tpu.matmul %27, %29, %cst_24 {dimension_numbers = #tpu.dot_dimension_numbers<[1], [0], [0], [1], [0, 0, 1, 1], [], []>} : vector<16x128xbf16>, vector<128x128xbf16>, vector<16x128xf32> -> vector<16x128xf32>
    %31 = arith.addf %25, %30 : vector<16x128xf32>
    %32 = vector.extract_strided_slice %8 {offsets = [4, 0, 0], sizes = [1, 16, 128], strides = [1, 1, 1]} : vector<25x16x128xbf16> to vector<1x16x128xbf16>
    %33 = vector.shape_cast %32 : vector<1x16x128xbf16> to vector<16x128xbf16>
    %c4 = arith.constant 4 : index
    %c0_25 = arith.constant 0 : index
    %c0_26 = arith.constant 0 : index
    %34 = vector.load %arg6[%c4, %c0_25, %c0_26] : memref<25x128x128xbf16, #tpu.memory_space<vmem>>, vector<1x128x128xbf16>
    %35 = vector.shape_cast %34 : vector<1x128x128xbf16> to vector<128x128xbf16>
    %cst_27 = arith.constant dense<0.000000e+00> : vector<16x128xf32>
    %36 = tpu.matmul %33, %35, %cst_27 {dimension_numbers = #tpu.dot_dimension_numbers<[1], [0], [0], [1], [0, 0, 1, 1], [], []>} : vector<16x128xbf16>, vector<128x128xbf16>, vector<16x128xf32> -> vector<16x128xf32>
    %37 = arith.addf %31, %36 : vector<16x128xf32>
    %38 = vector.extract_strided_slice %8 {offsets = [5, 0, 0], sizes = [1, 16, 128], strides = [1, 1, 1]} : vector<25x16x128xbf16> to vector<1x16x128xbf16>
    %39 = vector.shape_cast %38 : vector<1x16x128xbf16> to vector<16x128xbf16>
    %c5 = arith.constant 5 : index
    %c0_28 = arith.constant 0 : index
    %c0_29 = arith.constant 0 : index
    %40 = vector.load %arg6[%c5, %c0_28, %c0_29] : memref<25x128x128xbf16, #tpu.memory_space<vmem>>, vector<1x128x128xbf16>
    %41 = vector.shape_cast %40 : vector<1x128x128xbf16> to vector<128x128xbf16>
    %cst_30 = arith.constant dense<0.000000e+00> : vector<16x128xf32>
    %42 = tpu.matmul %39, %41, %cst_30 {dimension_numbers = #tpu.dot_dimension_numbers<[1], [0], [0], [1], [0, 0, 1, 1], [], []>} : vector<16x128xbf16>, vector<128x128xbf16>, vector<16x128xf32> -> vector<16x128xf32>
    %43 = arith.addf %37, %42 : vector<16x128xf32>
    %44 = vector.extract_strided_slice %8 {offsets = [6, 0, 0], sizes = [1, 16, 128], strides = [1, 1, 1]} : vector<25x16x128xbf16> to vector<1x16x128xbf16>
    %45 = vector.shape_cast %44 : vector<1x16x128xbf16> to vector<16x128xbf16>
    %c6 = arith.constant 6 : index
    %c0_31 = arith.constant 0 : index
    %c0_32 = arith.constant 0 : index
    %46 = vector.load %arg6[%c6, %c0_31, %c0_32] : memref<25x128x128xbf16, #tpu.memory_space<vmem>>, vector<1x128x128xbf16>
    %47 = vector.shape_cast %46 : vector<1x128x128xbf16> to vector<128x128xbf16>
    %cst_33 = arith.constant dense<0.000000e+00> : vector<16x128xf32>
    %48 = tpu.matmul %45, %47, %cst_33 {dimension_numbers = #tpu.dot_dimension_numbers<[1], [0], [0], [1], [0, 0, 1, 1], [], []>} : vector<16x128xbf16>, vector<128x128xbf16>, vector<16x128xf32> -> vector<16x128xf32>
    %49 = arith.addf %43, %48 : vector<16x128xf32>
    %50 = vector.extract_strided_slice %8 {offsets = [7, 0, 0], sizes = [1, 16, 128], strides = [1, 1, 1]} : vector<25x16x128xbf16> to vector<1x16x128xbf16>
    %51 = vector.shape_cast %50 : vector<1x16x128xbf16> to vector<16x128xbf16>
    %c7 = arith.constant 7 : index
    %c0_34 = arith.constant 0 : index
    %c0_35 = arith.constant 0 : index
    %52 = vector.load %arg6[%c7, %c0_34, %c0_35] : memref<25x128x128xbf16, #tpu.memory_space<vmem>>, vector<1x128x128xbf16>
    %53 = vector.shape_cast %52 : vector<1x128x128xbf16> to vector<128x128xbf16>
    %cst_36 = arith.constant dense<0.000000e+00> : vector<16x128xf32>
    %54 = tpu.matmul %51, %53, %cst_36 {dimension_numbers = #tpu.dot_dimension_numbers<[1], [0], [0], [1], [0, 0, 1, 1], [], []>} : vector<16x128xbf16>, vector<128x128xbf16>, vector<16x128xf32> -> vector<16x128xf32>
    %55 = arith.addf %49, %54 : vector<16x128xf32>
    %56 = vector.extract_strided_slice %8 {offsets = [8, 0, 0], sizes = [1, 16, 128], strides = [1, 1, 1]} : vector<25x16x128xbf16> to vector<1x16x128xbf16>
    %57 = vector.shape_cast %56 : vector<1x16x128xbf16> to vector<16x128xbf16>
    %c8 = arith.constant 8 : index
    %c0_37 = arith.constant 0 : index
    %c0_38 = arith.constant 0 : index
    %58 = vector.load %arg6[%c8, %c0_37, %c0_38] : memref<25x128x128xbf16, #tpu.memory_space<vmem>>, vector<1x128x128xbf16>
    %59 = vector.shape_cast %58 : vector<1x128x128xbf16> to vector<128x128xbf16>
    %cst_39 = arith.constant dense<0.000000e+00> : vector<16x128xf32>
    %60 = tpu.matmul %57, %59, %cst_39 {dimension_numbers = #tpu.dot_dimension_numbers<[1], [0], [0], [1], [0, 0, 1, 1], [], []>} : vector<16x128xbf16>, vector<128x128xbf16>, vector<16x128xf32> -> vector<16x128xf32>
    %61 = arith.addf %55, %60 : vector<16x128xf32>
    %62 = vector.extract_strided_slice %8 {offsets = [9, 0, 0], sizes = [1, 16, 128], strides = [1, 1, 1]} : vector<25x16x128xbf16> to vector<1x16x128xbf16>
    %63 = vector.shape_cast %62 : vector<1x16x128xbf16> to vector<16x128xbf16>
    %c9 = arith.constant 9 : index
    %c0_40 = arith.constant 0 : index
    %c0_41 = arith.constant 0 : index
    %64 = vector.load %arg6[%c9, %c0_40, %c0_41] : memref<25x128x128xbf16, #tpu.memory_space<vmem>>, vector<1x128x128xbf16>
    %65 = vector.shape_cast %64 : vector<1x128x128xbf16> to vector<128x128xbf16>
    %cst_42 = arith.constant dense<0.000000e+00> : vector<16x128xf32>
    %66 = tpu.matmul %63, %65, %cst_42 {dimension_numbers = #tpu.dot_dimension_numbers<[1], [0], [0], [1], [0, 0, 1, 1], [], []>} : vector<16x128xbf16>, vector<128x128xbf16>, vector<16x128xf32> -> vector<16x128xf32>
    %67 = arith.addf %61, %66 : vector<16x128xf32>
    %68 = vector.extract_strided_slice %8 {offsets = [10, 0, 0], sizes = [1, 16, 128], strides = [1, 1, 1]} : vector<25x16x128xbf16> to vector<1x16x128xbf16>
    %69 = vector.shape_cast %68 : vector<1x16x128xbf16> to vector<16x128xbf16>
    %c10 = arith.constant 10 : index
    %c0_43 = arith.constant 0 : index
    %c0_44 = arith.constant 0 : index
    %70 = vector.load %arg6[%c10, %c0_43, %c0_44] : memref<25x128x128xbf16, #tpu.memory_space<vmem>>, vector<1x128x128xbf16>
    %71 = vector.shape_cast %70 : vector<1x128x128xbf16> to vector<128x128xbf16>
    %cst_45 = arith.constant dense<0.000000e+00> : vector<16x128xf32>
    %72 = tpu.matmul %69, %71, %cst_45 {dimension_numbers = #tpu.dot_dimension_numbers<[1], [0], [0], [1], [0, 0, 1, 1], [], []>} : vector<16x128xbf16>, vector<128x128xbf16>, vector<16x128xf32> -> vector<16x128xf32>
    %73 = arith.addf %67, %72 : vector<16x128xf32>
    %74 = vector.extract_strided_slice %8 {offsets = [11, 0, 0], sizes = [1, 16, 128], strides = [1, 1, 1]} : vector<25x16x128xbf16> to vector<1x16x128xbf16>
    %75 = vector.shape_cast %74 : vector<1x16x128xbf16> to vector<16x128xbf16>
    %c11 = arith.constant 11 : index
    %c0_46 = arith.constant 0 : index
    %c0_47 = arith.constant 0 : index
    %76 = vector.load %arg6[%c11, %c0_46, %c0_47] : memref<25x128x128xbf16, #tpu.memory_space<vmem>>, vector<1x128x128xbf16>
    %77 = vector.shape_cast %76 : vector<1x128x128xbf16> to vector<128x128xbf16>
    %cst_48 = arith.constant dense<0.000000e+00> : vector<16x128xf32>
    %78 = tpu.matmul %75, %77, %cst_48 {dimension_numbers = #tpu.dot_dimension_numbers<[1], [0], [0], [1], [0, 0, 1, 1], [], []>} : vector<16x128xbf16>, vector<128x128xbf16>, vector<16x128xf32> -> vector<16x128xf32>
    %79 = arith.addf %73, %78 : vector<16x128xf32>
    %80 = vector.extract_strided_slice %8 {offsets = [12, 0, 0], sizes = [1, 16, 128], strides = [1, 1, 1]} : vector<25x16x128xbf16> to vector<1x16x128xbf16>
    %81 = vector.shape_cast %80 : vector<1x16x128xbf16> to vector<16x128xbf16>
    %c12 = arith.constant 12 : index
    %c0_49 = arith.constant 0 : index
    %c0_50 = arith.constant 0 : index
    %82 = vector.load %arg6[%c12, %c0_49, %c0_50] : memref<25x128x128xbf16, #tpu.memory_space<vmem>>, vector<1x128x128xbf16>
    %83 = vector.shape_cast %82 : vector<1x128x128xbf16> to vector<128x128xbf16>
    %cst_51 = arith.constant dense<0.000000e+00> : vector<16x128xf32>
    %84 = tpu.matmul %81, %83, %cst_51 {dimension_numbers = #tpu.dot_dimension_numbers<[1], [0], [0], [1], [0, 0, 1, 1], [], []>} : vector<16x128xbf16>, vector<128x128xbf16>, vector<16x128xf32> -> vector<16x128xf32>
    %85 = arith.addf %79, %84 : vector<16x128xf32>
    %86 = vector.extract_strided_slice %8 {offsets = [13, 0, 0], sizes = [1, 16, 128], strides = [1, 1, 1]} : vector<25x16x128xbf16> to vector<1x16x128xbf16>
    %87 = vector.shape_cast %86 : vector<1x16x128xbf16> to vector<16x128xbf16>
    %c13 = arith.constant 13 : index
    %c0_52 = arith.constant 0 : index
    %c0_53 = arith.constant 0 : index
    %88 = vector.load %arg6[%c13, %c0_52, %c0_53] : memref<25x128x128xbf16, #tpu.memory_space<vmem>>, vector<1x128x128xbf16>
    %89 = vector.shape_cast %88 : vector<1x128x128xbf16> to vector<128x128xbf16>
    %cst_54 = arith.constant dense<0.000000e+00> : vector<16x128xf32>
    %90 = tpu.matmul %87, %89, %cst_54 {dimension_numbers = #tpu.dot_dimension_numbers<[1], [0], [0], [1], [0, 0, 1, 1], [], []>} : vector<16x128xbf16>, vector<128x128xbf16>, vector<16x128xf32> -> vector<16x128xf32>
    %91 = arith.addf %85, %90 : vector<16x128xf32>
    %92 = vector.extract_strided_slice %8 {offsets = [14, 0, 0], sizes = [1, 16, 128], strides = [1, 1, 1]} : vector<25x16x128xbf16> to vector<1x16x128xbf16>
    %93 = vector.shape_cast %92 : vector<1x16x128xbf16> to vector<16x128xbf16>
    %c14 = arith.constant 14 : index
    %c0_55 = arith.constant 0 : index
    %c0_56 = arith.constant 0 : index
    %94 = vector.load %arg6[%c14, %c0_55, %c0_56] : memref<25x128x128xbf16, #tpu.memory_space<vmem>>, vector<1x128x128xbf16>
    %95 = vector.shape_cast %94 : vector<1x128x128xbf16> to vector<128x128xbf16>
    %cst_57 = arith.constant dense<0.000000e+00> : vector<16x128xf32>
    %96 = tpu.matmul %93, %95, %cst_57 {dimension_numbers = #tpu.dot_dimension_numbers<[1], [0], [0], [1], [0, 0, 1, 1], [], []>} : vector<16x128xbf16>, vector<128x128xbf16>, vector<16x128xf32> -> vector<16x128xf32>
    %97 = arith.addf %91, %96 : vector<16x128xf32>
    %98 = vector.extract_strided_slice %8 {offsets = [15, 0, 0], sizes = [1, 16, 128], strides = [1, 1, 1]} : vector<25x16x128xbf16> to vector<1x16x128xbf16>
    %99 = vector.shape_cast %98 : vector<1x16x128xbf16> to vector<16x128xbf16>
    %c15 = arith.constant 15 : index
    %c0_58 = arith.constant 0 : index
    %c0_59 = arith.constant 0 : index
    %100 = vector.load %arg6[%c15, %c0_58, %c0_59] : memref<25x128x128xbf16, #tpu.memory_space<vmem>>, vector<1x128x128xbf16>
    %101 = vector.shape_cast %100 : vector<1x128x128xbf16> to vector<128x128xbf16>
    %cst_60 = arith.constant dense<0.000000e+00> : vector<16x128xf32>
    %102 = tpu.matmul %99, %101, %cst_60 {dimension_numbers = #tpu.dot_dimension_numbers<[1], [0], [0], [1], [0, 0, 1, 1], [], []>} : vector<16x128xbf16>, vector<128x128xbf16>, vector<16x128xf32> -> vector<16x128xf32>
    %103 = arith.addf %97, %102 : vector<16x128xf32>
    %104 = vector.extract_strided_slice %8 {offsets = [16, 0, 0], sizes = [1, 16, 128], strides = [1, 1, 1]} : vector<25x16x128xbf16> to vector<1x16x128xbf16>
    %105 = vector.shape_cast %104 : vector<1x16x128xbf16> to vector<16x128xbf16>
    %c16 = arith.constant 16 : index
    %c0_61 = arith.constant 0 : index
    %c0_62 = arith.constant 0 : index
    %106 = vector.load %arg6[%c16, %c0_61, %c0_62] : memref<25x128x128xbf16, #tpu.memory_space<vmem>>, vector<1x128x128xbf16>
    %107 = vector.shape_cast %106 : vector<1x128x128xbf16> to vector<128x128xbf16>
    %cst_63 = arith.constant dense<0.000000e+00> : vector<16x128xf32>
    %108 = tpu.matmul %105, %107, %cst_63 {dimension_numbers = #tpu.dot_dimension_numbers<[1], [0], [0], [1], [0, 0, 1, 1], [], []>} : vector<16x128xbf16>, vector<128x128xbf16>, vector<16x128xf32> -> vector<16x128xf32>
    %109 = arith.addf %103, %108 : vector<16x128xf32>
    %110 = vector.extract_strided_slice %8 {offsets = [17, 0, 0], sizes = [1, 16, 128], strides = [1, 1, 1]} : vector<25x16x128xbf16> to vector<1x16x128xbf16>
    %111 = vector.shape_cast %110 : vector<1x16x128xbf16> to vector<16x128xbf16>
    %c17 = arith.constant 17 : index
    %c0_64 = arith.constant 0 : index
    %c0_65 = arith.constant 0 : index
    %112 = vector.load %arg6[%c17, %c0_64, %c0_65] : memref<25x128x128xbf16, #tpu.memory_space<vmem>>, vector<1x128x128xbf16>
    %113 = vector.shape_cast %112 : vector<1x128x128xbf16> to vector<128x128xbf16>
    %cst_66 = arith.constant dense<0.000000e+00> : vector<16x128xf32>
    %114 = tpu.matmul %111, %113, %cst_66 {dimension_numbers = #tpu.dot_dimension_numbers<[1], [0], [0], [1], [0, 0, 1, 1], [], []>} : vector<16x128xbf16>, vector<128x128xbf16>, vector<16x128xf32> -> vector<16x128xf32>
    %115 = arith.addf %109, %114 : vector<16x128xf32>
    %116 = vector.extract_strided_slice %8 {offsets = [18, 0, 0], sizes = [1, 16, 128], strides = [1, 1, 1]} : vector<25x16x128xbf16> to vector<1x16x128xbf16>
    %117 = vector.shape_cast %116 : vector<1x16x128xbf16> to vector<16x128xbf16>
    %c18 = arith.constant 18 : index
    %c0_67 = arith.constant 0 : index
    %c0_68 = arith.constant 0 : index
    %118 = vector.load %arg6[%c18, %c0_67, %c0_68] : memref<25x128x128xbf16, #tpu.memory_space<vmem>>, vector<1x128x128xbf16>
    %119 = vector.shape_cast %118 : vector<1x128x128xbf16> to vector<128x128xbf16>
    %cst_69 = arith.constant dense<0.000000e+00> : vector<16x128xf32>
    %120 = tpu.matmul %117, %119, %cst_69 {dimension_numbers = #tpu.dot_dimension_numbers<[1], [0], [0], [1], [0, 0, 1, 1], [], []>} : vector<16x128xbf16>, vector<128x128xbf16>, vector<16x128xf32> -> vector<16x128xf32>
    %121 = arith.addf %115, %120 : vector<16x128xf32>
    %122 = vector.extract_strided_slice %8 {offsets = [19, 0, 0], sizes = [1, 16, 128], strides = [1, 1, 1]} : vector<25x16x128xbf16> to vector<1x16x128xbf16>
    %123 = vector.shape_cast %122 : vector<1x16x128xbf16> to vector<16x128xbf16>
    %c19 = arith.constant 19 : index
    %c0_70 = arith.constant 0 : index
    %c0_71 = arith.constant 0 : index
    %124 = vector.load %arg6[%c19, %c0_70, %c0_71] : memref<25x128x128xbf16, #tpu.memory_space<vmem>>, vector<1x128x128xbf16>
    %125 = vector.shape_cast %124 : vector<1x128x128xbf16> to vector<128x128xbf16>
    %cst_72 = arith.constant dense<0.000000e+00> : vector<16x128xf32>
    %126 = tpu.matmul %123, %125, %cst_72 {dimension_numbers = #tpu.dot_dimension_numbers<[1], [0], [0], [1], [0, 0, 1, 1], [], []>} : vector<16x128xbf16>, vector<128x128xbf16>, vector<16x128xf32> -> vector<16x128xf32>
    %127 = arith.addf %121, %126 : vector<16x128xf32>
    %128 = vector.extract_strided_slice %8 {offsets = [20, 0, 0], sizes = [1, 16, 128], strides = [1, 1, 1]} : vector<25x16x128xbf16> to vector<1x16x128xbf16>
    %129 = vector.shape_cast %128 : vector<1x16x128xbf16> to vector<16x128xbf16>
    %c20 = arith.constant 20 : index
    %c0_73 = arith.constant 0 : index
    %c0_74 = arith.constant 0 : index
    %130 = vector.load %arg6[%c20, %c0_73, %c0_74] : memref<25x128x128xbf16, #tpu.memory_space<vmem>>, vector<1x128x128xbf16>
    %131 = vector.shape_cast %130 : vector<1x128x128xbf16> to vector<128x128xbf16>
    %cst_75 = arith.constant dense<0.000000e+00> : vector<16x128xf32>
    %132 = tpu.matmul %129, %131, %cst_75 {dimension_numbers = #tpu.dot_dimension_numbers<[1], [0], [0], [1], [0, 0, 1, 1], [], []>} : vector<16x128xbf16>, vector<128x128xbf16>, vector<16x128xf32> -> vector<16x128xf32>
    %133 = arith.addf %127, %132 : vector<16x128xf32>
    %134 = vector.extract_strided_slice %8 {offsets = [21, 0, 0], sizes = [1, 16, 128], strides = [1, 1, 1]} : vector<25x16x128xbf16> to vector<1x16x128xbf16>
    %135 = vector.shape_cast %134 : vector<1x16x128xbf16> to vector<16x128xbf16>
    %c21 = arith.constant 21 : index
    %c0_76 = arith.constant 0 : index
    %c0_77 = arith.constant 0 : index
    %136 = vector.load %arg6[%c21, %c0_76, %c0_77] : memref<25x128x128xbf16, #tpu.memory_space<vmem>>, vector<1x128x128xbf16>
    %137 = vector.shape_cast %136 : vector<1x128x128xbf16> to vector<128x128xbf16>
    %cst_78 = arith.constant dense<0.000000e+00> : vector<16x128xf32>
    %138 = tpu.matmul %135, %137, %cst_78 {dimension_numbers = #tpu.dot_dimension_numbers<[1], [0], [0], [1], [0, 0, 1, 1], [], []>} : vector<16x128xbf16>, vector<128x128xbf16>, vector<16x128xf32> -> vector<16x128xf32>
    %139 = arith.addf %133, %138 : vector<16x128xf32>
    %140 = vector.extract_strided_slice %8 {offsets = [22, 0, 0], sizes = [1, 16, 128], strides = [1, 1, 1]} : vector<25x16x128xbf16> to vector<1x16x128xbf16>
    %141 = vector.shape_cast %140 : vector<1x16x128xbf16> to vector<16x128xbf16>
    %c22 = arith.constant 22 : index
    %c0_79 = arith.constant 0 : index
    %c0_80 = arith.constant 0 : index
    %142 = vector.load %arg6[%c22, %c0_79, %c0_80] : memref<25x128x128xbf16, #tpu.memory_space<vmem>>, vector<1x128x128xbf16>
    %143 = vector.shape_cast %142 : vector<1x128x128xbf16> to vector<128x128xbf16>
    %cst_81 = arith.constant dense<0.000000e+00> : vector<16x128xf32>
    %144 = tpu.matmul %141, %143, %cst_81 {dimension_numbers = #tpu.dot_dimension_numbers<[1], [0], [0], [1], [0, 0, 1, 1], [], []>} : vector<16x128xbf16>, vector<128x128xbf16>, vector<16x128xf32> -> vector<16x128xf32>
    %145 = arith.addf %139, %144 : vector<16x128xf32>
    %146 = vector.extract_strided_slice %8 {offsets = [23, 0, 0], sizes = [1, 16, 128], strides = [1, 1, 1]} : vector<25x16x128xbf16> to vector<1x16x128xbf16>
    %147 = vector.shape_cast %146 : vector<1x16x128xbf16> to vector<16x128xbf16>
    %c23 = arith.constant 23 : index
    %c0_82 = arith.constant 0 : index
    %c0_83 = arith.constant 0 : index
    %148 = vector.load %arg6[%c23, %c0_82, %c0_83] : memref<25x128x128xbf16, #tpu.memory_space<vmem>>, vector<1x128x128xbf16>
    %149 = vector.shape_cast %148 : vector<1x128x128xbf16> to vector<128x128xbf16>
    %cst_84 = arith.constant dense<0.000000e+00> : vector<16x128xf32>
    %150 = tpu.matmul %147, %149, %cst_84 {dimension_numbers = #tpu.dot_dimension_numbers<[1], [0], [0], [1], [0, 0, 1, 1], [], []>} : vector<16x128xbf16>, vector<128x128xbf16>, vector<16x128xf32> -> vector<16x128xf32>
    %151 = arith.addf %145, %150 : vector<16x128xf32>
    %152 = vector.extract_strided_slice %8 {offsets = [24, 0, 0], sizes = [1, 16, 128], strides = [1, 1, 1]} : vector<25x16x128xbf16> to vector<1x16x128xbf16>
    %153 = vector.shape_cast %152 : vector<1x16x128xbf16> to vector<16x128xbf16>
    %c24 = arith.constant 24 : index
    %c0_85 = arith.constant 0 : index
    %c0_86 = arith.constant 0 : index
    %154 = vector.load %arg6[%c24, %c0_85, %c0_86] : memref<25x128x128xbf16, #tpu.memory_space<vmem>>, vector<1x128x128xbf16>
    %155 = vector.shape_cast %154 : vector<1x128x128xbf16> to vector<128x128xbf16>
    %cst_87 = arith.constant dense<0.000000e+00> : vector<16x128xf32>
    %156 = tpu.matmul %153, %155, %cst_87 {dimension_numbers = #tpu.dot_dimension_numbers<[1], [0], [0], [1], [0, 0, 1, 1], [], []>} : vector<16x128xbf16>, vector<128x128xbf16>, vector<16x128xf32> -> vector<16x128xf32>
    %157 = arith.addf %151, %156 : vector<16x128xf32>
    %c0_88 = arith.constant 0 : index
    %c0_89 = arith.constant 0 : index
    %158 = vector.load %arg7[%c0_88, %c0_89] : memref<1x128xf32, #tpu.memory_space<vmem>>, vector<1x128xf32>
    %159 = vector.broadcast %158 : vector<1x128xf32> to vector<16x128xf32>
    %160 = arith.addf %157, %159 : vector<16x128xf32>
    %cst_90 = arith.constant 0.000000e+00 : f32
    %161 = vector.broadcast %cst_90 : f32 to vector<16x128xf32>
    %162 = arith.maximumf %160, %161 : vector<16x128xf32>
    %163 = arith.truncf %162 : vector<16x128xf32> to vector<16x128xbf16>
    %c0_91 = arith.constant 0 : index
    %c0_92 = arith.constant 0 : index
    %164 = vector.load %arg8[%c0_91, %c0_92] : memref<128x128xbf16, #tpu.memory_space<vmem>>, vector<128x128xbf16>
    %cst_93 = arith.constant dense<0.000000e+00> : vector<16x128xf32>
    %165 = tpu.matmul %163, %164, %cst_93 {dimension_numbers = #tpu.dot_dimension_numbers<[1], [0], [0], [1], [0, 0, 1, 1], [], []>} : vector<16x128xbf16>, vector<128x128xbf16>, vector<16x128xf32> -> vector<16x128xf32>
    %c0_94 = arith.constant 0 : index
    %c0_95 = arith.constant 0 : index
    %166 = vector.load %arg9[%c0_94, %c0_95] : memref<1x128xf32, #tpu.memory_space<vmem>>, vector<1x128xf32>
    %167 = vector.broadcast %166 : vector<1x128xf32> to vector<16x128xf32>
    %168 = arith.addf %165, %167 : vector<16x128xf32>
    %cst_96 = arith.constant 0.000000e+00 : f32
    %169 = vector.broadcast %cst_96 : f32 to vector<16x128xf32>
    %170 = arith.maximumf %168, %169 : vector<16x128xf32>
    %171 = arith.truncf %170 : vector<16x128xf32> to vector<16x128xbf16>
    %c0_97 = arith.constant 0 : index
    %c0_98 = arith.constant 0 : index
    %172 = vector.load %arg10[%c0_97, %c0_98] : memref<128x128xbf16, #tpu.memory_space<vmem>>, vector<128x128xbf16>
    %cst_99 = arith.constant dense<0.000000e+00> : vector<16x128xf32>
    %173 = tpu.matmul %171, %172, %cst_99 {dimension_numbers = #tpu.dot_dimension_numbers<[1], [0], [0], [1], [0, 0, 1, 1], [], []>} : vector<16x128xbf16>, vector<128x128xbf16>, vector<16x128xf32> -> vector<16x128xf32>
    %c0_100 = arith.constant 0 : index
    %c0_101 = arith.constant 0 : index
    %174 = vector.load %arg11[%c0_100, %c0_101] : memref<1x128xf32, #tpu.memory_space<vmem>>, vector<1x128xf32>
    %175 = vector.broadcast %174 : vector<1x128xf32> to vector<16x128xf32>
    %176 = arith.addf %173, %175 : vector<16x128xf32>
    %c0_102 = arith.constant 0 : index
    %c0_103 = arith.constant 0 : index
    %177 = vector.load %arg12[%c0_102, %c0_103] : memref<16x128xf32, #tpu.memory_space<vmem>>, vector<16x128xf32>
    tpu.vector_store %arg12[%c0_102, %c0_103], %176 {strides = array<i32>} : memref<16x128xf32, #tpu.memory_space<vmem>>, vector<16x128xf32>,
    return
  }
  func.func @transform_0(%arg0: i32) -> (i32, i32, i32, i32) {
    %c0_i32 = arith.constant 0 : i32
    %c0_i32_0 = arith.constant 0 : i32
    %c0_i32_1 = arith.constant 0 : i32
    %c0_i32_2 = arith.constant 0 : i32
    return %c0_i32, %c0_i32_0, %arg0, %c0_i32_1 : i32, i32, i32, i32
  }
  func.func @transform_1(%arg0: i32) -> (i32, i32) {
    %c0_i32 = arith.constant 0 : i32
    %c0_i32_0 = arith.constant 0 : i32
    %c0_i32_1 = arith.constant 0 : i32
    return %c0_i32, %c0_i32_0 : i32, i32
  }
  func.func @transform_2(%arg0: i32) -> (i32, i32) {
    %c0_i32 = arith.constant 0 : i32
    %c0_i32_0 = arith.constant 0 : i32
    %c0_i32_1 = arith.constant 0 : i32
    return %c0_i32, %c0_i32_0 : i32, i32
  }
  func.func @transform_3(%arg0: i32) -> (i32, i32, i32, i32) {
    %c0_i32 = arith.constant 0 : i32
    %c0_i32_0 = arith.constant 0 : i32
    %c0_i32_1 = arith.constant 0 : i32
    %c0_i32_2 = arith.constant 0 : i32
    %c0_i32_3 = arith.constant 0 : i32
    return %c0_i32, %c0_i32_0, %c0_i32_1, %c0_i32_2 : i32, i32, i32, i32
  }
  func.func @transform_4(%arg0: i32) -> (i32, i32) {
    %c0_i32 = arith.constant 0 : i32
    %c0_i32_0 = arith.constant 0 : i32
    %c0_i32_1 = arith.constant 0 : i32
    return %c0_i32, %c0_i32_0 : i32, i32
  }
  func.func @transform_5(%arg0: i32) -> (i32, i32, i32) {
    %c0_i32 = arith.constant 0 : i32
    %c0_i32_0 = arith.constant 0 : i32
    %c0_i32_1 = arith.constant 0 : i32
    %c0_i32_2 = arith.constant 0 : i32
    return %c0_i32, %c0_i32_0, %c0_i32_1 : i32, i32, i32
  }
  func.func @transform_6(%arg0: i32) -> (i32, i32) {
    %c0_i32 = arith.constant 0 : i32
    %c0_i32_0 = arith.constant 0 : i32
    %c0_i32_1 = arith.constant 0 : i32
    return %c0_i32, %c0_i32_0 : i32, i32
  }
  func.func @transform_7(%arg0: i32) -> (i32, i32) {
    %c0_i32 = arith.constant 0 : i32
    %c0_i32_0 = arith.constant 0 : i32
    %c0_i32_1 = arith.constant 0 : i32
    return %c0_i32, %c0_i32_0 : i32, i32
  }
  func.func @transform_8(%arg0: i32) -> (i32, i32) {
    %c0_i32 = arith.constant 0 : i32
    %c0_i32_0 = arith.constant 0 : i32
    %c0_i32_1 = arith.constant 0 : i32
    return %c0_i32, %c0_i32_0 : i32, i32
  }
  func.func @transform_9(%arg0: i32) -> (i32, i32) {
    %c0_i32 = arith.constant 0 : i32
    %c0_i32_0 = arith.constant 0 : i32
    %c0_i32_1 = arith.constant 0 : i32
    return %c0_i32, %c0_i32_0 : i32, i32
  }
  func.func @transform_10(%arg0: i32) -> (i32, i32) {
    %c0_i32 = arith.constant 0 : i32
    %c0_i32_0 = arith.constant 0 : i32
    %c0_i32_1 = arith.constant 0 : i32
    return %c0_i32, %c0_i32_0 : i32, i32
  }
  func.func @transform_11(%arg0: i32) -> (i32, i32) {
    %c0_i32 = arith.constant 0 : i32
    %c0_i32_0 = arith.constant 0 : i32
    return %arg0, %c0_i32 : i32, i32
  }
}

</mosaic_0001>

<bundles_post_ra>
// kernel: cifar10_forward.1
= control target key start
LH: loop header
LB: loop body
LE: loop exit
PB: predicated region body
PF: predicated region fallthrough
CT: control target
= control target key end

     0   :  { %s26480_s17 = smov 0   ;;  %s26482_s18 = smov 0   ;;  %s30801_s0 = inlined_call_operand.vmem [shape: bf16[28,28,32,128], index: 0, kind: input, shape index: {}]   ;;  %s30802_s1 = inlined_call_operand.vmem [shape: bf16[128,128], index: 1, kind: input, shape index: {}]   ;;  %s30803_s2 = inlined_call_operand.vmem [shape: f32[1,128], index: 2, kind: input, shape index: {}]   ;;  %s30804_s3 = inlined_call_operand.vmem [shape: bf16[5,5,128,128], index: 3, kind: input, shape index: {}]   ;;  %s30805_s4 = inlined_call_operand.vmem [shape: f32[1,128], index: 4, kind: input, shape index: {}]   ;;  %s30806_s5 = inlined_call_operand.vmem [shape: bf16[25,128,128], index: 5, kind: input, shape index: {}]   ;;  %s30807_s6 = inlined_call_operand.vmem [shape: f32[1,128], index: 6, kind: input, shape index: {}]   ;;  %s30808_s7 = inlined_call_operand.vmem [shape: bf16[128,128], index: 7, kind: input, shape index: {}]   ;;  %s30809_s8 = inlined_call_operand.vmem [shape: f32[1,128], index: 8, kind: input, shape index: {}]   ;;  %s30810_s9 = inlined_call_operand.vmem [shape: bf16[128,128], index: 9, kind: input, shape index: {}]   ;;  %s30811_s10 = inlined_call_operand.vmem [shape: f32[1,128], index: 10, kind: input, shape index: {}]   ;;  %s30812_s11 = inlined_call_operand.vmem [shape: f32[32,128], index: 11, kind: output, shape index: {}]  }
   0x1   :  { %s26484_s19 = smov 0  }
   0x2 LB: > { %s19687_s20 = sadd.s32 4294967295, %s26392_s19   ;;  %s26497_s21 = sadd.s32 1, %s26392_s19   ;;  %s26392_s19 = sphi %s26484_s19, %s30818_s19   ;;  %s26388_s18 = sphi %s26482_s18, %s30817_s18   ;;  %s26384_s17 = sphi %s26480_s17, %s30816_s17  }
   0x3   : > { %s25_s22 = ssub.s32 %s26392_s19, %s26497_s21  ;;  %s28_s23 = sadd.s32 1, %s26388_s18 }
   0x4   : > { %p26_p0 = scmp.eq.s32.totalorder %s25_s22, 0  ;;  %p35_p1 = scmp.ne.s32.totalorder %s26388_s18, %s26384_s17 }
   0x5   : > { %p36_p2 = scmp.eq.s32.totalorder %s26392_s19, 0  ;;  %p19690_p4 = scmp.ge.s32.totalorder %s26392_s19, 2 }
   0x6   : > { %s26506_s24 = scalar_select %p26_p0, %s26388_s18, %s28_s23  }
   0x7   : > { %p37_p3 = por %p36_p2, %p35_p1  ;;  %327 = sbr.rel (%p19690_p4) target bundleno = 553 (0x229), region = 56 }
   0xe   : > { %330 = sbr.rel (!%p37_p3) target bundleno = 553 (0x229), region = 60  ;;  %s332_s25 = sand.u32 (%p37_p3), 1, %s26388_s18  }
   0xf   : > { %s21099_s26 = sshll.u32 (%p37_p3), %s26392_s19, 3  ;;  %s26511_s27 = smul.u32 (%p37_p3), 6272, %s332_s25 }
  0x10   : > { %s26516_s30 = scalar_lea.vmem (%p37_p3), %s30801_s0, %s21099_s26   ;;  %s26526_s15 = smov (%p37_p3), 0  }
  0x11   : > { %s334_s12 = scalar_lea.vmem (%p37_p3), [#allocation4], %s26511_s27   ;;  %s30814_s14 = smov (%p37_p3), %s26516_s30 }
  0x12   : > { %s30813_s13 = smov (%p37_p3), %s334_s12  ;;  %s26528_s16 = smov (%p37_p3), 0  }
  0x15 LB: >> { %v354_v0 = vld [vmem:[%s26400_s14] sm:$0xf]  ;;  %v356_v1 = vld [vmem:[%s26400_s14 + $0x10] sm:$0xf]  ;;  %s1922_s22 = sadd.s32 1, %s26404_s15  ;;  %s350_s16 = sadd.s32 1, %s26408_s16   ;;  %s26408_s16 = sphi %s26528_s16, %s350_s16   ;;  %s26404_s15 = sphi %s26526_s15, %s30815_s15   ;;  %s26400_s14 = sphi %s30814_s14, %s1927_s14   ;;  %s26396_s13 = sphi %s30813_s13, %s1928_s13  }
  0x16   : >> { %v358_v2 = vld [vmem:[%s26400_s14 + $0x20] sm:$0xf]  ;;  %355 = vst [vmem:[%s26396_s13] sm:$0xf] %v354_v0  ;;  %357 = vst [vmem:[%s26396_s13 + $0x8] sm:$0xf] %v356_v1  ;;  %p1923_p5 = scmp.ge.s32.totalorder %s1922_s22, 2 }
  0x17   : >> { %359 = vst [vmem:[%s26396_s13 + $0x10] sm:$0xf] %v358_v2  ;;  %v360_v3 = vld [vmem:[%s26400_s14 + $0x30] sm:$0xf]  ;;  %v362_v4 = vld [vmem:[%s26400_s14 + $0x40] sm:$0xf] }
  0x18   : >> { %v364_v5 = vld [vmem:[%s26400_s14 + $0x50] sm:$0xf]  ;;  %361 = vst [vmem:[%s26396_s13 + $0x18] sm:$0xf] %v360_v3  ;;  %363 = vst [vmem:[%s26396_s13 + $0x20] sm:$0xf] %v362_v4 }
  0x19   : >> { %365 = vst [vmem:[%s26396_s13 + $0x28] sm:$0xf] %v364_v5  ;;  %v366_v6 = vld [vmem:[%s26400_s14 + $0x60] sm:$0xf]  ;;  %v368_v7 = vld [vmem:[%s26400_s14 + $0x70] sm:$0xf] }
  0x1a   : >> { %v370_v8 = vld [vmem:[%s26400_s14 + $0x80] sm:$0xf]  ;;  %367 = vst [vmem:[%s26396_s13 + $0x30] sm:$0xf] %v366_v6  ;;  %369 = vst [vmem:[%s26396_s13 + $0x38] sm:$0xf] %v368_v7 }
  0x1b   : >> { %371 = vst [vmem:[%s26396_s13 + $0x40] sm:$0xf] %v370_v8  ;;  %v372_v9 = vld [vmem:[%s26400_s14 + $0x90] sm:$0xf]  ;;  %v374_v10 = vld [vmem:[%s26400_s14 + $0xa0] sm:$0xf] }
  0x1c   : >> { %v376_v11 = vld [vmem:[%s26400_s14 + $0xb0] sm:$0xf]  ;;  %373 = vst [vmem:[%s26396_s13 + $0x48] sm:$0xf] %v372_v9  ;;  %375 = vst [vmem:[%s26396_s13 + $0x50] sm:$0xf] %v374_v10 }
  0x1d   : >> { %377 = vst [vmem:[%s26396_s13 + $0x58] sm:$0xf] %v376_v11  ;;  %v378_v12 = vld [vmem:[%s26400_s14 + $0xc0] sm:$0xf]  ;;  %v380_v13 = vld [vmem:[%s26400_s14 + $0xd0] sm:$0xf] }
  0x1e   : >> { %v382_v14 = vld [vmem:[%s26400_s14 + $0xe0] sm:$0xf]  ;;  %379 = vst [vmem:[%s26396_s13 + $0x60] sm:$0xf] %v378_v12  ;;  %381 = vst [vmem:[%s26396_s13 + $0x68] sm:$0xf] %v380_v13 }
  0x1f   : >> { %383 = vst [vmem:[%s26396_s13 + $0x70] sm:$0xf] %v382_v14  ;;  %v384_v15 = vld [vmem:[%s26400_s14 + $0xf0] sm:$0xf]  ;;  %v386_v16 = vld [vmem:[%s26400_s14 + $0x100] sm:$0xf] }
  0x20   : >> { %v388_v17 = vld [vmem:[%s26400_s14 + $0x110] sm:$0xf]  ;;  %385 = vst [vmem:[%s26396_s13 + $0x78] sm:$0xf] %v384_v15  ;;  %387 = vst [vmem:[%s26396_s13 + $0x80] sm:$0xf] %v386_v16 }
  0x21   : >> { %389 = vst [vmem:[%s26396_s13 + $0x88] sm:$0xf] %v388_v17  ;;  %v390_v18 = vld [vmem:[%s26400_s14 + $0x120] sm:$0xf]  ;;  %v392_v19 = vld [vmem:[%s26400_s14 + $0x130] sm:$0xf] }
  0x22   : >> { %v394_v20 = vld [vmem:[%s26400_s14 + $0x140] sm:$0xf]  ;;  %391 = vst [vmem:[%s26396_s13 + $0x90] sm:$0xf] %v390_v18  ;;  %393 = vst [vmem:[%s26396_s13 + $0x98] sm:$0xf] %v392_v19 }
  0x23   : >> { %395 = vst [vmem:[%s26396_s13 + $0xa0] sm:$0xf] %v394_v20  ;;  %v396_v21 = vld [vmem:[%s26400_s14 + $0x150] sm:$0xf]  ;;  %v398_v22 = vld [vmem:[%s26400_s14 + $0x160] sm:$0xf] }
  0x24   : >> { %v400_v23 = vld [vmem:[%s26400_s14 + $0x170] sm:$0xf]  ;;  %397 = vst [vmem:[%s26396_s13 + $0xa8] sm:$0xf] %v396_v21  ;;  %399 = vst [vmem:[%s26396_s13 + $0xb0] sm:$0xf] %v398_v22 }
  0x25   : >> { %401 = vst [vmem:[%s26396_s13 + $0xb8] sm:$0xf] %v400_v23  ;;  %v402_v24 = vld [vmem:[%s26400_s14 + $0x180] sm:$0xf]  ;;  %v404_v25 = vld [vmem:[%s26400_s14 + $0x190] sm:$0xf] }
  0x26   : >> { %v406_v26 = vld [vmem:[%s26400_s14 + $0x1a0] sm:$0xf]  ;;  %403 = vst [vmem:[%s26396_s13 + $0xc0] sm:$0xf] %v402_v24  ;;  %405 = vst [vmem:[%s26396_s13 + $0xc8] sm:$0xf] %v404_v25 }
  0x27   : >> { %407 = vst [vmem:[%s26396_s13 + $0xd0] sm:$0xf] %v406_v26  ;;  %v408_v27 = vld [vmem:[%s26400_s14 + $0x1b0] sm:$0xf]  ;;  %v410_v28 = vld [vmem:[%s26400_s14 + $0x1c0] sm:$0xf] }
  0x28   : >> { %v412_v29 = vld [vmem:[%s26400_s14 + $0x1d0] sm:$0xf]  ;;  %409 = vst [vmem:[%s26396_s13 + $0xd8] sm:$0xf] %v408_v27  ;;  %411 = vst [vmem:[%s26396_s13 + $0xe0] sm:$0xf] %v410_v28 }
  0x29   : >> { %413 = vst [vmem:[%s26396_s13 + $0xe8] sm:$0xf] %v412_v29  ;;  %v414_v30 = vld [vmem:[%s26400_s14 + $0x1e0] sm:$0xf]  ;;  %v416_v31 = vld [vmem:[%s26400_s14 + $0x1f0] sm:$0xf] }
  0x2a   : >> { %v418_v32 = vld [vmem:[%s26400_s14 + $0x200] sm:$0xf]  ;;  %415 = vst [vmem:[%s26396_s13 + $0xf0] sm:$0xf] %v414_v30  ;;  %417 = vst [vmem:[%s26396_s13 + $0xf8] sm:$0xf] %v416_v31 }
  0x2b   : >> { %419 = vst [vmem:[%s26396_s13 + $0x100] sm:$0xf] %v418_v32  ;;  %v420_v33 = vld [vmem:[%s26400_s14 + $0x210] sm:$0xf]  ;;  %v422_v34 = vld [vmem:[%s26400_s14 + $0x220] sm:$0xf] }
  0x2c   : >> { %v424_v35 = vld [vmem:[%s26400_s14 + $0x230] sm:$0xf]  ;;  %421 = vst [vmem:[%s26396_s13 + $0x108] sm:$0xf] %v420_v33  ;;  %423 = vst [vmem:[%s26396_s13 + $0x110] sm:$0xf] %v422_v34 }
  0x2d   : >> { %425 = vst [vmem:[%s26396_s13 + $0x118] sm:$0xf] %v424_v35  ;;  %v426_v36 = vld [vmem:[%s26400_s14 + $0x240] sm:$0xf]  ;;  %v428_v37 = vld [vmem:[%s26400_s14 + $0x250] sm:$0xf] }
  0x2e   : >> { %v430_v38 = vld [vmem:[%s26400_s14 + $0x260] sm:$0xf]  ;;  %427 = vst [vmem:[%s26396_s13 + $0x120] sm:$0xf] %v426_v36  ;;  %429 = vst [vmem:[%s26396_s13 + $0x128] sm:$0xf] %v428_v37 }
  0x2f   : >> { %431 = vst [vmem:[%s26396_s13 + $0x130] sm:$0xf] %v430_v38  ;;  %v432_v39 = vld [vmem:[%s26400_s14 + $0x270] sm:$0xf]  ;;  %v434_v40 = vld [vmem:[%s26400_s14 + $0x280] sm:$0xf] }
  0x30   : >> { %v436_v41 = vld [vmem:[%s26400_s14 + $0x290] sm:$0xf]  ;;  %433 = vst [vmem:[%s26396_s13 + $0x138] sm:$0xf] %v432_v39  ;;  %435 = vst [vmem:[%s26396_s13 + $0x140] sm:$0xf] %v434_v40 }
  0x31   : >> { %437 = vst [vmem:[%s26396_s13 + $0x148] sm:$0xf] %v436_v41  ;;  %v438_v42 = vld [vmem:[%s26400_s14 + $0x2a0] sm:$0xf]  ;;  %v440_v43 = vld [vmem:[%s26400_s14 + $0x2b0] sm:$0xf] }
  0x32   : >> { %v442_v44 = vld [vmem:[%s26400_s14 + $0x2c0] sm:$0xf]  ;;  %439 = vst [vmem:[%s26396_s13 + $0x150] sm:$0xf] %v438_v42  ;;  %441 = vst [vmem:[%s26396_s13 + $0x158] sm:$0xf] %v440_v43 }
  0x33   : >> { %443 = vst [vmem:[%s26396_s13 + $0x160] sm:$0xf] %v442_v44  ;;  %v444_v45 = vld [vmem:[%s26400_s14 + $0x2d0] sm:$0xf]  ;;  %v446_v46 = vld [vmem:[%s26400_s14 + $0x2e0] sm:$0xf] }
  0x34   : >> { %v448_v47 = vld [vmem:[%s26400_s14 + $0x2f0] sm:$0xf]  ;;  %445 = vst [vmem:[%s26396_s13 + $0x168] sm:$0xf] %v444_v45  ;;  %447 = vst [vmem:[%s26396_s13 + $0x170] sm:$0xf] %v446_v46 }
  0x35   : >> { %449 = vst [vmem:[%s26396_s13 + $0x178] sm:$0xf] %v448_v47  ;;  %v450_v48 = vld [vmem:[%s26400_s14 + $0x300] sm:$0xf]  ;;  %v452_v49 = vld [vmem:[%s26400_s14 + $0x310] sm:$0xf] }
  0x36   : >> { %v454_v50 = vld [vmem:[%s26400_s14 + $0x320] sm:$0xf]  ;;  %451 = vst [vmem:[%s26396_s13 + $0x180] sm:$0xf] %v450_v48  ;;  %453 = vst [vmem:[%s26396_s13 + $0x188] sm:$0xf] %v452_v49 }
  0x37   : >> { %455 = vst [vmem:[%s26396_s13 + $0x190] sm:$0xf] %v454_v50  ;;  %v456_v51 = vld [vmem:[%s26400_s14 + $0x330] sm:$0xf]  ;;  %v458_v52 = vld [vmem:[%s26400_s14 + $0x340] sm:$0xf] }
  0x38   : >> { %v460_v53 = vld [vmem:[%s26400_s14 + $0x350] sm:$0xf]  ;;  %457 = vst [vmem:[%s26396_s13 + $0x198] sm:$0xf] %v456_v51  ;;  %459 = vst [vmem:[%s26396_s13 + $0x1a0] sm:$0xf] %v458_v52 }
  0x39   : >> { %461 = vst [vmem:[%s26396_s13 + $0x1a8] sm:$0xf] %v460_v53  ;;  %v462_v54 = vld [vmem:[%s26400_s14 + $0x360] sm:$0xf]  ;;  %v464_v55 = vld [vmem:[%s26400_s14 + $0x370] sm:$0xf] }
  0x3a   : >> { %v466_v56 = vld [vmem:[%s26400_s14 + $0x380] sm:$0xf]  ;;  %463 = vst [vmem:[%s26396_s13 + $0x1b0] sm:$0xf] %v462_v54  ;;  %465 = vst [vmem:[%s26396_s13 + $0x1b8] sm:$0xf] %v464_v55 }
  0x3b   : >> { %467 = vst [vmem:[%s26396_s13 + $0x1c0] sm:$0xf] %v466_v56  ;;  %v468_v57 = vld [vmem:[%s26400_s14 + $0x390] sm:$0xf]  ;;  %v470_v58 = vld [vmem:[%s26400_s14 + $0x3a0] sm:$0xf] }
  0x3c   : >> { %v472_v59 = vld [vmem:[%s26400_s14 + $0x3b0] sm:$0xf]  ;;  %469 = vst [vmem:[%s26396_s13 + $0x1c8] sm:$0xf] %v468_v57  ;;  %471 = vst [vmem:[%s26396_s13 + $0x1d0] sm:$0xf] %v470_v58 }
  0x3d   : >> { %473 = vst [vmem:[%s26396_s13 + $0x1d8] sm:$0xf] %v472_v59  ;;  %v474_v60 = vld [vmem:[%s26400_s14 + $0x3c0] sm:$0xf]  ;;  %v476_v61 = vld [vmem:[%s26400_s14 + $0x3d0] sm:$0xf] }
  0x3e   : >> { %v478_v62 = vld [vmem:[%s26400_s14 + $0x3e0] sm:$0xf]  ;;  %475 = vst [vmem:[%s26396_s13 + $0x1e0] sm:$0xf] %v474_v60  ;;  %477 = vst [vmem:[%s26396_s13 + $0x1e8] sm:$0xf] %v476_v61 }
  0x3f   : >> { %479 = vst [vmem:[%s26396_s13 + $0x1f0] sm:$0xf] %v478_v62  ;;  %v480_v63 = vld [vmem:[%s26400_s14 + $0x3f0] sm:$0xf]  ;;  %v482_v0 = vld [vmem:[%s26400_s14 + $0x400] sm:$0xf] }
  0x40   : >> { %v484_v1 = vld [vmem:[%s26400_s14 + $0x410] sm:$0xf]  ;;  %481 = vst [vmem:[%s26396_s13 + $0x1f8] sm:$0xf] %v480_v63  ;;  %483 = vst [vmem:[%s26396_s13 + $0x200] sm:$0xf] %v482_v0 }
  0x41   : >> { %485 = vst [vmem:[%s26396_s13 + $0x208] sm:$0xf] %v484_v1  ;;  %v486_v2 = vld [vmem:[%s26400_s14 + $0x420] sm:$0xf]  ;;  %v488_v3 = vld [vmem:[%s26400_s14 + $0x430] sm:$0xf] }
  0x42   : >> { %v490_v4 = vld [vmem:[%s26400_s14 + $0x440] sm:$0xf]  ;;  %487 = vst [vmem:[%s26396_s13 + $0x210] sm:$0xf] %v486_v2  ;;  %489 = vst [vmem:[%s26396_s13 + $0x218] sm:$0xf] %v488_v3 }
  0x43   : >> { %491 = vst [vmem:[%s26396_s13 + $0x220] sm:$0xf] %v490_v4  ;;  %v492_v5 = vld [vmem:[%s26400_s14 + $0x450] sm:$0xf]  ;;  %v494_v6 = vld [vmem:[%s26400_s14 + $0x460] sm:$0xf] }
  0x44   : >> { %v496_v7 = vld [vmem:[%s26400_s14 + $0x470] sm:$0xf]  ;;  %493 = vst [vmem:[%s26396_s13 + $0x228] sm:$0xf] %v492_v5  ;;  %495 = vst [vmem:[%s26396_s13 + $0x230] sm:$0xf] %v494_v6 }
  0x45   : >> { %497 = vst [vmem:[%s26396_s13 + $0x238] sm:$0xf] %v496_v7  ;;  %v498_v8 = vld [vmem:[%s26400_s14 + $0x480] sm:$0xf]  ;;  %v500_v9 = vld [vmem:[%s26400_s14 + $0x490] sm:$0xf] }
  0x46   : >> { %v502_v10 = vld [vmem:[%s26400_s14 + $0x4a0] sm:$0xf]  ;;  %499 = vst [vmem:[%s26396_s13 + $0x240] sm:$0xf] %v498_v8  ;;  %501 = vst [vmem:[%s26396_s13 + $0x248] sm:$0xf] %v500_v9 }
  0x47   : >> { %503 = vst [vmem:[%s26396_s13 + $0x250] sm:$0xf] %v502_v10  ;;  %v504_v11 = vld [vmem:[%s26400_s14 + $0x4b0] sm:$0xf]  ;;  %v506_v12 = vld [vmem:[%s26400_s14 + $0x4c0] sm:$0xf] }
  0x48   : >> { %v508_v13 = vld [vmem:[%s26400_s14 + $0x4d0] sm:$0xf]  ;;  %505 = vst [vmem:[%s26396_s13 + $0x258] sm:$0xf] %v504_v11  ;;  %507 = vst [vmem:[%s26396_s13 + $0x260] sm:$0xf] %v506_v12 }
  0x49   : >> { %509 = vst [vmem:[%s26396_s13 + $0x268] sm:$0xf] %v508_v13  ;;  %v510_v14 = vld [vmem:[%s26400_s14 + $0x4e0] sm:$0xf]  ;;  %v512_v15 = vld [vmem:[%s26400_s14 + $0x4f0] sm:$0xf] }
  0x4a   : >> { %v514_v16 = vld [vmem:[%s26400_s14 + $0x500] sm:$0xf]  ;;  %511 = vst [vmem:[%s26396_s13 + $0x270] sm:$0xf] %v510_v14  ;;  %513 = vst [vmem:[%s26396_s13 + $0x278] sm:$0xf] %v512_v15 }
  0x4b   : >> { %515 = vst [vmem:[%s26396_s13 + $0x280] sm:$0xf] %v514_v16  ;;  %v516_v17 = vld [vmem:[%s26400_s14 + $0x510] sm:$0xf]  ;;  %v518_v18 = vld [vmem:[%s26400_s14 + $0x520] sm:$0xf] }
  0x4c   : >> { %v520_v19 = vld [vmem:[%s26400_s14 + $0x530] sm:$0xf]  ;;  %517 = vst [vmem:[%s26396_s13 + $0x288] sm:$0xf] %v516_v17  ;;  %519 = vst [vmem:[%s26396_s13 + $0x290] sm:$0xf] %v518_v18 }
  0x4d   : >> { %521 = vst [vmem:[%s26396_s13 + $0x298] sm:$0xf] %v520_v19  ;;  %v522_v20 = vld [vmem:[%s26400_s14 + $0x540] sm:$0xf]  ;;  %v524_v21 = vld [vmem:[%s26400_s14 + $0x550] sm:$0xf] }
  0x4e   : >> { %v526_v22 = vld [vmem:[%s26400_s14 + $0x560] sm:$0xf]  ;;  %523 = vst [vmem:[%s26396_s13 + $0x2a0] sm:$0xf] %v522_v20  ;;  %525 = vst [vmem:[%s26396_s13 + $0x2a8] sm:$0xf] %v524_v21 }
  0x4f   : >> { %527 = vst [vmem:[%s26396_s13 + $0x2b0] sm:$0xf] %v526_v22  ;;  %v528_v23 = vld [vmem:[%s26400_s14 + $0x570] sm:$0xf]  ;;  %v530_v24 = vld [vmem:[%s26400_s14 + $0x580] sm:$0xf] }
  0x50   : >> { %v532_v25 = vld [vmem:[%s26400_s14 + $0x590] sm:$0xf]  ;;  %529 = vst [vmem:[%s26396_s13 + $0x2b8] sm:$0xf] %v528_v23  ;;  %531 = vst [vmem:[%s26396_s13 + $0x2c0] sm:$0xf] %v530_v24 }
  0x51   : >> { %533 = vst [vmem:[%s26396_s13 + $0x2c8] sm:$0xf] %v532_v25  ;;  %v534_v26 = vld [vmem:[%s26400_s14 + $0x5a0] sm:$0xf]  ;;  %v536_v27 = vld [vmem:[%s26400_s14 + $0x5b0] sm:$0xf] }
  0x52   : >> { %v538_v28 = vld [vmem:[%s26400_s14 + $0x5c0] sm:$0xf]  ;;  %535 = vst [vmem:[%s26396_s13 + $0x2d0] sm:$0xf] %v534_v26  ;;  %537 = vst [vmem:[%s26396_s13 + $0x2d8] sm:$0xf] %v536_v27 }
  0x53   : >> { %539 = vst [vmem:[%s26396_s13 + $0x2e0] sm:$0xf] %v538_v28  ;;  %v540_v29 = vld [vmem:[%s26400_s14 + $0x5d0] sm:$0xf]  ;;  %v542_v30 = vld [vmem:[%s26400_s14 + $0x5e0] sm:$0xf] }
  0x54   : >> { %v544_v31 = vld [vmem:[%s26400_s14 + $0x5f0] sm:$0xf]  ;;  %541 = vst [vmem:[%s26396_s13 + $0x2e8] sm:$0xf] %v540_v29  ;;  %543 = vst [vmem:[%s26396_s13 + $0x2f0] sm:$0xf] %v542_v30 }
  0x55   : >> { %545 = vst [vmem:[%s26396_s13 + $0x2f8] sm:$0xf] %v544_v31  ;;  %v546_v32 = vld [vmem:[%s26400_s14 + $0x600] sm:$0xf]  ;;  %v548_v33 = vld [vmem:[%s26400_s14 + $0x610] sm:$0xf] }
  0x56   : >> { %v550_v34 = vld [vmem:[%s26400_s14 + $0x620] sm:$0xf]  ;;  %547 = vst [vmem:[%s26396_s13 + $0x300] sm:$0xf] %v546_v32  ;;  %549 = vst [vmem:[%s26396_s13 + $0x308] sm:$0xf] %v548_v33 }
  0x57   : >> { %551 = vst [vmem:[%s26396_s13 + $0x310] sm:$0xf] %v550_v34  ;;  %v552_v35 = vld [vmem:[%s26400_s14 + $0x630] sm:$0xf]  ;;  %v554_v36 = vld [vmem:[%s26400_s14 + $0x640] sm:$0xf] }
  0x58   : >> { %v556_v37 = vld [vmem:[%s26400_s14 + $0x650] sm:$0xf]  ;;  %553 = vst [vmem:[%s26396_s13 + $0x318] sm:$0xf] %v552_v35  ;;  %555 = vst [vmem:[%s26396_s13 + $0x320] sm:$0xf] %v554_v36 }
  0x59   : >> { %557 = vst [vmem:[%s26396_s13 + $0x328] sm:$0xf] %v556_v37  ;;  %v558_v38 = vld [vmem:[%s26400_s14 + $0x660] sm:$0xf]  ;;  %v560_v39 = vld [vmem:[%s26400_s14 + $0x670] sm:$0xf] }
  0x5a   : >> { %v562_v40 = vld [vmem:[%s26400_s14 + $0x680] sm:$0xf]  ;;  %559 = vst [vmem:[%s26396_s13 + $0x330] sm:$0xf] %v558_v38  ;;  %561 = vst [vmem:[%s26396_s13 + $0x338] sm:$0xf] %v560_v39 }
  0x5b   : >> { %563 = vst [vmem:[%s26396_s13 + $0x340] sm:$0xf] %v562_v40  ;;  %v564_v41 = vld [vmem:[%s26400_s14 + $0x690] sm:$0xf]  ;;  %v566_v42 = vld [vmem:[%s26400_s14 + $0x6a0] sm:$0xf] }
  0x5c   : >> { %v568_v43 = vld [vmem:[%s26400_s14 + $0x6b0] sm:$0xf]  ;;  %565 = vst [vmem:[%s26396_s13 + $0x348] sm:$0xf] %v564_v41  ;;  %567 = vst [vmem:[%s26396_s13 + $0x350] sm:$0xf] %v566_v42 }
  0x5d   : >> { %569 = vst [vmem:[%s26396_s13 + $0x358] sm:$0xf] %v568_v43  ;;  %v570_v44 = vld [vmem:[%s26400_s14 + $0x6c0] sm:$0xf]  ;;  %v572_v45 = vld [vmem:[%s26400_s14 + $0x6d0] sm:$0xf] }
  0x5e   : >> { %v574_v46 = vld [vmem:[%s26400_s14 + $0x6e0] sm:$0xf]  ;;  %571 = vst [vmem:[%s26396_s13 + $0x360] sm:$0xf] %v570_v44  ;;  %573 = vst [vmem:[%s26396_s13 + $0x368] sm:$0xf] %v572_v45 }
  0x5f   : >> { %575 = vst [vmem:[%s26396_s13 + $0x370] sm:$0xf] %v574_v46  ;;  %v576_v47 = vld [vmem:[%s26400_s14 + $0x6f0] sm:$0xf]  ;;  %v578_v48 = vld [vmem:[%s26400_s14 + $0x700] sm:$0xf] }
  0x60   : >> { %v580_v49 = vld [vmem:[%s26400_s14 + $0x710] sm:$0xf]  ;;  %577 = vst [vmem:[%s26396_s13 + $0x378] sm:$0xf] %v576_v47  ;;  %579 = vst [vmem:[%s26396_s13 + $0x380] sm:$0xf] %v578_v48 }
  0x61   : >> { %581 = vst [vmem:[%s26396_s13 + $0x388] sm:$0xf] %v580_v49  ;;  %v582_v50 = vld [vmem:[%s26400_s14 + $0x720] sm:$0xf]  ;;  %v584_v51 = vld [vmem:[%s26400_s14 + $0x730] sm:$0xf] }
  0x62   : >> { %v586_v52 = vld [vmem:[%s26400_s14 + $0x740] sm:$0xf]  ;;  %583 = vst [vmem:[%s26396_s13 + $0x390] sm:$0xf] %v582_v50  ;;  %585 = vst [vmem:[%s26396_s13 + $0x398] sm:$0xf] %v584_v51 }
  0x63   : >> { %587 = vst [vmem:[%s26396_s13 + $0x3a0] sm:$0xf] %v586_v52  ;;  %v588_v53 = vld [vmem:[%s26400_s14 + $0x750] sm:$0xf]  ;;  %v590_v54 = vld [vmem:[%s26400_s14 + $0x760] sm:$0xf] }
  0x64   : >> { %v592_v55 = vld [vmem:[%s26400_s14 + $0x770] sm:$0xf]  ;;  %589 = vst [vmem:[%s26396_s13 + $0x3a8] sm:$0xf] %v588_v53  ;;  %591 = vst [vmem:[%s26396_s13 + $0x3b0] sm:$0xf] %v590_v54 }
  0x65   : >> { %593 = vst [vmem:[%s26396_s13 + $0x3b8] sm:$0xf] %v592_v55  ;;  %v594_v56 = vld [vmem:[%s26400_s14 + $0x780] sm:$0xf]  ;;  %v596_v57 = vld [vmem:[%s26400_s14 + $0x790] sm:$0xf] }
  0x66   : >> { %v598_v58 = vld [vmem:[%s26400_s14 + $0x7a0] sm:$0xf]  ;;  %595 = vst [vmem:[%s26396_s13 + $0x3c0] sm:$0xf] %v594_v56  ;;  %597 = vst [vmem:[%s26396_s13 + $0x3c8] sm:$0xf] %v596_v57 }
  0x67   : >> { %599 = vst [vmem:[%s26396_s13 + $0x3d0] sm:$0xf] %v598_v58  ;;  %v600_v59 = vld [vmem:[%s26400_s14 + $0x7b0] sm:$0xf]  ;;  %v602_v60 = vld [vmem:[%s26400_s14 + $0x7c0] sm:$0xf] }
  0x68   : >> { %v604_v61 = vld [vmem:[%s26400_s14 + $0x7d0] sm:$0xf]  ;;  %601 = vst [vmem:[%s26396_s13 + $0x3d8] sm:$0xf] %v600_v59  ;;  %603 = vst [vmem:[%s26396_s13 + $0x3e0] sm:$0xf] %v602_v60 }
  0x69   : >> { %605 = vst [vmem:[%s26396_s13 + $0x3e8] sm:$0xf] %v604_v61  ;;  %v606_v62 = vld [vmem:[%s26400_s14 + $0x7e0] sm:$0xf]  ;;  %v608_v63 = vld [vmem:[%s26400_s14 + $0x7f0] sm:$0xf] }
  0x6a   : >> { %v610_v0 = vld [vmem:[%s26400_s14 + $0x800] sm:$0xf]  ;;  %607 = vst [vmem:[%s26396_s13 + $0x3f0] sm:$0xf] %v606_v62  ;;  %609 = vst [vmem:[%s26396_s13 + $0x3f8] sm:$0xf] %v608_v63 }
  0x6b   : >> { %611 = vst [vmem:[%s26396_s13 + $0x400] sm:$0xf] %v610_v0  ;;  %v612_v1 = vld [vmem:[%s26400_s14 + $0x810] sm:$0xf]  ;;  %v614_v2 = vld [vmem:[%s26400_s14 + $0x820] sm:$0xf] }
  0x6c   : >> { %v616_v3 = vld [vmem:[%s26400_s14 + $0x830] sm:$0xf]  ;;  %613 = vst [vmem:[%s26396_s13 + $0x408] sm:$0xf] %v612_v1  ;;  %615 = vst [vmem:[%s26396_s13 + $0x410] sm:$0xf] %v614_v2 }
  0x6d   : >> { %617 = vst [vmem:[%s26396_s13 + $0x418] sm:$0xf] %v616_v3  ;;  %v618_v4 = vld [vmem:[%s26400_s14 + $0x840] sm:$0xf]  ;;  %v620_v5 = vld [vmem:[%s26400_s14 + $0x850] sm:$0xf] }
  0x6e   : >> { %v622_v6 = vld [vmem:[%s26400_s14 + $0x860] sm:$0xf]  ;;  %619 = vst [vmem:[%s26396_s13 + $0x420] sm:$0xf] %v618_v4  ;;  %621 = vst [vmem:[%s26396_s13 + $0x428] sm:$0xf] %v620_v5 }
  0x6f   : >> { %623 = vst [vmem:[%s26396_s13 + $0x430] sm:$0xf] %v622_v6  ;;  %v624_v7 = vld [vmem:[%s26400_s14 + $0x870] sm:$0xf]  ;;  %v626_v8 = vld [vmem:[%s26400_s14 + $0x880] sm:$0xf] }
  0x70   : >> { %v628_v9 = vld [vmem:[%s26400_s14 + $0x890] sm:$0xf]  ;;  %625 = vst [vmem:[%s26396_s13 + $0x438] sm:$0xf] %v624_v7  ;;  %627 = vst [vmem:[%s26396_s13 + $0x440] sm:$0xf] %v626_v8 }
  0x71   : >> { %629 = vst [vmem:[%s26396_s13 + $0x448] sm:$0xf] %v628_v9  ;;  %v630_v10 = vld [vmem:[%s26400_s14 + $0x8a0] sm:$0xf]  ;;  %v632_v11 = vld [vmem:[%s26400_s14 + $0x8b0] sm:$0xf] }
  0x72   : >> { %v634_v12 = vld [vmem:[%s26400_s14 + $0x8c0] sm:$0xf]  ;;  %631 = vst [vmem:[%s26396_s13 + $0x450] sm:$0xf] %v630_v10  ;;  %633 = vst [vmem:[%s26396_s13 + $0x458] sm:$0xf] %v632_v11 }
  0x73   : >> { %635 = vst [vmem:[%s26396_s13 + $0x460] sm:$0xf] %v634_v12  ;;  %v636_v13 = vld [vmem:[%s26400_s14 + $0x8d0] sm:$0xf]  ;;  %v638_v14 = vld [vmem:[%s26400_s14 + $0x8e0] sm:$0xf] }
  0x74   : >> { %v640_v15 = vld [vmem:[%s26400_s14 + $0x8f0] sm:$0xf]  ;;  %637 = vst [vmem:[%s26396_s13 + $0x468] sm:$0xf] %v636_v13  ;;  %639 = vst [vmem:[%s26396_s13 + $0x470] sm:$0xf] %v638_v14 }
  0x75   : >> { %641 = vst [vmem:[%s26396_s13 + $0x478] sm:$0xf] %v640_v15  ;;  %v642_v16 = vld [vmem:[%s26400_s14 + $0x900] sm:$0xf]  ;;  %v644_v17 = vld [vmem:[%s26400_s14 + $0x910] sm:$0xf] }
  0x76   : >> { %v646_v18 = vld [vmem:[%s26400_s14 + $0x920] sm:$0xf]  ;;  %643 = vst [vmem:[%s26396_s13 + $0x480] sm:$0xf] %v642_v16  ;;  %645 = vst [vmem:[%s26396_s13 + $0x488] sm:$0xf] %v644_v17 }
  0x77   : >> { %647 = vst [vmem:[%s26396_s13 + $0x490] sm:$0xf] %v646_v18  ;;  %v648_v19 = vld [vmem:[%s26400_s14 + $0x930] sm:$0xf]  ;;  %v650_v20 = vld [vmem:[%s26400_s14 + $0x940] sm:$0xf] }
  0x78   : >> { %v652_v21 = vld [vmem:[%s26400_s14 + $0x950] sm:$0xf]  ;;  %649 = vst [vmem:[%s26396_s13 + $0x498] sm:$0xf] %v648_v19  ;;  %651 = vst [vmem:[%s26396_s13 + $0x4a0] sm:$0xf] %v650_v20 }
  0x79   : >> { %653 = vst [vmem:[%s26396_s13 + $0x4a8] sm:$0xf] %v652_v21  ;;  %v654_v22 = vld [vmem:[%s26400_s14 + $0x960] sm:$0xf]  ;;  %v656_v23 = vld [vmem:[%s26400_s14 + $0x970] sm:$0xf] }
  0x7a   : >> { %v658_v24 = vld [vmem:[%s26400_s14 + $0x980] sm:$0xf]  ;;  %655 = vst [vmem:[%s26396_s13 + $0x4b0] sm:$0xf] %v654_v22  ;;  %657 = vst [vmem:[%s26396_s13 + $0x4b8] sm:$0xf] %v656_v23 }
  0x7b   : >> { %659 = vst [vmem:[%s26396_s13 + $0x4c0] sm:$0xf] %v658_v24  ;;  %v660_v25 = vld [vmem:[%s26400_s14 + $0x990] sm:$0xf]  ;;  %v662_v26 = vld [vmem:[%s26400_s14 + $0x9a0] sm:$0xf] }
  0x7c   : >> { %v664_v27 = vld [vmem:[%s26400_s14 + $0x9b0] sm:$0xf]  ;;  %661 = vst [vmem:[%s26396_s13 + $0x4c8] sm:$0xf] %v660_v25  ;;  %663 = vst [vmem:[%s26396_s13 + $0x4d0] sm:$0xf] %v662_v26 }
  0x7d   : >> { %665 = vst [vmem:[%s26396_s13 + $0x4d8] sm:$0xf] %v664_v27  ;;  %v666_v28 = vld [vmem:[%s26400_s14 + $0x9c0] sm:$0xf]  ;;  %v668_v29 = vld [vmem:[%s26400_s14 + $0x9d0] sm:$0xf] }
  0x7e   : >> { %v670_v30 = vld [vmem:[%s26400_s14 + $0x9e0] sm:$0xf]  ;;  %667 = vst [vmem:[%s26396_s13 + $0x4e0] sm:$0xf] %v666_v28  ;;  %669 = vst [vmem:[%s26396_s13 + $0x4e8] sm:$0xf] %v668_v29 }
  0x7f   : >> { %671 = vst [vmem:[%s26396_s13 + $0x4f0] sm:$0xf] %v670_v30  ;;  %v672_v31 = vld [vmem:[%s26400_s14 + $0x9f0] sm:$0xf]  ;;  %v674_v32 = vld [vmem:[%s26400_s14 + $0xa00] sm:$0xf] }
  0x80   : >> { %v676_v33 = vld [vmem:[%s26400_s14 + $0xa10] sm:$0xf]  ;;  %673 = vst [vmem:[%s26396_s13 + $0x4f8] sm:$0xf] %v672_v31  ;;  %675 = vst [vmem:[%s26396_s13 + $0x500] sm:$0xf] %v674_v32 }
  0x81   : >> { %677 = vst [vmem:[%s26396_s13 + $0x508] sm:$0xf] %v676_v33  ;;  %v678_v34 = vld [vmem:[%s26400_s14 + $0xa20] sm:$0xf]  ;;  %v680_v35 = vld [vmem:[%s26400_s14 + $0xa30] sm:$0xf] }
  0x82   : >> { %v682_v36 = vld [vmem:[%s26400_s14 + $0xa40] sm:$0xf]  ;;  %679 = vst [vmem:[%s26396_s13 + $0x510] sm:$0xf] %v678_v34  ;;  %681 = vst [vmem:[%s26396_s13 + $0x518] sm:$0xf] %v680_v35 }
  0x83   : >> { %683 = vst [vmem:[%s26396_s13 + $0x520] sm:$0xf] %v682_v36  ;;  %v684_v37 = vld [vmem:[%s26400_s14 + $0xa50] sm:$0xf]  ;;  %v686_v38 = vld [vmem:[%s26400_s14 + $0xa60] sm:$0xf] }
  0x84   : >> { %v688_v39 = vld [vmem:[%s26400_s14 + $0xa70] sm:$0xf]  ;;  %685 = vst [vmem:[%s26396_s13 + $0x528] sm:$0xf] %v684_v37  ;;  %687 = vst [vmem:[%s26396_s13 + $0x530] sm:$0xf] %v686_v38 }
  0x85   : >> { %689 = vst [vmem:[%s26396_s13 + $0x538] sm:$0xf] %v688_v39  ;;  %v690_v40 = vld [vmem:[%s26400_s14 + $0xa80] sm:$0xf]  ;;  %v692_v41 = vld [vmem:[%s26400_s14 + $0xa90] sm:$0xf] }
  0x86   : >> { %v694_v42 = vld [vmem:[%s26400_s14 + $0xaa0] sm:$0xf]  ;;  %691 = vst [vmem:[%s26396_s13 + $0x540] sm:$0xf] %v690_v40  ;;  %693 = vst [vmem:[%s26396_s13 + $0x548] sm:$0xf] %v692_v41 }
  0x87   : >> { %695 = vst [vmem:[%s26396_s13 + $0x550] sm:$0xf] %v694_v42  ;;  %v696_v43 = vld [vmem:[%s26400_s14 + $0xab0] sm:$0xf]  ;;  %v698_v44 = vld [vmem:[%s26400_s14 + $0xac0] sm:$0xf] }
  0x88   : >> { %v700_v45 = vld [vmem:[%s26400_s14 + $0xad0] sm:$0xf]  ;;  %697 = vst [vmem:[%s26396_s13 + $0x558] sm:$0xf] %v696_v43  ;;  %699 = vst [vmem:[%s26396_s13 + $0x560] sm:$0xf] %v698_v44 }
  0x89   : >> { %701 = vst [vmem:[%s26396_s13 + $0x568] sm:$0xf] %v700_v45  ;;  %v702_v46 = vld [vmem:[%s26400_s14 + $0xae0] sm:$0xf]  ;;  %v704_v47 = vld [vmem:[%s26400_s14 + $0xaf0] sm:$0xf] }
  0x8a   : >> { %v706_v48 = vld [vmem:[%s26400_s14 + $0xb00] sm:$0xf]  ;;  %703 = vst [vmem:[%s26396_s13 + $0x570] sm:$0xf] %v702_v46  ;;  %705 = vst [vmem:[%s26396_s13 + $0x578] sm:$0xf] %v704_v47 }
  0x8b   : >> { %707 = vst [vmem:[%s26396_s13 + $0x580] sm:$0xf] %v706_v48  ;;  %v708_v49 = vld [vmem:[%s26400_s14 + $0xb10] sm:$0xf]  ;;  %v710_v50 = vld [vmem:[%s26400_s14 + $0xb20] sm:$0xf] }
  0x8c   : >> { %v712_v51 = vld [vmem:[%s26400_s14 + $0xb30] sm:$0xf]  ;;  %709 = vst [vmem:[%s26396_s13 + $0x588] sm:$0xf] %v708_v49  ;;  %711 = vst [vmem:[%s26396_s13 + $0x590] sm:$0xf] %v710_v50 }
  0x8d   : >> { %713 = vst [vmem:[%s26396_s13 + $0x598] sm:$0xf] %v712_v51  ;;  %v714_v52 = vld [vmem:[%s26400_s14 + $0xb40] sm:$0xf]  ;;  %v716_v53 = vld [vmem:[%s26400_s14 + $0xb50] sm:$0xf] }
  0x8e   : >> { %v718_v54 = vld [vmem:[%s26400_s14 + $0xb60] sm:$0xf]  ;;  %715 = vst [vmem:[%s26396_s13 + $0x5a0] sm:$0xf] %v714_v52  ;;  %717 = vst [vmem:[%s26396_s13 + $0x5a8] sm:$0xf] %v716_v53 }
  0x8f   : >> { %719 = vst [vmem:[%s26396_s13 + $0x5b0] sm:$0xf] %v718_v54  ;;  %v720_v55 = vld [vmem:[%s26400_s14 + $0xb70] sm:$0xf]  ;;  %v722_v56 = vld [vmem:[%s26400_s14 + $0xb80] sm:$0xf] }
  0x90   : >> { %v724_v57 = vld [vmem:[%s26400_s14 + $0xb90] sm:$0xf]  ;;  %721 = vst [vmem:[%s26396_s13 + $0x5b8] sm:$0xf] %v720_v55  ;;  %723 = vst [vmem:[%s26396_s13 + $0x5c0] sm:$0xf] %v722_v56 }
  0x91   : >> { %725 = vst [vmem:[%s26396_s13 + $0x5c8] sm:$0xf] %v724_v57  ;;  %v726_v58 = vld [vmem:[%s26400_s14 + $0xba0] sm:$0xf]  ;;  %v728_v59 = vld [vmem:[%s26400_s14 + $0xbb0] sm:$0xf] }
  0x92   : >> { %v730_v60 = vld [vmem:[%s26400_s14 + $0xbc0] sm:$0xf]  ;;  %727 = vst [vmem:[%s26396_s13 + $0x5d0] sm:$0xf] %v726_v58  ;;  %729 = vst [vmem:[%s26396_s13 + $0x5d8] sm:$0xf] %v728_v59 }
  0x93   : >> { %731 = vst [vmem:[%s26396_s13 + $0x5e0] sm:$0xf] %v730_v60  ;;  %v732_v61 = vld [vmem:[%s26400_s14 + $0xbd0] sm:$0xf]  ;;  %v734_v62 = vld [vmem:[%s26400_s14 + $0xbe0] sm:$0xf] }
  0x94   : >> { %v736_v63 = vld [vmem:[%s26400_s14 + $0xbf0] sm:$0xf]  ;;  %733 = vst [vmem:[%s26396_s13 + $0x5e8] sm:$0xf] %v732_v61  ;;  %735 = vst [vmem:[%s26396_s13 + $0x5f0] sm:$0xf] %v734_v62 }
  0x95   : >> { %737 = vst [vmem:[%s26396_s13 + $0x5f8] sm:$0xf] %v736_v63  ;;  %v738_v0 = vld [vmem:[%s26400_s14 + $0xc00] sm:$0xf]  ;;  %v740_v1 = vld [vmem:[%s26400_s14 + $0xc10] sm:$0xf] }
  0x96   : >> { %v742_v2 = vld [vmem:[%s26400_s14 + $0xc20] sm:$0xf]  ;;  %739 = vst [vmem:[%s26396_s13 + $0x600] sm:$0xf] %v738_v0  ;;  %741 = vst [vmem:[%s26396_s13 + $0x608] sm:$0xf] %v740_v1 }
  0x97   : >> { %743 = vst [vmem:[%s26396_s13 + $0x610] sm:$0xf] %v742_v2  ;;  %v744_v3 = vld [vmem:[%s26400_s14 + $0xc30] sm:$0xf]  ;;  %v746_v4 = vld [vmem:[%s26400_s14 + $0xc40] sm:$0xf] }
  0x98   : >> { %v748_v5 = vld [vmem:[%s26400_s14 + $0xc50] sm:$0xf]  ;;  %745 = vst [vmem:[%s26396_s13 + $0x618] sm:$0xf] %v744_v3  ;;  %747 = vst [vmem:[%s26396_s13 + $0x620] sm:$0xf] %v746_v4 }
  0x99   : >> { %749 = vst [vmem:[%s26396_s13 + $0x628] sm:$0xf] %v748_v5  ;;  %v750_v6 = vld [vmem:[%s26400_s14 + $0xc60] sm:$0xf]  ;;  %v752_v7 = vld [vmem:[%s26400_s14 + $0xc70] sm:$0xf] }
  0x9a   : >> { %v754_v8 = vld [vmem:[%s26400_s14 + $0xc80] sm:$0xf]  ;;  %751 = vst [vmem:[%s26396_s13 + $0x630] sm:$0xf] %v750_v6  ;;  %753 = vst [vmem:[%s26396_s13 + $0x638] sm:$0xf] %v752_v7 }
  0x9b   : >> { %755 = vst [vmem:[%s26396_s13 + $0x640] sm:$0xf] %v754_v8  ;;  %v756_v9 = vld [vmem:[%s26400_s14 + $0xc90] sm:$0xf]  ;;  %v758_v10 = vld [vmem:[%s26400_s14 + $0xca0] sm:$0xf] }
  0x9c   : >> { %v760_v11 = vld [vmem:[%s26400_s14 + $0xcb0] sm:$0xf]  ;;  %757 = vst [vmem:[%s26396_s13 + $0x648] sm:$0xf] %v756_v9  ;;  %759 = vst [vmem:[%s26396_s13 + $0x650] sm:$0xf] %v758_v10 }
  0x9d   : >> { %761 = vst [vmem:[%s26396_s13 + $0x658] sm:$0xf] %v760_v11  ;;  %v762_v12 = vld [vmem:[%s26400_s14 + $0xcc0] sm:$0xf]  ;;  %v764_v13 = vld [vmem:[%s26400_s14 + $0xcd0] sm:$0xf] }
  0x9e   : >> { %v766_v14 = vld [vmem:[%s26400_s14 + $0xce0] sm:$0xf]  ;;  %763 = vst [vmem:[%s26396_s13 + $0x660] sm:$0xf] %v762_v12  ;;  %765 = vst [vmem:[%s26396_s13 + $0x668] sm:$0xf] %v764_v13 }
  0x9f   : >> { %767 = vst [vmem:[%s26396_s13 + $0x670] sm:$0xf] %v766_v14  ;;  %v768_v15 = vld [vmem:[%s26400_s14 + $0xcf0] sm:$0xf]  ;;  %v770_v16 = vld [vmem:[%s26400_s14 + $0xd00] sm:$0xf] }
  0xa0   : >> { %v772_v17 = vld [vmem:[%s26400_s14 + $0xd10] sm:$0xf]  ;;  %769 = vst [vmem:[%s26396_s13 + $0x678] sm:$0xf] %v768_v15  ;;  %771 = vst [vmem:[%s26396_s13 + $0x680] sm:$0xf] %v770_v16 }
  0xa1   : >> { %773 = vst [vmem:[%s26396_s13 + $0x688] sm:$0xf] %v772_v17  ;;  %v774_v18 = vld [vmem:[%s26400_s14 + $0xd20] sm:$0xf]  ;;  %v776_v19 = vld [vmem:[%s26400_s14 + $0xd30] sm:$0xf] }
  0xa2   : >> { %v778_v20 = vld [vmem:[%s26400_s14 + $0xd40] sm:$0xf]  ;;  %775 = vst [vmem:[%s26396_s13 + $0x690] sm:$0xf] %v774_v18  ;;  %777 = vst [vmem:[%s26396_s13 + $0x698] sm:$0xf] %v776_v19 }
  0xa3   : >> { %779 = vst [vmem:[%s26396_s13 + $0x6a0] sm:$0xf] %v778_v20  ;;  %v780_v21 = vld [vmem:[%s26400_s14 + $0xd50] sm:$0xf]  ;;  %v782_v22 = vld [vmem:[%s26400_s14 + $0xd60] sm:$0xf] }
  0xa4   : >> { %v784_v23 = vld [vmem:[%s26400_s14 + $0xd70] sm:$0xf]  ;;  %781 = vst [vmem:[%s26396_s13 + $0x6a8] sm:$0xf] %v780_v21  ;;  %783 = vst [vmem:[%s26396_s13 + $0x6b0] sm:$0xf] %v782_v22 }
  0xa5   : >> { %785 = vst [vmem:[%s26396_s13 + $0x6b8] sm:$0xf] %v784_v23  ;;  %v786_v24 = vld [vmem:[%s26400_s14 + $0xd80] sm:$0xf]  ;;  %v788_v25 = vld [vmem:[%s26400_s14 + $0xd90] sm:$0xf] }
  0xa6   : >> { %v790_v26 = vld [vmem:[%s26400_s14 + $0xda0] sm:$0xf]  ;;  %787 = vst [vmem:[%s26396_s13 + $0x6c0] sm:$0xf] %v786_v24  ;;  %789 = vst [vmem:[%s26396_s13 + $0x6c8] sm:$0xf] %v788_v25 }
  0xa7   : >> { %791 = vst [vmem:[%s26396_s13 + $0x6d0] sm:$0xf] %v790_v26  ;;  %v792_v27 = vld [vmem:[%s26400_s14 + $0xdb0] sm:$0xf]  ;;  %v794_v28 = vld [vmem:[%s26400_s14 + $0xdc0] sm:$0xf] }
  0xa8   : >> { %v796_v29 = vld [vmem:[%s26400_s14 + $0xdd0] sm:$0xf]  ;;  %793 = vst [vmem:[%s26396_s13 + $0x6d8] sm:$0xf] %v792_v27  ;;  %795 = vst [vmem:[%s26396_s13 + $0x6e0] sm:$0xf] %v794_v28 }
  0xa9   : >> { %797 = vst [vmem:[%s26396_s13 + $0x6e8] sm:$0xf] %v796_v29  ;;  %v798_v30 = vld [vmem:[%s26400_s14 + $0xde0] sm:$0xf]  ;;  %v800_v31 = vld [vmem:[%s26400_s14 + $0xdf0] sm:$0xf] }
  0xaa   : >> { %v802_v32 = vld [vmem:[%s26400_s14 + $0xe00] sm:$0xf]  ;;  %799 = vst [vmem:[%s26396_s13 + $0x6f0] sm:$0xf] %v798_v30  ;;  %801 = vst [vmem:[%s26396_s13 + $0x6f8] sm:$0xf] %v800_v31 }
  0xab   : >> { %803 = vst [vmem:[%s26396_s13 + $0x700] sm:$0xf] %v802_v32  ;;  %v804_v33 = vld [vmem:[%s26400_s14 + $0xe10] sm:$0xf]  ;;  %v806_v34 = vld [vmem:[%s26400_s14 + $0xe20] sm:$0xf] }
  0xac   : >> { %v808_v35 = vld [vmem:[%s26400_s14 + $0xe30] sm:$0xf]  ;;  %805 = vst [vmem:[%s26396_s13 + $0x708] sm:$0xf] %v804_v33  ;;  %807 = vst [vmem:[%s26396_s13 + $0x710] sm:$0xf] %v806_v34 }
  0xad   : >> { %809 = vst [vmem:[%s26396_s13 + $0x718] sm:$0xf] %v808_v35  ;;  %v810_v36 = vld [vmem:[%s26400_s14 + $0xe40] sm:$0xf]  ;;  %v812_v37 = vld [vmem:[%s26400_s14 + $0xe50] sm:$0xf] }
  0xae   : >> { %v814_v38 = vld [vmem:[%s26400_s14 + $0xe60] sm:$0xf]  ;;  %811 = vst [vmem:[%s26396_s13 + $0x720] sm:$0xf] %v810_v36  ;;  %813 = vst [vmem:[%s26396_s13 + $0x728] sm:$0xf] %v812_v37 }
  0xaf   : >> { %815 = vst [vmem:[%s26396_s13 + $0x730] sm:$0xf] %v814_v38  ;;  %v816_v39 = vld [vmem:[%s26400_s14 + $0xe70] sm:$0xf]  ;;  %v818_v40 = vld [vmem:[%s26400_s14 + $0xe80] sm:$0xf] }
  0xb0   : >> { %v820_v41 = vld [vmem:[%s26400_s14 + $0xe90] sm:$0xf]  ;;  %817 = vst [vmem:[%s26396_s13 + $0x738] sm:$0xf] %v816_v39  ;;  %819 = vst [vmem:[%s26396_s13 + $0x740] sm:$0xf] %v818_v40 }
  0xb1   : >> { %821 = vst [vmem:[%s26396_s13 + $0x748] sm:$0xf] %v820_v41  ;;  %v822_v42 = vld [vmem:[%s26400_s14 + $0xea0] sm:$0xf]  ;;  %v824_v43 = vld [vmem:[%s26400_s14 + $0xeb0] sm:$0xf] }
  0xb2   : >> { %v826_v44 = vld [vmem:[%s26400_s14 + $0xec0] sm:$0xf]  ;;  %823 = vst [vmem:[%s26396_s13 + $0x750] sm:$0xf] %v822_v42  ;;  %825 = vst [vmem:[%s26396_s13 + $0x758] sm:$0xf] %v824_v43 }
  0xb3   : >> { %827 = vst [vmem:[%s26396_s13 + $0x760] sm:$0xf] %v826_v44  ;;  %v828_v45 = vld [vmem:[%s26400_s14 + $0xed0] sm:$0xf]  ;;  %v830_v46 = vld [vmem:[%s26400_s14 + $0xee0] sm:$0xf] }
  0xb4   : >> { %v832_v47 = vld [vmem:[%s26400_s14 + $0xef0] sm:$0xf]  ;;  %829 = vst [vmem:[%s26396_s13 + $0x768] sm:$0xf] %v828_v45  ;;  %831 = vst [vmem:[%s26396_s13 + $0x770] sm:$0xf] %v830_v46 }
  0xb5   : >> { %833 = vst [vmem:[%s26396_s13 + $0x778] sm:$0xf] %v832_v47  ;;  %v834_v48 = vld [vmem:[%s26400_s14 + $0xf00] sm:$0xf]  ;;  %v836_v49 = vld [vmem:[%s26400_s14 + $0xf10] sm:$0xf] }
  0xb6   : >> { %v838_v50 = vld [vmem:[%s26400_s14 + $0xf20] sm:$0xf]  ;;  %835 = vst [vmem:[%s26396_s13 + $0x780] sm:$0xf] %v834_v48  ;;  %837 = vst [vmem:[%s26396_s13 + $0x788] sm:$0xf] %v836_v49 }
  0xb7   : >> { %839 = vst [vmem:[%s26396_s13 + $0x790] sm:$0xf] %v838_v50  ;;  %v840_v51 = vld [vmem:[%s26400_s14 + $0xf30] sm:$0xf]  ;;  %v842_v52 = vld [vmem:[%s26400_s14 + $0xf40] sm:$0xf] }
  0xb8   : >> { %v844_v53 = vld [vmem:[%s26400_s14 + $0xf50] sm:$0xf]  ;;  %841 = vst [vmem:[%s26396_s13 + $0x798] sm:$0xf] %v840_v51  ;;  %843 = vst [vmem:[%s26396_s13 + $0x7a0] sm:$0xf] %v842_v52 }
  0xb9   : >> { %845 = vst [vmem:[%s26396_s13 + $0x7a8] sm:$0xf] %v844_v53  ;;  %v846_v54 = vld [vmem:[%s26400_s14 + $0xf60] sm:$0xf]  ;;  %v848_v55 = vld [vmem:[%s26400_s14 + $0xf70] sm:$0xf] }
  0xba   : >> { %v850_v56 = vld [vmem:[%s26400_s14 + $0xf80] sm:$0xf]  ;;  %847 = vst [vmem:[%s26396_s13 + $0x7b0] sm:$0xf] %v846_v54  ;;  %849 = vst [vmem:[%s26396_s13 + $0x7b8] sm:$0xf] %v848_v55 }
  0xbb   : >> { %851 = vst [vmem:[%s26396_s13 + $0x7c0] sm:$0xf] %v850_v56  ;;  %v852_v57 = vld [vmem:[%s26400_s14 + $0xf90] sm:$0xf]  ;;  %v854_v58 = vld [vmem:[%s26400_s14 + $0xfa0] sm:$0xf] }
  0xbc   : >> { %v856_v59 = vld [vmem:[%s26400_s14 + $0xfb0] sm:$0xf]  ;;  %853 = vst [vmem:[%s26396_s13 + $0x7c8] sm:$0xf] %v852_v57  ;;  %855 = vst [vmem:[%s26396_s13 + $0x7d0] sm:$0xf] %v854_v58 }
  0xbd   : >> { %857 = vst [vmem:[%s26396_s13 + $0x7d8] sm:$0xf] %v856_v59  ;;  %v858_v60 = vld [vmem:[%s26400_s14 + $0xfc0] sm:$0xf]  ;;  %v860_v61 = vld [vmem:[%s26400_s14 + $0xfd0] sm:$0xf] }
  0xbe   : >> { %v862_v62 = vld [vmem:[%s26400_s14 + $0xfe0] sm:$0xf]  ;;  %859 = vst [vmem:[%s26396_s13 + $0x7e0] sm:$0xf] %v858_v60  ;;  %861 = vst [vmem:[%s26396_s13 + $0x7e8] sm:$0xf] %v860_v61 }
  0xbf   : >> { %863 = vst [vmem:[%s26396_s13 + $0x7f0] sm:$0xf] %v862_v62  ;;  %v864_v63 = vld [vmem:[%s26400_s14 + $0xff0] sm:$0xf]  ;;  %v866_v0 = vld [vmem:[%s26400_s14 + $0x1000] sm:$0xf] }
  0xc0   : >> { %v868_v1 = vld [vmem:[%s26400_s14 + $0x1010] sm:$0xf]  ;;  %865 = vst [vmem:[%s26396_s13 + $0x7f8] sm:$0xf] %v864_v63  ;;  %867 = vst [vmem:[%s26396_s13 + $0x800] sm:$0xf] %v866_v0 }
  0xc1   : >> { %869 = vst [vmem:[%s26396_s13 + $0x808] sm:$0xf] %v868_v1  ;;  %v870_v2 = vld [vmem:[%s26400_s14 + $0x1020] sm:$0xf]  ;;  %v872_v3 = vld [vmem:[%s26400_s14 + $0x1030] sm:$0xf] }
  0xc2   : >> { %v874_v4 = vld [vmem:[%s26400_s14 + $0x1040] sm:$0xf]  ;;  %871 = vst [vmem:[%s26396_s13 + $0x810] sm:$0xf] %v870_v2  ;;  %873 = vst [vmem:[%s26396_s13 + $0x818] sm:$0xf] %v872_v3 }
  0xc3   : >> { %875 = vst [vmem:[%s26396_s13 + $0x820] sm:$0xf] %v874_v4  ;;  %v876_v5 = vld [vmem:[%s26400_s14 + $0x1050] sm:$0xf]  ;;  %v878_v6 = vld [vmem:[%s26400_s14 + $0x1060] sm:$0xf] }
  0xc4   : >> { %v880_v7 = vld [vmem:[%s26400_s14 + $0x1070] sm:$0xf]  ;;  %877 = vst [vmem:[%s26396_s13 + $0x828] sm:$0xf] %v876_v5  ;;  %879 = vst [vmem:[%s26396_s13 + $0x830] sm:$0xf] %v878_v6 }
  0xc5   : >> { %881 = vst [vmem:[%s26396_s13 + $0x838] sm:$0xf] %v880_v7  ;;  %v882_v8 = vld [vmem:[%s26400_s14 + $0x1080] sm:$0xf]  ;;  %v884_v9 = vld [vmem:[%s26400_s14 + $0x1090] sm:$0xf] }
  0xc6   : >> { %v886_v10 = vld [vmem:[%s26400_s14 + $0x10a0] sm:$0xf]  ;;  %883 = vst [vmem:[%s26396_s13 + $0x840] sm:$0xf] %v882_v8  ;;  %885 = vst [vmem:[%s26396_s13 + $0x848] sm:$0xf] %v884_v9 }
  0xc7   : >> { %887 = vst [vmem:[%s26396_s13 + $0x850] sm:$0xf] %v886_v10  ;;  %v888_v11 = vld [vmem:[%s26400_s14 + $0x10b0] sm:$0xf]  ;;  %v890_v12 = vld [vmem:[%s26400_s14 + $0x10c0] sm:$0xf] }
  0xc8   : >> { %v892_v13 = vld [vmem:[%s26400_s14 + $0x10d0] sm:$0xf]  ;;  %889 = vst [vmem:[%s26396_s13 + $0x858] sm:$0xf] %v888_v11  ;;  %891 = vst [vmem:[%s26396_s13 + $0x860] sm:$0xf] %v890_v12 }
  0xc9   : >> { %893 = vst [vmem:[%s26396_s13 + $0x868] sm:$0xf] %v892_v13  ;;  %v894_v14 = vld [vmem:[%s26400_s14 + $0x10e0] sm:$0xf]  ;;  %v896_v15 = vld [vmem:[%s26400_s14 + $0x10f0] sm:$0xf] }
  0xca   : >> { %v898_v16 = vld [vmem:[%s26400_s14 + $0x1100] sm:$0xf]  ;;  %895 = vst [vmem:[%s26396_s13 + $0x870] sm:$0xf] %v894_v14  ;;  %897 = vst [vmem:[%s26396_s13 + $0x878] sm:$0xf] %v896_v15 }
  0xcb   : >> { %899 = vst [vmem:[%s26396_s13 + $0x880] sm:$0xf] %v898_v16  ;;  %v900_v17 = vld [vmem:[%s26400_s14 + $0x1110] sm:$0xf]  ;;  %v902_v18 = vld [vmem:[%s26400_s14 + $0x1120] sm:$0xf] }
  0xcc   : >> { %v904_v19 = vld [vmem:[%s26400_s14 + $0x1130] sm:$0xf]  ;;  %901 = vst [vmem:[%s26396_s13 + $0x888] sm:$0xf] %v900_v17  ;;  %903 = vst [vmem:[%s26396_s13 + $0x890] sm:$0xf] %v902_v18 }
  0xcd   : >> { %905 = vst [vmem:[%s26396_s13 + $0x898] sm:$0xf] %v904_v19  ;;  %v906_v20 = vld [vmem:[%s26400_s14 + $0x1140] sm:$0xf]  ;;  %v908_v21 = vld [vmem:[%s26400_s14 + $0x1150] sm:$0xf] }
  0xce   : >> { %v910_v22 = vld [vmem:[%s26400_s14 + $0x1160] sm:$0xf]  ;;  %907 = vst [vmem:[%s26396_s13 + $0x8a0] sm:$0xf] %v906_v20  ;;  %909 = vst [vmem:[%s26396_s13 + $0x8a8] sm:$0xf] %v908_v21 }
  0xcf   : >> { %911 = vst [vmem:[%s26396_s13 + $0x8b0] sm:$0xf] %v910_v22  ;;  %v912_v23 = vld [vmem:[%s26400_s14 + $0x1170] sm:$0xf]  ;;  %v914_v24 = vld [vmem:[%s26400_s14 + $0x1180] sm:$0xf] }
  0xd0   : >> { %v916_v25 = vld [vmem:[%s26400_s14 + $0x1190] sm:$0xf]  ;;  %913 = vst [vmem:[%s26396_s13 + $0x8b8] sm:$0xf] %v912_v23  ;;  %915 = vst [vmem:[%s26396_s13 + $0x8c0] sm:$0xf] %v914_v24 }
  0xd1   : >> { %917 = vst [vmem:[%s26396_s13 + $0x8c8] sm:$0xf] %v916_v25  ;;  %v918_v26 = vld [vmem:[%s26400_s14 + $0x11a0] sm:$0xf]  ;;  %v920_v27 = vld [vmem:[%s26400_s14 + $0x11b0] sm:$0xf] }
  0xd2   : >> { %v922_v28 = vld [vmem:[%s26400_s14 + $0x11c0] sm:$0xf]  ;;  %919 = vst [vmem:[%s26396_s13 + $0x8d0] sm:$0xf] %v918_v26  ;;  %921 = vst [vmem:[%s26396_s13 + $0x8d8] sm:$0xf] %v920_v27 }
  0xd3   : >> { %923 = vst [vmem:[%s26396_s13 + $0x8e0] sm:$0xf] %v922_v28  ;;  %v924_v29 = vld [vmem:[%s26400_s14 + $0x11d0] sm:$0xf]  ;;  %v926_v30 = vld [vmem:[%s26400_s14 + $0x11e0] sm:$0xf] }
  0xd4   : >> { %v928_v31 = vld [vmem:[%s26400_s14 + $0x11f0] sm:$0xf]  ;;  %925 = vst [vmem:[%s26396_s13 + $0x8e8] sm:$0xf] %v924_v29  ;;  %927 = vst [vmem:[%s26396_s13 + $0x8f0] sm:$0xf] %v926_v30 }
  0xd5   : >> { %929 = vst [vmem:[%s26396_s13 + $0x8f8] sm:$0xf] %v928_v31  ;;  %v930_v32 = vld [vmem:[%s26400_s14 + $0x1200] sm:$0xf]  ;;  %v932_v33 = vld [vmem:[%s26400_s14 + $0x1210] sm:$0xf] }
  0xd6   : >> { %v934_v34 = vld [vmem:[%s26400_s14 + $0x1220] sm:$0xf]  ;;  %931 = vst [vmem:[%s26396_s13 + $0x900] sm:$0xf] %v930_v32  ;;  %933 = vst [vmem:[%s26396_s13 + $0x908] sm:$0xf] %v932_v33 }
  0xd7   : >> { %935 = vst [vmem:[%s26396_s13 + $0x910] sm:$0xf] %v934_v34  ;;  %v936_v35 = vld [vmem:[%s26400_s14 + $0x1230] sm:$0xf]  ;;  %v938_v36 = vld [vmem:[%s26400_s14 + $0x1240] sm:$0xf] }
  0xd8   : >> { %v940_v37 = vld [vmem:[%s26400_s14 + $0x1250] sm:$0xf]  ;;  %937 = vst [vmem:[%s26396_s13 + $0x918] sm:$0xf] %v936_v35  ;;  %939 = vst [vmem:[%s26396_s13 + $0x920] sm:$0xf] %v938_v36 }
  0xd9   : >> { %941 = vst [vmem:[%s26396_s13 + $0x928] sm:$0xf] %v940_v37  ;;  %v942_v38 = vld [vmem:[%s26400_s14 + $0x1260] sm:$0xf]  ;;  %v944_v39 = vld [vmem:[%s26400_s14 + $0x1270] sm:$0xf] }
  0xda   : >> { %v946_v40 = vld [vmem:[%s26400_s14 + $0x1280] sm:$0xf]  ;;  %943 = vst [vmem:[%s26396_s13 + $0x930] sm:$0xf] %v942_v38  ;;  %945 = vst [vmem:[%s26396_s13 + $0x938] sm:$0xf] %v944_v39 }
  0xdb   : >> { %947 = vst [vmem:[%s26396_s13 + $0x940] sm:$0xf] %v946_v40  ;;  %v948_v41 = vld [vmem:[%s26400_s14 + $0x1290] sm:$0xf]  ;;  %v950_v42 = vld [vmem:[%s26400_s14 + $0x12a0] sm:$0xf] }
  0xdc   : >> { %v952_v43 = vld [vmem:[%s26400_s14 + $0x12b0] sm:$0xf]  ;;  %949 = vst [vmem:[%s26396_s13 + $0x948] sm:$0xf] %v948_v41  ;;  %951 = vst [vmem:[%s26396_s13 + $0x950] sm:$0xf] %v950_v42 }
  0xdd   : >> { %953 = vst [vmem:[%s26396_s13 + $0x958] sm:$0xf] %v952_v43  ;;  %v954_v44 = vld [vmem:[%s26400_s14 + $0x12c0] sm:$0xf]  ;;  %v956_v45 = vld [vmem:[%s26400_s14 + $0x12d0] sm:$0xf] }
  0xde   : >> { %v958_v46 = vld [vmem:[%s26400_s14 + $0x12e0] sm:$0xf]  ;;  %955 = vst [vmem:[%s26396_s13 + $0x960] sm:$0xf] %v954_v44  ;;  %957 = vst [vmem:[%s26396_s13 + $0x968] sm:$0xf] %v956_v45 }
  0xdf   : >> { %959 = vst [vmem:[%s26396_s13 + $0x970] sm:$0xf] %v958_v46  ;;  %v960_v47 = vld [vmem:[%s26400_s14 + $0x12f0] sm:$0xf]  ;;  %v962_v48 = vld [vmem:[%s26400_s14 + $0x1300] sm:$0xf] }
  0xe0   : >> { %v964_v49 = vld [vmem:[%s26400_s14 + $0x1310] sm:$0xf]  ;;  %961 = vst [vmem:[%s26396_s13 + $0x978] sm:$0xf] %v960_v47  ;;  %963 = vst [vmem:[%s26396_s13 + $0x980] sm:$0xf] %v962_v48 }
  0xe1   : >> { %965 = vst [vmem:[%s26396_s13 + $0x988] sm:$0xf] %v964_v49  ;;  %v966_v50 = vld [vmem:[%s26400_s14 + $0x1320] sm:$0xf]  ;;  %v968_v51 = vld [vmem:[%s26400_s14 + $0x1330] sm:$0xf] }
  0xe2   : >> { %v970_v52 = vld [vmem:[%s26400_s14 + $0x1340] sm:$0xf]  ;;  %967 = vst [vmem:[%s26396_s13 + $0x990] sm:$0xf] %v966_v50  ;;  %969 = vst [vmem:[%s26396_s13 + $0x998] sm:$0xf] %v968_v51 }
  0xe3   : >> { %971 = vst [vmem:[%s26396_s13 + $0x9a0] sm:$0xf] %v970_v52  ;;  %v972_v53 = vld [vmem:[%s26400_s14 + $0x1350] sm:$0xf]  ;;  %v974_v54 = vld [vmem:[%s26400_s14 + $0x1360] sm:$0xf] }
  0xe4   : >> { %v976_v55 = vld [vmem:[%s26400_s14 + $0x1370] sm:$0xf]  ;;  %973 = vst [vmem:[%s26396_s13 + $0x9a8] sm:$0xf] %v972_v53  ;;  %975 = vst [vmem:[%s26396_s13 + $0x9b0] sm:$0xf] %v974_v54 }
  0xe5   : >> { %977 = vst [vmem:[%s26396_s13 + $0x9b8] sm:$0xf] %v976_v55  ;;  %v978_v56 = vld [vmem:[%s26400_s14 + $0x1380] sm:$0xf]  ;;  %v980_v57 = vld [vmem:[%s26400_s14 + $0x1390] sm:$0xf] }
  0xe6   : >> { %v982_v58 = vld [vmem:[%s26400_s14 + $0x13a0] sm:$0xf]  ;;  %979 = vst [vmem:[%s26396_s13 + $0x9c0] sm:$0xf] %v978_v56  ;;  %981 = vst [vmem:[%s26396_s13 + $0x9c8] sm:$0xf] %v980_v57 }
  0xe7   : >> { %983 = vst [vmem:[%s26396_s13 + $0x9d0] sm:$0xf] %v982_v58  ;;  %v984_v59 = vld [vmem:[%s26400_s14 + $0x13b0] sm:$0xf]  ;;  %v986_v60 = vld [vmem:[%s26400_s14 + $0x13c0] sm:$0xf] }
  0xe8   : >> { %v988_v61 = vld [vmem:[%s26400_s14 + $0x13d0] sm:$0xf]  ;;  %985 = vst [vmem:[%s26396_s13 + $0x9d8] sm:$0xf] %v984_v59  ;;  %987 = vst [vmem:[%s26396_s13 + $0x9e0] sm:$0xf] %v986_v60 }
  0xe9   : >> { %989 = vst [vmem:[%s26396_s13 + $0x9e8] sm:$0xf] %v988_v61  ;;  %v990_v62 = vld [vmem:[%s26400_s14 + $0x13e0] sm:$0xf]  ;;  %v992_v63 = vld [vmem:[%s26400_s14 + $0x13f0] sm:$0xf] }
  0xea   : >> { %v994_v0 = vld [vmem:[%s26400_s14 + $0x1400] sm:$0xf]  ;;  %991 = vst [vmem:[%s26396_s13 + $0x9f0] sm:$0xf] %v990_v62  ;;  %993 = vst [vmem:[%s26396_s13 + $0x9f8] sm:$0xf] %v992_v63 }
  0xeb   : >> { %995 = vst [vmem:[%s26396_s13 + $0xa00] sm:$0xf] %v994_v0  ;;  %v996_v1 = vld [vmem:[%s26400_s14 + $0x1410] sm:$0xf]  ;;  %v998_v2 = vld [vmem:[%s26400_s14 + $0x1420] sm:$0xf] }
  0xec   : >> { %v1000_v3 = vld [vmem:[%s26400_s14 + $0x1430] sm:$0xf]  ;;  %997 = vst [vmem:[%s26396_s13 + $0xa08] sm:$0xf] %v996_v1  ;;  %999 = vst [vmem:[%s26396_s13 + $0xa10] sm:$0xf] %v998_v2 }
  0xed   : >> { %1001 = vst [vmem:[%s26396_s13 + $0xa18] sm:$0xf] %v1000_v3  ;;  %v1002_v4 = vld [vmem:[%s26400_s14 + $0x1440] sm:$0xf]  ;;  %v1004_v5 = vld [vmem:[%s26400_s14 + $0x1450] sm:$0xf] }
  0xee   : >> { %v1006_v6 = vld [vmem:[%s26400_s14 + $0x1460] sm:$0xf]  ;;  %1003 = vst [vmem:[%s26396_s13 + $0xa20] sm:$0xf] %v1002_v4  ;;  %1005 = vst [vmem:[%s26396_s13 + $0xa28] sm:$0xf] %v1004_v5 }
  0xef   : >> { %1007 = vst [vmem:[%s26396_s13 + $0xa30] sm:$0xf] %v1006_v6  ;;  %v1008_v7 = vld [vmem:[%s26400_s14 + $0x1470] sm:$0xf]  ;;  %v1010_v8 = vld [vmem:[%s26400_s14 + $0x1480] sm:$0xf] }
  0xf0   : >> { %v1012_v9 = vld [vmem:[%s26400_s14 + $0x1490] sm:$0xf]  ;;  %1009 = vst [vmem:[%s26396_s13 + $0xa38] sm:$0xf] %v1008_v7  ;;  %1011 = vst [vmem:[%s26396_s13 + $0xa40] sm:$0xf] %v1010_v8 }
  0xf1   : >> { %1013 = vst [vmem:[%s26396_s13 + $0xa48] sm:$0xf] %v1012_v9  ;;  %v1014_v10 = vld [vmem:[%s26400_s14 + $0x14a0] sm:$0xf]  ;;  %v1016_v11 = vld [vmem:[%s26400_s14 + $0x14b0] sm:$0xf] }
  0xf2   : >> { %v1018_v12 = vld [vmem:[%s26400_s14 + $0x14c0] sm:$0xf]  ;;  %1015 = vst [vmem:[%s26396_s13 + $0xa50] sm:$0xf] %v1014_v10  ;;  %1017 = vst [vmem:[%s26396_s13 + $0xa58] sm:$0xf] %v1016_v11 }
  0xf3   : >> { %1019 = vst [vmem:[%s26396_s13 + $0xa60] sm:$0xf] %v1018_v12  ;;  %v1020_v13 = vld [vmem:[%s26400_s14 + $0x14d0] sm:$0xf]  ;;  %v1022_v14 = vld [vmem:[%s26400_s14 + $0x14e0] sm:$0xf] }
  0xf4   : >> { %v1024_v15 = vld [vmem:[%s26400_s14 + $0x14f0] sm:$0xf]  ;;  %1021 = vst [vmem:[%s26396_s13 + $0xa68] sm:$0xf] %v1020_v13  ;;  %1023 = vst [vmem:[%s26396_s13 + $0xa70] sm:$0xf] %v1022_v14 }
  0xf5   : >> { %1025 = vst [vmem:[%s26396_s13 + $0xa78] sm:$0xf] %v1024_v15  ;;  %v1026_v16 = vld [vmem:[%s26400_s14 + $0x1500] sm:$0xf]  ;;  %v1028_v17 = vld [vmem:[%s26400_s14 + $0x1510] sm:$0xf] }
  0xf6   : >> { %v1030_v18 = vld [vmem:[%s26400_s14 + $0x1520] sm:$0xf]  ;;  %1027 = vst [vmem:[%s26396_s13 + $0xa80] sm:$0xf] %v1026_v16  ;;  %1029 = vst [vmem:[%s26396_s13 + $0xa88] sm:$0xf] %v1028_v17 }
  0xf7   : >> { %1031 = vst [vmem:[%s26396_s13 + $0xa90] sm:$0xf] %v1030_v18  ;;  %v1032_v19 = vld [vmem:[%s26400_s14 + $0x1530] sm:$0xf]  ;;  %v1034_v20 = vld [vmem:[%s26400_s14 + $0x1540] sm:$0xf] }
  0xf8   : >> { %v1036_v21 = vld [vmem:[%s26400_s14 + $0x1550] sm:$0xf]  ;;  %1033 = vst [vmem:[%s26396_s13 + $0xa98] sm:$0xf] %v1032_v19  ;;  %1035 = vst [vmem:[%s26396_s13 + $0xaa0] sm:$0xf] %v1034_v20 }
  0xf9   : >> { %1037 = vst [vmem:[%s26396_s13 + $0xaa8] sm:$0xf] %v1036_v21  ;;  %v1038_v22 = vld [vmem:[%s26400_s14 + $0x1560] sm:$0xf]  ;;  %v1040_v23 = vld [vmem:[%s26400_s14 + $0x1570] sm:$0xf] }
  0xfa   : >> { %v1042_v24 = vld [vmem:[%s26400_s14 + $0x1580] sm:$0xf]  ;;  %1039 = vst [vmem:[%s26396_s13 + $0xab0] sm:$0xf] %v1038_v22  ;;  %1041 = vst [vmem:[%s26396_s13 + $0xab8] sm:$0xf] %v1040_v23 }
  0xfb   : >> { %1043 = vst [vmem:[%s26396_s13 + $0xac0] sm:$0xf] %v1042_v24  ;;  %v1044_v25 = vld [vmem:[%s26400_s14 + $0x1590] sm:$0xf]  ;;  %v1046_v26 = vld [vmem:[%s26400_s14 + $0x15a0] sm:$0xf] }
  0xfc   : >> { %v1048_v27 = vld [vmem:[%s26400_s14 + $0x15b0] sm:$0xf]  ;;  %1045 = vst [vmem:[%s26396_s13 + $0xac8] sm:$0xf] %v1044_v25  ;;  %1047 = vst [vmem:[%s26396_s13 + $0xad0] sm:$0xf] %v1046_v26 }
  0xfd   : >> { %1049 = vst [vmem:[%s26396_s13 + $0xad8] sm:$0xf] %v1048_v27  ;;  %v1050_v28 = vld [vmem:[%s26400_s14 + $0x15c0] sm:$0xf]  ;;  %v1052_v29 = vld [vmem:[%s26400_s14 + $0x15d0] sm:$0xf] }
  0xfe   : >> { %v1054_v30 = vld [vmem:[%s26400_s14 + $0x15e0] sm:$0xf]  ;;  %1051 = vst [vmem:[%s26396_s13 + $0xae0] sm:$0xf] %v1050_v28  ;;  %1053 = vst [vmem:[%s26396_s13 + $0xae8] sm:$0xf] %v1052_v29 }
  0xff   : >> { %1055 = vst [vmem:[%s26396_s13 + $0xaf0] sm:$0xf] %v1054_v30  ;;  %v1056_v31 = vld [vmem:[%s26400_s14 + $0x15f0] sm:$0xf]  ;;  %v1058_v32 = vld [vmem:[%s26400_s14 + $0x1600] sm:$0xf] }
 0x100   : >> { %v1060_v33 = vld [vmem:[%s26400_s14 + $0x1610] sm:$0xf]  ;;  %1057 = vst [vmem:[%s26396_s13 + $0xaf8] sm:$0xf] %v1056_v31  ;;  %1059 = vst [vmem:[%s26396_s13 + $0xb00] sm:$0xf] %v1058_v32 }
 0x101   : >> { %1061 = vst [vmem:[%s26396_s13 + $0xb08] sm:$0xf] %v1060_v33  ;;  %v1062_v34 = vld [vmem:[%s26400_s14 + $0x1620] sm:$0xf]  ;;  %v1064_v35 = vld [vmem:[%s26400_s14 + $0x1630] sm:$0xf] }
 0x102   : >> { %v1066_v36 = vld [vmem:[%s26400_s14 + $0x1640] sm:$0xf]  ;;  %1063 = vst [vmem:[%s26396_s13 + $0xb10] sm:$0xf] %v1062_v34  ;;  %1065 = vst [vmem:[%s26396_s13 + $0xb18] sm:$0xf] %v1064_v35 }
 0x103   : >> { %1067 = vst [vmem:[%s26396_s13 + $0xb20] sm:$0xf] %v1066_v36  ;;  %v1068_v37 = vld [vmem:[%s26400_s14 + $0x1650] sm:$0xf]  ;;  %v1070_v38 = vld [vmem:[%s26400_s14 + $0x1660] sm:$0xf] }
 0x104   : >> { %v1072_v39 = vld [vmem:[%s26400_s14 + $0x1670] sm:$0xf]  ;;  %1069 = vst [vmem:[%s26396_s13 + $0xb28] sm:$0xf] %v1068_v37  ;;  %1071 = vst [vmem:[%s26396_s13 + $0xb30] sm:$0xf] %v1070_v38 }
 0x105   : >> { %1073 = vst [vmem:[%s26396_s13 + $0xb38] sm:$0xf] %v1072_v39  ;;  %v1074_v40 = vld [vmem:[%s26400_s14 + $0x1680] sm:$0xf]  ;;  %v1076_v41 = vld [vmem:[%s26400_s14 + $0x1690] sm:$0xf] }
 0x106   : >> { %v1078_v42 = vld [vmem:[%s26400_s14 + $0x16a0] sm:$0xf]  ;;  %1075 = vst [vmem:[%s26396_s13 + $0xb40] sm:$0xf] %v1074_v40  ;;  %1077 = vst [vmem:[%s26396_s13 + $0xb48] sm:$0xf] %v1076_v41 }
 0x107   : >> { %1079 = vst [vmem:[%s26396_s13 + $0xb50] sm:$0xf] %v1078_v42  ;;  %v1080_v43 = vld [vmem:[%s26400_s14 + $0x16b0] sm:$0xf]  ;;  %v1082_v44 = vld [vmem:[%s26400_s14 + $0x16c0] sm:$0xf] }
 0x108   : >> { %v1084_v45 = vld [vmem:[%s26400_s14 + $0x16d0] sm:$0xf]  ;;  %1081 = vst [vmem:[%s26396_s13 + $0xb58] sm:$0xf] %v1080_v43  ;;  %1083 = vst [vmem:[%s26396_s13 + $0xb60] sm:$0xf] %v1082_v44 }
 0x109   : >> { %1085 = vst [vmem:[%s26396_s13 + $0xb68] sm:$0xf] %v1084_v45  ;;  %v1086_v46 = vld [vmem:[%s26400_s14 + $0x16e0] sm:$0xf]  ;;  %v1088_v47 = vld [vmem:[%s26400_s14 + $0x16f0] sm:$0xf] }
 0x10a   : >> { %v1090_v48 = vld [vmem:[%s26400_s14 + $0x1700] sm:$0xf]  ;;  %1087 = vst [vmem:[%s26396_s13 + $0xb70] sm:$0xf] %v1086_v46  ;;  %1089 = vst [vmem:[%s26396_s13 + $0xb78] sm:$0xf] %v1088_v47 }
 0x10b   : >> { %1091 = vst [vmem:[%s26396_s13 + $0xb80] sm:$0xf] %v1090_v48  ;;  %v1092_v49 = vld [vmem:[%s26400_s14 + $0x1710] sm:$0xf]  ;;  %v1094_v50 = vld [vmem:[%s26400_s14 + $0x1720] sm:$0xf] }
 0x10c   : >> { %v1096_v51 = vld [vmem:[%s26400_s14 + $0x1730] sm:$0xf]  ;;  %1093 = vst [vmem:[%s26396_s13 + $0xb88] sm:$0xf] %v1092_v49  ;;  %1095 = vst [vmem:[%s26396_s13 + $0xb90] sm:$0xf] %v1094_v50 }
 0x10d   : >> { %1097 = vst [vmem:[%s26396_s13 + $0xb98] sm:$0xf] %v1096_v51  ;;  %v1098_v52 = vld [vmem:[%s26400_s14 + $0x1740] sm:$0xf]  ;;  %v1100_v53 = vld [vmem:[%s26400_s14 + $0x1750] sm:$0xf] }
 0x10e   : >> { %v1102_v54 = vld [vmem:[%s26400_s14 + $0x1760] sm:$0xf]  ;;  %1099 = vst [vmem:[%s26396_s13 + $0xba0] sm:$0xf] %v1098_v52  ;;  %1101 = vst [vmem:[%s26396_s13 + $0xba8] sm:$0xf] %v1100_v53 }
 0x10f   : >> { %1103 = vst [vmem:[%s26396_s13 + $0xbb0] sm:$0xf] %v1102_v54  ;;  %v1104_v55 = vld [vmem:[%s26400_s14 + $0x1770] sm:$0xf]  ;;  %v1106_v56 = vld [vmem:[%s26400_s14 + $0x1780] sm:$0xf] }
 0x110   : >> { %v1108_v57 = vld [vmem:[%s26400_s14 + $0x1790] sm:$0xf]  ;;  %1105 = vst [vmem:[%s26396_s13 + $0xbb8] sm:$0xf] %v1104_v55  ;;  %1107 = vst [vmem:[%s26396_s13 + $0xbc0] sm:$0xf] %v1106_v56 }
 0x111   : >> { %1109 = vst [vmem:[%s26396_s13 + $0xbc8] sm:$0xf] %v1108_v57  ;;  %v1110_v58 = vld [vmem:[%s26400_s14 + $0x17a0] sm:$0xf]  ;;  %v1112_v59 = vld [vmem:[%s26400_s14 + $0x17b0] sm:$0xf] }
 0x112   : >> { %v1114_v60 = vld [vmem:[%s26400_s14 + $0x17c0] sm:$0xf]  ;;  %1111 = vst [vmem:[%s26396_s13 + $0xbd0] sm:$0xf] %v1110_v58  ;;  %1113 = vst [vmem:[%s26396_s13 + $0xbd8] sm:$0xf] %v1112_v59 }
 0x113   : >> { %1115 = vst [vmem:[%s26396_s13 + $0xbe0] sm:$0xf] %v1114_v60  ;;  %v1116_v61 = vld [vmem:[%s26400_s14 + $0x17d0] sm:$0xf]  ;;  %v1118_v62 = vld [vmem:[%s26400_s14 + $0x17e0] sm:$0xf] }
 0x114   : >> { %v1120_v63 = vld [vmem:[%s26400_s14 + $0x17f0] sm:$0xf]  ;;  %1117 = vst [vmem:[%s26396_s13 + $0xbe8] sm:$0xf] %v1116_v61  ;;  %1119 = vst [vmem:[%s26396_s13 + $0xbf0] sm:$0xf] %v1118_v62 }
 0x115   : >> { %1121 = vst [vmem:[%s26396_s13 + $0xbf8] sm:$0xf] %v1120_v63  ;;  %v1122_v0 = vld [vmem:[%s26400_s14 + $0x1800] sm:$0xf]  ;;  %v1124_v1 = vld [vmem:[%s26400_s14 + $0x1810] sm:$0xf] }
 0x116   : >> { %v1126_v2 = vld [vmem:[%s26400_s14 + $0x1820] sm:$0xf]  ;;  %1123 = vst [vmem:[%s26396_s13 + $0xc00] sm:$0xf] %v1122_v0  ;;  %1125 = vst [vmem:[%s26396_s13 + $0xc08] sm:$0xf] %v1124_v1 }
 0x117   : >> { %1127 = vst [vmem:[%s26396_s13 + $0xc10] sm:$0xf] %v1126_v2  ;;  %v1128_v3 = vld [vmem:[%s26400_s14 + $0x1830] sm:$0xf]  ;;  %v1130_v4 = vld [vmem:[%s26400_s14 + $0x1840] sm:$0xf] }
 0x118   : >> { %v1132_v5 = vld [vmem:[%s26400_s14 + $0x1850] sm:$0xf]  ;;  %1129 = vst [vmem:[%s26396_s13 + $0xc18] sm:$0xf] %v1128_v3  ;;  %1131 = vst [vmem:[%s26396_s13 + $0xc20] sm:$0xf] %v1130_v4 }
 0x119   : >> { %1133 = vst [vmem:[%s26396_s13 + $0xc28] sm:$0xf] %v1132_v5  ;;  %v1134_v6 = vld [vmem:[%s26400_s14 + $0x1860] sm:$0xf]  ;;  %v1136_v7 = vld [vmem:[%s26400_s14 + $0x1870] sm:$0xf] }
 0x11a   : >> { %v1138_v8 = vld [vmem:[%s26400_s14 + $0x1880] sm:$0xf]  ;;  %1135 = vst [vmem:[%s26396_s13 + $0xc30] sm:$0xf] %v1134_v6  ;;  %1137 = vst [vmem:[%s26396_s13 + $0xc38] sm:$0xf] %v1136_v7 }
 0x11b   : >> { %1139 = vst [vmem:[%s26396_s13 + $0xc40] sm:$0xf] %v1138_v8  ;;  %v1140_v9 = vld [vmem:[%s26400_s14 + $0x1890] sm:$0xf]  ;;  %v1142_v10 = vld [vmem:[%s26400_s14 + $0x18a0] sm:$0xf] }
 0x11c   : >> { %v1144_v11 = vld [vmem:[%s26400_s14 + $0x18b0] sm:$0xf]  ;;  %1141 = vst [vmem:[%s26396_s13 + $0xc48] sm:$0xf] %v1140_v9  ;;  %1143 = vst [vmem:[%s26396_s13 + $0xc50] sm:$0xf] %v1142_v10 }
 0x11d   : >> { %1145 = vst [vmem:[%s26396_s13 + $0xc58] sm:$0xf] %v1144_v11  ;;  %v1146_v12 = vld [vmem:[%s26400_s14 + $0x18c0] sm:$0xf]  ;;  %v1148_v13 = vld [vmem:[%s26400_s14 + $0x18d0] sm:$0xf] }
 0x11e   : >> { %v1150_v14 = vld [vmem:[%s26400_s14 + $0x18e0] sm:$0xf]  ;;  %1147 = vst [vmem:[%s26396_s13 + $0xc60] sm:$0xf] %v1146_v12  ;;  %1149 = vst [vmem:[%s26396_s13 + $0xc68] sm:$0xf] %v1148_v13 }
 0x11f   : >> { %1151 = vst [vmem:[%s26396_s13 + $0xc70] sm:$0xf] %v1150_v14  ;;  %v1152_v15 = vld [vmem:[%s26400_s14 + $0x18f0] sm:$0xf]  ;;  %v1154_v16 = vld [vmem:[%s26400_s14 + $0x1900] sm:$0xf] }
 0x120   : >> { %v1156_v17 = vld [vmem:[%s26400_s14 + $0x1910] sm:$0xf]  ;;  %1153 = vst [vmem:[%s26396_s13 + $0xc78] sm:$0xf] %v1152_v15  ;;  %1155 = vst [vmem:[%s26396_s13 + $0xc80] sm:$0xf] %v1154_v16 }
 0x121   : >> { %1157 = vst [vmem:[%s26396_s13 + $0xc88] sm:$0xf] %v1156_v17  ;;  %v1158_v18 = vld [vmem:[%s26400_s14 + $0x1920] sm:$0xf]  ;;  %v1160_v19 = vld [vmem:[%s26400_s14 + $0x1930] sm:$0xf] }
 0x122   : >> { %v1162_v20 = vld [vmem:[%s26400_s14 + $0x1940] sm:$0xf]  ;;  %1159 = vst [vmem:[%s26396_s13 + $0xc90] sm:$0xf] %v1158_v18  ;;  %1161 = vst [vmem:[%s26396_s13 + $0xc98] sm:$0xf] %v1160_v19 }
 0x123   : >> { %1163 = vst [vmem:[%s26396_s13 + $0xca0] sm:$0xf] %v1162_v20  ;;  %v1164_v21 = vld [vmem:[%s26400_s14 + $0x1950] sm:$0xf]  ;;  %v1166_v22 = vld [vmem:[%s26400_s14 + $0x1960] sm:$0xf] }
 0x124   : >> { %v1168_v23 = vld [vmem:[%s26400_s14 + $0x1970] sm:$0xf]  ;;  %1165 = vst [vmem:[%s26396_s13 + $0xca8] sm:$0xf] %v1164_v21  ;;  %1167 = vst [vmem:[%s26396_s13 + $0xcb0] sm:$0xf] %v1166_v22 }
 0x125   : >> { %1169 = vst [vmem:[%s26396_s13 + $0xcb8] sm:$0xf] %v1168_v23  ;;  %v1170_v24 = vld [vmem:[%s26400_s14 + $0x1980] sm:$0xf]  ;;  %v1172_v25 = vld [vmem:[%s26400_s14 + $0x1990] sm:$0xf] }
 0x126   : >> { %v1174_v26 = vld [vmem:[%s26400_s14 + $0x19a0] sm:$0xf]  ;;  %1171 = vst [vmem:[%s26396_s13 + $0xcc0] sm:$0xf] %v1170_v24  ;;  %1173 = vst [vmem:[%s26396_s13 + $0xcc8] sm:$0xf] %v1172_v25 }
 0x127   : >> { %1175 = vst [vmem:[%s26396_s13 + $0xcd0] sm:$0xf] %v1174_v26  ;;  %v1176_v27 = vld [vmem:[%s26400_s14 + $0x19b0] sm:$0xf]  ;;  %v1178_v28 = vld [vmem:[%s26400_s14 + $0x19c0] sm:$0xf] }
 0x128   : >> { %v1180_v29 = vld [vmem:[%s26400_s14 + $0x19d0] sm:$0xf]  ;;  %1177 = vst [vmem:[%s26396_s13 + $0xcd8] sm:$0xf] %v1176_v27  ;;  %1179 = vst [vmem:[%s26396_s13 + $0xce0] sm:$0xf] %v1178_v28 }
 0x129   : >> { %1181 = vst [vmem:[%s26396_s13 + $0xce8] sm:$0xf] %v1180_v29  ;;  %v1182_v30 = vld [vmem:[%s26400_s14 + $0x19e0] sm:$0xf]  ;;  %v1184_v31 = vld [vmem:[%s26400_s14 + $0x19f0] sm:$0xf] }
 0x12a   : >> { %v1186_v32 = vld [vmem:[%s26400_s14 + $0x1a00] sm:$0xf]  ;;  %1183 = vst [vmem:[%s26396_s13 + $0xcf0] sm:$0xf] %v1182_v30  ;;  %1185 = vst [vmem:[%s26396_s13 + $0xcf8] sm:$0xf] %v1184_v31 }
 0x12b   : >> { %1187 = vst [vmem:[%s26396_s13 + $0xd00] sm:$0xf] %v1186_v32  ;;  %v1188_v33 = vld [vmem:[%s26400_s14 + $0x1a10] sm:$0xf]  ;;  %v1190_v34 = vld [vmem:[%s26400_s14 + $0x1a20] sm:$0xf] }
 0x12c   : >> { %v1192_v35 = vld [vmem:[%s26400_s14 + $0x1a30] sm:$0xf]  ;;  %1189 = vst [vmem:[%s26396_s13 + $0xd08] sm:$0xf] %v1188_v33  ;;  %1191 = vst [vmem:[%s26396_s13 + $0xd10] sm:$0xf] %v1190_v34 }
 0x12d   : >> { %1193 = vst [vmem:[%s26396_s13 + $0xd18] sm:$0xf] %v1192_v35  ;;  %v1194_v36 = vld [vmem:[%s26400_s14 + $0x1a40] sm:$0xf]  ;;  %v1196_v37 = vld [vmem:[%s26400_s14 + $0x1a50] sm:$0xf] }
 0x12e   : >> { %v1198_v38 = vld [vmem:[%s26400_s14 + $0x1a60] sm:$0xf]  ;;  %1195 = vst [vmem:[%s26396_s13 + $0xd20] sm:$0xf] %v1194_v36  ;;  %1197 = vst [vmem:[%s26396_s13 + $0xd28] sm:$0xf] %v1196_v37 }
 0x12f   : >> { %1199 = vst [vmem:[%s26396_s13 + $0xd30] sm:$0xf] %v1198_v38  ;;  %v1200_v39 = vld [vmem:[%s26400_s14 + $0x1a70] sm:$0xf]  ;;  %v1202_v40 = vld [vmem:[%s26400_s14 + $0x1a80] sm:$0xf] }
 0x130   : >> { %v1204_v41 = vld [vmem:[%s26400_s14 + $0x1a90] sm:$0xf]  ;;  %1201 = vst [vmem:[%s26396_s13 + $0xd38] sm:$0xf] %v1200_v39  ;;  %1203 = vst [vmem:[%s26396_s13 + $0xd40] sm:$0xf] %v1202_v40 }
 0x131   : >> { %1205 = vst [vmem:[%s26396_s13 + $0xd48] sm:$0xf] %v1204_v41  ;;  %v1206_v42 = vld [vmem:[%s26400_s14 + $0x1aa0] sm:$0xf]  ;;  %v1208_v43 = vld [vmem:[%s26400_s14 + $0x1ab0] sm:$0xf] }
 0x132   : >> { %v1210_v44 = vld [vmem:[%s26400_s14 + $0x1ac0] sm:$0xf]  ;;  %1207 = vst [vmem:[%s26396_s13 + $0xd50] sm:$0xf] %v1206_v42  ;;  %1209 = vst [vmem:[%s26396_s13 + $0xd58] sm:$0xf] %v1208_v43 }
 0x133   : >> { %1211 = vst [vmem:[%s26396_s13 + $0xd60] sm:$0xf] %v1210_v44  ;;  %v1212_v45 = vld [vmem:[%s26400_s14 + $0x1ad0] sm:$0xf]  ;;  %v1214_v46 = vld [vmem:[%s26400_s14 + $0x1ae0] sm:$0xf] }
 0x134   : >> { %v1216_v47 = vld [vmem:[%s26400_s14 + $0x1af0] sm:$0xf]  ;;  %1213 = vst [vmem:[%s26396_s13 + $0xd68] sm:$0xf] %v1212_v45  ;;  %1215 = vst [vmem:[%s26396_s13 + $0xd70] sm:$0xf] %v1214_v46 }
 0x135   : >> { %1217 = vst [vmem:[%s26396_s13 + $0xd78] sm:$0xf] %v1216_v47  ;;  %v1218_v48 = vld [vmem:[%s26400_s14 + $0x1b00] sm:$0xf]  ;;  %v1220_v49 = vld [vmem:[%s26400_s14 + $0x1b10] sm:$0xf] }
 0x136   : >> { %v1222_v50 = vld [vmem:[%s26400_s14 + $0x1b20] sm:$0xf]  ;;  %1219 = vst [vmem:[%s26396_s13 + $0xd80] sm:$0xf] %v1218_v48  ;;  %1221 = vst [vmem:[%s26396_s13 + $0xd88] sm:$0xf] %v1220_v49 }
 0x137   : >> { %1223 = vst [vmem:[%s26396_s13 + $0xd90] sm:$0xf] %v1222_v50  ;;  %v1224_v51 = vld [vmem:[%s26400_s14 + $0x1b30] sm:$0xf]  ;;  %v1226_v52 = vld [vmem:[%s26400_s14 + $0x1b40] sm:$0xf] }
 0x138   : >> { %v1228_v53 = vld [vmem:[%s26400_s14 + $0x1b50] sm:$0xf]  ;;  %1225 = vst [vmem:[%s26396_s13 + $0xd98] sm:$0xf] %v1224_v51  ;;  %1227 = vst [vmem:[%s26396_s13 + $0xda0] sm:$0xf] %v1226_v52 }
 0x139   : >> { %1229 = vst [vmem:[%s26396_s13 + $0xda8] sm:$0xf] %v1228_v53  ;;  %v1230_v54 = vld [vmem:[%s26400_s14 + $0x1b60] sm:$0xf]  ;;  %v1232_v55 = vld [vmem:[%s26400_s14 + $0x1b70] sm:$0xf] }
 0x13a   : >> { %v1234_v56 = vld [vmem:[%s26400_s14 + $0x1b80] sm:$0xf]  ;;  %1231 = vst [vmem:[%s26396_s13 + $0xdb0] sm:$0xf] %v1230_v54  ;;  %1233 = vst [vmem:[%s26396_s13 + $0xdb8] sm:$0xf] %v1232_v55 }
 0x13b   : >> { %1235 = vst [vmem:[%s26396_s13 + $0xdc0] sm:$0xf] %v1234_v56  ;;  %v1236_v57 = vld [vmem:[%s26400_s14 + $0x1b90] sm:$0xf]  ;;  %v1238_v58 = vld [vmem:[%s26400_s14 + $0x1ba0] sm:$0xf] }
 0x13c   : >> { %v1240_v59 = vld [vmem:[%s26400_s14 + $0x1bb0] sm:$0xf]  ;;  %1237 = vst [vmem:[%s26396_s13 + $0xdc8] sm:$0xf] %v1236_v57  ;;  %1239 = vst [vmem:[%s26396_s13 + $0xdd0] sm:$0xf] %v1238_v58 }
 0x13d   : >> { %1241 = vst [vmem:[%s26396_s13 + $0xdd8] sm:$0xf] %v1240_v59  ;;  %v1242_v60 = vld [vmem:[%s26400_s14 + $0x1bc0] sm:$0xf]  ;;  %v1244_v61 = vld [vmem:[%s26400_s14 + $0x1bd0] sm:$0xf] }
 0x13e   : >> { %v1246_v62 = vld [vmem:[%s26400_s14 + $0x1be0] sm:$0xf]  ;;  %1243 = vst [vmem:[%s26396_s13 + $0xde0] sm:$0xf] %v1242_v60  ;;  %1245 = vst [vmem:[%s26396_s13 + $0xde8] sm:$0xf] %v1244_v61 }
 0x13f   : >> { %1247 = vst [vmem:[%s26396_s13 + $0xdf0] sm:$0xf] %v1246_v62  ;;  %v1248_v63 = vld [vmem:[%s26400_s14 + $0x1bf0] sm:$0xf]  ;;  %v1250_v0 = vld [vmem:[%s26400_s14 + $0x1c00] sm:$0xf] }
 0x140   : >> { %v1252_v1 = vld [vmem:[%s26400_s14 + $0x1c10] sm:$0xf]  ;;  %1249 = vst [vmem:[%s26396_s13 + $0xdf8] sm:$0xf] %v1248_v63  ;;  %1251 = vst [vmem:[%s26396_s13 + $0xe00] sm:$0xf] %v1250_v0 }
 0x141   : >> { %1253 = vst [vmem:[%s26396_s13 + $0xe08] sm:$0xf] %v1252_v1  ;;  %v1254_v2 = vld [vmem:[%s26400_s14 + $0x1c20] sm:$0xf]  ;;  %v1256_v3 = vld [vmem:[%s26400_s14 + $0x1c30] sm:$0xf] }
 0x142   : >> { %v1258_v4 = vld [vmem:[%s26400_s14 + $0x1c40] sm:$0xf]  ;;  %1255 = vst [vmem:[%s26396_s13 + $0xe10] sm:$0xf] %v1254_v2  ;;  %1257 = vst [vmem:[%s26396_s13 + $0xe18] sm:$0xf] %v1256_v3 }
 0x143   : >> { %1259 = vst [vmem:[%s26396_s13 + $0xe20] sm:$0xf] %v1258_v4  ;;  %v1260_v5 = vld [vmem:[%s26400_s14 + $0x1c50] sm:$0xf]  ;;  %v1262_v6 = vld [vmem:[%s26400_s14 + $0x1c60] sm:$0xf] }
 0x144   : >> { %v1264_v7 = vld [vmem:[%s26400_s14 + $0x1c70] sm:$0xf]  ;;  %1261 = vst [vmem:[%s26396_s13 + $0xe28] sm:$0xf] %v1260_v5  ;;  %1263 = vst [vmem:[%s26396_s13 + $0xe30] sm:$0xf] %v1262_v6 }
 0x145   : >> { %1265 = vst [vmem:[%s26396_s13 + $0xe38] sm:$0xf] %v1264_v7  ;;  %v1266_v8 = vld [vmem:[%s26400_s14 + $0x1c80] sm:$0xf]  ;;  %v1268_v9 = vld [vmem:[%s26400_s14 + $0x1c90] sm:$0xf] }
 0x146   : >> { %v1270_v10 = vld [vmem:[%s26400_s14 + $0x1ca0] sm:$0xf]  ;;  %1267 = vst [vmem:[%s26396_s13 + $0xe40] sm:$0xf] %v1266_v8  ;;  %1269 = vst [vmem:[%s26396_s13 + $0xe48] sm:$0xf] %v1268_v9 }
 0x147   : >> { %1271 = vst [vmem:[%s26396_s13 + $0xe50] sm:$0xf] %v1270_v10  ;;  %v1272_v11 = vld [vmem:[%s26400_s14 + $0x1cb0] sm:$0xf]  ;;  %v1274_v12 = vld [vmem:[%s26400_s14 + $0x1cc0] sm:$0xf] }
 0x148   : >> { %v1276_v13 = vld [vmem:[%s26400_s14 + $0x1cd0] sm:$0xf]  ;;  %1273 = vst [vmem:[%s26396_s13 + $0xe58] sm:$0xf] %v1272_v11  ;;  %1275 = vst [vmem:[%s26396_s13 + $0xe60] sm:$0xf] %v1274_v12 }
 0x149   : >> { %1277 = vst [vmem:[%s26396_s13 + $0xe68] sm:$0xf] %v1276_v13  ;;  %v1278_v14 = vld [vmem:[%s26400_s14 + $0x1ce0] sm:$0xf]  ;;  %v1280_v15 = vld [vmem:[%s26400_s14 + $0x1cf0] sm:$0xf] }
 0x14a   : >> { %v1282_v16 = vld [vmem:[%s26400_s14 + $0x1d00] sm:$0xf]  ;;  %1279 = vst [vmem:[%s26396_s13 + $0xe70] sm:$0xf] %v1278_v14  ;;  %1281 = vst [vmem:[%s26396_s13 + $0xe78] sm:$0xf] %v1280_v15 }
 0x14b   : >> { %1283 = vst [vmem:[%s26396_s13 + $0xe80] sm:$0xf] %v1282_v16  ;;  %v1284_v17 = vld [vmem:[%s26400_s14 + $0x1d10] sm:$0xf]  ;;  %v1286_v18 = vld [vmem:[%s26400_s14 + $0x1d20] sm:$0xf] }
 0x14c   : >> { %v1288_v19 = vld [vmem:[%s26400_s14 + $0x1d30] sm:$0xf]  ;;  %1285 = vst [vmem:[%s26396_s13 + $0xe88] sm:$0xf] %v1284_v17  ;;  %1287 = vst [vmem:[%s26396_s13 + $0xe90] sm:$0xf] %v1286_v18 }
 0x14d   : >> { %1289 = vst [vmem:[%s26396_s13 + $0xe98] sm:$0xf] %v1288_v19  ;;  %v1290_v20 = vld [vmem:[%s26400_s14 + $0x1d40] sm:$0xf]  ;;  %v1292_v21 = vld [vmem:[%s26400_s14 + $0x1d50] sm:$0xf] }
 0x14e   : >> { %v1294_v22 = vld [vmem:[%s26400_s14 + $0x1d60] sm:$0xf]  ;;  %1291 = vst [vmem:[%s26396_s13 + $0xea0] sm:$0xf] %v1290_v20  ;;  %1293 = vst [vmem:[%s26396_s13 + $0xea8] sm:$0xf] %v1292_v21 }
 0x14f   : >> { %1295 = vst [vmem:[%s26396_s13 + $0xeb0] sm:$0xf] %v1294_v22  ;;  %v1296_v23 = vld [vmem:[%s26400_s14 + $0x1d70] sm:$0xf]  ;;  %v1298_v24 = vld [vmem:[%s26400_s14 + $0x1d80] sm:$0xf] }
 0x150   : >> { %v1300_v25 = vld [vmem:[%s26400_s14 + $0x1d90] sm:$0xf]  ;;  %1297 = vst [vmem:[%s26396_s13 + $0xeb8] sm:$0xf] %v1296_v23  ;;  %1299 = vst [vmem:[%s26396_s13 + $0xec0] sm:$0xf] %v1298_v24 }
 0x151   : >> { %1301 = vst [vmem:[%s26396_s13 + $0xec8] sm:$0xf] %v1300_v25  ;;  %v1302_v26 = vld [vmem:[%s26400_s14 + $0x1da0] sm:$0xf]  ;;  %v1304_v27 = vld [vmem:[%s26400_s14 + $0x1db0] sm:$0xf] }
 0x152   : >> { %v1306_v28 = vld [vmem:[%s26400_s14 + $0x1dc0] sm:$0xf]  ;;  %1303 = vst [vmem:[%s26396_s13 + $0xed0] sm:$0xf] %v1302_v26  ;;  %1305 = vst [vmem:[%s26396_s13 + $0xed8] sm:$0xf] %v1304_v27 }
 0x153   : >> { %1307 = vst [vmem:[%s26396_s13 + $0xee0] sm:$0xf] %v1306_v28  ;;  %v1308_v29 = vld [vmem:[%s26400_s14 + $0x1dd0] sm:$0xf]  ;;  %v1310_v30 = vld [vmem:[%s26400_s14 + $0x1de0] sm:$0xf] }
 0x154   : >> { %v1312_v31 = vld [vmem:[%s26400_s14 + $0x1df0] sm:$0xf]  ;;  %1309 = vst [vmem:[%s26396_s13 + $0xee8] sm:$0xf] %v1308_v29  ;;  %1311 = vst [vmem:[%s26396_s13 + $0xef0] sm:$0xf] %v1310_v30 }
 0x155   : >> { %1313 = vst [vmem:[%s26396_s13 + $0xef8] sm:$0xf] %v1312_v31  ;;  %v1314_v32 = vld [vmem:[%s26400_s14 + $0x1e00] sm:$0xf]  ;;  %v1316_v33 = vld [vmem:[%s26400_s14 + $0x1e10] sm:$0xf] }
 0x156   : >> { %v1318_v34 = vld [vmem:[%s26400_s14 + $0x1e20] sm:$0xf]  ;;  %1315 = vst [vmem:[%s26396_s13 + $0xf00] sm:$0xf] %v1314_v32  ;;  %1317 = vst [vmem:[%s26396_s13 + $0xf08] sm:$0xf] %v1316_v33 }
 0x157   : >> { %1319 = vst [vmem:[%s26396_s13 + $0xf10] sm:$0xf] %v1318_v34  ;;  %v1320_v35 = vld [vmem:[%s26400_s14 + $0x1e30] sm:$0xf]  ;;  %v1322_v36 = vld [vmem:[%s26400_s14 + $0x1e40] sm:$0xf] }
 0x158   : >> { %v1324_v37 = vld [vmem:[%s26400_s14 + $0x1e50] sm:$0xf]  ;;  %1321 = vst [vmem:[%s26396_s13 + $0xf18] sm:$0xf] %v1320_v35  ;;  %1323 = vst [vmem:[%s26396_s13 + $0xf20] sm:$0xf] %v1322_v36 }
 0x159   : >> { %1325 = vst [vmem:[%s26396_s13 + $0xf28] sm:$0xf] %v1324_v37  ;;  %v1326_v38 = vld [vmem:[%s26400_s14 + $0x1e60] sm:$0xf]  ;;  %v1328_v39 = vld [vmem:[%s26400_s14 + $0x1e70] sm:$0xf] }
 0x15a   : >> { %v1330_v40 = vld [vmem:[%s26400_s14 + $0x1e80] sm:$0xf]  ;;  %1327 = vst [vmem:[%s26396_s13 + $0xf30] sm:$0xf] %v1326_v38  ;;  %1329 = vst [vmem:[%s26396_s13 + $0xf38] sm:$0xf] %v1328_v39 }
 0x15b   : >> { %1331 = vst [vmem:[%s26396_s13 + $0xf40] sm:$0xf] %v1330_v40  ;;  %v1332_v41 = vld [vmem:[%s26400_s14 + $0x1e90] sm:$0xf]  ;;  %v1334_v42 = vld [vmem:[%s26400_s14 + $0x1ea0] sm:$0xf] }
 0x15c   : >> { %v1336_v43 = vld [vmem:[%s26400_s14 + $0x1eb0] sm:$0xf]  ;;  %1333 = vst [vmem:[%s26396_s13 + $0xf48] sm:$0xf] %v1332_v41  ;;  %1335 = vst [vmem:[%s26396_s13 + $0xf50] sm:$0xf] %v1334_v42 }
 0x15d   : >> { %1337 = vst [vmem:[%s26396_s13 + $0xf58] sm:$0xf] %v1336_v43  ;;  %v1338_v44 = vld [vmem:[%s26400_s14 + $0x1ec0] sm:$0xf]  ;;  %v1340_v45 = vld [vmem:[%s26400_s14 + $0x1ed0] sm:$0xf] }
 0x15e   : >> { %v1342_v46 = vld [vmem:[%s26400_s14 + $0x1ee0] sm:$0xf]  ;;  %1339 = vst [vmem:[%s26396_s13 + $0xf60] sm:$0xf] %v1338_v44  ;;  %1341 = vst [vmem:[%s26396_s13 + $0xf68] sm:$0xf] %v1340_v45 }
 0x15f   : >> { %1343 = vst [vmem:[%s26396_s13 + $0xf70] sm:$0xf] %v1342_v46  ;;  %v1344_v47 = vld [vmem:[%s26400_s14 + $0x1ef0] sm:$0xf]  ;;  %v1346_v48 = vld [vmem:[%s26400_s14 + $0x1f00] sm:$0xf] }
 0x160   : >> { %v1348_v49 = vld [vmem:[%s26400_s14 + $0x1f10] sm:$0xf]  ;;  %1345 = vst [vmem:[%s26396_s13 + $0xf78] sm:$0xf] %v1344_v47  ;;  %1347 = vst [vmem:[%s26396_s13 + $0xf80] sm:$0xf] %v1346_v48 }
 0x161   : >> { %1349 = vst [vmem:[%s26396_s13 + $0xf88] sm:$0xf] %v1348_v49  ;;  %v1350_v50 = vld [vmem:[%s26400_s14 + $0x1f20] sm:$0xf]  ;;  %v1352_v51 = vld [vmem:[%s26400_s14 + $0x1f30] sm:$0xf] }
 0x162   : >> { %v1354_v52 = vld [vmem:[%s26400_s14 + $0x1f40] sm:$0xf]  ;;  %1351 = vst [vmem:[%s26396_s13 + $0xf90] sm:$0xf] %v1350_v50  ;;  %1353 = vst [vmem:[%s26396_s13 + $0xf98] sm:$0xf] %v1352_v51 }
 0x163   : >> { %1355 = vst [vmem:[%s26396_s13 + $0xfa0] sm:$0xf] %v1354_v52  ;;  %v1356_v53 = vld [vmem:[%s26400_s14 + $0x1f50] sm:$0xf]  ;;  %v1358_v54 = vld [vmem:[%s26400_s14 + $0x1f60] sm:$0xf] }
 0x164   : >> { %v1360_v55 = vld [vmem:[%s26400_s14 + $0x1f70] sm:$0xf]  ;;  %1357 = vst [vmem:[%s26396_s13 + $0xfa8] sm:$0xf] %v1356_v53  ;;  %1359 = vst [vmem:[%s26396_s13 + $0xfb0] sm:$0xf] %v1358_v54 }
 0x165   : >> { %1361 = vst [vmem:[%s26396_s13 + $0xfb8] sm:$0xf] %v1360_v55  ;;  %v1362_v56 = vld [vmem:[%s26400_s14 + $0x1f80] sm:$0xf]  ;;  %v1364_v57 = vld [vmem:[%s26400_s14 + $0x1f90] sm:$0xf] }
 0x166   : >> { %v1366_v58 = vld [vmem:[%s26400_s14 + $0x1fa0] sm:$0xf]  ;;  %1363 = vst [vmem:[%s26396_s13 + $0xfc0] sm:$0xf] %v1362_v56  ;;  %1365 = vst [vmem:[%s26396_s13 + $0xfc8] sm:$0xf] %v1364_v57 }
 0x167   : >> { %1367 = vst [vmem:[%s26396_s13 + $0xfd0] sm:$0xf] %v1366_v58  ;;  %v1368_v59 = vld [vmem:[%s26400_s14 + $0x1fb0] sm:$0xf]  ;;  %v1370_v60 = vld [vmem:[%s26400_s14 + $0x1fc0] sm:$0xf] }
 0x168   : >> { %v1372_v61 = vld [vmem:[%s26400_s14 + $0x1fd0] sm:$0xf]  ;;  %1369 = vst [vmem:[%s26396_s13 + $0xfd8] sm:$0xf] %v1368_v59  ;;  %1371 = vst [vmem:[%s26396_s13 + $0xfe0] sm:$0xf] %v1370_v60 }
 0x169   : >> { %1373 = vst [vmem:[%s26396_s13 + $0xfe8] sm:$0xf] %v1372_v61  ;;  %v1374_v62 = vld [vmem:[%s26400_s14 + $0x1fe0] sm:$0xf]  ;;  %v1376_v63 = vld [vmem:[%s26400_s14 + $0x1ff0] sm:$0xf] }
 0x16a   : >> { %v1378_v0 = vld [vmem:[%s26400_s14 + $0x2000] sm:$0xf]  ;;  %1375 = vst [vmem:[%s26396_s13 + $0xff0] sm:$0xf] %v1374_v62  ;;  %1377 = vst [vmem:[%s26396_s13 + $0xff8] sm:$0xf] %v1376_v63 }
 0x16b   : >> { %1379 = vst [vmem:[%s26396_s13 + $0x1000] sm:$0xf] %v1378_v0  ;;  %v1380_v1 = vld [vmem:[%s26400_s14 + $0x2010] sm:$0xf]  ;;  %v1382_v2 = vld [vmem:[%s26400_s14 + $0x2020] sm:$0xf] }
 0x16c   : >> { %v1384_v3 = vld [vmem:[%s26400_s14 + $0x2030] sm:$0xf]  ;;  %1381 = vst [vmem:[%s26396_s13 + $0x1008] sm:$0xf] %v1380_v1  ;;  %1383 = vst [vmem:[%s26396_s13 + $0x1010] sm:$0xf] %v1382_v2 }
 0x16d   : >> { %1385 = vst [vmem:[%s26396_s13 + $0x1018] sm:$0xf] %v1384_v3  ;;  %v1386_v4 = vld [vmem:[%s26400_s14 + $0x2040] sm:$0xf]  ;;  %v1388_v5 = vld [vmem:[%s26400_s14 + $0x2050] sm:$0xf] }
 0x16e   : >> { %v1390_v6 = vld [vmem:[%s26400_s14 + $0x2060] sm:$0xf]  ;;  %1387 = vst [vmem:[%s26396_s13 + $0x1020] sm:$0xf] %v1386_v4  ;;  %1389 = vst [vmem:[%s26396_s13 + $0x1028] sm:$0xf] %v1388_v5 }
 0x16f   : >> { %1391 = vst [vmem:[%s26396_s13 + $0x1030] sm:$0xf] %v1390_v6  ;;  %v1392_v7 = vld [vmem:[%s26400_s14 + $0x2070] sm:$0xf]  ;;  %v1394_v8 = vld [vmem:[%s26400_s14 + $0x2080] sm:$0xf] }
 0x170   : >> { %v1396_v9 = vld [vmem:[%s26400_s14 + $0x2090] sm:$0xf]  ;;  %1393 = vst [vmem:[%s26396_s13 + $0x1038] sm:$0xf] %v1392_v7  ;;  %1395 = vst [vmem:[%s26396_s13 + $0x1040] sm:$0xf] %v1394_v8 }
 0x171   : >> { %1397 = vst [vmem:[%s26396_s13 + $0x1048] sm:$0xf] %v1396_v9  ;;  %v1398_v10 = vld [vmem:[%s26400_s14 + $0x20a0] sm:$0xf]  ;;  %v1400_v11 = vld [vmem:[%s26400_s14 + $0x20b0] sm:$0xf] }
 0x172   : >> { %v1402_v12 = vld [vmem:[%s26400_s14 + $0x20c0] sm:$0xf]  ;;  %1399 = vst [vmem:[%s26396_s13 + $0x1050] sm:$0xf] %v1398_v10  ;;  %1401 = vst [vmem:[%s26396_s13 + $0x1058] sm:$0xf] %v1400_v11 }
 0x173   : >> { %1403 = vst [vmem:[%s26396_s13 + $0x1060] sm:$0xf] %v1402_v12  ;;  %v1404_v13 = vld [vmem:[%s26400_s14 + $0x20d0] sm:$0xf]  ;;  %v1406_v14 = vld [vmem:[%s26400_s14 + $0x20e0] sm:$0xf] }
 0x174   : >> { %v1408_v15 = vld [vmem:[%s26400_s14 + $0x20f0] sm:$0xf]  ;;  %1405 = vst [vmem:[%s26396_s13 + $0x1068] sm:$0xf] %v1404_v13  ;;  %1407 = vst [vmem:[%s26396_s13 + $0x1070] sm:$0xf] %v1406_v14 }
 0x175   : >> { %1409 = vst [vmem:[%s26396_s13 + $0x1078] sm:$0xf] %v1408_v15  ;;  %v1410_v16 = vld [vmem:[%s26400_s14 + $0x2100] sm:$0xf]  ;;  %v1412_v17 = vld [vmem:[%s26400_s14 + $0x2110] sm:$0xf] }
 0x176   : >> { %v1414_v18 = vld [vmem:[%s26400_s14 + $0x2120] sm:$0xf]  ;;  %1411 = vst [vmem:[%s26396_s13 + $0x1080] sm:$0xf] %v1410_v16  ;;  %1413 = vst [vmem:[%s26396_s13 + $0x1088] sm:$0xf] %v1412_v17 }
 0x177   : >> { %1415 = vst [vmem:[%s26396_s13 + $0x1090] sm:$0xf] %v1414_v18  ;;  %v1416_v19 = vld [vmem:[%s26400_s14 + $0x2130] sm:$0xf]  ;;  %v1418_v20 = vld [vmem:[%s26400_s14 + $0x2140] sm:$0xf] }
 0x178   : >> { %v1420_v21 = vld [vmem:[%s26400_s14 + $0x2150] sm:$0xf]  ;;  %1417 = vst [vmem:[%s26396_s13 + $0x1098] sm:$0xf] %v1416_v19  ;;  %1419 = vst [vmem:[%s26396_s13 + $0x10a0] sm:$0xf] %v1418_v20 }
 0x179   : >> { %1421 = vst [vmem:[%s26396_s13 + $0x10a8] sm:$0xf] %v1420_v21  ;;  %v1422_v22 = vld [vmem:[%s26400_s14 + $0x2160] sm:$0xf]  ;;  %v1424_v23 = vld [vmem:[%s26400_s14 + $0x2170] sm:$0xf] }
 0x17a   : >> { %v1426_v24 = vld [vmem:[%s26400_s14 + $0x2180] sm:$0xf]  ;;  %1423 = vst [vmem:[%s26396_s13 + $0x10b0] sm:$0xf] %v1422_v22  ;;  %1425 = vst [vmem:[%s26396_s13 + $0x10b8] sm:$0xf] %v1424_v23 }
 0x17b   : >> { %1427 = vst [vmem:[%s26396_s13 + $0x10c0] sm:$0xf] %v1426_v24  ;;  %v1428_v25 = vld [vmem:[%s26400_s14 + $0x2190] sm:$0xf]  ;;  %v1430_v26 = vld [vmem:[%s26400_s14 + $0x21a0] sm:$0xf] }
 0x17c   : >> { %v1432_v27 = vld [vmem:[%s26400_s14 + $0x21b0] sm:$0xf]  ;;  %1429 = vst [vmem:[%s26396_s13 + $0x10c8] sm:$0xf] %v1428_v25  ;;  %1431 = vst [vmem:[%s26396_s13 + $0x10d0] sm:$0xf] %v1430_v26 }
 0x17d   : >> { %1433 = vst [vmem:[%s26396_s13 + $0x10d8] sm:$0xf] %v1432_v27  ;;  %v1434_v28 = vld [vmem:[%s26400_s14 + $0x21c0] sm:$0xf]  ;;  %v1436_v29 = vld [vmem:[%s26400_s14 + $0x21d0] sm:$0xf] }
 0x17e   : >> { %v1438_v30 = vld [vmem:[%s26400_s14 + $0x21e0] sm:$0xf]  ;;  %1435 = vst [vmem:[%s26396_s13 + $0x10e0] sm:$0xf] %v1434_v28  ;;  %1437 = vst [vmem:[%s26396_s13 + $0x10e8] sm:$0xf] %v1436_v29 }
 0x17f   : >> { %1439 = vst [vmem:[%s26396_s13 + $0x10f0] sm:$0xf] %v1438_v30  ;;  %v1440_v31 = vld [vmem:[%s26400_s14 + $0x21f0] sm:$0xf]  ;;  %v1442_v32 = vld [vmem:[%s26400_s14 + $0x2200] sm:$0xf] }
 0x180   : >> { %v1444_v33 = vld [vmem:[%s26400_s14 + $0x2210] sm:$0xf]  ;;  %1441 = vst [vmem:[%s26396_s13 + $0x10f8] sm:$0xf] %v1440_v31  ;;  %1443 = vst [vmem:[%s26396_s13 + $0x1100] sm:$0xf] %v1442_v32 }
 0x181   : >> { %1445 = vst [vmem:[%s26396_s13 + $0x1108] sm:$0xf] %v1444_v33  ;;  %v1446_v34 = vld [vmem:[%s26400_s14 + $0x2220] sm:$0xf]  ;;  %v1448_v35 = vld [vmem:[%s26400_s14 + $0x2230] sm:$0xf] }
 0x182   : >> { %v1450_v36 = vld [vmem:[%s26400_s14 + $0x2240] sm:$0xf]  ;;  %1447 = vst [vmem:[%s26396_s13 + $0x1110] sm:$0xf] %v1446_v34  ;;  %1449 = vst [vmem:[%s26396_s13 + $0x1118] sm:$0xf] %v1448_v35 }
 0x183   : >> { %1451 = vst [vmem:[%s26396_s13 + $0x1120] sm:$0xf] %v1450_v36  ;;  %v1452_v37 = vld [vmem:[%s26400_s14 + $0x2250] sm:$0xf]  ;;  %v1454_v38 = vld [vmem:[%s26400_s14 + $0x2260] sm:$0xf] }
 0x184   : >> { %v1456_v39 = vld [vmem:[%s26400_s14 + $0x2270] sm:$0xf]  ;;  %1453 = vst [vmem:[%s26396_s13 + $0x1128] sm:$0xf] %v1452_v37  ;;  %1455 = vst [vmem:[%s26396_s13 + $0x1130] sm:$0xf] %v1454_v38 }
 0x185   : >> { %1457 = vst [vmem:[%s26396_s13 + $0x1138] sm:$0xf] %v1456_v39  ;;  %v1458_v40 = vld [vmem:[%s26400_s14 + $0x2280] sm:$0xf]  ;;  %v1460_v41 = vld [vmem:[%s26400_s14 + $0x2290] sm:$0xf] }
 0x186   : >> { %v1462_v42 = vld [vmem:[%s26400_s14 + $0x22a0] sm:$0xf]  ;;  %1459 = vst [vmem:[%s26396_s13 + $0x1140] sm:$0xf] %v1458_v40  ;;  %1461 = vst [vmem:[%s26396_s13 + $0x1148] sm:$0xf] %v1460_v41 }
 0x187   : >> { %1463 = vst [vmem:[%s26396_s13 + $0x1150] sm:$0xf] %v1462_v42  ;;  %v1464_v43 = vld [vmem:[%s26400_s14 + $0x22b0] sm:$0xf]  ;;  %v1466_v44 = vld [vmem:[%s26400_s14 + $0x22c0] sm:$0xf] }
 0x188   : >> { %v1468_v45 = vld [vmem:[%s26400_s14 + $0x22d0] sm:$0xf]  ;;  %1465 = vst [vmem:[%s26396_s13 + $0x1158] sm:$0xf] %v1464_v43  ;;  %1467 = vst [vmem:[%s26396_s13 + $0x1160] sm:$0xf] %v1466_v44 }
 0x189   : >> { %1469 = vst [vmem:[%s26396_s13 + $0x1168] sm:$0xf] %v1468_v45  ;;  %v1470_v46 = vld [vmem:[%s26400_s14 + $0x22e0] sm:$0xf]  ;;  %v1472_v47 = vld [vmem:[%s26400_s14 + $0x22f0] sm:$0xf] }
 0x18a   : >> { %v1474_v48 = vld [vmem:[%s26400_s14 + $0x2300] sm:$0xf]  ;;  %1471 = vst [vmem:[%s26396_s13 + $0x1170] sm:$0xf] %v1470_v46  ;;  %1473 = vst [vmem:[%s26396_s13 + $0x1178] sm:$0xf] %v1472_v47 }
 0x18b   : >> { %1475 = vst [vmem:[%s26396_s13 + $0x1180] sm:$0xf] %v1474_v48  ;;  %v1476_v49 = vld [vmem:[%s26400_s14 + $0x2310] sm:$0xf]  ;;  %v1478_v50 = vld [vmem:[%s26400_s14 + $0x2320] sm:$0xf] }
 0x18c   : >> { %v1480_v51 = vld [vmem:[%s26400_s14 + $0x2330] sm:$0xf]  ;;  %1477 = vst [vmem:[%s26396_s13 + $0x1188] sm:$0xf] %v1476_v49  ;;  %1479 = vst [vmem:[%s26396_s13 + $0x1190] sm:$0xf] %v1478_v50 }
 0x18d   : >> { %1481 = vst [vmem:[%s26396_s13 + $0x1198] sm:$0xf] %v1480_v51  ;;  %v1482_v52 = vld [vmem:[%s26400_s14 + $0x2340] sm:$0xf]  ;;  %v1484_v53 = vld [vmem:[%s26400_s14 + $0x2350] sm:$0xf] }
 0x18e   : >> { %v1486_v54 = vld [vmem:[%s26400_s14 + $0x2360] sm:$0xf]  ;;  %1483 = vst [vmem:[%s26396_s13 + $0x11a0] sm:$0xf] %v1482_v52  ;;  %1485 = vst [vmem:[%s26396_s13 + $0x11a8] sm:$0xf] %v1484_v53 }
 0x18f   : >> { %1487 = vst [vmem:[%s26396_s13 + $0x11b0] sm:$0xf] %v1486_v54  ;;  %v1488_v55 = vld [vmem:[%s26400_s14 + $0x2370] sm:$0xf]  ;;  %v1490_v56 = vld [vmem:[%s26400_s14 + $0x2380] sm:$0xf] }
 0x190   : >> { %v1492_v57 = vld [vmem:[%s26400_s14 + $0x2390] sm:$0xf]  ;;  %1489 = vst [vmem:[%s26396_s13 + $0x11b8] sm:$0xf] %v1488_v55  ;;  %1491 = vst [vmem:[%s26396_s13 + $0x11c0] sm:$0xf] %v1490_v56 }
 0x191   : >> { %1493 = vst [vmem:[%s26396_s13 + $0x11c8] sm:$0xf] %v1492_v57  ;;  %v1494_v58 = vld [vmem:[%s26400_s14 + $0x23a0] sm:$0xf]  ;;  %v1496_v59 = vld [vmem:[%s26400_s14 + $0x23b0] sm:$0xf] }
 0x192   : >> { %v1498_v60 = vld [vmem:[%s26400_s14 + $0x23c0] sm:$0xf]  ;;  %1495 = vst [vmem:[%s26396_s13 + $0x11d0] sm:$0xf] %v1494_v58  ;;  %1497 = vst [vmem:[%s26396_s13 + $0x11d8] sm:$0xf] %v1496_v59 }
 0x193   : >> { %1499 = vst [vmem:[%s26396_s13 + $0x11e0] sm:$0xf] %v1498_v60  ;;  %v1500_v61 = vld [vmem:[%s26400_s14 + $0x23d0] sm:$0xf]  ;;  %v1502_v62 = vld [vmem:[%s26400_s14 + $0x23e0] sm:$0xf] }
 0x194   : >> { %v1504_v63 = vld [vmem:[%s26400_s14 + $0x23f0] sm:$0xf]  ;;  %1501 = vst [vmem:[%s26396_s13 + $0x11e8] sm:$0xf] %v1500_v61  ;;  %1503 = vst [vmem:[%s26396_s13 + $0x11f0] sm:$0xf] %v1502_v62 }
 0x195   : >> { %1505 = vst [vmem:[%s26396_s13 + $0x11f8] sm:$0xf] %v1504_v63  ;;  %v1506_v0 = vld [vmem:[%s26400_s14 + $0x2400] sm:$0xf]  ;;  %v1508_v1 = vld [vmem:[%s26400_s14 + $0x2410] sm:$0xf] }
 0x196   : >> { %v1510_v2 = vld [vmem:[%s26400_s14 + $0x2420] sm:$0xf]  ;;  %1507 = vst [vmem:[%s26396_s13 + $0x1200] sm:$0xf] %v1506_v0  ;;  %1509 = vst [vmem:[%s26396_s13 + $0x1208] sm:$0xf] %v1508_v1 }
 0x197   : >> { %1511 = vst [vmem:[%s26396_s13 + $0x1210] sm:$0xf] %v1510_v2  ;;  %v1512_v3 = vld [vmem:[%s26400_s14 + $0x2430] sm:$0xf]  ;;  %v1514_v4 = vld [vmem:[%s26400_s14 + $0x2440] sm:$0xf] }
 0x198   : >> { %v1516_v5 = vld [vmem:[%s26400_s14 + $0x2450] sm:$0xf]  ;;  %1513 = vst [vmem:[%s26396_s13 + $0x1218] sm:$0xf] %v1512_v3  ;;  %1515 = vst [vmem:[%s26396_s13 + $0x1220] sm:$0xf] %v1514_v4 }
 0x199   : >> { %1517 = vst [vmem:[%s26396_s13 + $0x1228] sm:$0xf] %v1516_v5  ;;  %v1518_v6 = vld [vmem:[%s26400_s14 + $0x2460] sm:$0xf]  ;;  %v1520_v7 = vld [vmem:[%s26400_s14 + $0x2470] sm:$0xf] }
 0x19a   : >> { %v1522_v8 = vld [vmem:[%s26400_s14 + $0x2480] sm:$0xf]  ;;  %1519 = vst [vmem:[%s26396_s13 + $0x1230] sm:$0xf] %v1518_v6  ;;  %1521 = vst [vmem:[%s26396_s13 + $0x1238] sm:$0xf] %v1520_v7 }
 0x19b   : >> { %1523 = vst [vmem:[%s26396_s13 + $0x1240] sm:$0xf] %v1522_v8  ;;  %v1524_v9 = vld [vmem:[%s26400_s14 + $0x2490] sm:$0xf]  ;;  %v1526_v10 = vld [vmem:[%s26400_s14 + $0x24a0] sm:$0xf] }
 0x19c   : >> { %v1528_v11 = vld [vmem:[%s26400_s14 + $0x24b0] sm:$0xf]  ;;  %1525 = vst [vmem:[%s26396_s13 + $0x1248] sm:$0xf] %v1524_v9  ;;  %1527 = vst [vmem:[%s26396_s13 + $0x1250] sm:$0xf] %v1526_v10 }
 0x19d   : >> { %1529 = vst [vmem:[%s26396_s13 + $0x1258] sm:$0xf] %v1528_v11  ;;  %v1530_v12 = vld [vmem:[%s26400_s14 + $0x24c0] sm:$0xf]  ;;  %v1532_v13 = vld [vmem:[%s26400_s14 + $0x24d0] sm:$0xf] }
 0x19e   : >> { %v1534_v14 = vld [vmem:[%s26400_s14 + $0x24e0] sm:$0xf]  ;;  %1531 = vst [vmem:[%s26396_s13 + $0x1260] sm:$0xf] %v1530_v12  ;;  %1533 = vst [vmem:[%s26396_s13 + $0x1268] sm:$0xf] %v1532_v13 }
 0x19f   : >> { %1535 = vst [vmem:[%s26396_s13 + $0x1270] sm:$0xf] %v1534_v14  ;;  %v1536_v15 = vld [vmem:[%s26400_s14 + $0x24f0] sm:$0xf]  ;;  %v1538_v16 = vld [vmem:[%s26400_s14 + $0x2500] sm:$0xf] }
 0x1a0   : >> { %v1540_v17 = vld [vmem:[%s26400_s14 + $0x2510] sm:$0xf]  ;;  %1537 = vst [vmem:[%s26396_s13 + $0x1278] sm:$0xf] %v1536_v15  ;;  %1539 = vst [vmem:[%s26396_s13 + $0x1280] sm:$0xf] %v1538_v16 }
 0x1a1   : >> { %1541 = vst [vmem:[%s26396_s13 + $0x1288] sm:$0xf] %v1540_v17  ;;  %v1542_v18 = vld [vmem:[%s26400_s14 + $0x2520] sm:$0xf]  ;;  %v1544_v19 = vld [vmem:[%s26400_s14 + $0x2530] sm:$0xf] }
 0x1a2   : >> { %v1546_v20 = vld [vmem:[%s26400_s14 + $0x2540] sm:$0xf]  ;;  %1543 = vst [vmem:[%s26396_s13 + $0x1290] sm:$0xf] %v1542_v18  ;;  %1545 = vst [vmem:[%s26396_s13 + $0x1298] sm:$0xf] %v1544_v19 }
 0x1a3   : >> { %1547 = vst [vmem:[%s26396_s13 + $0x12a0] sm:$0xf] %v1546_v20  ;;  %v1548_v21 = vld [vmem:[%s26400_s14 + $0x2550] sm:$0xf]  ;;  %v1550_v22 = vld [vmem:[%s26400_s14 + $0x2560] sm:$0xf] }
 0x1a4   : >> { %v1552_v23 = vld [vmem:[%s26400_s14 + $0x2570] sm:$0xf]  ;;  %1549 = vst [vmem:[%s26396_s13 + $0x12a8] sm:$0xf] %v1548_v21  ;;  %1551 = vst [vmem:[%s26396_s13 + $0x12b0] sm:$0xf] %v1550_v22 }
 0x1a5   : >> { %1553 = vst [vmem:[%s26396_s13 + $0x12b8] sm:$0xf] %v1552_v23  ;;  %v1554_v24 = vld [vmem:[%s26400_s14 + $0x2580] sm:$0xf]  ;;  %v1556_v25 = vld [vmem:[%s26400_s14 + $0x2590] sm:$0xf] }
 0x1a6   : >> { %v1558_v26 = vld [vmem:[%s26400_s14 + $0x25a0] sm:$0xf]  ;;  %1555 = vst [vmem:[%s26396_s13 + $0x12c0] sm:$0xf] %v1554_v24  ;;  %1557 = vst [vmem:[%s26396_s13 + $0x12c8] sm:$0xf] %v1556_v25 }
 0x1a7   : >> { %1559 = vst [vmem:[%s26396_s13 + $0x12d0] sm:$0xf] %v1558_v26  ;;  %v1560_v27 = vld [vmem:[%s26400_s14 + $0x25b0] sm:$0xf]  ;;  %v1562_v28 = vld [vmem:[%s26400_s14 + $0x25c0] sm:$0xf] }
 0x1a8   : >> { %v1564_v29 = vld [vmem:[%s26400_s14 + $0x25d0] sm:$0xf]  ;;  %1561 = vst [vmem:[%s26396_s13 + $0x12d8] sm:$0xf] %v1560_v27  ;;  %1563 = vst [vmem:[%s26396_s13 + $0x12e0] sm:$0xf] %v1562_v28 }
 0x1a9   : >> { %1565 = vst [vmem:[%s26396_s13 + $0x12e8] sm:$0xf] %v1564_v29  ;;  %v1566_v30 = vld [vmem:[%s26400_s14 + $0x25e0] sm:$0xf]  ;;  %v1568_v31 = vld [vmem:[%s26400_s14 + $0x25f0] sm:$0xf] }
 0x1aa   : >> { %v1570_v32 = vld [vmem:[%s26400_s14 + $0x2600] sm:$0xf]  ;;  %1567 = vst [vmem:[%s26396_s13 + $0x12f0] sm:$0xf] %v1566_v30  ;;  %1569 = vst [vmem:[%s26396_s13 + $0x12f8] sm:$0xf] %v1568_v31 }
 0x1ab   : >> { %1571 = vst [vmem:[%s26396_s13 + $0x1300] sm:$0xf] %v1570_v32  ;;  %v1572_v33 = vld [vmem:[%s26400_s14 + $0x2610] sm:$0xf]  ;;  %v1574_v34 = vld [vmem:[%s26400_s14 + $0x2620] sm:$0xf] }
 0x1ac   : >> { %v1576_v35 = vld [vmem:[%s26400_s14 + $0x2630] sm:$0xf]  ;;  %1573 = vst [vmem:[%s26396_s13 + $0x1308] sm:$0xf] %v1572_v33  ;;  %1575 = vst [vmem:[%s26396_s13 + $0x1310] sm:$0xf] %v1574_v34 }
 0x1ad   : >> { %1577 = vst [vmem:[%s26396_s13 + $0x1318] sm:$0xf] %v1576_v35  ;;  %v1578_v36 = vld [vmem:[%s26400_s14 + $0x2640] sm:$0xf]  ;;  %v1580_v37 = vld [vmem:[%s26400_s14 + $0x2650] sm:$0xf] }
 0x1ae   : >> { %v1582_v38 = vld [vmem:[%s26400_s14 + $0x2660] sm:$0xf]  ;;  %1579 = vst [vmem:[%s26396_s13 + $0x1320] sm:$0xf] %v1578_v36  ;;  %1581 = vst [vmem:[%s26396_s13 + $0x1328] sm:$0xf] %v1580_v37 }
 0x1af   : >> { %1583 = vst [vmem:[%s26396_s13 + $0x1330] sm:$0xf] %v1582_v38  ;;  %v1584_v39 = vld [vmem:[%s26400_s14 + $0x2670] sm:$0xf]  ;;  %v1586_v40 = vld [vmem:[%s26400_s14 + $0x2680] sm:$0xf] }
 0x1b0   : >> { %v1588_v41 = vld [vmem:[%s26400_s14 + $0x2690] sm:$0xf]  ;;  %1585 = vst [vmem:[%s26396_s13 + $0x1338] sm:$0xf] %v1584_v39  ;;  %1587 = vst [vmem:[%s26396_s13 + $0x1340] sm:$0xf] %v1586_v40 }
 0x1b1   : >> { %1589 = vst [vmem:[%s26396_s13 + $0x1348] sm:$0xf] %v1588_v41  ;;  %v1590_v42 = vld [vmem:[%s26400_s14 + $0x26a0] sm:$0xf]  ;;  %v1592_v43 = vld [vmem:[%s26400_s14 + $0x26b0] sm:$0xf] }
 0x1b2   : >> { %v1594_v44 = vld [vmem:[%s26400_s14 + $0x26c0] sm:$0xf]  ;;  %1591 = vst [vmem:[%s26396_s13 + $0x1350] sm:$0xf] %v1590_v42  ;;  %1593 = vst [vmem:[%s26396_s13 + $0x1358] sm:$0xf] %v1592_v43 }
 0x1b3   : >> { %1595 = vst [vmem:[%s26396_s13 + $0x1360] sm:$0xf] %v1594_v44  ;;  %v1596_v45 = vld [vmem:[%s26400_s14 + $0x26d0] sm:$0xf]  ;;  %v1598_v46 = vld [vmem:[%s26400_s14 + $0x26e0] sm:$0xf] }
 0x1b4   : >> { %v1600_v47 = vld [vmem:[%s26400_s14 + $0x26f0] sm:$0xf]  ;;  %1597 = vst [vmem:[%s26396_s13 + $0x1368] sm:$0xf] %v1596_v45  ;;  %1599 = vst [vmem:[%s26396_s13 + $0x1370] sm:$0xf] %v1598_v46 }
 0x1b5   : >> { %1601 = vst [vmem:[%s26396_s13 + $0x1378] sm:$0xf] %v1600_v47  ;;  %v1602_v48 = vld [vmem:[%s26400_s14 + $0x2700] sm:$0xf]  ;;  %v1604_v49 = vld [vmem:[%s26400_s14 + $0x2710] sm:$0xf] }
 0x1b6   : >> { %v1606_v50 = vld [vmem:[%s26400_s14 + $0x2720] sm:$0xf]  ;;  %1603 = vst [vmem:[%s26396_s13 + $0x1380] sm:$0xf] %v1602_v48  ;;  %1605 = vst [vmem:[%s26396_s13 + $0x1388] sm:$0xf] %v1604_v49 }
 0x1b7   : >> { %1607 = vst [vmem:[%s26396_s13 + $0x1390] sm:$0xf] %v1606_v50  ;;  %v1608_v51 = vld [vmem:[%s26400_s14 + $0x2730] sm:$0xf]  ;;  %v1610_v52 = vld [vmem:[%s26400_s14 + $0x2740] sm:$0xf] }
 0x1b8   : >> { %v1612_v53 = vld [vmem:[%s26400_s14 + $0x2750] sm:$0xf]  ;;  %1609 = vst [vmem:[%s26396_s13 + $0x1398] sm:$0xf] %v1608_v51  ;;  %1611 = vst [vmem:[%s26396_s13 + $0x13a0] sm:$0xf] %v1610_v52 }
 0x1b9   : >> { %1613 = vst [vmem:[%s26396_s13 + $0x13a8] sm:$0xf] %v1612_v53  ;;  %v1614_v54 = vld [vmem:[%s26400_s14 + $0x2760] sm:$0xf]  ;;  %v1616_v55 = vld [vmem:[%s26400_s14 + $0x2770] sm:$0xf] }
 0x1ba   : >> { %v1618_v56 = vld [vmem:[%s26400_s14 + $0x2780] sm:$0xf]  ;;  %1615 = vst [vmem:[%s26396_s13 + $0x13b0] sm:$0xf] %v1614_v54  ;;  %1617 = vst [vmem:[%s26396_s13 + $0x13b8] sm:$0xf] %v1616_v55 }
 0x1bb   : >> { %1619 = vst [vmem:[%s26396_s13 + $0x13c0] sm:$0xf] %v1618_v56  ;;  %v1620_v57 = vld [vmem:[%s26400_s14 + $0x2790] sm:$0xf]  ;;  %v1622_v58 = vld [vmem:[%s26400_s14 + $0x27a0] sm:$0xf] }
 0x1bc   : >> { %v1624_v59 = vld [vmem:[%s26400_s14 + $0x27b0] sm:$0xf]  ;;  %1621 = vst [vmem:[%s26396_s13 + $0x13c8] sm:$0xf] %v1620_v57  ;;  %1623 = vst [vmem:[%s26396_s13 + $0x13d0] sm:$0xf] %v1622_v58 }
 0x1bd   : >> { %1625 = vst [vmem:[%s26396_s13 + $0x13d8] sm:$0xf] %v1624_v59  ;;  %v1626_v60 = vld [vmem:[%s26400_s14 + $0x27c0] sm:$0xf]  ;;  %v1628_v61 = vld [vmem:[%s26400_s14 + $0x27d0] sm:$0xf] }
 0x1be   : >> { %v1630_v62 = vld [vmem:[%s26400_s14 + $0x27e0] sm:$0xf]  ;;  %1627 = vst [vmem:[%s26396_s13 + $0x13e0] sm:$0xf] %v1626_v60  ;;  %1629 = vst [vmem:[%s26396_s13 + $0x13e8] sm:$0xf] %v1628_v61 }
 0x1bf   : >> { %1631 = vst [vmem:[%s26396_s13 + $0x13f0] sm:$0xf] %v1630_v62  ;;  %v1632_v63 = vld [vmem:[%s26400_s14 + $0x27f0] sm:$0xf]  ;;  %v1634_v0 = vld [vmem:[%s26400_s14 + $0x2800] sm:$0xf] }
 0x1c0   : >> { %v1636_v1 = vld [vmem:[%s26400_s14 + $0x2810] sm:$0xf]  ;;  %1633 = vst [vmem:[%s26396_s13 + $0x13f8] sm:$0xf] %v1632_v63  ;;  %1635 = vst [vmem:[%s26396_s13 + $0x1400] sm:$0xf] %v1634_v0 }
 0x1c1   : >> { %1637 = vst [vmem:[%s26396_s13 + $0x1408] sm:$0xf] %v1636_v1  ;;  %v1638_v2 = vld [vmem:[%s26400_s14 + $0x2820] sm:$0xf]  ;;  %v1640_v3 = vld [vmem:[%s26400_s14 + $0x2830] sm:$0xf] }
 0x1c2   : >> { %v1642_v4 = vld [vmem:[%s26400_s14 + $0x2840] sm:$0xf]  ;;  %1639 = vst [vmem:[%s26396_s13 + $0x1410] sm:$0xf] %v1638_v2  ;;  %1641 = vst [vmem:[%s26396_s13 + $0x1418] sm:$0xf] %v1640_v3 }
 0x1c3   : >> { %1643 = vst [vmem:[%s26396_s13 + $0x1420] sm:$0xf] %v1642_v4  ;;  %v1644_v5 = vld [vmem:[%s26400_s14 + $0x2850] sm:$0xf]  ;;  %v1646_v6 = vld [vmem:[%s26400_s14 + $0x2860] sm:$0xf] }
 0x1c4   : >> { %v1648_v7 = vld [vmem:[%s26400_s14 + $0x2870] sm:$0xf]  ;;  %1645 = vst [vmem:[%s26396_s13 + $0x1428] sm:$0xf] %v1644_v5  ;;  %1647 = vst [vmem:[%s26396_s13 + $0x1430] sm:$0xf] %v1646_v6 }
 0x1c5   : >> { %1649 = vst [vmem:[%s26396_s13 + $0x1438] sm:$0xf] %v1648_v7  ;;  %v1650_v8 = vld [vmem:[%s26400_s14 + $0x2880] sm:$0xf]  ;;  %v1652_v9 = vld [vmem:[%s26400_s14 + $0x2890] sm:$0xf] }
 0x1c6   : >> { %v1654_v10 = vld [vmem:[%s26400_s14 + $0x28a0] sm:$0xf]  ;;  %1651 = vst [vmem:[%s26396_s13 + $0x1440] sm:$0xf] %v1650_v8  ;;  %1653 = vst [vmem:[%s26396_s13 + $0x1448] sm:$0xf] %v1652_v9 }
 0x1c7   : >> { %1655 = vst [vmem:[%s26396_s13 + $0x1450] sm:$0xf] %v1654_v10  ;;  %v1656_v11 = vld [vmem:[%s26400_s14 + $0x28b0] sm:$0xf]  ;;  %v1658_v12 = vld [vmem:[%s26400_s14 + $0x28c0] sm:$0xf] }
 0x1c8   : >> { %v1660_v13 = vld [vmem:[%s26400_s14 + $0x28d0] sm:$0xf]  ;;  %1657 = vst [vmem:[%s26396_s13 + $0x1458] sm:$0xf] %v1656_v11  ;;  %1659 = vst [vmem:[%s26396_s13 + $0x1460] sm:$0xf] %v1658_v12 }
 0x1c9   : >> { %1661 = vst [vmem:[%s26396_s13 + $0x1468] sm:$0xf] %v1660_v13  ;;  %v1662_v14 = vld [vmem:[%s26400_s14 + $0x28e0] sm:$0xf]  ;;  %v1664_v15 = vld [vmem:[%s26400_s14 + $0x28f0] sm:$0xf] }
 0x1ca   : >> { %v1666_v16 = vld [vmem:[%s26400_s14 + $0x2900] sm:$0xf]  ;;  %1663 = vst [vmem:[%s26396_s13 + $0x1470] sm:$0xf] %v1662_v14  ;;  %1665 = vst [vmem:[%s26396_s13 + $0x1478] sm:$0xf] %v1664_v15 }
 0x1cb   : >> { %1667 = vst [vmem:[%s26396_s13 + $0x1480] sm:$0xf] %v1666_v16  ;;  %v1668_v17 = vld [vmem:[%s26400_s14 + $0x2910] sm:$0xf]  ;;  %v1670_v18 = vld [vmem:[%s26400_s14 + $0x2920] sm:$0xf] }
 0x1cc   : >> { %v1672_v19 = vld [vmem:[%s26400_s14 + $0x2930] sm:$0xf]  ;;  %1669 = vst [vmem:[%s26396_s13 + $0x1488] sm:$0xf] %v1668_v17  ;;  %1671 = vst [vmem:[%s26396_s13 + $0x1490] sm:$0xf] %v1670_v18 }
 0x1cd   : >> { %1673 = vst [vmem:[%s26396_s13 + $0x1498] sm:$0xf] %v1672_v19  ;;  %v1674_v20 = vld [vmem:[%s26400_s14 + $0x2940] sm:$0xf]  ;;  %v1676_v21 = vld [vmem:[%s26400_s14 + $0x2950] sm:$0xf] }
 0x1ce   : >> { %v1678_v22 = vld [vmem:[%s26400_s14 + $0x2960] sm:$0xf]  ;;  %1675 = vst [vmem:[%s26396_s13 + $0x14a0] sm:$0xf] %v1674_v20  ;;  %1677 = vst [vmem:[%s26396_s13 + $0x14a8] sm:$0xf] %v1676_v21 }
 0x1cf   : >> { %1679 = vst [vmem:[%s26396_s13 + $0x14b0] sm:$0xf] %v1678_v22  ;;  %v1680_v23 = vld [vmem:[%s26400_s14 + $0x2970] sm:$0xf]  ;;  %v1682_v24 = vld [vmem:[%s26400_s14 + $0x2980] sm:$0xf] }
 0x1d0   : >> { %v1684_v25 = vld [vmem:[%s26400_s14 + $0x2990] sm:$0xf]  ;;  %1681 = vst [vmem:[%s26396_s13 + $0x14b8] sm:$0xf] %v1680_v23  ;;  %1683 = vst [vmem:[%s26396_s13 + $0x14c0] sm:$0xf] %v1682_v24 }
 0x1d1   : >> { %1685 = vst [vmem:[%s26396_s13 + $0x14c8] sm:$0xf] %v1684_v25  ;;  %v1686_v26 = vld [vmem:[%s26400_s14 + $0x29a0] sm:$0xf]  ;;  %v1688_v27 = vld [vmem:[%s26400_s14 + $0x29b0] sm:$0xf] }
 0x1d2   : >> { %v1690_v28 = vld [vmem:[%s26400_s14 + $0x29c0] sm:$0xf]  ;;  %1687 = vst [vmem:[%s26396_s13 + $0x14d0] sm:$0xf] %v1686_v26  ;;  %1689 = vst [vmem:[%s26396_s13 + $0x14d8] sm:$0xf] %v1688_v27 }
 0x1d3   : >> { %1691 = vst [vmem:[%s26396_s13 + $0x14e0] sm:$0xf] %v1690_v28  ;;  %v1692_v29 = vld [vmem:[%s26400_s14 + $0x29d0] sm:$0xf]  ;;  %v1694_v30 = vld [vmem:[%s26400_s14 + $0x29e0] sm:$0xf] }
 0x1d4   : >> { %v1696_v31 = vld [vmem:[%s26400_s14 + $0x29f0] sm:$0xf]  ;;  %1693 = vst [vmem:[%s26396_s13 + $0x14e8] sm:$0xf] %v1692_v29  ;;  %1695 = vst [vmem:[%s26396_s13 + $0x14f0] sm:$0xf] %v1694_v30 }
 0x1d5   : >> { %1697 = vst [vmem:[%s26396_s13 + $0x14f8] sm:$0xf] %v1696_v31  ;;  %v1698_v32 = vld [vmem:[%s26400_s14 + $0x2a00] sm:$0xf]  ;;  %v1700_v33 = vld [vmem:[%s26400_s14 + $0x2a10] sm:$0xf] }
 0x1d6   : >> { %v1702_v34 = vld [vmem:[%s26400_s14 + $0x2a20] sm:$0xf]  ;;  %1699 = vst [vmem:[%s26396_s13 + $0x1500] sm:$0xf] %v1698_v32  ;;  %1701 = vst [vmem:[%s26396_s13 + $0x1508] sm:$0xf] %v1700_v33 }
 0x1d7   : >> { %1703 = vst [vmem:[%s26396_s13 + $0x1510] sm:$0xf] %v1702_v34  ;;  %v1704_v35 = vld [vmem:[%s26400_s14 + $0x2a30] sm:$0xf]  ;;  %v1706_v36 = vld [vmem:[%s26400_s14 + $0x2a40] sm:$0xf] }
 0x1d8   : >> { %v1708_v37 = vld [vmem:[%s26400_s14 + $0x2a50] sm:$0xf]  ;;  %1705 = vst [vmem:[%s26396_s13 + $0x1518] sm:$0xf] %v1704_v35  ;;  %1707 = vst [vmem:[%s26396_s13 + $0x1520] sm:$0xf] %v1706_v36 }
 0x1d9   : >> { %1709 = vst [vmem:[%s26396_s13 + $0x1528] sm:$0xf] %v1708_v37  ;;  %v1710_v38 = vld [vmem:[%s26400_s14 + $0x2a60] sm:$0xf]  ;;  %v1712_v39 = vld [vmem:[%s26400_s14 + $0x2a70] sm:$0xf] }
 0x1da   : >> { %v1714_v40 = vld [vmem:[%s26400_s14 + $0x2a80] sm:$0xf]  ;;  %1711 = vst [vmem:[%s26396_s13 + $0x1530] sm:$0xf] %v1710_v38  ;;  %1713 = vst [vmem:[%s26396_s13 + $0x1538] sm:$0xf] %v1712_v39 }
 0x1db   : >> { %1715 = vst [vmem:[%s26396_s13 + $0x1540] sm:$0xf] %v1714_v40  ;;  %v1716_v41 = vld [vmem:[%s26400_s14 + $0x2a90] sm:$0xf]  ;;  %v1718_v42 = vld [vmem:[%s26400_s14 + $0x2aa0] sm:$0xf] }
 0x1dc   : >> { %v1720_v43 = vld [vmem:[%s26400_s14 + $0x2ab0] sm:$0xf]  ;;  %1717 = vst [vmem:[%s26396_s13 + $0x1548] sm:$0xf] %v1716_v41  ;;  %1719 = vst [vmem:[%s26396_s13 + $0x1550] sm:$0xf] %v1718_v42 }
 0x1dd   : >> { %1721 = vst [vmem:[%s26396_s13 + $0x1558] sm:$0xf] %v1720_v43  ;;  %v1722_v44 = vld [vmem:[%s26400_s14 + $0x2ac0] sm:$0xf]  ;;  %v1724_v45 = vld [vmem:[%s26400_s14 + $0x2ad0] sm:$0xf] }
 0x1de   : >> { %v1726_v46 = vld [vmem:[%s26400_s14 + $0x2ae0] sm:$0xf]  ;;  %1723 = vst [vmem:[%s26396_s13 + $0x1560] sm:$0xf] %v1722_v44  ;;  %1725 = vst [vmem:[%s26396_s13 + $0x1568] sm:$0xf] %v1724_v45 }
 0x1df   : >> { %1727 = vst [vmem:[%s26396_s13 + $0x1570] sm:$0xf] %v1726_v46  ;;  %v1728_v47 = vld [vmem:[%s26400_s14 + $0x2af0] sm:$0xf]  ;;  %v1730_v48 = vld [vmem:[%s26400_s14 + $0x2b00] sm:$0xf] }
 0x1e0   : >> { %v1732_v49 = vld [vmem:[%s26400_s14 + $0x2b10] sm:$0xf]  ;;  %1729 = vst [vmem:[%s26396_s13 + $0x1578] sm:$0xf] %v1728_v47  ;;  %1731 = vst [vmem:[%s26396_s13 + $0x1580] sm:$0xf] %v1730_v48 }
 0x1e1   : >> { %1733 = vst [vmem:[%s26396_s13 + $0x1588] sm:$0xf] %v1732_v49  ;;  %v1734_v50 = vld [vmem:[%s26400_s14 + $0x2b20] sm:$0xf]  ;;  %v1736_v51 = vld [vmem:[%s26400_s14 + $0x2b30] sm:$0xf] }
 0x1e2   : >> { %v1738_v52 = vld [vmem:[%s26400_s14 + $0x2b40] sm:$0xf]  ;;  %1735 = vst [vmem:[%s26396_s13 + $0x1590] sm:$0xf] %v1734_v50  ;;  %1737 = vst [vmem:[%s26396_s13 + $0x1598] sm:$0xf] %v1736_v51 }
 0x1e3   : >> { %1739 = vst [vmem:[%s26396_s13 + $0x15a0] sm:$0xf] %v1738_v52  ;;  %v1740_v53 = vld [vmem:[%s26400_s14 + $0x2b50] sm:$0xf]  ;;  %v1742_v54 = vld [vmem:[%s26400_s14 + $0x2b60] sm:$0xf] }
 0x1e4   : >> { %v1744_v55 = vld [vmem:[%s26400_s14 + $0x2b70] sm:$0xf]  ;;  %1741 = vst [vmem:[%s26396_s13 + $0x15a8] sm:$0xf] %v1740_v53  ;;  %1743 = vst [vmem:[%s26396_s13 + $0x15b0] sm:$0xf] %v1742_v54 }
 0x1e5   : >> { %1745 = vst [vmem:[%s26396_s13 + $0x15b8] sm:$0xf] %v1744_v55  ;;  %v1746_v56 = vld [vmem:[%s26400_s14 + $0x2b80] sm:$0xf]  ;;  %v1748_v57 = vld [vmem:[%s26400_s14 + $0x2b90] sm:$0xf] }
 0x1e6   : >> { %v1750_v58 = vld [vmem:[%s26400_s14 + $0x2ba0] sm:$0xf]  ;;  %1747 = vst [vmem:[%s26396_s13 + $0x15c0] sm:$0xf] %v1746_v56  ;;  %1749 = vst [vmem:[%s26396_s13 + $0x15c8] sm:$0xf] %v1748_v57 }
 0x1e7   : >> { %1751 = vst [vmem:[%s26396_s13 + $0x15d0] sm:$0xf] %v1750_v58  ;;  %v1752_v59 = vld [vmem:[%s26400_s14 + $0x2bb0] sm:$0xf]  ;;  %v1754_v60 = vld [vmem:[%s26400_s14 + $0x2bc0] sm:$0xf] }
 0x1e8   : >> { %v1756_v61 = vld [vmem:[%s26400_s14 + $0x2bd0] sm:$0xf]  ;;  %1753 = vst [vmem:[%s26396_s13 + $0x15d8] sm:$0xf] %v1752_v59  ;;  %1755 = vst [vmem:[%s26396_s13 + $0x15e0] sm:$0xf] %v1754_v60 }
 0x1e9   : >> { %1757 = vst [vmem:[%s26396_s13 + $0x15e8] sm:$0xf] %v1756_v61  ;;  %v1758_v62 = vld [vmem:[%s26400_s14 + $0x2be0] sm:$0xf]  ;;  %v1760_v63 = vld [vmem:[%s26400_s14 + $0x2bf0] sm:$0xf] }
 0x1ea   : >> { %v1762_v0 = vld [vmem:[%s26400_s14 + $0x2c00] sm:$0xf]  ;;  %1759 = vst [vmem:[%s26396_s13 + $0x15f0] sm:$0xf] %v1758_v62  ;;  %1761 = vst [vmem:[%s26396_s13 + $0x15f8] sm:$0xf] %v1760_v63 }
 0x1eb   : >> { %1763 = vst [vmem:[%s26396_s13 + $0x1600] sm:$0xf] %v1762_v0  ;;  %v1764_v1 = vld [vmem:[%s26400_s14 + $0x2c10] sm:$0xf]  ;;  %v1766_v2 = vld [vmem:[%s26400_s14 + $0x2c20] sm:$0xf] }
 0x1ec   : >> { %v1768_v3 = vld [vmem:[%s26400_s14 + $0x2c30] sm:$0xf]  ;;  %1765 = vst [vmem:[%s26396_s13 + $0x1608] sm:$0xf] %v1764_v1  ;;  %1767 = vst [vmem:[%s26396_s13 + $0x1610] sm:$0xf] %v1766_v2 }
 0x1ed   : >> { %1769 = vst [vmem:[%s26396_s13 + $0x1618] sm:$0xf] %v1768_v3  ;;  %v1770_v4 = vld [vmem:[%s26400_s14 + $0x2c40] sm:$0xf]  ;;  %v1772_v5 = vld [vmem:[%s26400_s14 + $0x2c50] sm:$0xf] }
 0x1ee   : >> { %v1774_v6 = vld [vmem:[%s26400_s14 + $0x2c60] sm:$0xf]  ;;  %1771 = vst [vmem:[%s26396_s13 + $0x1620] sm:$0xf] %v1770_v4  ;;  %1773 = vst [vmem:[%s26396_s13 + $0x1628] sm:$0xf] %v1772_v5 }
 0x1ef   : >> { %1775 = vst [vmem:[%s26396_s13 + $0x1630] sm:$0xf] %v1774_v6  ;;  %v1776_v7 = vld [vmem:[%s26400_s14 + $0x2c70] sm:$0xf]  ;;  %v1778_v8 = vld [vmem:[%s26400_s14 + $0x2c80] sm:$0xf] }
 0x1f0   : >> { %v1780_v9 = vld [vmem:[%s26400_s14 + $0x2c90] sm:$0xf]  ;;  %1777 = vst [vmem:[%s26396_s13 + $0x1638] sm:$0xf] %v1776_v7  ;;  %1779 = vst [vmem:[%s26396_s13 + $0x1640] sm:$0xf] %v1778_v8 }
 0x1f1   : >> { %1781 = vst [vmem:[%s26396_s13 + $0x1648] sm:$0xf] %v1780_v9  ;;  %v1782_v10 = vld [vmem:[%s26400_s14 + $0x2ca0] sm:$0xf]  ;;  %v1784_v11 = vld [vmem:[%s26400_s14 + $0x2cb0] sm:$0xf] }
 0x1f2   : >> { %v1786_v12 = vld [vmem:[%s26400_s14 + $0x2cc0] sm:$0xf]  ;;  %1783 = vst [vmem:[%s26396_s13 + $0x1650] sm:$0xf] %v1782_v10  ;;  %1785 = vst [vmem:[%s26396_s13 + $0x1658] sm:$0xf] %v1784_v11 }
 0x1f3   : >> { %1787 = vst [vmem:[%s26396_s13 + $0x1660] sm:$0xf] %v1786_v12  ;;  %v1788_v13 = vld [vmem:[%s26400_s14 + $0x2cd0] sm:$0xf]  ;;  %v1790_v14 = vld [vmem:[%s26400_s14 + $0x2ce0] sm:$0xf] }
 0x1f4   : >> { %v1792_v15 = vld [vmem:[%s26400_s14 + $0x2cf0] sm:$0xf]  ;;  %1789 = vst [vmem:[%s26396_s13 + $0x1668] sm:$0xf] %v1788_v13  ;;  %1791 = vst [vmem:[%s26396_s13 + $0x1670] sm:$0xf] %v1790_v14 }
 0x1f5   : >> { %1793 = vst [vmem:[%s26396_s13 + $0x1678] sm:$0xf] %v1792_v15  ;;  %v1794_v16 = vld [vmem:[%s26400_s14 + $0x2d00] sm:$0xf]  ;;  %v1796_v17 = vld [vmem:[%s26400_s14 + $0x2d10] sm:$0xf] }
 0x1f6   : >> { %v1798_v18 = vld [vmem:[%s26400_s14 + $0x2d20] sm:$0xf]  ;;  %1795 = vst [vmem:[%s26396_s13 + $0x1680] sm:$0xf] %v1794_v16  ;;  %1797 = vst [vmem:[%s26396_s13 + $0x1688] sm:$0xf] %v1796_v17 }
 0x1f7   : >> { %1799 = vst [vmem:[%s26396_s13 + $0x1690] sm:$0xf] %v1798_v18  ;;  %v1800_v19 = vld [vmem:[%s26400_s14 + $0x2d30] sm:$0xf]  ;;  %v1802_v20 = vld [vmem:[%s26400_s14 + $0x2d40] sm:$0xf] }
 0x1f8   : >> { %v1804_v21 = vld [vmem:[%s26400_s14 + $0x2d50] sm:$0xf]  ;;  %1801 = vst [vmem:[%s26396_s13 + $0x1698] sm:$0xf] %v1800_v19  ;;  %1803 = vst [vmem:[%s26396_s13 + $0x16a0] sm:$0xf] %v1802_v20 }
 0x1f9   : >> { %1805 = vst [vmem:[%s26396_s13 + $0x16a8] sm:$0xf] %v1804_v21  ;;  %v1806_v22 = vld [vmem:[%s26400_s14 + $0x2d60] sm:$0xf]  ;;  %v1808_v23 = vld [vmem:[%s26400_s14 + $0x2d70] sm:$0xf] }
 0x1fa   : >> { %v1810_v24 = vld [vmem:[%s26400_s14 + $0x2d80] sm:$0xf]  ;;  %1807 = vst [vmem:[%s26396_s13 + $0x16b0] sm:$0xf] %v1806_v22  ;;  %1809 = vst [vmem:[%s26396_s13 + $0x16b8] sm:$0xf] %v1808_v23 }
 0x1fb   : >> { %1811 = vst [vmem:[%s26396_s13 + $0x16c0] sm:$0xf] %v1810_v24  ;;  %v1812_v25 = vld [vmem:[%s26400_s14 + $0x2d90] sm:$0xf]  ;;  %v1814_v26 = vld [vmem:[%s26400_s14 + $0x2da0] sm:$0xf] }
 0x1fc   : >> { %v1816_v27 = vld [vmem:[%s26400_s14 + $0x2db0] sm:$0xf]  ;;  %1813 = vst [vmem:[%s26396_s13 + $0x16c8] sm:$0xf] %v1812_v25  ;;  %1815 = vst [vmem:[%s26396_s13 + $0x16d0] sm:$0xf] %v1814_v26 }
 0x1fd   : >> { %1817 = vst [vmem:[%s26396_s13 + $0x16d8] sm:$0xf] %v1816_v27  ;;  %v1818_v28 = vld [vmem:[%s26400_s14 + $0x2dc0] sm:$0xf]  ;;  %v1820_v29 = vld [vmem:[%s26400_s14 + $0x2dd0] sm:$0xf] }
 0x1fe   : >> { %v1822_v30 = vld [vmem:[%s26400_s14 + $0x2de0] sm:$0xf]  ;;  %1819 = vst [vmem:[%s26396_s13 + $0x16e0] sm:$0xf] %v1818_v28  ;;  %1821 = vst [vmem:[%s26396_s13 + $0x16e8] sm:$0xf] %v1820_v29 }
 0x1ff   : >> { %1823 = vst [vmem:[%s26396_s13 + $0x16f0] sm:$0xf] %v1822_v30  ;;  %v1824_v31 = vld [vmem:[%s26400_s14 + $0x2df0] sm:$0xf]  ;;  %v1826_v32 = vld [vmem:[%s26400_s14 + $0x2e00] sm:$0xf] }
 0x200   : >> { %v1828_v33 = vld [vmem:[%s26400_s14 + $0x2e10] sm:$0xf]  ;;  %1825 = vst [vmem:[%s26396_s13 + $0x16f8] sm:$0xf] %v1824_v31  ;;  %1827 = vst [vmem:[%s26396_s13 + $0x1700] sm:$0xf] %v1826_v32 }
 0x201   : >> { %1829 = vst [vmem:[%s26396_s13 + $0x1708] sm:$0xf] %v1828_v33  ;;  %v1830_v34 = vld [vmem:[%s26400_s14 + $0x2e20] sm:$0xf]  ;;  %v1832_v35 = vld [vmem:[%s26400_s14 + $0x2e30] sm:$0xf] }
 0x202   : >> { %v1834_v36 = vld [vmem:[%s26400_s14 + $0x2e40] sm:$0xf]  ;;  %1831 = vst [vmem:[%s26396_s13 + $0x1710] sm:$0xf] %v1830_v34  ;;  %1833 = vst [vmem:[%s26396_s13 + $0x1718] sm:$0xf] %v1832_v35 }
 0x203   : >> { %1835 = vst [vmem:[%s26396_s13 + $0x1720] sm:$0xf] %v1834_v36  ;;  %v1836_v37 = vld [vmem:[%s26400_s14 + $0x2e50] sm:$0xf]  ;;  %v1838_v38 = vld [vmem:[%s26400_s14 + $0x2e60] sm:$0xf] }
 0x204   : >> { %v1840_v39 = vld [vmem:[%s26400_s14 + $0x2e70] sm:$0xf]  ;;  %1837 = vst [vmem:[%s26396_s13 + $0x1728] sm:$0xf] %v1836_v37  ;;  %1839 = vst [vmem:[%s26396_s13 + $0x1730] sm:$0xf] %v1838_v38 }
 0x205   : >> { %1841 = vst [vmem:[%s26396_s13 + $0x1738] sm:$0xf] %v1840_v39  ;;  %v1842_v40 = vld [vmem:[%s26400_s14 + $0x2e80] sm:$0xf]  ;;  %v1844_v41 = vld [vmem:[%s26400_s14 + $0x2e90] sm:$0xf] }
 0x206   : >> { %v1846_v42 = vld [vmem:[%s26400_s14 + $0x2ea0] sm:$0xf]  ;;  %1843 = vst [vmem:[%s26396_s13 + $0x1740] sm:$0xf] %v1842_v40  ;;  %1845 = vst [vmem:[%s26396_s13 + $0x1748] sm:$0xf] %v1844_v41 }
 0x207   : >> { %1847 = vst [vmem:[%s26396_s13 + $0x1750] sm:$0xf] %v1846_v42  ;;  %v1848_v43 = vld [vmem:[%s26400_s14 + $0x2eb0] sm:$0xf]  ;;  %v1850_v44 = vld [vmem:[%s26400_s14 + $0x2ec0] sm:$0xf] }
 0x208   : >> { %v1852_v45 = vld [vmem:[%s26400_s14 + $0x2ed0] sm:$0xf]  ;;  %1849 = vst [vmem:[%s26396_s13 + $0x1758] sm:$0xf] %v1848_v43  ;;  %1851 = vst [vmem:[%s26396_s13 + $0x1760] sm:$0xf] %v1850_v44 }
 0x209   : >> { %1853 = vst [vmem:[%s26396_s13 + $0x1768] sm:$0xf] %v1852_v45  ;;  %v1854_v46 = vld [vmem:[%s26400_s14 + $0x2ee0] sm:$0xf]  ;;  %v1856_v47 = vld [vmem:[%s26400_s14 + $0x2ef0] sm:$0xf] }
 0x20a   : >> { %v1858_v48 = vld [vmem:[%s26400_s14 + $0x2f00] sm:$0xf]  ;;  %1855 = vst [vmem:[%s26396_s13 + $0x1770] sm:$0xf] %v1854_v46  ;;  %1857 = vst [vmem:[%s26396_s13 + $0x1778] sm:$0xf] %v1856_v47 }
 0x20b   : >> { %1859 = vst [vmem:[%s26396_s13 + $0x1780] sm:$0xf] %v1858_v48  ;;  %v1860_v49 = vld [vmem:[%s26400_s14 + $0x2f10] sm:$0xf]  ;;  %v1862_v50 = vld [vmem:[%s26400_s14 + $0x2f20] sm:$0xf] }
 0x20c   : >> { %v1864_v51 = vld [vmem:[%s26400_s14 + $0x2f30] sm:$0xf]  ;;  %1861 = vst [vmem:[%s26396_s13 + $0x1788] sm:$0xf] %v1860_v49  ;;  %1863 = vst [vmem:[%s26396_s13 + $0x1790] sm:$0xf] %v1862_v50 }
 0x20d   : >> { %1865 = vst [vmem:[%s26396_s13 + $0x1798] sm:$0xf] %v1864_v51  ;;  %v1866_v52 = vld [vmem:[%s26400_s14 + $0x2f40] sm:$0xf]  ;;  %v1868_v53 = vld [vmem:[%s26400_s14 + $0x2f50] sm:$0xf] }
 0x20e   : >> { %v1870_v54 = vld [vmem:[%s26400_s14 + $0x2f60] sm:$0xf]  ;;  %1867 = vst [vmem:[%s26396_s13 + $0x17a0] sm:$0xf] %v1866_v52  ;;  %1869 = vst [vmem:[%s26396_s13 + $0x17a8] sm:$0xf] %v1868_v53 }
 0x20f   : >> { %1871 = vst [vmem:[%s26396_s13 + $0x17b0] sm:$0xf] %v1870_v54  ;;  %v1872_v55 = vld [vmem:[%s26400_s14 + $0x2f70] sm:$0xf]  ;;  %v1874_v56 = vld [vmem:[%s26400_s14 + $0x2f80] sm:$0xf] }
 0x210   : >> { %v1876_v57 = vld [vmem:[%s26400_s14 + $0x2f90] sm:$0xf]  ;;  %1873 = vst [vmem:[%s26396_s13 + $0x17b8] sm:$0xf] %v1872_v55  ;;  %1875 = vst [vmem:[%s26396_s13 + $0x17c0] sm:$0xf] %v1874_v56 }
 0x211   : >> { %1877 = vst [vmem:[%s26396_s13 + $0x17c8] sm:$0xf] %v1876_v57  ;;  %v1878_v58 = vld [vmem:[%s26400_s14 + $0x2fa0] sm:$0xf]  ;;  %v1880_v59 = vld [vmem:[%s26400_s14 + $0x2fb0] sm:$0xf] }
 0x212   : >> { %v1882_v60 = vld [vmem:[%s26400_s14 + $0x2fc0] sm:$0xf]  ;;  %1879 = vst [vmem:[%s26396_s13 + $0x17d0] sm:$0xf] %v1878_v58  ;;  %1881 = vst [vmem:[%s26396_s13 + $0x17d8] sm:$0xf] %v1880_v59 }
 0x213   : >> { %1883 = vst [vmem:[%s26396_s13 + $0x17e0] sm:$0xf] %v1882_v60  ;;  %v1884_v61 = vld [vmem:[%s26400_s14 + $0x2fd0] sm:$0xf]  ;;  %v1886_v62 = vld [vmem:[%s26400_s14 + $0x2fe0] sm:$0xf] }
 0x214   : >> { %v1888_v63 = vld [vmem:[%s26400_s14 + $0x2ff0] sm:$0xf]  ;;  %1885 = vst [vmem:[%s26396_s13 + $0x17e8] sm:$0xf] %v1884_v61  ;;  %1887 = vst [vmem:[%s26396_s13 + $0x17f0] sm:$0xf] %v1886_v62 }
 0x215   : >> { %1889 = vst [vmem:[%s26396_s13 + $0x17f8] sm:$0xf] %v1888_v63  ;;  %v1890_v0 = vld [vmem:[%s26400_s14 + $0x3000] sm:$0xf]  ;;  %v1892_v1 = vld [vmem:[%s26400_s14 + $0x3010] sm:$0xf] }
 0x216   : >> { %v1894_v2 = vld [vmem:[%s26400_s14 + $0x3020] sm:$0xf]  ;;  %1891 = vst [vmem:[%s26396_s13 + $0x1800] sm:$0xf] %v1890_v0  ;;  %1893 = vst [vmem:[%s26396_s13 + $0x1808] sm:$0xf] %v1892_v1 }
 0x217   : >> { %1895 = vst [vmem:[%s26396_s13 + $0x1810] sm:$0xf] %v1894_v2  ;;  %v1896_v3 = vld [vmem:[%s26400_s14 + $0x3030] sm:$0xf]  ;;  %v1898_v4 = vld [vmem:[%s26400_s14 + $0x3040] sm:$0xf] }
 0x218   : >> { %v1900_v5 = vld [vmem:[%s26400_s14 + $0x3050] sm:$0xf]  ;;  %1897 = vst [vmem:[%s26396_s13 + $0x1818] sm:$0xf] %v1896_v3  ;;  %1899 = vst [vmem:[%s26396_s13 + $0x1820] sm:$0xf] %v1898_v4 }
 0x219   : >> { %1901 = vst [vmem:[%s26396_s13 + $0x1828] sm:$0xf] %v1900_v5  ;;  %v1902_v6 = vld [vmem:[%s26400_s14 + $0x3060] sm:$0xf]  ;;  %v1904_v7 = vld [vmem:[%s26400_s14 + $0x3070] sm:$0xf] }
 0x21a   : >> { %v1906_v8 = vld [vmem:[%s26400_s14 + $0x3080] sm:$0xf]  ;;  %1903 = vst [vmem:[%s26396_s13 + $0x1830] sm:$0xf] %v1902_v6  ;;  %1905 = vst [vmem:[%s26396_s13 + $0x1838] sm:$0xf] %v1904_v7 }
 0x21b   : >> { %1907 = vst [vmem:[%s26396_s13 + $0x1840] sm:$0xf] %v1906_v8  ;;  %v1908_v9 = vld [vmem:[%s26400_s14 + $0x3090] sm:$0xf]  ;;  %v1910_v10 = vld [vmem:[%s26400_s14 + $0x30a0] sm:$0xf] }
 0x21c   : >> { %v1912_v11 = vld [vmem:[%s26400_s14 + $0x30b0] sm:$0xf]  ;;  %1909 = vst [vmem:[%s26396_s13 + $0x1848] sm:$0xf] %v1908_v9  ;;  %1911 = vst [vmem:[%s26396_s13 + $0x1850] sm:$0xf] %v1910_v10 }
 0x21d   : >> { %1913 = vst [vmem:[%s26396_s13 + $0x1858] sm:$0xf] %v1912_v11  ;;  %v1914_v12 = vld [vmem:[%s26400_s14 + $0x30c0] sm:$0xf]  ;;  %v1916_v13 = vld [vmem:[%s26400_s14 + $0x30d0] sm:$0xf] }
 0x21e   : >> { %v1918_v14 = vld [vmem:[%s26400_s14 + $0x30e0] sm:$0xf]  ;;  %1915 = vst [vmem:[%s26396_s13 + $0x1860] sm:$0xf] %v1914_v12  ;;  %1917 = vst [vmem:[%s26396_s13 + $0x1868] sm:$0xf] %v1916_v13 }
 0x21f   : >> { %1919 = vst [vmem:[%s26396_s13 + $0x1870] sm:$0xf] %v1918_v14  ;;  %v1920_v15 = vld [vmem:[%s26400_s14 + $0x30f0] sm:$0xf]  ;;  %s30820_s22 = smov (%p1923_p5, %s1922_s22), 0  ;;  %p347_p6 = scmp.ge.s32.totalorder %s350_s16, 2  }
 0x220   : >> { %1921 = vst [vmem:[%s26396_s13 + $0x1878] sm:$0xf] %v1920_v15  ;;  %s19693_s23 = sshll.u32 %s30820_s22, 2  ;;  %s30815_s15 = smov %s30820_s22 }
 0x221   : >> { %s1927_s14 = scalar_lea.vmem %s26516_s30, %s19693_s23   ;;  %s1928_s13 = scalar_lea.vmem %s334_s12, %s19693_s23 [#allocation4]  }
 0x222   : > { %349 = sbr.rel (!%p347_p6) target bundleno = 21 (0x15), region = 227 }
 0x229 PF: > { %p19695_p7 = scmp.ge.s32.totalorder %s26392_s19, 1  ;;  %p6710_p8 = scmp.lt.s32.totalorder %s26392_s19, 3 }
 0x22b   : > { %p6711_p9 = pnand %p19695_p7, %p6710_p8 }
 0x22c   : > { %s6717_s25 = sand.u32 (!%p6711_p9), 1, %s26384_s17   ;;  %s19696_s26 = sshll.u32 (!%p6711_p9), %s19687_s20, 1  ;;  %v28131_v16 = vld [vmem:[%s30802_s1] sm:$0xf] (!%p6711_p9)  ;;  %v28136_v17 = vld [vmem:[%s30802_s1 + $0x4] sm:$0xf] (!%p6711_p9) }
 0x22d   : > { %6714 = sbr.rel (%p6711_p9) target bundleno = 3241 (0xca9), region = 112  ;;  %p6758_p10 = scmp.lt.s32.totalorder (!%p6711_p9), %s19696_s26, 3  ;;  %v28143_v18 = vld [vmem:[%s30802_s1 + $0x8] sm:$0xf] (!%p6711_p9)  ;;  %v28148_v19 = vld [vmem:[%s30802_s1 + $0xc] sm:$0xf] (!%p6711_p9) }
 0x22e   : > { %s28138_s27 = smul.u32 (!%p6711_p9), 6272, %s6717_s25  ;;  %v28153_v20 = vld [vmem:[%s30802_s1 + $0x10] sm:$0xf] (!%p6711_p9)  ;;  %v28158_v21 = vld [vmem:[%s30802_s1 + $0x14] sm:$0xf] (!%p6711_p9)  ;;  %s28221_s14 = smov (!%p6711_p9), 0  }
 0x22f   : > { %v28163_v22 = vld [vmem:[%s30802_s1 + $0x18] sm:$0xf] (!%p6711_p9)  ;;  %v28168_v23 = vld [vmem:[%s30802_s1 + $0x1c] sm:$0xf] (!%p6711_p9)  ;;  %v28173_v24 = vld [vmem:[%s30802_s1 + $0x20] sm:$0xf] (!%p6711_p9) }
 0x230   : > { %v28178_v25 = vld [vmem:[%s30802_s1 + $0x24] sm:$0xf] (!%p6711_p9)  ;;  %v28183_v26 = vld [vmem:[%s30802_s1 + $0x28] sm:$0xf] (!%p6711_p9)  ;;  %v28188_v27 = vld [vmem:[%s30802_s1 + $0x2c] sm:$0xf] (!%p6711_p9) }
 0x231   : > { %v28193_v28 = vld [vmem:[%s30802_s1 + $0x30] sm:$0xf] (!%p6711_p9)  ;;  %v28198_v29 = vld [vmem:[%s30802_s1 + $0x34] sm:$0xf] (!%p6711_p9)  ;;  %v28203_v30 = vld [vmem:[%s30802_s1 + $0x38] sm:$0xf] (!%p6711_p9) }
 0x232   : > { %v28208_v31 = vld [vmem:[%s30802_s1 + $0x3c] sm:$0xf] (!%p6711_p9)  ;;  %v28218_v32 = vld [vmem:[%s30803_s2] ss:$0 sm:$0xff] (!%p6711_p9) }
 0x234   : > { %s30822_s26 = smov (!%p6758_p10, %s19696_s26), 3 }
 0x235   : > { %s19697_s28 = sshll.u32 %s30822_s26, 3  ;;  %s6719_s26 = scalar_lea.vmem [#allocation4], %s28138_s27 }
 0x236   : > { %s28213_s19 = scalar_lea.vmem %s30812_s11, %s19697_s28 }
 0x237 LB: >> { %v19729_v33 = vcombine.low %v28131_v16, %v28136_v17  ;;  %v19730_v34 = vcombine.low %v28143_v18, %v28148_v19  ;;  %s21100_s15 = smul.u32 448, %s26412_s14  ;;  %v19731_v35 = vcombine.low %v28153_v20, %v28158_v21  ;;  %v19732_v38 = vcombine.low %v28163_v22, %v28168_v23  ;;  %s26412_s14 = sphi %s28221_s14, %s6786_s14  }
 0x238   : >> { %v19733_v39 = vcombine.low %v28173_v24, %v28178_v25  ;;  %v19734_v40 = vcombine.low %v28183_v26, %v28188_v27  ;;  %v19735_v41 = vcombine.low %v28193_v28, %v28198_v29  ;;  %v19736_v42 = vcombine.low %v28203_v30, %v28208_v31  ;;  %s21101_s25 = smul.u32 112, %s26412_s14  ;;  %s6786_s14 = sadd.s32 1, %s26412_s14  }
 0x239   : >> { %22319 = vmatprep.subr.bf16.mxu0 %v19729_v33  ;;  %22391 = vmatprep.subr.bf16.mxu1 %v19729_v33  ;;  %s28235_s23 = scalar_lea.vmem %s6719_s26, %s21100_s15 [#allocation4]  ;;  %p6783_p11 = scmp.ge.s32.totalorder %s6786_s14, 14  }
 0x23a   : >> { %22320 = vmatpush3.bf16.msra.mxu0 %v19729_v33  ;;  %22392 = vmatpush3.bf16.msra.mxu1 %v19729_v33  ;;  %v25839_v36 = vld [vmem:[%s28235_s23] sm:$0xff]   ;;  %v25841_v43 = vld [vmem:[%s28235_s23 + $0x8] sm:$0xff]   ;;  %v25843_v45 = vld [vmem:[%s28235_s23 + $0x10] sm:$0xff]   ;;  %s28320_s28 = scalar_lea.vmem [#allocation2], %s21101_s25  ;;  %s28440_s22 = smov (%p6783_p11), 0  }
 0x23b   : >> { %22321 = vmatprep.subr.bf16.mxu0 %v19730_v34  ;;  %22393 = vmatprep.subr.bf16.mxu1 %v19730_v34  ;;  %v25840_v37 = vld [vmem:[%s28235_s23 + $0xe0] sm:$0xff]   ;;  %v25842_v44 = vld [vmem:[%s28235_s23 + $0xe8] sm:$0xff]   ;;  %v25844_v46 = vld [vmem:[%s28235_s23 + $0xf0] sm:$0xff]  }
 0x23c   : >> { %22335 = vmatprep.mubr.bf16.mxu0 %v25839_v36  ;;  %22407 = vmatprep.mubr.bf16.mxu1 %v25840_v37  ;;  %v25845_v47 = vld [vmem:[%s28235_s23 + $0x18] sm:$0xff]   ;;  %v25847_v49 = vld [vmem:[%s28235_s23 + $0x20] sm:$0xff]   ;;  %v25849_v51 = vld [vmem:[%s28235_s23 + $0x28] sm:$0xff]  }
 0x23d   : >> { %v25846_v48 = vld [vmem:[%s28235_s23 + $0xf8] sm:$0xff]   ;;  %v25848_v50 = vld [vmem:[%s28235_s23 + $0x100] sm:$0xff]   ;;  %v25850_v52 = vld [vmem:[%s28235_s23 + $0x108] sm:$0xff]  }
 0x23e   : >> { %22322 = vmatpush3.bf16.msra.mxu0 %v19730_v34  ;;  %22394 = vmatpush3.bf16.msra.mxu1 %v19730_v34  ;;  %v25851_v53 = vld [vmem:[%s28235_s23 + $0x30] sm:$0xff]   ;;  %v25853_v55 = vld [vmem:[%s28235_s23 + $0x38] sm:$0xff]   ;;  %v25855_v57 = vld [vmem:[%s28235_s23 + $0x40] sm:$0xff]  }
 0x23f   : >> { %22323 = vmatprep.subr.bf16.mxu0 %v19731_v35  ;;  %22395 = vmatprep.subr.bf16.mxu1 %v19731_v35  ;;  %v25852_v54 = vld [vmem:[%s28235_s23 + $0x110] sm:$0xff]   ;;  %v25854_v56 = vld [vmem:[%s28235_s23 + $0x118] sm:$0xff]   ;;  %v25856_v58 = vld [vmem:[%s28235_s23 + $0x120] sm:$0xff]  }
 0x240   : >> { %v25857_v59 = vld [vmem:[%s28235_s23 + $0x48] sm:$0xff]   ;;  %v25859_v61 = vld [vmem:[%s28235_s23 + $0x50] sm:$0xff]   ;;  %v25861_v63 = vld [vmem:[%s28235_s23 + $0x58] sm:$0xff]  }
 0x241   : >> { %v25858_v60 = vld [vmem:[%s28235_s23 + $0x128] sm:$0xff]   ;;  %v25860_v62 = vld [vmem:[%s28235_s23 + $0x130] sm:$0xff]   ;;  %v25862_v0 = vld [vmem:[%s28235_s23 + $0x138] sm:$0xff]  }
 0x242   : >> { %22324 = vmatpush3.bf16.msra.mxu0 %v19731_v35  ;;  %22396 = vmatpush3.bf16.msra.mxu1 %v19731_v35  ;;  %v25863_v1 = vld [vmem:[%s28235_s23 + $0x60] sm:$0xff]   ;;  %v25865_v3 = vld [vmem:[%s28235_s23 + $0x68] sm:$0xff]   ;;  %v25867_v5 = vld [vmem:[%s28235_s23 + $0x70] sm:$0xff]  }
 0x243   : >> { %22325 = vmatprep.subr.bf16.mxu0 %v19732_v38  ;;  %22397 = vmatprep.subr.bf16.mxu1 %v19732_v38  ;;  %v25864_v2 = vld [vmem:[%s28235_s23 + $0x140] sm:$0xff]   ;;  %v25866_v4 = vld [vmem:[%s28235_s23 + $0x148] sm:$0xff]   ;;  %v25868_v6 = vld [vmem:[%s28235_s23 + $0x150] sm:$0xff]  }
 0x244   : >> { %v25869_v7 = vld [vmem:[%s28235_s23 + $0x78] sm:$0xff]   ;;  %v25871_v9 = vld [vmem:[%s28235_s23 + $0x80] sm:$0xff]   ;;  %v25873_v11 = vld [vmem:[%s28235_s23 + $0x88] sm:$0xff]  }
 0x245   : >> { %v25870_v8 = vld [vmem:[%s28235_s23 + $0x158] sm:$0xff]   ;;  %v25872_v10 = vld [vmem:[%s28235_s23 + $0x160] sm:$0xff]   ;;  %v25874_v12 = vld [vmem:[%s28235_s23 + $0x168] sm:$0xff]  }
 0x246   : >> { %22326 = vmatpush3.bf16.msra.mxu0 %v19732_v38  ;;  %22398 = vmatpush3.bf16.msra.mxu1 %v19732_v38  ;;  %v25875_v13 = vld [vmem:[%s28235_s23 + $0x90] sm:$0xff]   ;;  %v25877_v15 = vld [vmem:[%s28235_s23 + $0x98] sm:$0xff]   ;;  %v25879_v34 = vld [vmem:[%s28235_s23 + $0xa0] sm:$0xff]  }
 0x247   : >> { %22327 = vmatprep.subr.bf16.mxu0 %v19733_v39  ;;  %22399 = vmatprep.subr.bf16.mxu1 %v19733_v39  ;;  %v25876_v14 = vld [vmem:[%s28235_s23 + $0x170] sm:$0xff]   ;;  %v25878_v33 = vld [vmem:[%s28235_s23 + $0x178] sm:$0xff]   ;;  %v25880_v35 = vld [vmem:[%s28235_s23 + $0x180] sm:$0xff]  }
 0x248   : >> { %v25881_v36 = vld [vmem:[%s28235_s23 + $0xa8] sm:$0xff]   ;;  %v25883_v38 = vld [vmem:[%s28235_s23 + $0xb0] sm:$0xff]  }
 0x249   : >> { %v25882_v37 = vld [vmem:[%s28235_s23 + $0x188] sm:$0xff]  }
 0x24a   : >> { %22328 = vmatpush3.bf16.msra.mxu0 %v19733_v39  ;;  %22400 = vmatpush3.bf16.msra.mxu1 %v19733_v39  ;;  %v25884_v39 = vld [vmem:[%s28235_s23 + $0x190] sm:$0xff]  }
 0x24b   : >> { %22329 = vmatprep.subr.bf16.mxu0 %v19734_v40  ;;  %22401 = vmatprep.subr.bf16.mxu1 %v19734_v40 }
 0x24e   : >> { %22330 = vmatpush3.bf16.msra.mxu0 %v19734_v40  ;;  %22402 = vmatpush3.bf16.msra.mxu1 %v19734_v40  ;;  %v25885_v40 = vld [vmem:[%s28235_s23 + $0xb8] sm:$0xff]  }
 0x24f   : >> { %22331 = vmatprep.subr.bf16.mxu0 %v19735_v41  ;;  %22403 = vmatprep.subr.bf16.mxu1 %v19735_v41 }
 0x252   : >> { %22332 = vmatpush3.bf16.msra.mxu0 %v19735_v41  ;;  %22404 = vmatpush3.bf16.msra.mxu1 %v19735_v41  ;;  %v25886_v41 = vld [vmem:[%s28235_s23 + $0x198] sm:$0xff]  }
 0x253   : >> { %22333 = vmatprep.subr.bf16.mxu0 %v19736_v42  ;;  %22405 = vmatprep.subr.bf16.mxu1 %v19736_v42 }
 0x256   : >> { %22334 = vmatpush3.bf16.msra.mxu0 %v19736_v42  ;;  %22406 = vmatpush3.bf16.msra.mxu1 %v19736_v42  ;;  %v25887_v42 = vld [vmem:[%s28235_s23 + $0xc0] sm:$0xff]  }
 0x259   : >> { %22336 = vmatmul.mubr.bf16.vlgmr.msra.gmra.mrb[0].mxu0 %v25841_v43  ;;  %22408 = vmatmul.mubr.bf16.vlgmr.msra.gmra.mrb[0].mxu1 %v25842_v44  ;;  %v25888_v43 = vld [vmem:[%s28235_s23 + $0x1a0] sm:$0xff]   ;;  %v25889_v44 = vld [vmem:[%s28235_s23 + $0xc8] sm:$0xff]  }
 0x25a   : >> { %22339 = vmatprep.mubr.bf16.mxu0 %v25843_v45  ;;  %22411 = vmatprep.mubr.bf16.mxu1 %v25844_v46  ;;  %v25890_v45 = vld [vmem:[%s28235_s23 + $0x1a8] sm:$0xff]   ;;  %v25891_v46 = vld [vmem:[%s28235_s23 + $0xd0] sm:$0xff]  }
 0x261   : >> { %22340 = vmatmul.mubr.bf16.gmra.mrb[4].mxu0 %v25845_v47  ;;  %22412 = vmatmul.mubr.bf16.gmra.mrb[4].mxu1 %v25846_v48  ;;  %v25892_v47 = vld [vmem:[%s28235_s23 + $0x1b0] sm:$0xff]   ;;  %v25893_v48 = vld [vmem:[%s28235_s23 + $0xd8] sm:$0xff]  }
 0x262   : >> { %22343 = vmatprep.mubr.bf16.mxu0 %v25847_v49  ;;  %22415 = vmatprep.mubr.bf16.mxu1 %v25848_v50  ;;  %v25894_v49 = vld [vmem:[%s28235_s23 + $0x1b8] sm:$0xff]  }
 0x269   : >> { %22344 = vmatmul.mubr.bf16.gmra.mrb[8].mxu0 %v25849_v51  ;;  %22416 = vmatmul.mubr.bf16.gmra.mrb[8].mxu1 %v25850_v52 }
 0x26a   : >> { %22347 = vmatprep.mubr.bf16.mxu0 %v25851_v53  ;;  %22419 = vmatprep.mubr.bf16.mxu1 %v25852_v54 }
 0x271   : >> { %22348 = vmatmul.mubr.bf16.gmra.mrb[12].mxu0 %v25853_v55  ;;  %22420 = vmatmul.mubr.bf16.gmra.mrb[12].mxu1 %v25854_v56 }
 0x272   : >> { %22351 = vmatprep.mubr.bf16.mxu0 %v25855_v57  ;;  %22423 = vmatprep.mubr.bf16.mxu1 %v25856_v58 }
 0x279   : >> { %22352 = vmatmul.mubr.bf16.gmra.mrb[16].mxu0 %v25857_v59  ;;  %22424 = vmatmul.mubr.bf16.gmra.mrb[16].mxu1 %v25858_v60 }
 0x27a   : >> { %22355 = vmatprep.mubr.bf16.mxu0 %v25859_v61  ;;  %22427 = vmatprep.mubr.bf16.mxu1 %v25860_v62 }
 0x281   : >> { %22356 = vmatmul.mubr.bf16.gmra.mrb[20].mxu0 %v25861_v63  ;;  %22428 = vmatmul.mubr.bf16.gmra.mrb[20].mxu1 %v25862_v0 }
 0x282   : >> { %22359 = vmatprep.mubr.bf16.mxu0 %v25863_v1  ;;  %22431 = vmatprep.mubr.bf16.mxu1 %v25864_v2 }
 0x289   : >> { %22360 = vmatmul.mubr.bf16.gmra.mrb[24].mxu0 %v25865_v3  ;;  %22432 = vmatmul.mubr.bf16.gmra.mrb[24].mxu1 %v25866_v4 }
 0x28a   : >> { %22363 = vmatprep.mubr.bf16.mxu0 %v25867_v5  ;;  %22435 = vmatprep.mubr.bf16.mxu1 %v25868_v6 }
 0x291   : >> { %22364 = vmatmul.mubr.bf16.gmra.mrb[28].mxu0 %v25869_v7  ;;  %22436 = vmatmul.mubr.bf16.gmra.mrb[28].mxu1 %v25870_v8 }
 0x292   : >> { %22367 = vmatprep.mubr.bf16.mxu0 %v25871_v9  ;;  %22439 = vmatprep.mubr.bf16.mxu1 %v25872_v10 }
 0x299   : >> { %22368 = vmatmul.mubr.bf16.gmra.mrb[32].mxu0 %v25873_v11  ;;  %22440 = vmatmul.mubr.bf16.gmra.mrb[32].mxu1 %v25874_v12 }
 0x29a   : >> { %22371 = vmatprep.mubr.bf16.mxu0 %v25875_v13  ;;  %22443 = vmatprep.mubr.bf16.mxu1 %v25876_v14 }
 0x2a1   : >> { %22372 = vmatmul.mubr.bf16.gmra.mrb[36].mxu0 %v25877_v15  ;;  %22444 = vmatmul.mubr.bf16.gmra.mrb[36].mxu1 %v25878_v33 }
 0x2a2   : >> { %22375 = vmatprep.mubr.bf16.mxu0 %v25879_v34  ;;  %22447 = vmatprep.mubr.bf16.mxu1 %v25880_v35 }
 0x2a9   : >> { %22376 = vmatmul.mubr.bf16.gmra.mrb[40].mxu0 %v25881_v36  ;;  %22448 = vmatmul.mubr.bf16.gmra.mrb[40].mxu1 %v25882_v37 }
 0x2aa   : >> { %22379 = vmatprep.mubr.bf16.mxu0 %v25883_v38  ;;  %22451 = vmatprep.mubr.bf16.mxu1 %v25884_v39 }
 0x2b1   : >> { %22380 = vmatmul.mubr.bf16.gmra.mrb[44].mxu0 %v25885_v40  ;;  %22452 = vmatmul.mubr.bf16.gmra.mrb[44].mxu1 %v25886_v41 }
 0x2b2   : >> { %22383 = vmatprep.mubr.bf16.mxu0 %v25887_v42  ;;  %22455 = vmatprep.mubr.bf16.mxu1 %v25888_v43 }
 0x2b9   : >> { %22384 = vmatmul.mubr.bf16.gmra.mrb[48].mxu0 %v25889_v44  ;;  %22456 = vmatmul.mubr.bf16.gmra.mrb[48].mxu1 %v25890_v45 }
 0x2ba   : >> { %22387 = vmatprep.mubr.bf16.mxu0 %v25891_v46  ;;  %22459 = vmatprep.mubr.bf16.mxu1 %v25892_v47 }
 0x2c1   : >> { %22388 = vmatmul.mubr.bf16.gmra.mrb[52].mxu0 %v25893_v48  ;;  %22460 = vmatmul.mubr.bf16.gmra.mrb[52].mxu1 %v25894_v49 }
 0x32c   : >> { %v22337_v50 = vpop.f32.mrb[0].mxu0  ;;  %v22409_v51 = vpop.f32.mrb[0].mxu1 }
 0x32d   : >> { %v7328_v52 = vadd.f32 %v22337_v50, %v28218_v32  ;;  %v7953_v53 = vadd.f32 %v22409_v51, %v28218_v32  ;;  %v7097_v54 = vpop.f32.mrb[1].mxu0  ;;  %v7728_v55 = vpop.f32.mrb[1].mxu1 }
 0x32e   : >> { %v7326_v56 = vadd.f32 %v28218_v32, %v7097_v54  ;;  %v7951_v57 = vadd.f32 %v28218_v32, %v7728_v55  ;;  %v22338_v58 = vpop.f32.mrb[2].mxu0  ;;  %v22410_v59 = vpop.f32.mrb[2].mxu1 }
 0x32f   : >> { %v7384_v60 = vmax.f32 %v7328_v52, 0.0  ;;  %v8009_v61 = vmax.f32 %v7953_v53, 0.0  ;;  %v7329_v62 = vadd.f32 %v22338_v58, %v28218_v32  ;;  %v7954_v63 = vadd.f32 %v22410_v59, %v28218_v32  ;;  %v7100_v0 = vpop.f32.mrb[3].mxu0  ;;  %v7731_v1 = vpop.f32.mrb[3].mxu1 }
 0x330   : >> { %v7382_v2 = vmax.f32 %v7326_v56, 0.0  ;;  %v8007_v3 = vmax.f32 %v7951_v57, 0.0  ;;  %v7327_v4 = vadd.f32 %v28218_v32, %v7100_v0  ;;  %v7952_v5 = vadd.f32 %v28218_v32, %v7731_v1 }
 0x331   : >> { %v7385_v6 = vmax.f32 %v7329_v62, 0.0  ;;  %v8010_v7 = vmax.f32 %v7954_v63, 0.0 }
 0x332   : >> { %v7438_v8 = vmax.f32 %v7382_v2, %v7384_v60  ;;  %v8063_v9 = vmax.f32 %v8007_v3, %v8009_v61  ;;  %v7383_v10 = vmax.f32 %v7327_v4, 0.0  ;;  %v8008_v11 = vmax.f32 %v7952_v5, 0.0 }
 0x334   : >> { %v8091_v12 = vmax.f32 %v7438_v8, %v8063_v9  ;;  %v7439_v13 = vmax.f32 %v7383_v10, %v7385_v6  ;;  %v8064_v14 = vmax.f32 %v8008_v11, %v8010_v7  ;;  %v22341_v15 = vpop.f32.mrb[4].mxu0  ;;  %v22413_v33 = vpop.f32.mrb[4].mxu1 }
 0x335   : >> { %v7332_v34 = vadd.f32 %v22341_v15, %v28218_v32  ;;  %v7957_v35 = vadd.f32 %v22413_v33, %v28218_v32  ;;  %v7113_v36 = vpop.f32.mrb[5].mxu0  ;;  %v7744_v37 = vpop.f32.mrb[5].mxu1 }
 0x336   : >> { %v8092_v38 = vmax.f32 %v7439_v13, %v8064_v14  ;;  %v7330_v39 = vadd.f32 %v28218_v32, %v7113_v36  ;;  %v7955_v40 = vadd.f32 %v28218_v32, %v7744_v37  ;;  %v22342_v41 = vpop.f32.mrb[6].mxu0  ;;  %v22414_v42 = vpop.f32.mrb[6].mxu1 }
 0x337   : >> { %v7388_v43 = vmax.f32 %v7332_v34, 0.0  ;;  %v8013_v44 = vmax.f32 %v7957_v35, 0.0  ;;  %v7333_v45 = vadd.f32 %v22342_v41, %v28218_v32  ;;  %v7958_v46 = vadd.f32 %v22414_v42, %v28218_v32  ;;  %v7116_v47 = vpop.f32.mrb[7].mxu0  ;;  %v7747_v48 = vpop.f32.mrb[7].mxu1 }
 0x338   : >> { %v8119_v49 = vpack.c.bf16 %v8092_v38, %v8091_v12  ;;  %v7386_v50 = vmax.f32 %v7330_v39, 0.0  ;;  %v8011_v51 = vmax.f32 %v7955_v40, 0.0  ;;  %v7331_v52 = vadd.f32 %v28218_v32, %v7116_v47 }
 0x339   : >> { %v7389_v53 = vmax.f32 %v7333_v45, 0.0  ;;  %v8014_v54 = vmax.f32 %v7958_v46, 0.0  ;;  %v7956_v55 = vadd.f32 %v28218_v32, %v7747_v48 }
 0x33a   : >> { %8136 = vst [vmem:[%s28320_s28] sm:$0xff] %v8119_v49  ;;  %v7440_v56 = vmax.f32 %v7386_v50, %v7388_v43  ;;  %v8065_v57 = vmax.f32 %v8011_v51, %v8013_v44  ;;  %v7387_v58 = vmax.f32 %v7331_v52, 0.0 }
 0x33b   : >> { %v8012_v59 = vmax.f32 %v7956_v55, 0.0 }
 0x33c   : >> { %v8093_v60 = vmax.f32 %v7440_v56, %v8065_v57  ;;  %v7441_v61 = vmax.f32 %v7387_v58, %v7389_v53  ;;  %v22345_v62 = vpop.f32.mrb[8].mxu0  ;;  %v22417_v63 = vpop.f32.mrb[8].mxu1 }
 0x33d   : >> { %v8066_v0 = vmax.f32 %v8012_v59, %v8014_v54  ;;  %v7336_v1 = vadd.f32 %v22345_v62, %v28218_v32  ;;  %v7961_v2 = vadd.f32 %v22417_v63, %v28218_v32  ;;  %v7129_v3 = vpop.f32.mrb[9].mxu0  ;;  %v7760_v4 = vpop.f32.mrb[9].mxu1 }
 0x33e   : >> { %v7334_v5 = vadd.f32 %v28218_v32, %v7129_v3  ;;  %v7959_v6 = vadd.f32 %v28218_v32, %v7760_v4  ;;  %v22346_v7 = vpop.f32.mrb[10].mxu0  ;;  %v22418_v8 = vpop.f32.mrb[10].mxu1 }
 0x33f   : >> { %v8094_v9 = vmax.f32 %v7441_v61, %v8066_v0  ;;  %v7392_v10 = vmax.f32 %v7336_v1, 0.0  ;;  %v8017_v11 = vmax.f32 %v7961_v2, 0.0  ;;  %v7337_v12 = vadd.f32 %v22346_v7, %v28218_v32  ;;  %v7132_v13 = vpop.f32.mrb[11].mxu0  ;;  %v7763_v14 = vpop.f32.mrb[11].mxu1 }
 0x340   : >> { %v7390_v15 = vmax.f32 %v7334_v5, 0.0  ;;  %v8015_v33 = vmax.f32 %v7959_v6, 0.0  ;;  %v7962_v34 = vadd.f32 %v22418_v8, %v28218_v32  ;;  %v7335_v35 = vadd.f32 %v28218_v32, %v7132_v13 }
 0x341   : >> { %v8120_v36 = vpack.c.bf16 %v8094_v9, %v8093_v60  ;;  %v7393_v37 = vmax.f32 %v7337_v12, 0.0  ;;  %v7960_v38 = vadd.f32 %v28218_v32, %v7763_v14 }
 0x342   : >> { %v7442_v39 = vmax.f32 %v7390_v15, %v7392_v10  ;;  %v8067_v40 = vmax.f32 %v8015_v33, %v8017_v11  ;;  %v8018_v41 = vmax.f32 %v7962_v34, 0.0  ;;  %v7391_v42 = vmax.f32 %v7335_v35, 0.0 }
 0x343   : >> { %8137 = vst [vmem:[%s28320_s28 + $0x8] sm:$0xff] %v8120_v36  ;;  %v8016_v43 = vmax.f32 %v7960_v38, 0.0 }
 0x344   : >> { %v8095_v44 = vmax.f32 %v7442_v39, %v8067_v40  ;;  %v7443_v45 = vmax.f32 %v7391_v42, %v7393_v37  ;;  %v22349_v46 = vpop.f32.mrb[12].mxu0  ;;  %v22421_v47 = vpop.f32.mrb[12].mxu1 }
 0x345   : >> { %v8068_v48 = vmax.f32 %v8016_v43, %v8018_v41  ;;  %v7340_v49 = vadd.f32 %v22349_v46, %v28218_v32  ;;  %v7965_v50 = vadd.f32 %v22421_v47, %v28218_v32  ;;  %v7145_v51 = vpop.f32.mrb[13].mxu0  ;;  %v7776_v52 = vpop.f32.mrb[13].mxu1 }
 0x346   : >> { %v7338_v53 = vadd.f32 %v28218_v32, %v7145_v51  ;;  %v7963_v54 = vadd.f32 %v28218_v32, %v7776_v52  ;;  %v22350_v55 = vpop.f32.mrb[14].mxu0  ;;  %v22422_v56 = vpop.f32.mrb[14].mxu1 }
 0x347   : >> { %v8096_v57 = vmax.f32 %v7443_v45, %v8068_v48  ;;  %v7396_v58 = vmax.f32 %v7340_v49, 0.0  ;;  %v8021_v59 = vmax.f32 %v7965_v50, 0.0  ;;  %v7341_v60 = vadd.f32 %v22350_v55, %v28218_v32  ;;  %v7148_v61 = vpop.f32.mrb[15].mxu0  ;;  %v7779_v62 = vpop.f32.mrb[15].mxu1 }
 0x348   : >> { %v7394_v63 = vmax.f32 %v7338_v53, 0.0  ;;  %v8019_v0 = vmax.f32 %v7963_v54, 0.0  ;;  %v7966_v1 = vadd.f32 %v22422_v56, %v28218_v32  ;;  %v7339_v2 = vadd.f32 %v28218_v32, %v7148_v61 }
 0x349   : >> { %v8121_v3 = vpack.c.bf16 %v8096_v57, %v8095_v44  ;;  %v7397_v4 = vmax.f32 %v7341_v60, 0.0  ;;  %v7964_v5 = vadd.f32 %v28218_v32, %v7779_v62 }
 0x34a   : >> { %v7444_v6 = vmax.f32 %v7394_v63, %v7396_v58  ;;  %v8069_v7 = vmax.f32 %v8019_v0, %v8021_v59  ;;  %v8022_v8 = vmax.f32 %v7966_v1, 0.0  ;;  %v7395_v9 = vmax.f32 %v7339_v2, 0.0 }
 0x34b   : >> { %8138 = vst [vmem:[%s28320_s28 + $0x10] sm:$0xff] %v8121_v3  ;;  %v8020_v10 = vmax.f32 %v7964_v5, 0.0 }
 0x34c   : >> { %v8097_v11 = vmax.f32 %v7444_v6, %v8069_v7  ;;  %v7445_v12 = vmax.f32 %v7395_v9, %v7397_v4  ;;  %v22353_v13 = vpop.f32.mrb[16].mxu0  ;;  %v22425_v14 = vpop.f32.mrb[16].mxu1 }
 0x34d   : >> { %v8070_v15 = vmax.f32 %v8020_v10, %v8022_v8  ;;  %v7344_v33 = vadd.f32 %v22353_v13, %v28218_v32  ;;  %v7969_v34 = vadd.f32 %v22425_v14, %v28218_v32  ;;  %v7161_v35 = vpop.f32.mrb[17].mxu0  ;;  %v7792_v36 = vpop.f32.mrb[17].mxu1 }
 0x34e   : >> { %v7342_v37 = vadd.f32 %v28218_v32, %v7161_v35  ;;  %v7967_v38 = vadd.f32 %v28218_v32, %v7792_v36  ;;  %v22354_v39 = vpop.f32.mrb[18].mxu0  ;;  %v22426_v40 = vpop.f32.mrb[18].mxu1 }
 0x34f   : >> { %v8098_v41 = vmax.f32 %v7445_v12, %v8070_v15  ;;  %v7400_v42 = vmax.f32 %v7344_v33, 0.0  ;;  %v8025_v43 = vmax.f32 %v7969_v34, 0.0  ;;  %v7345_v44 = vadd.f32 %v22354_v39, %v28218_v32  ;;  %v7164_v45 = vpop.f32.mrb[19].mxu0  ;;  %v7795_v46 = vpop.f32.mrb[19].mxu1 }
 0x350   : >> { %v7398_v47 = vmax.f32 %v7342_v37, 0.0  ;;  %v8023_v48 = vmax.f32 %v7967_v38, 0.0  ;;  %v7970_v49 = vadd.f32 %v22426_v40, %v28218_v32  ;;  %v7343_v50 = vadd.f32 %v28218_v32, %v7164_v45 }
 0x351   : >> { %v8122_v51 = vpack.c.bf16 %v8098_v41, %v8097_v11  ;;  %v7401_v52 = vmax.f32 %v7345_v44, 0.0  ;;  %v7968_v53 = vadd.f32 %v28218_v32, %v7795_v46 }
 0x352   : >> { %v7446_v54 = vmax.f32 %v7398_v47, %v7400_v42  ;;  %v8071_v55 = vmax.f32 %v8023_v48, %v8025_v43  ;;  %v8026_v56 = vmax.f32 %v7970_v49, 0.0  ;;  %v7399_v57 = vmax.f32 %v7343_v50, 0.0 }
 0x353   : >> { %8139 = vst [vmem:[%s28320_s28 + $0x18] sm:$0xff] %v8122_v51  ;;  %v8024_v58 = vmax.f32 %v7968_v53, 0.0 }
 0x354   : >> { %v8099_v59 = vmax.f32 %v7446_v54, %v8071_v55  ;;  %v7447_v60 = vmax.f32 %v7399_v57, %v7401_v52  ;;  %v22357_v61 = vpop.f32.mrb[20].mxu0  ;;  %v22429_v62 = vpop.f32.mrb[20].mxu1 }
 0x355   : >> { %v8072_v63 = vmax.f32 %v8024_v58, %v8026_v56  ;;  %v7348_v0 = vadd.f32 %v22357_v61, %v28218_v32  ;;  %v7973_v1 = vadd.f32 %v22429_v62, %v28218_v32  ;;  %v7177_v2 = vpop.f32.mrb[21].mxu0  ;;  %v7808_v3 = vpop.f32.mrb[21].mxu1 }
 0x356   : >> { %v7346_v4 = vadd.f32 %v28218_v32, %v7177_v2  ;;  %v7971_v5 = vadd.f32 %v28218_v32, %v7808_v3  ;;  %v22358_v6 = vpop.f32.mrb[22].mxu0  ;;  %v22430_v7 = vpop.f32.mrb[22].mxu1 }
 0x357   : >> { %v8100_v8 = vmax.f32 %v7447_v60, %v8072_v63  ;;  %v7404_v9 = vmax.f32 %v7348_v0, 0.0  ;;  %v8029_v10 = vmax.f32 %v7973_v1, 0.0  ;;  %v7349_v11 = vadd.f32 %v22358_v6, %v28218_v32  ;;  %v7180_v12 = vpop.f32.mrb[23].mxu0  ;;  %v7811_v13 = vpop.f32.mrb[23].mxu1 }
 0x358   : >> { %v7402_v14 = vmax.f32 %v7346_v4, 0.0  ;;  %v8027_v15 = vmax.f32 %v7971_v5, 0.0  ;;  %v7974_v33 = vadd.f32 %v22430_v7, %v28218_v32  ;;  %v7347_v34 = vadd.f32 %v28218_v32, %v7180_v12 }
 0x359   : >> { %v8123_v35 = vpack.c.bf16 %v8100_v8, %v8099_v59  ;;  %v7405_v36 = vmax.f32 %v7349_v11, 0.0  ;;  %v7972_v37 = vadd.f32 %v28218_v32, %v7811_v13 }
 0x35a   : >> { %v7448_v38 = vmax.f32 %v7402_v14, %v7404_v9  ;;  %v8073_v39 = vmax.f32 %v8027_v15, %v8029_v10  ;;  %v8030_v40 = vmax.f32 %v7974_v33, 0.0  ;;  %v7403_v41 = vmax.f32 %v7347_v34, 0.0 }
 0x35b   : >> { %8140 = vst [vmem:[%s28320_s28 + $0x20] sm:$0xff] %v8123_v35  ;;  %v8028_v42 = vmax.f32 %v7972_v37, 0.0 }
 0x35c   : >> { %v8101_v43 = vmax.f32 %v7448_v38, %v8073_v39  ;;  %v7449_v44 = vmax.f32 %v7403_v41, %v7405_v36  ;;  %v22361_v45 = vpop.f32.mrb[24].mxu0  ;;  %v22433_v46 = vpop.f32.mrb[24].mxu1 }
 0x35d   : >> { %v8074_v47 = vmax.f32 %v8028_v42, %v8030_v40  ;;  %v7352_v48 = vadd.f32 %v22361_v45, %v28218_v32  ;;  %v7977_v49 = vadd.f32 %v22433_v46, %v28218_v32  ;;  %v7193_v50 = vpop.f32.mrb[25].mxu0  ;;  %v7824_v51 = vpop.f32.mrb[25].mxu1 }
 0x35e   : >> { %v7350_v52 = vadd.f32 %v28218_v32, %v7193_v50  ;;  %v7975_v53 = vadd.f32 %v28218_v32, %v7824_v51  ;;  %v22362_v54 = vpop.f32.mrb[26].mxu0  ;;  %v22434_v55 = vpop.f32.mrb[26].mxu1 }
 0x35f   : >> { %v8102_v56 = vmax.f32 %v7449_v44, %v8074_v47  ;;  %v7408_v57 = vmax.f32 %v7352_v48, 0.0  ;;  %v8033_v58 = vmax.f32 %v7977_v49, 0.0  ;;  %v7353_v59 = vadd.f32 %v22362_v54, %v28218_v32  ;;  %v7196_v60 = vpop.f32.mrb[27].mxu0  ;;  %v7827_v61 = vpop.f32.mrb[27].mxu1 }
 0x360   : >> { %v7406_v62 = vmax.f32 %v7350_v52, 0.0  ;;  %v8031_v63 = vmax.f32 %v7975_v53, 0.0  ;;  %v7978_v0 = vadd.f32 %v22434_v55, %v28218_v32  ;;  %v7351_v1 = vadd.f32 %v28218_v32, %v7196_v60 }
 0x361   : >> { %v8124_v2 = vpack.c.bf16 %v8102_v56, %v8101_v43  ;;  %v7409_v3 = vmax.f32 %v7353_v59, 0.0  ;;  %v7976_v4 = vadd.f32 %v28218_v32, %v7827_v61 }
 0x362   : >> { %v7450_v5 = vmax.f32 %v7406_v62, %v7408_v57  ;;  %v8075_v6 = vmax.f32 %v8031_v63, %v8033_v58  ;;  %v8034_v7 = vmax.f32 %v7978_v0, 0.0  ;;  %v7407_v8 = vmax.f32 %v7351_v1, 0.0 }
 0x363   : >> { %8141 = vst [vmem:[%s28320_s28 + $0x28] sm:$0xff] %v8124_v2  ;;  %v8032_v9 = vmax.f32 %v7976_v4, 0.0 }
 0x364   : >> { %v8103_v10 = vmax.f32 %v7450_v5, %v8075_v6  ;;  %v7451_v11 = vmax.f32 %v7407_v8, %v7409_v3  ;;  %v22365_v12 = vpop.f32.mrb[28].mxu0  ;;  %v22437_v13 = vpop.f32.mrb[28].mxu1 }
 0x365   : >> { %v8076_v14 = vmax.f32 %v8032_v9, %v8034_v7  ;;  %v7356_v15 = vadd.f32 %v22365_v12, %v28218_v32  ;;  %v7981_v33 = vadd.f32 %v22437_v13, %v28218_v32  ;;  %v7209_v34 = vpop.f32.mrb[29].mxu0  ;;  %v7840_v35 = vpop.f32.mrb[29].mxu1 }
 0x366   : >> { %v7354_v36 = vadd.f32 %v28218_v32, %v7209_v34  ;;  %v7979_v37 = vadd.f32 %v28218_v32, %v7840_v35  ;;  %v22366_v38 = vpop.f32.mrb[30].mxu0  ;;  %v22438_v39 = vpop.f32.mrb[30].mxu1 }
 0x367   : >> { %v8104_v40 = vmax.f32 %v7451_v11, %v8076_v14  ;;  %v7412_v41 = vmax.f32 %v7356_v15, 0.0  ;;  %v8037_v42 = vmax.f32 %v7981_v33, 0.0  ;;  %v7357_v43 = vadd.f32 %v22366_v38, %v28218_v32  ;;  %v7212_v44 = vpop.f32.mrb[31].mxu0  ;;  %v7843_v45 = vpop.f32.mrb[31].mxu1 }
 0x368   : >> { %v7410_v46 = vmax.f32 %v7354_v36, 0.0  ;;  %v8035_v47 = vmax.f32 %v7979_v37, 0.0  ;;  %v7982_v48 = vadd.f32 %v22438_v39, %v28218_v32  ;;  %v7355_v49 = vadd.f32 %v28218_v32, %v7212_v44 }
 0x369   : >> { %v8125_v50 = vpack.c.bf16 %v8104_v40, %v8103_v10  ;;  %v7413_v51 = vmax.f32 %v7357_v43, 0.0  ;;  %v7980_v52 = vadd.f32 %v28218_v32, %v7843_v45 }
 0x36a   : >> { %v7452_v53 = vmax.f32 %v7410_v46, %v7412_v41  ;;  %v8077_v54 = vmax.f32 %v8035_v47, %v8037_v42  ;;  %v8038_v55 = vmax.f32 %v7982_v48, 0.0  ;;  %v7411_v56 = vmax.f32 %v7355_v49, 0.0 }
 0x36b   : >> { %8142 = vst [vmem:[%s28320_s28 + $0x30] sm:$0xff] %v8125_v50  ;;  %v8036_v57 = vmax.f32 %v7980_v52, 0.0 }
 0x36c   : >> { %v8105_v58 = vmax.f32 %v7452_v53, %v8077_v54  ;;  %v7453_v59 = vmax.f32 %v7411_v56, %v7413_v51  ;;  %v22369_v60 = vpop.f32.mrb[32].mxu0  ;;  %v22441_v61 = vpop.f32.mrb[32].mxu1 }
 0x36d   : >> { %v8078_v62 = vmax.f32 %v8036_v57, %v8038_v55  ;;  %v7360_v63 = vadd.f32 %v22369_v60, %v28218_v32  ;;  %v7985_v0 = vadd.f32 %v22441_v61, %v28218_v32  ;;  %v7225_v1 = vpop.f32.mrb[33].mxu0  ;;  %v7856_v2 = vpop.f32.mrb[33].mxu1 }
 0x36e   : >> { %v7358_v3 = vadd.f32 %v28218_v32, %v7225_v1  ;;  %v7983_v4 = vadd.f32 %v28218_v32, %v7856_v2  ;;  %v22370_v5 = vpop.f32.mrb[34].mxu0  ;;  %v22442_v6 = vpop.f32.mrb[34].mxu1 }
 0x36f   : >> { %v8106_v7 = vmax.f32 %v7453_v59, %v8078_v62  ;;  %v7416_v8 = vmax.f32 %v7360_v63, 0.0  ;;  %v8041_v9 = vmax.f32 %v7985_v0, 0.0  ;;  %v7361_v10 = vadd.f32 %v22370_v5, %v28218_v32  ;;  %v7228_v11 = vpop.f32.mrb[35].mxu0  ;;  %v7859_v12 = vpop.f32.mrb[35].mxu1 }
 0x370   : >> { %v7414_v13 = vmax.f32 %v7358_v3, 0.0  ;;  %v8039_v14 = vmax.f32 %v7983_v4, 0.0  ;;  %v7986_v15 = vadd.f32 %v22442_v6, %v28218_v32  ;;  %v7359_v33 = vadd.f32 %v28218_v32, %v7228_v11 }
 0x371   : >> { %v8126_v34 = vpack.c.bf16 %v8106_v7, %v8105_v58  ;;  %v7417_v35 = vmax.f32 %v7361_v10, 0.0  ;;  %v7984_v36 = vadd.f32 %v28218_v32, %v7859_v12 }
 0x372   : >> { %v7454_v37 = vmax.f32 %v7414_v13, %v7416_v8  ;;  %v8079_v38 = vmax.f32 %v8039_v14, %v8041_v9  ;;  %v8042_v39 = vmax.f32 %v7986_v15, 0.0  ;;  %v7415_v40 = vmax.f32 %v7359_v33, 0.0 }
 0x373   : >> { %8143 = vst [vmem:[%s28320_s28 + $0x38] sm:$0xff] %v8126_v34  ;;  %v8040_v41 = vmax.f32 %v7984_v36, 0.0 }
 0x374   : >> { %v8107_v42 = vmax.f32 %v7454_v37, %v8079_v38  ;;  %v7455_v43 = vmax.f32 %v7415_v40, %v7417_v35  ;;  %v22373_v44 = vpop.f32.mrb[36].mxu0  ;;  %v22445_v45 = vpop.f32.mrb[36].mxu1 }
 0x375   : >> { %v8080_v46 = vmax.f32 %v8040_v41, %v8042_v39  ;;  %v7364_v47 = vadd.f32 %v22373_v44, %v28218_v32  ;;  %v7989_v48 = vadd.f32 %v22445_v45, %v28218_v32  ;;  %v7241_v49 = vpop.f32.mrb[37].mxu0  ;;  %v7872_v50 = vpop.f32.mrb[37].mxu1 }
 0x376   : >> { %v7362_v51 = vadd.f32 %v28218_v32, %v7241_v49  ;;  %v7987_v52 = vadd.f32 %v28218_v32, %v7872_v50  ;;  %v22374_v53 = vpop.f32.mrb[38].mxu0  ;;  %v22446_v54 = vpop.f32.mrb[38].mxu1 }
 0x377   : >> { %v8108_v55 = vmax.f32 %v7455_v43, %v8080_v46  ;;  %v7420_v56 = vmax.f32 %v7364_v47, 0.0  ;;  %v8045_v57 = vmax.f32 %v7989_v48, 0.0  ;;  %v7365_v58 = vadd.f32 %v22374_v53, %v28218_v32  ;;  %v7244_v59 = vpop.f32.mrb[39].mxu0  ;;  %v7875_v60 = vpop.f32.mrb[39].mxu1 }
 0x378   : >> { %v7418_v61 = vmax.f32 %v7362_v51, 0.0  ;;  %v8043_v62 = vmax.f32 %v7987_v52, 0.0  ;;  %v7990_v63 = vadd.f32 %v22446_v54, %v28218_v32  ;;  %v7363_v0 = vadd.f32 %v28218_v32, %v7244_v59 }
 0x379   : >> { %v8127_v1 = vpack.c.bf16 %v8108_v55, %v8107_v42  ;;  %v7421_v2 = vmax.f32 %v7365_v58, 0.0  ;;  %v7988_v3 = vadd.f32 %v28218_v32, %v7875_v60 }
 0x37a   : >> { %v7456_v4 = vmax.f32 %v7418_v61, %v7420_v56  ;;  %v8081_v5 = vmax.f32 %v8043_v62, %v8045_v57  ;;  %v8046_v6 = vmax.f32 %v7990_v63, 0.0  ;;  %v7419_v7 = vmax.f32 %v7363_v0, 0.0 }
 0x37b   : >> { %8144 = vst [vmem:[%s28320_s28 + $0x40] sm:$0xff] %v8127_v1  ;;  %v8044_v8 = vmax.f32 %v7988_v3, 0.0 }
 0x37c   : >> { %v8109_v9 = vmax.f32 %v7456_v4, %v8081_v5  ;;  %v7457_v10 = vmax.f32 %v7419_v7, %v7421_v2  ;;  %v22377_v11 = vpop.f32.mrb[40].mxu0  ;;  %v22449_v12 = vpop.f32.mrb[40].mxu1 }
 0x37d   : >> { %v8082_v13 = vmax.f32 %v8044_v8, %v8046_v6  ;;  %v7368_v14 = vadd.f32 %v22377_v11, %v28218_v32  ;;  %v7993_v15 = vadd.f32 %v22449_v12, %v28218_v32  ;;  %v7257_v33 = vpop.f32.mrb[41].mxu0  ;;  %v7888_v34 = vpop.f32.mrb[41].mxu1 }
 0x37e   : >> { %v7366_v35 = vadd.f32 %v28218_v32, %v7257_v33  ;;  %v7991_v36 = vadd.f32 %v28218_v32, %v7888_v34  ;;  %v22378_v37 = vpop.f32.mrb[42].mxu0  ;;  %v22450_v38 = vpop.f32.mrb[42].mxu1 }
 0x37f   : >> { %v8110_v39 = vmax.f32 %v7457_v10, %v8082_v13  ;;  %v7424_v40 = vmax.f32 %v7368_v14, 0.0  ;;  %v8049_v41 = vmax.f32 %v7993_v15, 0.0  ;;  %v7369_v42 = vadd.f32 %v22378_v37, %v28218_v32  ;;  %v7260_v43 = vpop.f32.mrb[43].mxu0  ;;  %v7891_v44 = vpop.f32.mrb[43].mxu1 }
 0x380   : >> { %v7422_v45 = vmax.f32 %v7366_v35, 0.0  ;;  %v8047_v46 = vmax.f32 %v7991_v36, 0.0  ;;  %v7994_v47 = vadd.f32 %v22450_v38, %v28218_v32  ;;  %v7367_v48 = vadd.f32 %v28218_v32, %v7260_v43 }
 0x381   : >> { %v8128_v49 = vpack.c.bf16 %v8110_v39, %v8109_v9  ;;  %v7425_v50 = vmax.f32 %v7369_v42, 0.0  ;;  %v7992_v51 = vadd.f32 %v28218_v32, %v7891_v44 }
 0x382   : >> { %v7458_v52 = vmax.f32 %v7422_v45, %v7424_v40  ;;  %v8083_v53 = vmax.f32 %v8047_v46, %v8049_v41  ;;  %v8050_v54 = vmax.f32 %v7994_v47, 0.0  ;;  %v7423_v55 = vmax.f32 %v7367_v48, 0.0 }
 0x383   : >> { %8145 = vst [vmem:[%s28320_s28 + $0x48] sm:$0xff] %v8128_v49  ;;  %v8048_v56 = vmax.f32 %v7992_v51, 0.0 }
 0x384   : >> { %v8111_v57 = vmax.f32 %v7458_v52, %v8083_v53  ;;  %v7459_v58 = vmax.f32 %v7423_v55, %v7425_v50  ;;  %v22381_v59 = vpop.f32.mrb[44].mxu0  ;;  %v22453_v60 = vpop.f32.mrb[44].mxu1 }
 0x385   : >> { %v8084_v61 = vmax.f32 %v8048_v56, %v8050_v54  ;;  %v7372_v62 = vadd.f32 %v22381_v59, %v28218_v32  ;;  %v7997_v63 = vadd.f32 %v22453_v60, %v28218_v32  ;;  %v7273_v0 = vpop.f32.mrb[45].mxu0  ;;  %v7904_v1 = vpop.f32.mrb[45].mxu1 }
 0x386   : >> { %v7370_v2 = vadd.f32 %v28218_v32, %v7273_v0  ;;  %v7995_v3 = vadd.f32 %v28218_v32, %v7904_v1  ;;  %v22382_v4 = vpop.f32.mrb[46].mxu0  ;;  %v22454_v5 = vpop.f32.mrb[46].mxu1 }
 0x387   : >> { %v8112_v6 = vmax.f32 %v7459_v58, %v8084_v61  ;;  %v7428_v7 = vmax.f32 %v7372_v62, 0.0  ;;  %v8053_v8 = vmax.f32 %v7997_v63, 0.0  ;;  %v7373_v9 = vadd.f32 %v22382_v4, %v28218_v32  ;;  %v7276_v10 = vpop.f32.mrb[47].mxu0  ;;  %v7907_v11 = vpop.f32.mrb[47].mxu1 }
 0x388   : >> { %v7426_v12 = vmax.f32 %v7370_v2, 0.0  ;;  %v8051_v13 = vmax.f32 %v7995_v3, 0.0  ;;  %v7998_v14 = vadd.f32 %v22454_v5, %v28218_v32  ;;  %v7371_v15 = vadd.f32 %v28218_v32, %v7276_v10 }
 0x389   : >> { %v8129_v33 = vpack.c.bf16 %v8112_v6, %v8111_v57  ;;  %v7429_v34 = vmax.f32 %v7373_v9, 0.0  ;;  %v7996_v35 = vadd.f32 %v28218_v32, %v7907_v11 }
 0x38a   : >> { %v7460_v36 = vmax.f32 %v7426_v12, %v7428_v7  ;;  %v8085_v37 = vmax.f32 %v8051_v13, %v8053_v8  ;;  %v8054_v38 = vmax.f32 %v7998_v14, 0.0  ;;  %v7427_v39 = vmax.f32 %v7371_v15, 0.0 }
 0x38b   : >> { %8146 = vst [vmem:[%s28320_s28 + $0x50] sm:$0xff] %v8129_v33  ;;  %v8052_v40 = vmax.f32 %v7996_v35, 0.0 }
 0x38c   : >> { %v8113_v41 = vmax.f32 %v7460_v36, %v8085_v37  ;;  %v7461_v42 = vmax.f32 %v7427_v39, %v7429_v34  ;;  %v22385_v43 = vpop.f32.mrb[48].mxu0  ;;  %v22457_v44 = vpop.f32.mrb[48].mxu1 }
 0x38d   : >> { %v8086_v45 = vmax.f32 %v8052_v40, %v8054_v38  ;;  %v7376_v46 = vadd.f32 %v22385_v43, %v28218_v32  ;;  %v8001_v47 = vadd.f32 %v22457_v44, %v28218_v32  ;;  %v7289_v48 = vpop.f32.mrb[49].mxu0  ;;  %v7920_v49 = vpop.f32.mrb[49].mxu1 }
 0x38e   : >> { %v7374_v50 = vadd.f32 %v28218_v32, %v7289_v48  ;;  %v7999_v51 = vadd.f32 %v28218_v32, %v7920_v49  ;;  %v22386_v52 = vpop.f32.mrb[50].mxu0  ;;  %v22458_v53 = vpop.f32.mrb[50].mxu1 }
 0x38f   : >> { %v8114_v54 = vmax.f32 %v7461_v42, %v8086_v45  ;;  %v7432_v55 = vmax.f32 %v7376_v46, 0.0  ;;  %v8057_v56 = vmax.f32 %v8001_v47, 0.0  ;;  %v7377_v57 = vadd.f32 %v22386_v52, %v28218_v32  ;;  %v7292_v58 = vpop.f32.mrb[51].mxu0  ;;  %v7923_v59 = vpop.f32.mrb[51].mxu1 }
 0x390   : >> { %v7430_v60 = vmax.f32 %v7374_v50, 0.0  ;;  %v8055_v61 = vmax.f32 %v7999_v51, 0.0  ;;  %v8002_v62 = vadd.f32 %v22458_v53, %v28218_v32  ;;  %v7375_v63 = vadd.f32 %v28218_v32, %v7292_v58 }
 0x391   : >> { %v8130_v0 = vpack.c.bf16 %v8114_v54, %v8113_v41  ;;  %v7433_v1 = vmax.f32 %v7377_v57, 0.0  ;;  %v8000_v2 = vadd.f32 %v28218_v32, %v7923_v59 }
 0x392   : >> { %v7462_v3 = vmax.f32 %v7430_v60, %v7432_v55  ;;  %v8087_v4 = vmax.f32 %v8055_v61, %v8057_v56  ;;  %v8058_v5 = vmax.f32 %v8002_v62, 0.0  ;;  %v7431_v6 = vmax.f32 %v7375_v63, 0.0  ;;  %v28438_v61 = vld [vmem:[%s30805_s4] ss:$0 sm:$0xff] (%p6783_p11) }
 0x393   : >> { %8147 = vst [vmem:[%s28320_s28 + $0x58] sm:$0xff] %v8130_v0  ;;  %v8056_v7 = vmax.f32 %v8000_v2, 0.0 }
 0x394   : >> { %v8115_v8 = vmax.f32 %v7462_v3, %v8087_v4  ;;  %v7463_v9 = vmax.f32 %v7431_v6, %v7433_v1  ;;  %v22389_v10 = vpop.f32.mrb[52].mxu0  ;;  %v22461_v11 = vpop.f32.mrb[52].mxu1 }
 0x395   : >> { %v8088_v12 = vmax.f32 %v8056_v7, %v8058_v5  ;;  %v7380_v13 = vadd.f32 %v22389_v10, %v28218_v32  ;;  %v8005_v14 = vadd.f32 %v22461_v11, %v28218_v32  ;;  %v7305_v15 = vpop.f32.mrb[53].mxu0  ;;  %v7936_v33 = vpop.f32.mrb[53].mxu1 }
 0x396   : >> { %v7378_v34 = vadd.f32 %v28218_v32, %v7305_v15  ;;  %v8003_v35 = vadd.f32 %v28218_v32, %v7936_v33  ;;  %v22390_v36 = vpop.f32.mrb[54].mxu0  ;;  %v22462_v37 = vpop.f32.mrb[54].mxu1 }
 0x397   : >> { %v8116_v38 = vmax.f32 %v7463_v9, %v8088_v12  ;;  %v7436_v39 = vmax.f32 %v7380_v13, 0.0  ;;  %v8061_v40 = vmax.f32 %v8005_v14, 0.0  ;;  %v7381_v41 = vadd.f32 %v22390_v36, %v28218_v32  ;;  %v7308_v42 = vpop.f32.mrb[55].mxu0  ;;  %v7939_v43 = vpop.f32.mrb[55].mxu1 }
 0x398   : >> { %v7434_v44 = vmax.f32 %v7378_v34, 0.0  ;;  %v8059_v45 = vmax.f32 %v8003_v35, 0.0  ;;  %v8006_v46 = vadd.f32 %v22462_v37, %v28218_v32  ;;  %v7379_v47 = vadd.f32 %v28218_v32, %v7308_v42 }
 0x399   : >> { %v8131_v48 = vpack.c.bf16 %v8116_v38, %v8115_v8  ;;  %v7437_v49 = vmax.f32 %v7381_v41, 0.0  ;;  %v8004_v50 = vadd.f32 %v28218_v32, %v7939_v43 }
 0x39a   : >> { %v7464_v51 = vmax.f32 %v7434_v44, %v7436_v39  ;;  %v8089_v52 = vmax.f32 %v8059_v45, %v8061_v40  ;;  %v8062_v53 = vmax.f32 %v8006_v46, 0.0  ;;  %v7435_v54 = vmax.f32 %v7379_v47, 0.0 }
 0x39b   : >> { %8148 = vst [vmem:[%s28320_s28 + $0x60] sm:$0xff] %v8131_v48  ;;  %v8060_v55 = vmax.f32 %v8004_v50, 0.0 }
 0x39c   : >> { %v8117_v56 = vmax.f32 %v7464_v51, %v8089_v52  ;;  %v7465_v57 = vmax.f32 %v7435_v54, %v7437_v49 }
 0x39d   : >> { %v8090_v58 = vmax.f32 %v8060_v55, %v8062_v53  ;;  %6785 = sbr.rel (!%p6783_p11) target bundleno = 567 (0x237), region = 238 }
 0x39f   : >> { %v8118_v59 = vmax.f32 %v7465_v57, %v8090_v58 }
 0x3a1   : >> { %v8132_v60 = vpack.c.bf16 %v8118_v59, %v8117_v56 }
 0x3a3   : >> { %8149 = vst [vmem:[%s28320_s28 + $0x68] sm:$0xff] %v8132_v60 }
 0x3a4 LB: >> { %v25895_v62 = vld [vmem:[%s30804_s3 + $0x40] sm:$0xff]   ;;  %v25896_v16 = vld [vmem:[%s30804_s3 + $0x48] sm:$0xff]   ;;  %s21102_s27 = smul.u32 224, %s26416_s22  ;;  %v25897_v17 = vld [vmem:[%s30804_s3 + $0x50] sm:$0xff]   ;;  %s26416_s22 = sphi %s28440_s22, %s8156_s22  }
 0x3a5   : >> { %22463 = vmatprep.subr.bf16.mxu0 %v25895_v62  ;;  %23363 = vmatprep.subr.bf16.mxu1 %v25895_v62  ;;  %v25898_v18 = vld [vmem:[%s30804_s3 + $0x58] sm:$0xff]   ;;  %v25899_v21 = vld [vmem:[%s30804_s3 + $0x60] sm:$0xff]   ;;  %v25900_v22 = vld [vmem:[%s30804_s3 + $0x68] sm:$0xff]  }
 0x3a6   : >> { %22464 = vmatpush3.bf16.msra.mxu0 %v25895_v62  ;;  %23364 = vmatpush3.bf16.msra.mxu1 %v25895_v62  ;;  %s28458_s23 = scalar_lea.vmem [#allocation2], %s21102_s27  ;;  %v25901_v23 = vld [vmem:[%s30804_s3 + $0x70] sm:$0xff]   ;;  %v25902_v24 = vld [vmem:[%s30804_s3 + $0x78] sm:$0xff]   ;;  %v25903_v25 = vld [vmem:[%s30804_s3] sm:$0xff]  }
 0x3a7   : >> { %22465 = vmatprep.subr.bf16.mxu0 %v25896_v16  ;;  %23365 = vmatprep.subr.bf16.mxu1 %v25896_v16  ;;  %v25904_v28 = vld [vmem:[%s30804_s3 + $0x8] sm:$0xff]   ;;  %v25905_v31 = vld [vmem:[%s30804_s3 + $0x10] sm:$0xff]   ;;  %v25906_v0 = vld [vmem:[%s30804_s3 + $0x18] sm:$0xff]  }
 0x3a8   : >> { %v25907_v3 = vld [vmem:[%s30804_s3 + $0x20] sm:$0xff]   ;;  %v25908_v8 = vld [vmem:[%s30804_s3 + $0x28] sm:$0xff]   ;;  %v25909_v9 = vld [vmem:[%s30804_s3 + $0x30] sm:$0xff]  }
 0x3a9   : >> { %v25910_v14 = vld [vmem:[%s30804_s3 + $0x38] sm:$0xff]   ;;  %v25911_v15 = vld [vmem:[%s30804_s3 + $0x80] sm:$0xff]   ;;  %v25912_v37 = vld [vmem:[%s30804_s3 + $0x88] sm:$0xff]  }
 0x3aa   : >> { %22466 = vmatpush3.bf16.msra.mxu0 %v25896_v16  ;;  %23366 = vmatpush3.bf16.msra.mxu1 %v25896_v16  ;;  %v28461_v19 = vld [vmem:[%s28458_s23 + $0x8] sm:$0xff]  ;;  %v28464_v20 = vld [vmem:[%s28458_s23 + $0x78] sm:$0xff]  ;;  %v28484_v26 = vld [vmem:[%s28458_s23 + $0x10] sm:$0xff] }
 0x3ab   : >> { %22467 = vmatprep.subr.bf16.mxu0 %v25897_v17  ;;  %23367 = vmatprep.subr.bf16.mxu1 %v25897_v17  ;;  %v28487_v27 = vld [vmem:[%s28458_s23 + $0x80] sm:$0xff]  ;;  %v28493_v29 = vld [vmem:[%s28458_s23 + $0x18] sm:$0xff]  ;;  %v28498_v30 = vld [vmem:[%s28458_s23 + $0x88] sm:$0xff] }
 0x3ac   : >> { %22479 = vmatprep.mubr.bf16.mxu0 %v28461_v19  ;;  %23379 = vmatprep.mubr.bf16.mxu1 %v28464_v20  ;;  %v28506_v32 = vld [vmem:[%s28458_s23 + $0x20] sm:$0xff]  ;;  %v28509_v63 = vld [vmem:[%s28458_s23 + $0x90] sm:$0xff]  ;;  %v28515_v1 = vld [vmem:[%s28458_s23 + $0x28] sm:$0xff] }
 0x3ad   : >> { %v28520_v2 = vld [vmem:[%s28458_s23 + $0x98] sm:$0xff]  ;;  %v28528_v4 = vld [vmem:[%s28458_s23 + $0x30] sm:$0xff]  ;;  %v28531_v5 = vld [vmem:[%s28458_s23 + $0xa0] sm:$0xff] }
 0x3ae   : >> { %22468 = vmatpush3.bf16.msra.mxu0 %v25897_v17  ;;  %23368 = vmatpush3.bf16.msra.mxu1 %v25897_v17  ;;  %v28534_v6 = vld [vmem:[%s28458_s23 + $0x38] sm:$0xff]  ;;  %v28537_v7 = vld [vmem:[%s28458_s23 + $0xa8] sm:$0xff]  ;;  %v28550_v10 = vld [vmem:[%s28458_s23 + $0x40] sm:$0xff] }
 0x3af   : >> { %22469 = vmatprep.subr.bf16.mxu0 %v25898_v18  ;;  %23369 = vmatprep.subr.bf16.mxu1 %v25898_v18  ;;  %v28553_v11 = vld [vmem:[%s28458_s23 + $0xb0] sm:$0xff]  ;;  %v28556_v12 = vld [vmem:[%s28458_s23 + $0x48] sm:$0xff]  ;;  %v28559_v13 = vld [vmem:[%s28458_s23 + $0xb8] sm:$0xff] }
 0x3b0   : >> { %v28572_v33 = vld [vmem:[%s28458_s23 + $0x50] sm:$0xff]  ;;  %v28575_v34 = vld [vmem:[%s28458_s23 + $0xc0] sm:$0xff]  ;;  %v25914_v39 = vld [vmem:[%s30804_s3 + $0x98] sm:$0xff]  }
 0x3b1   : >> { %v8161_v35 = vld [vmem:[%s28458_s23] sm:$0xff]  ;;  %v19934_v36 = vld [vmem:[%s28458_s23 + $0x70] sm:$0xff]  ;;  %v25916_v41 = vld [vmem:[%s30804_s3 + $0xa8] sm:$0xff]  }
 0x3b2   : >> { %22470 = vmatpush3.bf16.msra.mxu0 %v25898_v18  ;;  %23370 = vmatpush3.bf16.msra.mxu1 %v25898_v18  ;;  %v25913_v38 = vld [vmem:[%s30804_s3 + $0x90] sm:$0xff]   ;;  %v25915_v40 = vld [vmem:[%s30804_s3 + $0xa0] sm:$0xff]   ;;  %v25918_v43 = vld [vmem:[%s30804_s3 + $0xb8] sm:$0xff]  }
 0x3b3   : >> { %22471 = vmatprep.subr.bf16.mxu0 %v25899_v21  ;;  %23371 = vmatprep.subr.bf16.mxu1 %v25899_v21  ;;  %v25917_v42 = vld [vmem:[%s30804_s3 + $0xb0] sm:$0xff]   ;;  %v25919_v44 = vld [vmem:[%s30804_s3 + $0xc0] sm:$0xff]   ;;  %v25920_v45 = vld [vmem:[%s30804_s3 + $0xc8] sm:$0xff]  }
 0x3b4   : >> { %v25921_v46 = vld [vmem:[%s30804_s3 + $0xd0] sm:$0xff]   ;;  %v25922_v47 = vld [vmem:[%s30804_s3 + $0xd8] sm:$0xff]   ;;  %v25923_v48 = vld [vmem:[%s30804_s3 + $0xe0] sm:$0xff]  }
 0x3b5   : >> { %v25924_v49 = vld [vmem:[%s30804_s3 + $0xe8] sm:$0xff]   ;;  %v25925_v50 = vld [vmem:[%s30804_s3 + $0xf0] sm:$0xff]   ;;  %v25926_v51 = vld [vmem:[%s30804_s3 + $0xf8] sm:$0xff]  }
 0x3b6   : >> { %22472 = vmatpush3.bf16.msra.mxu0 %v25899_v21  ;;  %23372 = vmatpush3.bf16.msra.mxu1 %v25899_v21  ;;  %v25927_v52 = vld [vmem:[%s30804_s3 + $0x100] sm:$0xff]   ;;  %v28666_v53 = vld [vmem:[%s28458_s23 + $0x58] sm:$0xff]  ;;  %v28669_v54 = vld [vmem:[%s28458_s23 + $0xc8] sm:$0xff] }
 0x3b7   : >> { %22473 = vmatprep.subr.bf16.mxu0 %v25900_v22  ;;  %23373 = vmatprep.subr.bf16.mxu1 %v25900_v22  ;;  %v25928_v55 = vld [vmem:[%s30804_s3 + $0x108] sm:$0xff]   ;;  %v25929_v56 = vld [vmem:[%s30804_s3 + $0x110] sm:$0xff]   ;;  %v25930_v57 = vld [vmem:[%s30804_s3 + $0x118] sm:$0xff]  }
 0x3b8   : >> { %v25931_v58 = vld [vmem:[%s30804_s3 + $0x120] sm:$0xff]   ;;  %v25932_v59 = vld [vmem:[%s30804_s3 + $0x128] sm:$0xff]   ;;  %v25933_v60 = vld [vmem:[%s30804_s3 + $0x130] sm:$0xff]  }
 0x3b9   : >> { %v25934_v62 = vld [vmem:[%s30804_s3 + $0x138] sm:$0xff]   ;;  %v25935_v16 = vld [vmem:[%s30804_s3 + $0x140] sm:$0xff]   ;;  %v28719_v18 = vld [vmem:[%s28458_s23 + $0xd0] sm:$0xff] }
 0x3ba   : >> { %22474 = vmatpush3.bf16.msra.mxu0 %v25900_v22  ;;  %23374 = vmatpush3.bf16.msra.mxu1 %v25900_v22  ;;  %v28716_v17 = vld [vmem:[%s28458_s23 + $0x60] sm:$0xff]  ;;  %v25936_v21 = vld [vmem:[%s30804_s3 + $0x148] sm:$0xff]  }
 0x3bb   : >> { %22475 = vmatprep.subr.bf16.mxu0 %v25901_v23  ;;  %23375 = vmatprep.subr.bf16.mxu1 %v25901_v23  ;;  %v26097_v22 = vld [vmem:[%s28458_s23 + $0x28] sm:$0xff] }
 0x3be   : >> { %22476 = vmatpush3.bf16.msra.mxu0 %v25901_v23  ;;  %23376 = vmatpush3.bf16.msra.mxu1 %v25901_v23  ;;  %v28733_v23 = vld [vmem:[%s28458_s23 + $0x98] sm:$0xff] }
 0x3bf   : >> { %22477 = vmatprep.subr.bf16.mxu0 %v25902_v24  ;;  %23377 = vmatprep.subr.bf16.mxu1 %v25902_v24 }
 0x3c2   : >> { %22478 = vmatpush3.bf16.msra.mxu0 %v25902_v24  ;;  %23378 = vmatpush3.bf16.msra.mxu1 %v25902_v24  ;;  %v25937_v24 = vld [vmem:[%s30804_s3 + $0x150] sm:$0xff]  }
 0x3c3   : >> { %22499 = vmatprep.subr.bf16.mxu0 %v25903_v25  ;;  %23399 = vmatprep.subr.bf16.mxu1 %v25903_v25 }
 0x3c5   : >> { %22480 = vmatmul.mubr.bf16.vlgmr.msra.gmra.mrb[0].mxu0 %v28484_v26  ;;  %23380 = vmatmul.mubr.bf16.vlgmr.msra.gmra.mrb[0].mxu1 %v28487_v27 }
 0x3c6   : >> { %22500 = vmatpush3.bf16.msra.mxu0 %v25903_v25  ;;  %23400 = vmatpush3.bf16.msra.mxu1 %v25903_v25  ;;  %v26099_v25 = vld [vmem:[%s28458_s23 + $0x30] sm:$0xff] }
 0x3c7   : >> { %22501 = vmatprep.subr.bf16.mxu0 %v25904_v28  ;;  %23401 = vmatprep.subr.bf16.mxu1 %v25904_v28 }
 0x3c8   : >> { %22483 = vmatprep.mubr.bf16.mxu0 %v28493_v29  ;;  %23383 = vmatprep.mubr.bf16.mxu1 %v28498_v30 }
 0x3ca   : >> { %22502 = vmatpush3.bf16.msra.mxu0 %v25904_v28  ;;  %23402 = vmatpush3.bf16.msra.mxu1 %v25904_v28  ;;  %v26101_v28 = vld [vmem:[%s28458_s23 + $0x38] sm:$0xff] }
 0x3cb   : >> { %22503 = vmatprep.subr.bf16.mxu0 %v25905_v31  ;;  %23403 = vmatprep.subr.bf16.mxu1 %v25905_v31 }
 0x3cd   : >> { %22484 = vmatmul.mubr.bf16.gmra.mrb[4].mxu0 %v28506_v32  ;;  %23384 = vmatmul.mubr.bf16.gmra.mrb[4].mxu1 %v28509_v63 }
 0x3ce   : >> { %22504 = vmatpush3.bf16.msra.mxu0 %v25905_v31  ;;  %23404 = vmatpush3.bf16.msra.mxu1 %v25905_v31  ;;  %v25939_v31 = vld [vmem:[%s30804_s3 + $0x160] sm:$0xff]  }
 0x3cf   : >> { %22487 = vmatprep.mubr.bf16.mxu0 %v28515_v1  ;;  %22505 = vmatprep.subr.bf16.mxu0 %v25906_v0 }
 0x3d0   : >> { %23387 = vmatprep.mubr.bf16.mxu1 %v28520_v2  ;;  %23405 = vmatprep.subr.bf16.mxu1 %v25906_v0 }
 0x3d2   : >> { %22506 = vmatpush3.bf16.msra.mxu0 %v25906_v0  ;;  %23406 = vmatpush3.bf16.msra.mxu1 %v25906_v0  ;;  %v26105_v0 = vld [vmem:[%s28458_s23 + $0x48] sm:$0xff] }
 0x3d3   : >> { %22507 = vmatprep.subr.bf16.mxu0 %v25907_v3  ;;  %23407 = vmatprep.subr.bf16.mxu1 %v25907_v3 }
 0x3d5   : >> { %22488 = vmatmul.mubr.bf16.gmra.mrb[8].mxu0 %v28528_v4  ;;  %23388 = vmatmul.mubr.bf16.gmra.mrb[8].mxu1 %v28531_v5 }
 0x3d6   : >> { %22508 = vmatpush3.bf16.msra.mxu0 %v25907_v3  ;;  %23408 = vmatpush3.bf16.msra.mxu1 %v25907_v3  ;;  %v28770_v3 = vld [vmem:[%s28458_s23 + $0xc0] sm:$0xff] }
 0x3d7   : >> { %22491 = vmatprep.mubr.bf16.mxu0 %v28534_v6  ;;  %23391 = vmatprep.mubr.bf16.mxu1 %v28537_v7 }
 0x3d8   : >> { %22509 = vmatprep.subr.bf16.mxu0 %v25908_v8  ;;  %23409 = vmatprep.subr.bf16.mxu1 %v25908_v8 }
 0x3da   : >> { %22510 = vmatpush3.bf16.msra.mxu0 %v25908_v8  ;;  %23410 = vmatpush3.bf16.msra.mxu1 %v25908_v8  ;;  %v28788_v8 = vld [vmem:[%s28458_s23 + $0xd8] sm:$0xff] }
 0x3db   : >> { %22511 = vmatprep.subr.bf16.mxu0 %v25909_v9  ;;  %23411 = vmatprep.subr.bf16.mxu1 %v25909_v9 }
 0x3dd   : >> { %22492 = vmatmul.mubr.bf16.gmra.mrb[12].mxu0 %v28550_v10  ;;  %23392 = vmatmul.mubr.bf16.gmra.mrb[12].mxu1 %v28553_v11 }
 0x3de   : >> { %22495 = vmatprep.mubr.bf16.mxu0 %v28556_v12  ;;  %22512 = vmatpush3.bf16.msra.mxu0 %v25909_v9 }
 0x3df   : >> { %23395 = vmatprep.mubr.bf16.mxu1 %v28559_v13  ;;  %23412 = vmatpush3.bf16.msra.mxu1 %v25909_v9  ;;  %v28791_v9 = vld [vmem:[%s28458_s23 + $0xe0] sm:$0xff] }
 0x3e0   : >> { %22513 = vmatprep.subr.bf16.mxu0 %v25910_v14  ;;  %23413 = vmatprep.subr.bf16.mxu1 %v25910_v14 }
 0x3e2   : >> { %22514 = vmatpush3.bf16.msra.mxu0 %v25910_v14 }
 0x3e3   : >> { %23414 = vmatpush3.bf16.msra.mxu1 %v25910_v14  ;;  %22535 = vmatprep.subr.bf16.mxu0 %v25911_v15  ;;  %v28808_v14 = vld [vmem:[%s28458_s23 + $0xf0] sm:$0xff] }
 0x3e4   : >> { %23435 = vmatprep.subr.bf16.mxu1 %v25911_v15 }
 0x3e5   : >> { %22496 = vmatmul.mubr.bf16.gmra.mrb[16].mxu0 %v28572_v33  ;;  %23396 = vmatmul.mubr.bf16.gmra.mrb[16].mxu1 %v28575_v34 }
 0x3e6   : >> { %22515 = vmatprep.mubr.bf16.mxu0 %v8161_v35  ;;  %23415 = vmatprep.mubr.bf16.mxu1 %v19934_v36  ;;  %v25946_v35 = vld [vmem:[%s30804_s3 + $0x198] sm:$0xff]   ;;  %v28825_v36 = vld [vmem:[%s28458_s23 + $0x88] sm:$0xff] }
 0x3ed   : >> { %22516 = vmatmul.mubr.bf16.vlgmr.msra.gmra.mrb[0].mxu0 %v28461_v19  ;;  %23416 = vmatmul.mubr.bf16.vlgmr.msra.gmra.mrb[0].mxu1 %v28464_v20  ;;  %v26095_v19 = vld [vmem:[%s28458_s23 + $0x20] sm:$0xff]  ;;  %v28725_v20 = vld [vmem:[%s28458_s23 + $0x90] sm:$0xff] }
 0x3ee   : >> { %22536 = vmatpush3.bf16.msra.mxu0 %v25911_v15  ;;  %23436 = vmatpush3.bf16.msra.mxu1 %v25911_v15  ;;  %v25945_v15 = vld [vmem:[%s30804_s3 + $0x190] sm:$0xff]  }
 0x3ef   : >> { %22537 = vmatprep.subr.bf16.mxu0 %v25912_v37  ;;  %23437 = vmatprep.subr.bf16.mxu1 %v25912_v37 }
 0x3f0   : >> { %22519 = vmatprep.mubr.bf16.mxu0 %v28484_v26  ;;  %23419 = vmatprep.mubr.bf16.mxu1 %v28487_v27 }
 0x3f2   : >> { %22538 = vmatpush3.bf16.msra.mxu0 %v25912_v37  ;;  %23438 = vmatpush3.bf16.msra.mxu1 %v25912_v37  ;;  %v28830_v37 = vld [vmem:[%s28458_s23 + $0x100] sm:$0xff] }
 0x3f3   : >> { %22539 = vmatprep.subr.bf16.mxu0 %v25913_v38  ;;  %23439 = vmatprep.subr.bf16.mxu1 %v25913_v38 }
 0x3f5   : >> { %22520 = vmatmul.mubr.bf16.gmra.mrb[4].mxu0 %v28493_v29  ;;  %23420 = vmatmul.mubr.bf16.gmra.mrb[4].mxu1 %v28498_v30 }
 0x3f6   : >> { %22540 = vmatpush3.bf16.msra.mxu0 %v25913_v38  ;;  %23440 = vmatpush3.bf16.msra.mxu1 %v25913_v38  ;;  %v25947_v38 = vld [vmem:[%s30804_s3 + $0x1a0] sm:$0xff]  }
 0x3f7   : >> { %22523 = vmatprep.mubr.bf16.mxu0 %v28506_v32  ;;  %22541 = vmatprep.subr.bf16.mxu0 %v25914_v39 }
 0x3f8   : >> { %23423 = vmatprep.mubr.bf16.mxu1 %v28509_v63  ;;  %23441 = vmatprep.subr.bf16.mxu1 %v25914_v39 }
 0x3fa   : >> { %22542 = vmatpush3.bf16.msra.mxu0 %v25914_v39  ;;  %23442 = vmatpush3.bf16.msra.mxu1 %v25914_v39  ;;  %v28838_v39 = vld [vmem:[%s28458_s23 + $0x108] sm:$0xff] }
 0x3fb   : >> { %22543 = vmatprep.subr.bf16.mxu0 %v25915_v40  ;;  %23443 = vmatprep.subr.bf16.mxu1 %v25915_v40 }
 0x3fd   : >> { %22524 = vmatmul.mubr.bf16.gmra.mrb[8].mxu0 %v28515_v1  ;;  %23424 = vmatmul.mubr.bf16.gmra.mrb[8].mxu1 %v28520_v2 }
 0x3fe   : >> { %22544 = vmatpush3.bf16.msra.mxu0 %v25915_v40  ;;  %23444 = vmatpush3.bf16.msra.mxu1 %v25915_v40  ;;  %v28841_v40 = vld [vmem:[%s28458_s23 + $0x110] sm:$0xff] }
 0x3ff   : >> { %22527 = vmatprep.mubr.bf16.mxu0 %v28528_v4  ;;  %23427 = vmatprep.mubr.bf16.mxu1 %v28531_v5 }
 0x400   : >> { %22545 = vmatprep.subr.bf16.mxu0 %v25916_v41  ;;  %23445 = vmatprep.subr.bf16.mxu1 %v25916_v41 }
 0x402   : >> { %22546 = vmatpush3.bf16.msra.mxu0 %v25916_v41  ;;  %23446 = vmatpush3.bf16.msra.mxu1 %v25916_v41  ;;  %v25948_v41 = vld [vmem:[%s30804_s3 + $0x1a8] sm:$0xff]  }
 0x403   : >> { %22547 = vmatprep.subr.bf16.mxu0 %v25917_v42  ;;  %23447 = vmatprep.subr.bf16.mxu1 %v25917_v42 }
 0x405   : >> { %22528 = vmatmul.mubr.bf16.gmra.mrb[12].mxu0 %v28534_v6  ;;  %23428 = vmatmul.mubr.bf16.gmra.mrb[12].mxu1 %v28537_v7 }
 0x406   : >> { %22531 = vmatprep.mubr.bf16.mxu0 %v28550_v10  ;;  %22548 = vmatpush3.bf16.msra.mxu0 %v25917_v42 }
 0x407   : >> { %23431 = vmatprep.mubr.bf16.mxu1 %v28553_v11  ;;  %23448 = vmatpush3.bf16.msra.mxu1 %v25917_v42  ;;  %v25949_v42 = vld [vmem:[%s30804_s3 + $0x1b0] sm:$0xff]  }
 0x408   : >> { %22549 = vmatprep.subr.bf16.mxu0 %v25918_v43  ;;  %23449 = vmatprep.subr.bf16.mxu1 %v25918_v43 }
 0x40a   : >> { %22550 = vmatpush3.bf16.msra.mxu0 %v25918_v43 }
 0x40b   : >> { %23450 = vmatpush3.bf16.msra.mxu1 %v25918_v43  ;;  %22571 = vmatprep.subr.bf16.mxu0 %v25919_v44  ;;  %v28854_v43 = vld [vmem:[%s28458_s23 + $0x118] sm:$0xff] }
 0x40c   : >> { %23471 = vmatprep.subr.bf16.mxu1 %v25919_v44 }
 0x40d   : >> { %22532 = vmatmul.mubr.bf16.gmra.mrb[16].mxu0 %v28556_v12  ;;  %23432 = vmatmul.mubr.bf16.gmra.mrb[16].mxu1 %v28559_v13 }
 0x40e   : >> { %22551 = vmatprep.mubr.bf16.mxu0 %v28484_v26  ;;  %23451 = vmatprep.mubr.bf16.mxu1 %v28487_v27  ;;  %v28741_v26 = vld [vmem:[%s28458_s23 + $0xa0] sm:$0xff]  ;;  %v25938_v27 = vld [vmem:[%s30804_s3 + $0x158] sm:$0xff]  }
 0x415   : >> { %22552 = vmatmul.mubr.bf16.vlgmr.msra.gmra.mrb[0].mxu0 %v28493_v29  ;;  %23452 = vmatmul.mubr.bf16.vlgmr.msra.gmra.mrb[0].mxu1 %v28498_v30 }
 0x416   : >> { %22572 = vmatpush3.bf16.msra.mxu0 %v25919_v44  ;;  %23472 = vmatpush3.bf16.msra.mxu1 %v25919_v44  ;;  %v28857_v44 = vld [vmem:[%s28458_s23 + $0x120] sm:$0xff] }
 0x417   : >> { %22573 = vmatprep.subr.bf16.mxu0 %v25920_v45  ;;  %23473 = vmatprep.subr.bf16.mxu1 %v25920_v45 }
 0x418   : >> { %22555 = vmatprep.mubr.bf16.mxu0 %v28506_v32  ;;  %23455 = vmatprep.mubr.bf16.mxu1 %v28509_v63 }
 0x41a   : >> { %22574 = vmatpush3.bf16.msra.mxu0 %v25920_v45  ;;  %23474 = vmatpush3.bf16.msra.mxu1 %v25920_v45  ;;  %v25950_v45 = vld [vmem:[%s30804_s3 + $0x1b8] sm:$0xff]  }
 0x41b   : >> { %22575 = vmatprep.subr.bf16.mxu0 %v25921_v46  ;;  %23475 = vmatprep.subr.bf16.mxu1 %v25921_v46 }
 0x41d   : >> { %22556 = vmatmul.mubr.bf16.gmra.mrb[4].mxu0 %v28515_v1  ;;  %23456 = vmatmul.mubr.bf16.gmra.mrb[4].mxu1 %v28520_v2 }
 0x41e   : >> { %22576 = vmatpush3.bf16.msra.mxu0 %v25921_v46  ;;  %23476 = vmatpush3.bf16.msra.mxu1 %v25921_v46  ;;  %v25951_v46 = vld [vmem:[%s30804_s3 + $0x1c0] sm:$0xff]  }
 0x41f   : >> { %22559 = vmatprep.mubr.bf16.mxu0 %v28528_v4  ;;  %22577 = vmatprep.subr.bf16.mxu0 %v25922_v47 }
 0x420   : >> { %23459 = vmatprep.mubr.bf16.mxu1 %v28531_v5  ;;  %23477 = vmatprep.subr.bf16.mxu1 %v25922_v47 }
 0x422   : >> { %22578 = vmatpush3.bf16.msra.mxu0 %v25922_v47  ;;  %23478 = vmatpush3.bf16.msra.mxu1 %v25922_v47  ;;  %v28870_v47 = vld [vmem:[%s28458_s23 + $0x128] sm:$0xff] }
 0x423   : >> { %22579 = vmatprep.subr.bf16.mxu0 %v25923_v48  ;;  %23479 = vmatprep.subr.bf16.mxu1 %v25923_v48 }
 0x425   : >> { %22560 = vmatmul.mubr.bf16.gmra.mrb[8].mxu0 %v28534_v6  ;;  %23460 = vmatmul.mubr.bf16.gmra.mrb[8].mxu1 %v28537_v7 }
 0x426   : >> { %22580 = vmatpush3.bf16.msra.mxu0 %v25923_v48  ;;  %23480 = vmatpush3.bf16.msra.mxu1 %v25923_v48  ;;  %v25952_v48 = vld [vmem:[%s30804_s3 + $0x1c8] sm:$0xff]  }
 0x427   : >> { %22563 = vmatprep.mubr.bf16.mxu0 %v28550_v10  ;;  %23463 = vmatprep.mubr.bf16.mxu1 %v28553_v11 }
 0x428   : >> { %22581 = vmatprep.subr.bf16.mxu0 %v25924_v49  ;;  %23481 = vmatprep.subr.bf16.mxu1 %v25924_v49 }
 0x42a   : >> { %22582 = vmatpush3.bf16.msra.mxu0 %v25924_v49  ;;  %23482 = vmatpush3.bf16.msra.mxu1 %v25924_v49  ;;  %v25953_v49 = vld [vmem:[%s30804_s3 + $0x1d0] sm:$0xff]  }
 0x42b   : >> { %22583 = vmatprep.subr.bf16.mxu0 %v25925_v50  ;;  %23483 = vmatprep.subr.bf16.mxu1 %v25925_v50 }
 0x42d   : >> { %22564 = vmatmul.mubr.bf16.gmra.mrb[12].mxu0 %v28556_v12  ;;  %23464 = vmatmul.mubr.bf16.gmra.mrb[12].mxu1 %v28559_v13 }
 0x42e   : >> { %22567 = vmatprep.mubr.bf16.mxu0 %v28572_v33  ;;  %22584 = vmatpush3.bf16.msra.mxu0 %v25925_v50 }
 0x42f   : >> { %23467 = vmatprep.mubr.bf16.mxu1 %v28575_v34  ;;  %23484 = vmatpush3.bf16.msra.mxu1 %v25925_v50  ;;  %v25954_v50 = vld [vmem:[%s30804_s3 + $0x1d8] sm:$0xff]  }
 0x430   : >> { %22585 = vmatprep.subr.bf16.mxu0 %v25926_v51  ;;  %23485 = vmatprep.subr.bf16.mxu1 %v25926_v51 }
 0x432   : >> { %22586 = vmatpush3.bf16.msra.mxu0 %v25926_v51 }
 0x433   : >> { %23486 = vmatpush3.bf16.msra.mxu1 %v25926_v51  ;;  %22607 = vmatprep.subr.bf16.mxu0 %v25927_v52  ;;  %v25955_v51 = vld [vmem:[%s30804_s3 + $0x1e0] sm:$0xff]  }
 0x434   : >> { %23507 = vmatprep.subr.bf16.mxu1 %v25927_v52 }
 0x435   : >> { %22568 = vmatmul.mubr.bf16.gmra.mrb[16].mxu0 %v28666_v53  ;;  %23468 = vmatmul.mubr.bf16.gmra.mrb[16].mxu1 %v28669_v54 }
 0x436   : >> { %22587 = vmatprep.mubr.bf16.mxu0 %v28493_v29  ;;  %23487 = vmatprep.mubr.bf16.mxu1 %v28498_v30  ;;  %v28749_v29 = vld [vmem:[%s28458_s23 + $0xa8] sm:$0xff]  ;;  %v26103_v30 = vld [vmem:[%s28458_s23 + $0x40] sm:$0xff] }
 0x43d   : >> { %22588 = vmatmul.mubr.bf16.vlgmr.msra.gmra.mrb[0].mxu0 %v28506_v32  ;;  %23488 = vmatmul.mubr.bf16.vlgmr.msra.gmra.mrb[0].mxu1 %v28509_v63  ;;  %v28757_v32 = vld [vmem:[%s28458_s23 + $0xb0] sm:$0xff]  ;;  %v25940_v63 = vld [vmem:[%s30804_s3 + $0x168] sm:$0xff]  }
 0x43e   : >> { %22608 = vmatpush3.bf16.msra.mxu0 %v25927_v52  ;;  %23508 = vmatpush3.bf16.msra.mxu1 %v25927_v52  ;;  %v25956_v52 = vld [vmem:[%s30804_s3 + $0x1e8] sm:$0xff]  }
 0x43f   : >> { %22609 = vmatprep.subr.bf16.mxu0 %v25928_v55  ;;  %23509 = vmatprep.subr.bf16.mxu1 %v25928_v55 }
 0x440   : >> { %22591 = vmatprep.mubr.bf16.mxu0 %v28515_v1  ;;  %23491 = vmatprep.mubr.bf16.mxu1 %v28520_v2  ;;  %v28765_v1 = vld [vmem:[%s28458_s23 + $0xb8] sm:$0xff]  ;;  %v26107_v2 = vld [vmem:[%s28458_s23 + $0x50] sm:$0xff] }
 0x442   : >> { %22610 = vmatpush3.bf16.msra.mxu0 %v25928_v55  ;;  %23510 = vmatpush3.bf16.msra.mxu1 %v25928_v55  ;;  %v25958_v55 = vld [vmem:[%s30804_s3 + $0x1f8] sm:$0xff]  }
 0x443   : >> { %22611 = vmatprep.subr.bf16.mxu0 %v25929_v56  ;;  %23511 = vmatprep.subr.bf16.mxu1 %v25929_v56 }
 0x445   : >> { %22592 = vmatmul.mubr.bf16.gmra.mrb[4].mxu0 %v28528_v4  ;;  %23492 = vmatmul.mubr.bf16.gmra.mrb[4].mxu1 %v28531_v5  ;;  %v25941_v4 = vld [vmem:[%s30804_s3 + $0x170] sm:$0xff]   ;;  %v25942_v5 = vld [vmem:[%s30804_s3 + $0x178] sm:$0xff]  }
 0x446   : >> { %22612 = vmatpush3.bf16.msra.mxu0 %v25929_v56  ;;  %23512 = vmatpush3.bf16.msra.mxu1 %v25929_v56  ;;  %v25959_v56 = vld [vmem:[%s30804_s3 + $0x200] sm:$0xff]  }
 0x447   : >> { %22595 = vmatprep.mubr.bf16.mxu0 %v28534_v6  ;;  %22613 = vmatprep.subr.bf16.mxu0 %v25930_v57  ;;  %v25943_v6 = vld [vmem:[%s30804_s3 + $0x180] sm:$0xff]  }
 0x448   : >> { %23495 = vmatprep.mubr.bf16.mxu1 %v28537_v7  ;;  %23513 = vmatprep.subr.bf16.mxu1 %v25930_v57  ;;  %v8174_v7 = vld [vmem:[%s28458_s23 + $0x68] sm:$0xff] }
 0x44a   : >> { %22614 = vmatpush3.bf16.msra.mxu0 %v25930_v57  ;;  %23514 = vmatpush3.bf16.msra.mxu1 %v25930_v57  ;;  %v28917_v57 = vld [vmem:[%s28458_s23 + $0x130] sm:$0xff] }
 0x44b   : >> { %22615 = vmatprep.subr.bf16.mxu0 %v25931_v58  ;;  %23515 = vmatprep.subr.bf16.mxu1 %v25931_v58 }
 0x44d   : >> { %22596 = vmatmul.mubr.bf16.gmra.mrb[8].mxu0 %v28550_v10  ;;  %23496 = vmatmul.mubr.bf16.gmra.mrb[8].mxu1 %v28553_v11  ;;  %v26109_v10 = vld [vmem:[%s28458_s23 + $0x70] sm:$0xff]  ;;  %v28797_v11 = vld [vmem:[%s28458_s23 + $0xe8] sm:$0xff] }
 0x44e   : >> { %22616 = vmatpush3.bf16.msra.mxu0 %v25931_v58  ;;  %23516 = vmatpush3.bf16.msra.mxu1 %v25931_v58  ;;  %v25960_v58 = vld [vmem:[%s30804_s3 + $0x208] sm:$0xff]  }
 0x44f   : >> { %22599 = vmatprep.mubr.bf16.mxu0 %v28556_v12  ;;  %23499 = vmatprep.mubr.bf16.mxu1 %v28559_v13  ;;  %v25944_v12 = vld [vmem:[%s30804_s3 + $0x188] sm:$0xff]   ;;  %v28803_v13 = vld [vmem:[%s28458_s23 + $0x78] sm:$0xff] }
 0x450   : >> { %22617 = vmatprep.subr.bf16.mxu0 %v25932_v59  ;;  %23517 = vmatprep.subr.bf16.mxu1 %v25932_v59 }
 0x452   : >> { %22618 = vmatpush3.bf16.msra.mxu0 %v25932_v59  ;;  %23518 = vmatpush3.bf16.msra.mxu1 %v25932_v59  ;;  %v25961_v59 = vld [vmem:[%s30804_s3 + $0x210] sm:$0xff]  }
 0x453   : >> { %22619 = vmatprep.subr.bf16.mxu0 %v25933_v60  ;;  %23519 = vmatprep.subr.bf16.mxu1 %v25933_v60 }
 0x455   : >> { %22600 = vmatmul.mubr.bf16.gmra.mrb[12].mxu0 %v28572_v33  ;;  %23500 = vmatmul.mubr.bf16.gmra.mrb[12].mxu1 %v28575_v34  ;;  %v28814_v33 = vld [vmem:[%s28458_s23 + $0x80] sm:$0xff]  ;;  %v28819_v34 = vld [vmem:[%s28458_s23 + $0xf8] sm:$0xff] }
 0x456   : >> { %22603 = vmatprep.mubr.bf16.mxu0 %v28666_v53  ;;  %22620 = vmatpush3.bf16.msra.mxu0 %v25933_v60 }
 0x457   : >> { %23503 = vmatprep.mubr.bf16.mxu1 %v28669_v54  ;;  %23520 = vmatpush3.bf16.msra.mxu1 %v25933_v60  ;;  %v25962_v60 = vld [vmem:[%s30804_s3 + $0x218] sm:$0xff]  }
 0x458   : >> { %22621 = vmatprep.subr.bf16.mxu0 %v25934_v62  ;;  %23521 = vmatprep.subr.bf16.mxu1 %v25934_v62 }
 0x45a   : >> { %22622 = vmatpush3.bf16.msra.mxu0 %v25934_v62 }
 0x45b   : >> { %23522 = vmatpush3.bf16.msra.mxu1 %v25934_v62  ;;  %22643 = vmatprep.subr.bf16.mxu0 %v25935_v16  ;;  %v25963_v62 = vld [vmem:[%s30804_s3 + $0x220] sm:$0xff]  }
 0x45c   : >> { %23543 = vmatprep.subr.bf16.mxu1 %v25935_v16 }
 0x45d   : >> { %22604 = vmatmul.mubr.bf16.gmra.mrb[16].mxu0 %v28716_v17  ;;  %23504 = vmatmul.mubr.bf16.gmra.mrb[16].mxu1 %v28719_v18 }
 0x45e   : >> { %22623 = vmatprep.mubr.bf16.mxu0 %v26095_v19  ;;  %23523 = vmatprep.mubr.bf16.mxu1 %v28725_v20  ;;  %v25966_v19 = vld [vmem:[%s30804_s3 + $0x238] sm:$0xff]  }
 0x465   : >> { %22624 = vmatmul.mubr.bf16.vlgmr.msra.gmra.mrb[0].mxu0 %v26097_v22  ;;  %23524 = vmatmul.mubr.bf16.vlgmr.msra.gmra.mrb[0].mxu1 %v28733_v23  ;;  %v28964_v22 = vld [vmem:[%s28458_s23 + $0x138] sm:$0xff] }
 0x466   : >> { %22644 = vmatpush3.bf16.msra.mxu0 %v25935_v16  ;;  %23544 = vmatpush3.bf16.msra.mxu1 %v25935_v16  ;;  %v25964_v16 = vld [vmem:[%s30804_s3 + $0x228] sm:$0xff]  }
 0x467   : >> { %22645 = vmatprep.subr.bf16.mxu0 %v25936_v21  ;;  %23545 = vmatprep.subr.bf16.mxu1 %v25936_v21 }
 0x468   : >> { %22627 = vmatprep.mubr.bf16.mxu0 %v26099_v25  ;;  %23527 = vmatprep.mubr.bf16.mxu1 %v28741_v26  ;;  %v25969_v25 = vld [vmem:[%s30804_s3 + $0x250] sm:$0xff]  }
 0x46a   : >> { %22646 = vmatpush3.bf16.msra.mxu0 %v25936_v21  ;;  %23546 = vmatpush3.bf16.msra.mxu1 %v25936_v21  ;;  %v25967_v21 = vld [vmem:[%s30804_s3 + $0x240] sm:$0xff]  }
 0x46b   : >> { %22647 = vmatprep.subr.bf16.mxu0 %v25937_v24  ;;  %23547 = vmatprep.subr.bf16.mxu1 %v25937_v24 }
 0x46d   : >> { %22628 = vmatmul.mubr.bf16.gmra.mrb[4].mxu0 %v26101_v28  ;;  %23528 = vmatmul.mubr.bf16.gmra.mrb[4].mxu1 %v28749_v29  ;;  %v25971_v28 = vld [vmem:[%s30804_s3 + $0x260] sm:$0xff]  }
 0x46e   : >> { %22648 = vmatpush3.bf16.msra.mxu0 %v25937_v24  ;;  %23548 = vmatpush3.bf16.msra.mxu1 %v25937_v24  ;;  %v25968_v24 = vld [vmem:[%s30804_s3 + $0x248] sm:$0xff]  }
 0x46f   : >> { %22631 = vmatprep.mubr.bf16.mxu0 %v26103_v30  ;;  %22649 = vmatprep.subr.bf16.mxu0 %v25938_v27  ;;  %v25972_v30 = vld [vmem:[%s30804_s3 + $0x268] sm:$0xff]  }
 0x470   : >> { %23531 = vmatprep.mubr.bf16.mxu1 %v28757_v32  ;;  %23549 = vmatprep.subr.bf16.mxu1 %v25938_v27 }
 0x472   : >> { %22650 = vmatpush3.bf16.msra.mxu0 %v25938_v27  ;;  %23550 = vmatpush3.bf16.msra.mxu1 %v25938_v27  ;;  %v25970_v27 = vld [vmem:[%s30804_s3 + $0x258] sm:$0xff]  }
 0x473   : >> { %22651 = vmatprep.subr.bf16.mxu0 %v25939_v31  ;;  %23551 = vmatprep.subr.bf16.mxu1 %v25939_v31 }
 0x475   : >> { %22632 = vmatmul.mubr.bf16.gmra.mrb[8].mxu0 %v26105_v0  ;;  %23532 = vmatmul.mubr.bf16.gmra.mrb[8].mxu1 %v28765_v1  ;;  %v25975_v0 = vld [vmem:[%s30804_s3 + $0x280] sm:$0xff]  }
 0x476   : >> { %22652 = vmatpush3.bf16.msra.mxu0 %v25939_v31  ;;  %23552 = vmatpush3.bf16.msra.mxu1 %v25939_v31  ;;  %v25973_v31 = vld [vmem:[%s30804_s3 + $0x270] sm:$0xff]  }
 0x477   : >> { %22635 = vmatprep.mubr.bf16.mxu0 %v26107_v2  ;;  %23535 = vmatprep.mubr.bf16.mxu1 %v28770_v3  ;;  %v29011_v2 = vld [vmem:[%s28458_s23 + $0x140] sm:$0xff] }
 0x478   : >> { %22653 = vmatprep.subr.bf16.mxu0 %v25940_v63  ;;  %23553 = vmatprep.subr.bf16.mxu1 %v25940_v63 }
 0x47a   : >> { %22654 = vmatpush3.bf16.msra.mxu0 %v25940_v63  ;;  %23554 = vmatpush3.bf16.msra.mxu1 %v25940_v63  ;;  %v25974_v63 = vld [vmem:[%s30804_s3 + $0x278] sm:$0xff]  }
 0x47b   : >> { %22655 = vmatprep.subr.bf16.mxu0 %v25941_v4  ;;  %23555 = vmatprep.subr.bf16.mxu1 %v25941_v4 }
 0x47d   : >> { %22636 = vmatmul.mubr.bf16.gmra.mrb[12].mxu0 %v28666_v53  ;;  %23536 = vmatmul.mubr.bf16.gmra.mrb[12].mxu1 %v28669_v54  ;;  %v25957_v53 = vld [vmem:[%s30804_s3 + $0x1f0] sm:$0xff]  }
 0x47e   : >> { %22639 = vmatprep.mubr.bf16.mxu0 %v28716_v17  ;;  %22656 = vmatpush3.bf16.msra.mxu0 %v25941_v4  ;;  %v25965_v17 = vld [vmem:[%s30804_s3 + $0x230] sm:$0xff]  }
 0x47f   : >> { %23539 = vmatprep.mubr.bf16.mxu1 %v28719_v18  ;;  %23556 = vmatpush3.bf16.msra.mxu1 %v25941_v4  ;;  %v25976_v4 = vld [vmem:[%s30804_s3 + $0x288] sm:$0xff]  }
 0x480   : >> { %22657 = vmatprep.subr.bf16.mxu0 %v25942_v5  ;;  %23557 = vmatprep.subr.bf16.mxu1 %v25942_v5 }
 0x482   : >> { %22658 = vmatpush3.bf16.msra.mxu0 %v25942_v5 }
 0x483   : >> { %23558 = vmatpush3.bf16.msra.mxu1 %v25942_v5  ;;  %22679 = vmatprep.subr.bf16.mxu0 %v25943_v6  ;;  %v25977_v5 = vld [vmem:[%s30804_s3 + $0x290] sm:$0xff]  }
 0x484   : >> { %23579 = vmatprep.subr.bf16.mxu1 %v25943_v6 }
 0x485   : >> { %22640 = vmatmul.mubr.bf16.gmra.mrb[16].mxu0 %v8174_v7  ;;  %23540 = vmatmul.mubr.bf16.gmra.mrb[16].mxu1 %v28788_v8  ;;  %v29076_v7 = vld [vmem:[%s28458_s23 + $0x160] sm:$0xff] }
 0x486   : >> { %22659 = vmatprep.mubr.bf16.mxu0 %v26109_v10  ;;  %23559 = vmatprep.mubr.bf16.mxu1 %v28791_v9  ;;  %v25986_v10 = vld [vmem:[%s30804_s3 + $0x2d8] sm:$0xff]  }
 0x48d   : >> { %22660 = vmatmul.mubr.bf16.vlgmr.msra.gmra.mrb[0].mxu0 %v28803_v13  ;;  %23560 = vmatmul.mubr.bf16.vlgmr.msra.gmra.mrb[0].mxu1 %v28797_v11 }
 0x48e   : >> { %22680 = vmatpush3.bf16.msra.mxu0 %v25943_v6  ;;  %23580 = vmatpush3.bf16.msra.mxu1 %v25943_v6  ;;  %v25984_v6 = vld [vmem:[%s30804_s3 + $0x2c8] sm:$0xff]  }
 0x48f   : >> { %22681 = vmatprep.subr.bf16.mxu0 %v25944_v12  ;;  %23581 = vmatprep.subr.bf16.mxu1 %v25944_v12 }
 0x490   : >> { %22663 = vmatprep.mubr.bf16.mxu0 %v28814_v33  ;;  %23563 = vmatprep.mubr.bf16.mxu1 %v28808_v14 }
 0x492   : >> { %22682 = vmatpush3.bf16.msra.mxu0 %v25944_v12  ;;  %23582 = vmatpush3.bf16.msra.mxu1 %v25944_v12  ;;  %v29092_v12 = vld [vmem:[%s28458_s23 + $0x170] sm:$0xff] }
 0x493   : >> { %22683 = vmatprep.subr.bf16.mxu0 %v25945_v15  ;;  %23583 = vmatprep.subr.bf16.mxu1 %v25945_v15 }
 0x495   : >> { %22664 = vmatmul.mubr.bf16.gmra.mrb[4].mxu0 %v28825_v36  ;;  %23564 = vmatmul.mubr.bf16.gmra.mrb[4].mxu1 %v28819_v34 }
 0x496   : >> { %22684 = vmatpush3.bf16.msra.mxu0 %v25945_v15  ;;  %23584 = vmatpush3.bf16.msra.mxu1 %v25945_v15  ;;  %v29100_v15 = vld [vmem:[%s28458_s23 + $0x178] sm:$0xff] }
 0x497   : >> { %22667 = vmatprep.mubr.bf16.mxu0 %v28725_v20  ;;  %22685 = vmatprep.subr.bf16.mxu0 %v25946_v35 }
 0x498   : >> { %23567 = vmatprep.mubr.bf16.mxu1 %v28830_v37  ;;  %23585 = vmatprep.subr.bf16.mxu1 %v25946_v35 }
 0x49a   : >> { %22686 = vmatpush3.bf16.msra.mxu0 %v25946_v35  ;;  %23586 = vmatpush3.bf16.msra.mxu1 %v25946_v35  ;;  %v25988_v35 = vld [vmem:[%s30804_s3 + $0x2e8] sm:$0xff]  }
 0x49b   : >> { %22687 = vmatprep.subr.bf16.mxu0 %v25947_v38  ;;  %23587 = vmatprep.subr.bf16.mxu1 %v25947_v38 }
 0x49d   : >> { %22668 = vmatmul.mubr.bf16.gmra.mrb[8].mxu0 %v28733_v23  ;;  %23568 = vmatmul.mubr.bf16.gmra.mrb[8].mxu1 %v28838_v39 }
 0x49e   : >> { %22688 = vmatpush3.bf16.msra.mxu0 %v25947_v38  ;;  %23588 = vmatpush3.bf16.msra.mxu1 %v25947_v38  ;;  %v29116_v38 = vld [vmem:[%s28458_s23 + $0x188] sm:$0xff] }
 0x49f   : >> { %22671 = vmatprep.mubr.bf16.mxu0 %v28741_v26  ;;  %23571 = vmatprep.mubr.bf16.mxu1 %v28841_v40 }
 0x4a0   : >> { %22689 = vmatprep.subr.bf16.mxu0 %v25948_v41  ;;  %23589 = vmatprep.subr.bf16.mxu1 %v25948_v41 }
 0x4a2   : >> { %22690 = vmatpush3.bf16.msra.mxu0 %v25948_v41  ;;  %23590 = vmatpush3.bf16.msra.mxu1 %v25948_v41  ;;  %v29119_v41 = vld [vmem:[%s28458_s23 + $0x190] sm:$0xff] }
 0x4a3   : >> { %22691 = vmatprep.subr.bf16.mxu0 %v25949_v42  ;;  %23591 = vmatprep.subr.bf16.mxu1 %v25949_v42 }
 0x4a5   : >> { %22672 = vmatmul.mubr.bf16.gmra.mrb[12].mxu0 %v28749_v29  ;;  %23572 = vmatmul.mubr.bf16.gmra.mrb[12].mxu1 %v28854_v43 }
 0x4a6   : >> { %22675 = vmatprep.mubr.bf16.mxu0 %v28757_v32  ;;  %22692 = vmatpush3.bf16.msra.mxu0 %v25949_v42 }
 0x4a7   : >> { %23575 = vmatprep.mubr.bf16.mxu1 %v28857_v44  ;;  %23592 = vmatpush3.bf16.msra.mxu1 %v25949_v42  ;;  %v25990_v42 = vld [vmem:[%s30804_s3 + $0x2f8] sm:$0xff]  }
 0x4a8   : >> { %22693 = vmatprep.subr.bf16.mxu0 %v25950_v45  ;;  %23593 = vmatprep.subr.bf16.mxu1 %v25950_v45 }
 0x4aa   : >> { %22694 = vmatpush3.bf16.msra.mxu0 %v25950_v45 }
 0x4ab   : >> { %23594 = vmatpush3.bf16.msra.mxu1 %v25950_v45  ;;  %22715 = vmatprep.subr.bf16.mxu0 %v25951_v46  ;;  %v25991_v45 = vld [vmem:[%s30804_s3 + $0x300] sm:$0xff]  }
 0x4ac   : >> { %23615 = vmatprep.subr.bf16.mxu1 %v25951_v46 }
 0x4ad   : >> { %22676 = vmatmul.mubr.bf16.gmra.mrb[16].mxu0 %v28765_v1  ;;  %23576 = vmatmul.mubr.bf16.gmra.mrb[16].mxu1 %v28870_v47 }
 0x4ae   : >> { %22695 = vmatprep.mubr.bf16.mxu0 %v28803_v13  ;;  %23595 = vmatprep.mubr.bf16.mxu1 %v28797_v11  ;;  %v25987_v13 = vld [vmem:[%s30804_s3 + $0x2e0] sm:$0xff]  }
 0x4b5   : >> { %22696 = vmatmul.mubr.bf16.vlgmr.msra.gmra.mrb[0].mxu0 %v28814_v33  ;;  %23596 = vmatmul.mubr.bf16.vlgmr.msra.gmra.mrb[0].mxu1 %v28808_v14 }
 0x4b6   : >> { %22716 = vmatpush3.bf16.msra.mxu0 %v25951_v46  ;;  %23616 = vmatpush3.bf16.msra.mxu1 %v25951_v46  ;;  %v29132_v46 = vld [vmem:[%s28458_s23 + $0x198] sm:$0xff] }
 0x4b7   : >> { %22717 = vmatprep.subr.bf16.mxu0 %v25952_v48  ;;  %23617 = vmatprep.subr.bf16.mxu1 %v25952_v48 }
 0x4b8   : >> { %22699 = vmatprep.mubr.bf16.mxu0 %v28825_v36  ;;  %23599 = vmatprep.mubr.bf16.mxu1 %v28819_v34 }
 0x4ba   : >> { %22718 = vmatpush3.bf16.msra.mxu0 %v25952_v48  ;;  %23618 = vmatpush3.bf16.msra.mxu1 %v25952_v48  ;;  %v25992_v48 = vld [vmem:[%s30804_s3 + $0x308] sm:$0xff]  }
 0x4bb   : >> { %22719 = vmatprep.subr.bf16.mxu0 %v25953_v49  ;;  %23619 = vmatprep.subr.bf16.mxu1 %v25953_v49 }
 0x4bd   : >> { %22700 = vmatmul.mubr.bf16.gmra.mrb[4].mxu0 %v28725_v20  ;;  %23600 = vmatmul.mubr.bf16.gmra.mrb[4].mxu1 %v28830_v37 }
 0x4be   : >> { %22720 = vmatpush3.bf16.msra.mxu0 %v25953_v49  ;;  %23620 = vmatpush3.bf16.msra.mxu1 %v25953_v49  ;;  %v25993_v49 = vld [vmem:[%s30804_s3 + $0x310] sm:$0xff]  }
 0x4bf   : >> { %22703 = vmatprep.mubr.bf16.mxu0 %v28733_v23  ;;  %22721 = vmatprep.subr.bf16.mxu0 %v25954_v50 }
 0x4c0   : >> { %23603 = vmatprep.mubr.bf16.mxu1 %v28838_v39  ;;  %23621 = vmatprep.subr.bf16.mxu1 %v25954_v50 }
 0x4c2   : >> { %22722 = vmatpush3.bf16.msra.mxu0 %v25954_v50  ;;  %23622 = vmatpush3.bf16.msra.mxu1 %v25954_v50  ;;  %v25995_v50 = vld [vmem:[%s30804_s3 + $0x320] sm:$0xff]  }
 0x4c3   : >> { %22723 = vmatprep.subr.bf16.mxu0 %v25955_v51  ;;  %23623 = vmatprep.subr.bf16.mxu1 %v25955_v51 }
 0x4c5   : >> { %22704 = vmatmul.mubr.bf16.gmra.mrb[8].mxu0 %v28741_v26  ;;  %23604 = vmatmul.mubr.bf16.gmra.mrb[8].mxu1 %v28841_v40 }
 0x4c6   : >> { %22724 = vmatpush3.bf16.msra.mxu0 %v25955_v51  ;;  %23624 = vmatpush3.bf16.msra.mxu1 %v25955_v51  ;;  %v25996_v51 = vld [vmem:[%s30804_s3 + $0x328] sm:$0xff]  }
 0x4c7   : >> { %22707 = vmatprep.mubr.bf16.mxu0 %v28749_v29  ;;  %23607 = vmatprep.mubr.bf16.mxu1 %v28854_v43 }
 0x4c8   : >> { %22725 = vmatprep.subr.bf16.mxu0 %v25956_v52  ;;  %23625 = vmatprep.subr.bf16.mxu1 %v25956_v52 }
 0x4ca   : >> { %22726 = vmatpush3.bf16.msra.mxu0 %v25956_v52  ;;  %23626 = vmatpush3.bf16.msra.mxu1 %v25956_v52  ;;  %v25997_v52 = vld [vmem:[%s30804_s3 + $0x330] sm:$0xff]  }
 0x4cb   : >> { %22727 = vmatprep.subr.bf16.mxu0 %v25957_v53  ;;  %23627 = vmatprep.subr.bf16.mxu1 %v25957_v53 }
 0x4cd   : >> { %22708 = vmatmul.mubr.bf16.gmra.mrb[12].mxu0 %v28757_v32  ;;  %23608 = vmatmul.mubr.bf16.gmra.mrb[12].mxu1 %v28857_v44 }
 0x4ce   : >> { %22711 = vmatprep.mubr.bf16.mxu0 %v28765_v1  ;;  %22728 = vmatpush3.bf16.msra.mxu0 %v25957_v53 }
 0x4cf   : >> { %23611 = vmatprep.mubr.bf16.mxu1 %v28870_v47  ;;  %23628 = vmatpush3.bf16.msra.mxu1 %v25957_v53  ;;  %v25998_v53 = vld [vmem:[%s30804_s3 + $0x338] sm:$0xff]  }
 0x4d0   : >> { %22729 = vmatprep.subr.bf16.mxu0 %v25958_v55  ;;  %23629 = vmatprep.subr.bf16.mxu1 %v25958_v55 }
 0x4d2   : >> { %22730 = vmatpush3.bf16.msra.mxu0 %v25958_v55 }
 0x4d3   : >> { %23630 = vmatpush3.bf16.msra.mxu1 %v25958_v55  ;;  %22751 = vmatprep.subr.bf16.mxu0 %v25959_v56  ;;  %v25999_v55 = vld [vmem:[%s30804_s3 + $0x340] sm:$0xff]  }
 0x4d4   : >> { %23651 = vmatprep.subr.bf16.mxu1 %v25959_v56 }
 0x4d5   : >> { %22712 = vmatmul.mubr.bf16.gmra.mrb[16].mxu0 %v28770_v3  ;;  %23612 = vmatmul.mubr.bf16.gmra.mrb[16].mxu1 %v28917_v57 }
 0x4d6   : >> { %22731 = vmatprep.mubr.bf16.mxu0 %v28814_v33  ;;  %23631 = vmatprep.mubr.bf16.mxu1 %v28808_v14  ;;  %v29103_v33 = vld [vmem:[%s28458_s23 + $0x180] sm:$0xff] }
 0x4dd   : >> { %22732 = vmatmul.mubr.bf16.vlgmr.msra.gmra.mrb[0].mxu0 %v28825_v36  ;;  %23632 = vmatmul.mubr.bf16.vlgmr.msra.gmra.mrb[0].mxu1 %v28819_v34 }
 0x4de   : >> { %22752 = vmatpush3.bf16.msra.mxu0 %v25959_v56  ;;  %23652 = vmatpush3.bf16.msra.mxu1 %v25959_v56  ;;  %v29179_v56 = vld [vmem:[%s28458_s23 + $0x1a0] sm:$0xff] }
 0x4df   : >> { %22753 = vmatprep.subr.bf16.mxu0 %v25960_v58  ;;  %23653 = vmatprep.subr.bf16.mxu1 %v25960_v58 }
 0x4e0   : >> { %22735 = vmatprep.mubr.bf16.mxu0 %v28725_v20  ;;  %23635 = vmatprep.mubr.bf16.mxu1 %v28830_v37 }
 0x4e2   : >> { %22754 = vmatpush3.bf16.msra.mxu0 %v25960_v58  ;;  %23654 = vmatpush3.bf16.msra.mxu1 %v25960_v58  ;;  %v26000_v58 = vld [vmem:[%s30804_s3 + $0x348] sm:$0xff]  }
 0x4e3   : >> { %22755 = vmatprep.subr.bf16.mxu0 %v25961_v59  ;;  %23655 = vmatprep.subr.bf16.mxu1 %v25961_v59 }
 0x4e5   : >> { %22736 = vmatmul.mubr.bf16.gmra.mrb[4].mxu0 %v28733_v23  ;;  %23636 = vmatmul.mubr.bf16.gmra.mrb[4].mxu1 %v28838_v39 }
 0x4e6   : >> { %22756 = vmatpush3.bf16.msra.mxu0 %v25961_v59  ;;  %23656 = vmatpush3.bf16.msra.mxu1 %v25961_v59  ;;  %v26001_v59 = vld [vmem:[%s30804_s3 + $0x350] sm:$0xff]  }
 0x4e7   : >> { %22739 = vmatprep.mubr.bf16.mxu0 %v28741_v26  ;;  %22757 = vmatprep.subr.bf16.mxu0 %v25962_v60 }
 0x4e8   : >> { %23639 = vmatprep.mubr.bf16.mxu1 %v28841_v40  ;;  %23657 = vmatprep.subr.bf16.mxu1 %v25962_v60 }
 0x4ea   : >> { %22758 = vmatpush3.bf16.msra.mxu0 %v25962_v60  ;;  %23658 = vmatpush3.bf16.msra.mxu1 %v25962_v60  ;;  %v26003_v60 = vld [vmem:[%s30804_s3 + $0x360] sm:$0xff]  }
 0x4eb   : >> { %22759 = vmatprep.subr.bf16.mxu0 %v25963_v62  ;;  %23659 = vmatprep.subr.bf16.mxu1 %v25963_v62 }
 0x4ed   : >> { %22740 = vmatmul.mubr.bf16.gmra.mrb[8].mxu0 %v28749_v29  ;;  %23640 = vmatmul.mubr.bf16.gmra.mrb[8].mxu1 %v28854_v43 }
 0x4ee   : >> { %22760 = vmatpush3.bf16.msra.mxu0 %v25963_v62  ;;  %23660 = vmatpush3.bf16.msra.mxu1 %v25963_v62  ;;  %v26004_v62 = vld [vmem:[%s30804_s3 + $0x368] sm:$0xff]  }
 0x4ef   : >> { %22743 = vmatprep.mubr.bf16.mxu0 %v28757_v32  ;;  %23643 = vmatprep.mubr.bf16.mxu1 %v28857_v44 }
 0x4f0   : >> { %22761 = vmatprep.subr.bf16.mxu0 %v25964_v16  ;;  %23661 = vmatprep.subr.bf16.mxu1 %v25964_v16 }
 0x4f2   : >> { %22762 = vmatpush3.bf16.msra.mxu0 %v25964_v16  ;;  %23662 = vmatpush3.bf16.msra.mxu1 %v25964_v16  ;;  %v26005_v16 = vld [vmem:[%s30804_s3 + $0x370] sm:$0xff]  }
 0x4f3   : >> { %22763 = vmatprep.subr.bf16.mxu0 %v25965_v17  ;;  %23663 = vmatprep.subr.bf16.mxu1 %v25965_v17 }
 0x4f5   : >> { %22744 = vmatmul.mubr.bf16.gmra.mrb[12].mxu0 %v28765_v1  ;;  %23644 = vmatmul.mubr.bf16.gmra.mrb[12].mxu1 %v28870_v47 }
 0x4f6   : >> { %22747 = vmatprep.mubr.bf16.mxu0 %v28770_v3  ;;  %22764 = vmatpush3.bf16.msra.mxu0 %v25965_v17 }
 0x4f7   : >> { %23647 = vmatprep.mubr.bf16.mxu1 %v28917_v57  ;;  %23664 = vmatpush3.bf16.msra.mxu1 %v25965_v17  ;;  %v26006_v17 = vld [vmem:[%s30804_s3 + $0x378] sm:$0xff]  }
 0x4f8   : >> { %22765 = vmatprep.subr.bf16.mxu0 %v25966_v19  ;;  %23665 = vmatprep.subr.bf16.mxu1 %v25966_v19 }
 0x4fa   : >> { %22766 = vmatpush3.bf16.msra.mxu0 %v25966_v19 }
 0x4fb   : >> { %23666 = vmatpush3.bf16.msra.mxu1 %v25966_v19  ;;  %22787 = vmatprep.subr.bf16.mxu0 %v25967_v21  ;;  %v26007_v19 = vld [vmem:[%s30804_s3 + $0x380] sm:$0xff]  }
 0x4fc   : >> { %23687 = vmatprep.subr.bf16.mxu1 %v25967_v21 }
 0x4fd   : >> { %22748 = vmatmul.mubr.bf16.gmra.mrb[16].mxu0 %v28669_v54  ;;  %23648 = vmatmul.mubr.bf16.gmra.mrb[16].mxu1 %v28964_v22 }
 0x4fe   : >> { %22767 = vmatprep.mubr.bf16.mxu0 %v28825_v36  ;;  %23667 = vmatprep.mubr.bf16.mxu1 %v28819_v34  ;;  %v25989_v36 = vld [vmem:[%s30804_s3 + $0x2f0] sm:$0xff]  }
 0x505   : >> { %22768 = vmatmul.mubr.bf16.vlgmr.msra.gmra.mrb[0].mxu0 %v28725_v20  ;;  %23668 = vmatmul.mubr.bf16.vlgmr.msra.gmra.mrb[0].mxu1 %v28830_v37 }
 0x506   : >> { %22788 = vmatpush3.bf16.msra.mxu0 %v25967_v21  ;;  %23688 = vmatpush3.bf16.msra.mxu1 %v25967_v21  ;;  %v29226_v21 = vld [vmem:[%s28458_s23 + $0x1a8] sm:$0xff] }
 0x507   : >> { %22789 = vmatprep.subr.bf16.mxu0 %v25968_v24  ;;  %23689 = vmatprep.subr.bf16.mxu1 %v25968_v24 }
 0x508   : >> { %22771 = vmatprep.mubr.bf16.mxu0 %v28733_v23  ;;  %23671 = vmatprep.mubr.bf16.mxu1 %v28838_v39 }
 0x50a   : >> { %22790 = vmatpush3.bf16.msra.mxu0 %v25968_v24  ;;  %23690 = vmatpush3.bf16.msra.mxu1 %v25968_v24  ;;  %v26008_v24 = vld [vmem:[%s30804_s3 + $0x388] sm:$0xff]  }
 0x50b   : >> { %22791 = vmatprep.subr.bf16.mxu0 %v25969_v25  ;;  %23691 = vmatprep.subr.bf16.mxu1 %v25969_v25 }
 0x50d   : >> { %22772 = vmatmul.mubr.bf16.gmra.mrb[4].mxu0 %v28741_v26  ;;  %23672 = vmatmul.mubr.bf16.gmra.mrb[4].mxu1 %v28841_v40 }
 0x50e   : >> { %22792 = vmatpush3.bf16.msra.mxu0 %v25969_v25  ;;  %23692 = vmatpush3.bf16.msra.mxu1 %v25969_v25  ;;  %v26009_v25 = vld [vmem:[%s30804_s3 + $0x390] sm:$0xff]  }
 0x50f   : >> { %22775 = vmatprep.mubr.bf16.mxu0 %v28749_v29  ;;  %22793 = vmatprep.subr.bf16.mxu0 %v25970_v27 }
 0x510   : >> { %23675 = vmatprep.mubr.bf16.mxu1 %v28854_v43  ;;  %23693 = vmatprep.subr.bf16.mxu1 %v25970_v27 }
 0x512   : >> { %22794 = vmatpush3.bf16.msra.mxu0 %v25970_v27  ;;  %23694 = vmatpush3.bf16.msra.mxu1 %v25970_v27  ;;  %v26113_v27 = vld [vmem:[%s28458_s23 + $0x100] sm:$0xff] }
 0x513   : >> { %22795 = vmatprep.subr.bf16.mxu0 %v25971_v28  ;;  %23695 = vmatprep.subr.bf16.mxu1 %v25971_v28 }
 0x515   : >> { %22776 = vmatmul.mubr.bf16.gmra.mrb[8].mxu0 %v28757_v32  ;;  %23676 = vmatmul.mubr.bf16.gmra.mrb[8].mxu1 %v28857_v44 }
 0x516   : >> { %22796 = vmatpush3.bf16.msra.mxu0 %v25971_v28  ;;  %23696 = vmatpush3.bf16.msra.mxu1 %v25971_v28  ;;  %v26016_v28 = vld [vmem:[%s30804_s3 + $0x3c8] sm:$0xff]  }
 0x517   : >> { %22779 = vmatprep.mubr.bf16.mxu0 %v28765_v1  ;;  %23679 = vmatprep.mubr.bf16.mxu1 %v28870_v47 }
 0x518   : >> { %22797 = vmatprep.subr.bf16.mxu0 %v25972_v30  ;;  %23697 = vmatprep.subr.bf16.mxu1 %v25972_v30 }
 0x51a   : >> { %22798 = vmatpush3.bf16.msra.mxu0 %v25972_v30  ;;  %23698 = vmatpush3.bf16.msra.mxu1 %v25972_v30  ;;  %v26114_v30 = vld [vmem:[%s28458_s23 + $0x108] sm:$0xff] }
 0x51b   : >> { %22799 = vmatprep.subr.bf16.mxu0 %v25973_v31  ;;  %23699 = vmatprep.subr.bf16.mxu1 %v25973_v31 }
 0x51d   : >> { %22780 = vmatmul.mubr.bf16.gmra.mrb[12].mxu0 %v28770_v3  ;;  %23680 = vmatmul.mubr.bf16.gmra.mrb[12].mxu1 %v28917_v57 }
 0x51e   : >> { %22783 = vmatprep.mubr.bf16.mxu0 %v28669_v54  ;;  %22800 = vmatpush3.bf16.msra.mxu0 %v25973_v31 }
 0x51f   : >> { %23683 = vmatprep.mubr.bf16.mxu1 %v28964_v22  ;;  %23700 = vmatpush3.bf16.msra.mxu1 %v25973_v31  ;;  %v26017_v31 = vld [vmem:[%s30804_s3 + $0x3d0] sm:$0xff]  }
 0x520   : >> { %22801 = vmatprep.subr.bf16.mxu0 %v25974_v63  ;;  %23701 = vmatprep.subr.bf16.mxu1 %v25974_v63 }
 0x522   : >> { %22802 = vmatpush3.bf16.msra.mxu0 %v25974_v63 }
 0x523   : >> { %23702 = vmatpush3.bf16.msra.mxu1 %v25974_v63  ;;  %22823 = vmatprep.subr.bf16.mxu0 %v25975_v0  ;;  %v26115_v63 = vld [vmem:[%s28458_s23 + $0x110] sm:$0xff] }
 0x524   : >> { %23723 = vmatprep.subr.bf16.mxu1 %v25975_v0 }
 0x525   : >> { %22784 = vmatmul.mubr.bf16.gmra.mrb[16].mxu0 %v28719_v18  ;;  %23684 = vmatmul.mubr.bf16.gmra.mrb[16].mxu1 %v29011_v2 }
 0x526   : >> { %22803 = vmatprep.mubr.bf16.mxu0 %v28725_v20  ;;  %23703 = vmatprep.mubr.bf16.mxu1 %v28830_v37  ;;  %v25978_v20 = vld [vmem:[%s30804_s3 + $0x298] sm:$0xff]  }
 0x52d   : >> { %22804 = vmatmul.mubr.bf16.vlgmr.msra.gmra.mrb[0].mxu0 %v28733_v23  ;;  %23704 = vmatmul.mubr.bf16.vlgmr.msra.gmra.mrb[0].mxu1 %v28838_v39  ;;  %v25979_v23 = vld [vmem:[%s30804_s3 + $0x2a0] sm:$0xff]  }
 0x52e   : >> { %22824 = vmatpush3.bf16.msra.mxu0 %v25975_v0  ;;  %23724 = vmatpush3.bf16.msra.mxu1 %v25975_v0  ;;  %v26018_v0 = vld [vmem:[%s30804_s3 + $0x3d8] sm:$0xff]  }
 0x52f   : >> { %22825 = vmatprep.subr.bf16.mxu0 %v25976_v4  ;;  %23725 = vmatprep.subr.bf16.mxu1 %v25976_v4 }
 0x530   : >> { %22807 = vmatprep.mubr.bf16.mxu0 %v28741_v26  ;;  %23707 = vmatprep.mubr.bf16.mxu1 %v28841_v40  ;;  %v25980_v26 = vld [vmem:[%s30804_s3 + $0x2a8] sm:$0xff]  }
 0x532   : >> { %22826 = vmatpush3.bf16.msra.mxu0 %v25976_v4  ;;  %23726 = vmatpush3.bf16.msra.mxu1 %v25976_v4  ;;  %v26116_v4 = vld [vmem:[%s28458_s23 + $0x118] sm:$0xff] }
 0x533   : >> { %22827 = vmatprep.subr.bf16.mxu0 %v25977_v5  ;;  %23727 = vmatprep.subr.bf16.mxu1 %v25977_v5 }
 0x535   : >> { %22808 = vmatmul.mubr.bf16.gmra.mrb[4].mxu0 %v28749_v29  ;;  %23708 = vmatmul.mubr.bf16.gmra.mrb[4].mxu1 %v28854_v43  ;;  %v25981_v29 = vld [vmem:[%s30804_s3 + $0x2b0] sm:$0xff]  }
 0x536   : >> { %22828 = vmatpush3.bf16.msra.mxu0 %v25977_v5  ;;  %23728 = vmatpush3.bf16.msra.mxu1 %v25977_v5  ;;  %v26117_v5 = vld [vmem:[%s28458_s23 + $0x120] sm:$0xff] }
 0x537   : >> { %22811 = vmatprep.mubr.bf16.mxu0 %v28757_v32  ;;  %22829 = vmatprep.subr.bf16.mxu0 %v25978_v20  ;;  %v25982_v32 = vld [vmem:[%s30804_s3 + $0x2b8] sm:$0xff]  }
 0x538   : >> { %23711 = vmatprep.mubr.bf16.mxu1 %v28857_v44  ;;  %23729 = vmatprep.subr.bf16.mxu1 %v25978_v20 }
 0x53a   : >> { %22830 = vmatpush3.bf16.msra.mxu0 %v25978_v20  ;;  %23730 = vmatpush3.bf16.msra.mxu1 %v25978_v20  ;;  %v26019_v20 = vld [vmem:[%s30804_s3 + $0x3e0] sm:$0xff]  }
 0x53b   : >> { %22831 = vmatprep.subr.bf16.mxu0 %v25979_v23  ;;  %23731 = vmatprep.subr.bf16.mxu1 %v25979_v23 }
 0x53d   : >> { %22812 = vmatmul.mubr.bf16.gmra.mrb[8].mxu0 %v28765_v1  ;;  %23712 = vmatmul.mubr.bf16.gmra.mrb[8].mxu1 %v28870_v47  ;;  %v25983_v1 = vld [vmem:[%s30804_s3 + $0x2c0] sm:$0xff]  }
 0x53e   : >> { %22832 = vmatpush3.bf16.msra.mxu0 %v25979_v23  ;;  %23732 = vmatpush3.bf16.msra.mxu1 %v25979_v23  ;;  %v26020_v23 = vld [vmem:[%s30804_s3 + $0x3e8] sm:$0xff]  }
 0x53f   : >> { %22815 = vmatprep.mubr.bf16.mxu0 %v28770_v3  ;;  %23715 = vmatprep.mubr.bf16.mxu1 %v28917_v57  ;;  %v29058_v3 = vld [vmem:[%s28458_s23 + $0x148] sm:$0xff] }
 0x540   : >> { %22833 = vmatprep.subr.bf16.mxu0 %v25980_v26  ;;  %23733 = vmatprep.subr.bf16.mxu1 %v25980_v26 }
 0x542   : >> { %22834 = vmatpush3.bf16.msra.mxu0 %v25980_v26  ;;  %23734 = vmatpush3.bf16.msra.mxu1 %v25980_v26  ;;  %v26118_v26 = vld [vmem:[%s28458_s23 + $0x128] sm:$0xff] }
 0x543   : >> { %22835 = vmatprep.subr.bf16.mxu0 %v25981_v29  ;;  %23735 = vmatprep.subr.bf16.mxu1 %v25981_v29 }
 0x545   : >> { %22816 = vmatmul.mubr.bf16.gmra.mrb[12].mxu0 %v28669_v54  ;;  %23716 = vmatmul.mubr.bf16.gmra.mrb[12].mxu1 %v28964_v22  ;;  %v29061_v54 = vld [vmem:[%s28458_s23 + $0x150] sm:$0xff] }
 0x546   : >> { %22819 = vmatprep.mubr.bf16.mxu0 %v28719_v18  ;;  %22836 = vmatpush3.bf16.msra.mxu0 %v25981_v29  ;;  %v29068_v18 = vld [vmem:[%s28458_s23 + $0x158] sm:$0xff] }
 0x547   : >> { %23719 = vmatprep.mubr.bf16.mxu1 %v29011_v2  ;;  %23736 = vmatpush3.bf16.msra.mxu1 %v25981_v29  ;;  %v26021_v29 = vld [vmem:[%s30804_s3 + $0x3f0] sm:$0xff]  }
 0x548   : >> { %22837 = vmatprep.subr.bf16.mxu0 %v25982_v32  ;;  %23737 = vmatprep.subr.bf16.mxu1 %v25982_v32 }
 0x54a   : >> { %22838 = vmatpush3.bf16.msra.mxu0 %v25982_v32 }
 0x54b   : >> { %23738 = vmatpush3.bf16.msra.mxu1 %v25982_v32  ;;  %22859 = vmatprep.subr.bf16.mxu0 %v25983_v1  ;;  %v26022_v32 = vld [vmem:[%s30804_s3 + $0x3f8] sm:$0xff]  }
 0x54c   : >> { %23759 = vmatprep.subr.bf16.mxu1 %v25983_v1 }
 0x54d   : >> { %22820 = vmatmul.mubr.bf16.gmra.mrb[16].mxu0 %v28788_v8  ;;  %23720 = vmatmul.mubr.bf16.gmra.mrb[16].mxu1 %v29058_v3  ;;  %v25985_v8 = vld [vmem:[%s30804_s3 + $0x2d0] sm:$0xff]  }
 0x54e   : >> { %22839 = vmatprep.mubr.bf16.mxu0 %v28791_v9  ;;  %23739 = vmatprep.mubr.bf16.mxu1 %v29061_v54  ;;  %v29084_v9 = vld [vmem:[%s28458_s23 + $0x168] sm:$0xff] }
 0x555   : >> { %22840 = vmatmul.mubr.bf16.vlgmr.msra.gmra.mrb[0].mxu0 %v28797_v11  ;;  %23740 = vmatmul.mubr.bf16.vlgmr.msra.gmra.mrb[0].mxu1 %v29068_v18 }
 0x556   : >> { %22860 = vmatpush3.bf16.msra.mxu0 %v25983_v1  ;;  %23760 = vmatpush3.bf16.msra.mxu1 %v25983_v1  ;;  %v29320_v1 = vld [vmem:[%s28458_s23 + $0x1b8] sm:$0xff] }
 0x557   : >> { %22861 = vmatprep.subr.bf16.mxu0 %v25984_v6  ;;  %23761 = vmatprep.subr.bf16.mxu1 %v25984_v6 }
 0x558   : >> { %22843 = vmatprep.mubr.bf16.mxu0 %v28808_v14  ;;  %23743 = vmatprep.mubr.bf16.mxu1 %v29076_v7 }
 0x55a   : >> { %22862 = vmatpush3.bf16.msra.mxu0 %v25984_v6  ;;  %23762 = vmatpush3.bf16.msra.mxu1 %v25984_v6  ;;  %v26024_v6 = vld [vmem:[%s30804_s3 + $0x408] sm:$0xff]  }
 0x55b   : >> { %22863 = vmatprep.subr.bf16.mxu0 %v25985_v8  ;;  %23763 = vmatprep.subr.bf16.mxu1 %v25985_v8 }
 0x55d   : >> { %22844 = vmatmul.mubr.bf16.gmra.mrb[4].mxu0 %v28819_v34  ;;  %23744 = vmatmul.mubr.bf16.gmra.mrb[4].mxu1 %v29084_v9 }
 0x55e   : >> { %22864 = vmatpush3.bf16.msra.mxu0 %v25985_v8  ;;  %23764 = vmatpush3.bf16.msra.mxu1 %v25985_v8  ;;  %v29338_v8 = vld [vmem:[%s28458_s23 + $0x1d0] sm:$0xff] }
 0x55f   : >> { %22847 = vmatprep.mubr.bf16.mxu0 %v28830_v37  ;;  %22865 = vmatprep.subr.bf16.mxu0 %v25986_v10 }
 0x560   : >> { %23747 = vmatprep.mubr.bf16.mxu1 %v29092_v12  ;;  %23765 = vmatprep.subr.bf16.mxu1 %v25986_v10 }
 0x562   : >> { %22866 = vmatpush3.bf16.msra.mxu0 %v25986_v10  ;;  %23766 = vmatpush3.bf16.msra.mxu1 %v25986_v10  ;;  %v26026_v10 = vld [vmem:[%s30804_s3 + $0x418] sm:$0xff]  }
 0x563   : >> { %22867 = vmatprep.subr.bf16.mxu0 %v25987_v13  ;;  %23767 = vmatprep.subr.bf16.mxu1 %v25987_v13 }
 0x565   : >> { %22848 = vmatmul.mubr.bf16.gmra.mrb[8].mxu0 %v28838_v39  ;;  %23748 = vmatmul.mubr.bf16.gmra.mrb[8].mxu1 %v29100_v15 }
 0x566   : >> { %22868 = vmatpush3.bf16.msra.mxu0 %v25987_v13  ;;  %23768 = vmatpush3.bf16.msra.mxu1 %v25987_v13  ;;  %v29354_v13 = vld [vmem:[%s28458_s23 + $0x1e0] sm:$0xff] }
 0x567   : >> { %22851 = vmatprep.mubr.bf16.mxu0 %v28841_v40  ;;  %23751 = vmatprep.mubr.bf16.mxu1 %v29103_v33 }
 0x568   : >> { %22869 = vmatprep.subr.bf16.mxu0 %v25988_v35  ;;  %23769 = vmatprep.subr.bf16.mxu1 %v25988_v35 }
 0x56a   : >> { %22870 = vmatpush3.bf16.msra.mxu0 %v25988_v35  ;;  %23770 = vmatpush3.bf16.msra.mxu1 %v25988_v35  ;;  %v26027_v35 = vld [vmem:[%s30804_s3 + $0x420] sm:$0xff]  }
 0x56b   : >> { %22871 = vmatprep.subr.bf16.mxu0 %v25989_v36  ;;  %23771 = vmatprep.subr.bf16.mxu1 %v25989_v36 }
 0x56d   : >> { %22852 = vmatmul.mubr.bf16.gmra.mrb[12].mxu0 %v28854_v43  ;;  %23752 = vmatmul.mubr.bf16.gmra.mrb[12].mxu1 %v29116_v38 }
 0x56e   : >> { %22855 = vmatprep.mubr.bf16.mxu0 %v28857_v44  ;;  %22872 = vmatpush3.bf16.msra.mxu0 %v25989_v36 }
 0x56f   : >> { %23755 = vmatprep.mubr.bf16.mxu1 %v29119_v41  ;;  %23772 = vmatpush3.bf16.msra.mxu1 %v25989_v36  ;;  %v29362_v36 = vld [vmem:[%s28458_s23 + $0x1e8] sm:$0xff] }
 0x570   : >> { %22873 = vmatprep.subr.bf16.mxu0 %v25990_v42  ;;  %23773 = vmatprep.subr.bf16.mxu1 %v25990_v42 }
 0x572   : >> { %22874 = vmatpush3.bf16.msra.mxu0 %v25990_v42 }
 0x573   : >> { %23774 = vmatpush3.bf16.msra.mxu1 %v25990_v42  ;;  %22895 = vmatprep.subr.bf16.mxu0 %v25991_v45  ;;  %v29365_v42 = vld [vmem:[%s28458_s23 + $0x1f0] sm:$0xff] }
 0x574   : >> { %23795 = vmatprep.subr.bf16.mxu1 %v25991_v45 }
 0x575   : >> { %22856 = vmatmul.mubr.bf16.gmra.mrb[16].mxu0 %v28870_v47  ;;  %23756 = vmatmul.mubr.bf16.gmra.mrb[16].mxu1 %v29132_v46 }
 0x576   : >> { %22875 = vmatprep.mubr.bf16.mxu0 %v28797_v11  ;;  %23775 = vmatprep.mubr.bf16.mxu1 %v29068_v18  ;;  %v25994_v11 = vld [vmem:[%s30804_s3 + $0x318] sm:$0xff]  }
 0x57d   : >> { %22876 = vmatmul.mubr.bf16.vlgmr.msra.gmra.mrb[0].mxu0 %v28808_v14  ;;  %23776 = vmatmul.mubr.bf16.vlgmr.msra.gmra.mrb[0].mxu1 %v29076_v7 }
 0x57e   : >> { %22896 = vmatpush3.bf16.msra.mxu0 %v25991_v45  ;;  %23796 = vmatpush3.bf16.msra.mxu1 %v25991_v45  ;;  %v26028_v45 = vld [vmem:[%s30804_s3 + $0x428] sm:$0xff]  }
 0x57f   : >> { %22897 = vmatprep.subr.bf16.mxu0 %v25992_v48  ;;  %23797 = vmatprep.subr.bf16.mxu1 %v25992_v48 }
 0x580   : >> { %22879 = vmatprep.mubr.bf16.mxu0 %v28819_v34  ;;  %23779 = vmatprep.mubr.bf16.mxu1 %v29084_v9 }
 0x582   : >> { %22898 = vmatpush3.bf16.msra.mxu0 %v25992_v48  ;;  %23798 = vmatpush3.bf16.msra.mxu1 %v25992_v48  ;;  %v26029_v48 = vld [vmem:[%s30804_s3 + $0x430] sm:$0xff]  }
 0x583   : >> { %22899 = vmatprep.subr.bf16.mxu0 %v25993_v49  ;;  %23799 = vmatprep.subr.bf16.mxu1 %v25993_v49 }
 0x585   : >> { %22880 = vmatmul.mubr.bf16.gmra.mrb[4].mxu0 %v28830_v37  ;;  %23780 = vmatmul.mubr.bf16.gmra.mrb[4].mxu1 %v29092_v12 }
 0x586   : >> { %22900 = vmatpush3.bf16.msra.mxu0 %v25993_v49  ;;  %23800 = vmatpush3.bf16.msra.mxu1 %v25993_v49  ;;  %v29378_v49 = vld [vmem:[%s28458_s23 + $0x1f8] sm:$0xff] }
 0x587   : >> { %22883 = vmatprep.mubr.bf16.mxu0 %v28838_v39  ;;  %22901 = vmatprep.subr.bf16.mxu0 %v25994_v11 }
 0x588   : >> { %23783 = vmatprep.mubr.bf16.mxu1 %v29100_v15  ;;  %23801 = vmatprep.subr.bf16.mxu1 %v25994_v11 }
 0x58a   : >> { %22902 = vmatpush3.bf16.msra.mxu0 %v25994_v11  ;;  %23802 = vmatpush3.bf16.msra.mxu1 %v25994_v11  ;;  %v29381_v11 = vld [vmem:[%s28458_s23 + $0x200] sm:$0xff] }
 0x58b   : >> { %22903 = vmatprep.subr.bf16.mxu0 %v25995_v50  ;;  %23803 = vmatprep.subr.bf16.mxu1 %v25995_v50 }
 0x58d   : >> { %22884 = vmatmul.mubr.bf16.gmra.mrb[8].mxu0 %v28841_v40  ;;  %23784 = vmatmul.mubr.bf16.gmra.mrb[8].mxu1 %v29103_v33 }
 0x58e   : >> { %22904 = vmatpush3.bf16.msra.mxu0 %v25995_v50  ;;  %23804 = vmatpush3.bf16.msra.mxu1 %v25995_v50  ;;  %v26030_v50 = vld [vmem:[%s30804_s3 + $0x438] sm:$0xff]  }
 0x58f   : >> { %22887 = vmatprep.mubr.bf16.mxu0 %v28854_v43  ;;  %23787 = vmatprep.mubr.bf16.mxu1 %v29116_v38 }
 0x590   : >> { %22905 = vmatprep.subr.bf16.mxu0 %v25996_v51  ;;  %23805 = vmatprep.subr.bf16.mxu1 %v25996_v51 }
 0x592   : >> { %22906 = vmatpush3.bf16.msra.mxu0 %v25996_v51  ;;  %23806 = vmatpush3.bf16.msra.mxu1 %v25996_v51  ;;  %v26031_v51 = vld [vmem:[%s30804_s3 + $0x440] sm:$0xff]  }
 0x593   : >> { %22907 = vmatprep.subr.bf16.mxu0 %v25997_v52  ;;  %23807 = vmatprep.subr.bf16.mxu1 %v25997_v52 }
 0x595   : >> { %22888 = vmatmul.mubr.bf16.gmra.mrb[12].mxu0 %v28857_v44  ;;  %23788 = vmatmul.mubr.bf16.gmra.mrb[12].mxu1 %v29119_v41 }
 0x596   : >> { %22891 = vmatprep.mubr.bf16.mxu0 %v28870_v47  ;;  %22908 = vmatpush3.bf16.msra.mxu0 %v25997_v52 }
 0x597   : >> { %23791 = vmatprep.mubr.bf16.mxu1 %v29132_v46  ;;  %23808 = vmatpush3.bf16.msra.mxu1 %v25997_v52  ;;  %v29394_v52 = vld [vmem:[%s28458_s23 + $0x208] sm:$0xff] }
 0x598   : >> { %22909 = vmatprep.subr.bf16.mxu0 %v25998_v53  ;;  %23809 = vmatprep.subr.bf16.mxu1 %v25998_v53 }
 0x59a   : >> { %22910 = vmatpush3.bf16.msra.mxu0 %v25998_v53 }
 0x59b   : >> { %23810 = vmatpush3.bf16.msra.mxu1 %v25998_v53  ;;  %22931 = vmatprep.subr.bf16.mxu0 %v25999_v55  ;;  %v26032_v53 = vld [vmem:[%s30804_s3 + $0x448] sm:$0xff]  }
 0x59c   : >> { %23831 = vmatprep.subr.bf16.mxu1 %v25999_v55 }
 0x59d   : >> { %22892 = vmatmul.mubr.bf16.gmra.mrb[16].mxu0 %v28917_v57  ;;  %23792 = vmatmul.mubr.bf16.gmra.mrb[16].mxu1 %v29179_v56 }
 0x59e   : >> { %22911 = vmatprep.mubr.bf16.mxu0 %v28808_v14  ;;  %23811 = vmatprep.mubr.bf16.mxu1 %v29076_v7  ;;  %v26002_v14 = vld [vmem:[%s30804_s3 + $0x358] sm:$0xff]  }
 0x5a5   : >> { %22912 = vmatmul.mubr.bf16.vlgmr.msra.gmra.mrb[0].mxu0 %v28819_v34  ;;  %23812 = vmatmul.mubr.bf16.vlgmr.msra.gmra.mrb[0].mxu1 %v29084_v9 }
 0x5a6   : >> { %22932 = vmatpush3.bf16.msra.mxu0 %v25999_v55  ;;  %23832 = vmatpush3.bf16.msra.mxu1 %v25999_v55  ;;  %v26033_v55 = vld [vmem:[%s30804_s3 + $0x450] sm:$0xff]  }
 0x5a7   : >> { %22933 = vmatprep.subr.bf16.mxu0 %v26000_v58  ;;  %23833 = vmatprep.subr.bf16.mxu1 %v26000_v58 }
 0x5a8   : >> { %22915 = vmatprep.mubr.bf16.mxu0 %v28830_v37  ;;  %23815 = vmatprep.mubr.bf16.mxu1 %v29092_v12 }
 0x5aa   : >> { %22934 = vmatpush3.bf16.msra.mxu0 %v26000_v58  ;;  %23834 = vmatpush3.bf16.msra.mxu1 %v26000_v58  ;;  %v26035_v58 = vld [vmem:[%s30804_s3 + $0x460] sm:$0xff]  }
 0x5ab   : >> { %22935 = vmatprep.subr.bf16.mxu0 %v26001_v59  ;;  %23835 = vmatprep.subr.bf16.mxu1 %v26001_v59 }
 0x5ad   : >> { %22916 = vmatmul.mubr.bf16.gmra.mrb[4].mxu0 %v28838_v39  ;;  %23816 = vmatmul.mubr.bf16.gmra.mrb[4].mxu1 %v29100_v15 }
 0x5ae   : >> { %22936 = vmatpush3.bf16.msra.mxu0 %v26001_v59  ;;  %23836 = vmatpush3.bf16.msra.mxu1 %v26001_v59  ;;  %v26036_v59 = vld [vmem:[%s30804_s3 + $0x468] sm:$0xff]  }
 0x5af   : >> { %22919 = vmatprep.mubr.bf16.mxu0 %v28841_v40  ;;  %22937 = vmatprep.subr.bf16.mxu0 %v26002_v14 }
 0x5b0   : >> { %23819 = vmatprep.mubr.bf16.mxu1 %v29103_v33  ;;  %23837 = vmatprep.subr.bf16.mxu1 %v26002_v14 }
 0x5b2   : >> { %22938 = vmatpush3.bf16.msra.mxu0 %v26002_v14  ;;  %23838 = vmatpush3.bf16.msra.mxu1 %v26002_v14  ;;  %v26037_v14 = vld [vmem:[%s30804_s3 + $0x470] sm:$0xff]  }
 0x5b3   : >> { %22939 = vmatprep.subr.bf16.mxu0 %v26003_v60  ;;  %23839 = vmatprep.subr.bf16.mxu1 %v26003_v60 }
 0x5b5   : >> { %22920 = vmatmul.mubr.bf16.gmra.mrb[8].mxu0 %v28854_v43  ;;  %23820 = vmatmul.mubr.bf16.gmra.mrb[8].mxu1 %v29116_v38 }
 0x5b6   : >> { %22940 = vmatpush3.bf16.msra.mxu0 %v26003_v60  ;;  %23840 = vmatpush3.bf16.msra.mxu1 %v26003_v60  ;;  %v26038_v60 = vld [vmem:[%s30804_s3 + $0x478] sm:$0xff]  }
 0x5b7   : >> { %22923 = vmatprep.mubr.bf16.mxu0 %v28857_v44  ;;  %23823 = vmatprep.mubr.bf16.mxu1 %v29119_v41 }
 0x5b8   : >> { %22941 = vmatprep.subr.bf16.mxu0 %v26004_v62  ;;  %23841 = vmatprep.subr.bf16.mxu1 %v26004_v62 }
 0x5ba   : >> { %22942 = vmatpush3.bf16.msra.mxu0 %v26004_v62  ;;  %23842 = vmatpush3.bf16.msra.mxu1 %v26004_v62  ;;  %v26039_v62 = vld [vmem:[%s30804_s3 + $0x480] sm:$0xff]  }
 0x5bb   : >> { %22943 = vmatprep.subr.bf16.mxu0 %v26005_v16  ;;  %23843 = vmatprep.subr.bf16.mxu1 %v26005_v16 }
 0x5bd   : >> { %22924 = vmatmul.mubr.bf16.gmra.mrb[12].mxu0 %v28870_v47  ;;  %23824 = vmatmul.mubr.bf16.gmra.mrb[12].mxu1 %v29132_v46 }
 0x5be   : >> { %22927 = vmatprep.mubr.bf16.mxu0 %v28917_v57  ;;  %22944 = vmatpush3.bf16.msra.mxu0 %v26005_v16 }
 0x5bf   : >> { %23827 = vmatprep.mubr.bf16.mxu1 %v29179_v56  ;;  %23844 = vmatpush3.bf16.msra.mxu1 %v26005_v16  ;;  %v29441_v16 = vld [vmem:[%s28458_s23 + $0x210] sm:$0xff] }
 0x5c0   : >> { %22945 = vmatprep.subr.bf16.mxu0 %v26006_v17  ;;  %23845 = vmatprep.subr.bf16.mxu1 %v26006_v17 }
 0x5c2   : >> { %22946 = vmatpush3.bf16.msra.mxu0 %v26006_v17 }
 0x5c3   : >> { %23846 = vmatpush3.bf16.msra.mxu1 %v26006_v17  ;;  %22967 = vmatprep.subr.bf16.mxu0 %v26007_v19  ;;  %v26040_v17 = vld [vmem:[%s30804_s3 + $0x488] sm:$0xff]  }
 0x5c4   : >> { %23867 = vmatprep.subr.bf16.mxu1 %v26007_v19 }
 0x5c5   : >> { %22928 = vmatmul.mubr.bf16.gmra.mrb[16].mxu0 %v28964_v22  ;;  %23828 = vmatmul.mubr.bf16.gmra.mrb[16].mxu1 %v29226_v21 }
 0x5c6   : >> { %22947 = vmatprep.mubr.bf16.mxu0 %v28819_v34  ;;  %23847 = vmatprep.mubr.bf16.mxu1 %v29084_v9  ;;  %v26010_v34 = vld [vmem:[%s30804_s3 + $0x398] sm:$0xff]  }
 0x5cd   : >> { %22948 = vmatmul.mubr.bf16.vlgmr.msra.gmra.mrb[0].mxu0 %v28830_v37  ;;  %23848 = vmatmul.mubr.bf16.vlgmr.msra.gmra.mrb[0].mxu1 %v29092_v12  ;;  %v26011_v37 = vld [vmem:[%s30804_s3 + $0x3a0] sm:$0xff]  }
 0x5ce   : >> { %22968 = vmatpush3.bf16.msra.mxu0 %v26007_v19  ;;  %23868 = vmatpush3.bf16.msra.mxu1 %v26007_v19  ;;  %v26041_v19 = vld [vmem:[%s30804_s3 + $0x490] sm:$0xff]  }
 0x5cf   : >> { %22969 = vmatprep.subr.bf16.mxu0 %v26008_v24  ;;  %23869 = vmatprep.subr.bf16.mxu1 %v26008_v24 }
 0x5d0   : >> { %22951 = vmatprep.mubr.bf16.mxu0 %v28838_v39  ;;  %23851 = vmatprep.mubr.bf16.mxu1 %v29100_v15  ;;  %v26012_v39 = vld [vmem:[%s30804_s3 + $0x3a8] sm:$0xff]  }
 0x5d2   : >> { %22970 = vmatpush3.bf16.msra.mxu0 %v26008_v24  ;;  %23870 = vmatpush3.bf16.msra.mxu1 %v26008_v24  ;;  %v26043_v24 = vld [vmem:[%s30804_s3 + $0x4a0] sm:$0xff]  }
 0x5d3   : >> { %22971 = vmatprep.subr.bf16.mxu0 %v26009_v25  ;;  %23871 = vmatprep.subr.bf16.mxu1 %v26009_v25 }
 0x5d5   : >> { %22952 = vmatmul.mubr.bf16.gmra.mrb[4].mxu0 %v28841_v40  ;;  %23852 = vmatmul.mubr.bf16.gmra.mrb[4].mxu1 %v29103_v33  ;;  %v26013_v40 = vld [vmem:[%s30804_s3 + $0x3b0] sm:$0xff]  }
 0x5d6   : >> { %22972 = vmatpush3.bf16.msra.mxu0 %v26009_v25  ;;  %23872 = vmatpush3.bf16.msra.mxu1 %v26009_v25  ;;  %v26044_v25 = vld [vmem:[%s30804_s3 + $0x4a8] sm:$0xff]  }
 0x5d7   : >> { %22955 = vmatprep.mubr.bf16.mxu0 %v28854_v43  ;;  %22973 = vmatprep.subr.bf16.mxu0 %v26010_v34  ;;  %v26014_v43 = vld [vmem:[%s30804_s3 + $0x3b8] sm:$0xff]  }
 0x5d8   : >> { %23855 = vmatprep.mubr.bf16.mxu1 %v29116_v38  ;;  %23873 = vmatprep.subr.bf16.mxu1 %v26010_v34 }
 0x5da   : >> { %22974 = vmatpush3.bf16.msra.mxu0 %v26010_v34  ;;  %23874 = vmatpush3.bf16.msra.mxu1 %v26010_v34  ;;  %v26045_v34 = vld [vmem:[%s30804_s3 + $0x4b0] sm:$0xff]  }
 0x5db   : >> { %22975 = vmatprep.subr.bf16.mxu0 %v26011_v37  ;;  %23875 = vmatprep.subr.bf16.mxu1 %v26011_v37 }
 0x5dd   : >> { %22956 = vmatmul.mubr.bf16.gmra.mrb[8].mxu0 %v28857_v44  ;;  %23856 = vmatmul.mubr.bf16.gmra.mrb[8].mxu1 %v29119_v41  ;;  %v26015_v44 = vld [vmem:[%s30804_s3 + $0x3c0] sm:$0xff]  }
 0x5de   : >> { %22976 = vmatpush3.bf16.msra.mxu0 %v26011_v37  ;;  %23876 = vmatpush3.bf16.msra.mxu1 %v26011_v37  ;;  %v26046_v37 = vld [vmem:[%s30804_s3 + $0x4b8] sm:$0xff]  }
 0x5df   : >> { %22959 = vmatprep.mubr.bf16.mxu0 %v28870_v47  ;;  %23859 = vmatprep.mubr.bf16.mxu1 %v29132_v46  ;;  %v29273_v47 = vld [vmem:[%s28458_s23 + $0x1b0] sm:$0xff] }
 0x5e0   : >> { %22977 = vmatprep.subr.bf16.mxu0 %v26012_v39  ;;  %23877 = vmatprep.subr.bf16.mxu1 %v26012_v39 }
 0x5e2   : >> { %22978 = vmatpush3.bf16.msra.mxu0 %v26012_v39  ;;  %23878 = vmatpush3.bf16.msra.mxu1 %v26012_v39  ;;  %v26047_v39 = vld [vmem:[%s30804_s3 + $0x4c0] sm:$0xff]  }
 0x5e3   : >> { %22979 = vmatprep.subr.bf16.mxu0 %v26013_v40  ;;  %23879 = vmatprep.subr.bf16.mxu1 %v26013_v40 }
 0x5e5   : >> { %22960 = vmatmul.mubr.bf16.gmra.mrb[12].mxu0 %v28917_v57  ;;  %23860 = vmatmul.mubr.bf16.gmra.mrb[12].mxu1 %v29179_v56 }
 0x5e6   : >> { %22963 = vmatprep.mubr.bf16.mxu0 %v28964_v22  ;;  %22980 = vmatpush3.bf16.msra.mxu0 %v26013_v40 }
 0x5e7   : >> { %23863 = vmatprep.mubr.bf16.mxu1 %v29226_v21  ;;  %23880 = vmatpush3.bf16.msra.mxu1 %v26013_v40  ;;  %v29488_v40 = vld [vmem:[%s28458_s23 + $0x218] sm:$0xff] }
 0x5e8   : >> { %22981 = vmatprep.subr.bf16.mxu0 %v26014_v43  ;;  %23881 = vmatprep.subr.bf16.mxu1 %v26014_v43 }
 0x5ea   : >> { %22982 = vmatpush3.bf16.msra.mxu0 %v26014_v43 }
 0x5eb   : >> { %23882 = vmatpush3.bf16.msra.mxu1 %v26014_v43  ;;  %23003 = vmatprep.subr.bf16.mxu0 %v26015_v44  ;;  %v26048_v43 = vld [vmem:[%s30804_s3 + $0x4c8] sm:$0xff]  }
 0x5ec   : >> { %23903 = vmatprep.subr.bf16.mxu1 %v26015_v44 }
 0x5ed   : >> { %22964 = vmatmul.mubr.bf16.gmra.mrb[16].mxu0 %v29011_v2  ;;  %23864 = vmatmul.mubr.bf16.gmra.mrb[16].mxu1 %v29273_v47 }
 0x5ee   : >> { %22983 = vmatprep.mubr.bf16.mxu0 %v26113_v27  ;;  %23883 = vmatprep.mubr.bf16.mxu1 %v29092_v12  ;;  %v26119_v27 = vld [vmem:[%s28458_s23 + $0x170] sm:$0xff] }
 0x5f5   : >> { %22984 = vmatmul.mubr.bf16.vlgmr.msra.gmra.mrb[0].mxu0 %v26114_v30  ;;  %23884 = vmatmul.mubr.bf16.vlgmr.msra.gmra.mrb[0].mxu1 %v29100_v15  ;;  %v26120_v30 = vld [vmem:[%s28458_s23 + $0x178] sm:$0xff] }
 0x5f6   : >> { %23004 = vmatpush3.bf16.msra.mxu0 %v26015_v44  ;;  %23904 = vmatpush3.bf16.msra.mxu1 %v26015_v44  ;;  %v26049_v44 = vld [vmem:[%s30804_s3 + $0x4d0] sm:$0xff]  }
 0x5f7   : >> { %23005 = vmatprep.subr.bf16.mxu0 %v26016_v28  ;;  %23905 = vmatprep.subr.bf16.mxu1 %v26016_v28 }
 0x5f8   : >> { %22987 = vmatprep.mubr.bf16.mxu0 %v26115_v63  ;;  %23887 = vmatprep.mubr.bf16.mxu1 %v29103_v33  ;;  %v26121_v63 = vld [vmem:[%s28458_s23 + $0x180] sm:$0xff] }
 0x5fa   : >> { %23006 = vmatpush3.bf16.msra.mxu0 %v26016_v28  ;;  %23906 = vmatpush3.bf16.msra.mxu1 %v26016_v28  ;;  %v26056_v28 = vld [vmem:[%s30804_s3 + $0x508] sm:$0xff]  }
 0x5fb   : >> { %23007 = vmatprep.subr.bf16.mxu0 %v26017_v31  ;;  %23907 = vmatprep.subr.bf16.mxu1 %v26017_v31 }
 0x5fd   : >> { %22988 = vmatmul.mubr.bf16.gmra.mrb[4].mxu0 %v26116_v4  ;;  %23888 = vmatmul.mubr.bf16.gmra.mrb[4].mxu1 %v29116_v38  ;;  %v26122_v4 = vld [vmem:[%s28458_s23 + $0x188] sm:$0xff] }
 0x5fe   : >> { %23008 = vmatpush3.bf16.msra.mxu0 %v26017_v31  ;;  %23908 = vmatpush3.bf16.msra.mxu1 %v26017_v31  ;;  %v26057_v31 = vld [vmem:[%s30804_s3 + $0x510] sm:$0xff]  }
 0x5ff   : >> { %22991 = vmatprep.mubr.bf16.mxu0 %v26117_v5  ;;  %23009 = vmatprep.subr.bf16.mxu0 %v26018_v0  ;;  %v26123_v5 = vld [vmem:[%s28458_s23 + $0x190] sm:$0xff] }
 0x600   : >> { %23891 = vmatprep.mubr.bf16.mxu1 %v29119_v41  ;;  %23909 = vmatprep.subr.bf16.mxu1 %v26018_v0 }
 0x602   : >> { %23010 = vmatpush3.bf16.msra.mxu0 %v26018_v0  ;;  %23910 = vmatpush3.bf16.msra.mxu1 %v26018_v0  ;;  %v26058_v0 = vld [vmem:[%s30804_s3 + $0x518] sm:$0xff]  }
 0x603   : >> { %23011 = vmatprep.subr.bf16.mxu0 %v26019_v20  ;;  %23911 = vmatprep.subr.bf16.mxu1 %v26019_v20 }
 0x605   : >> { %22992 = vmatmul.mubr.bf16.gmra.mrb[8].mxu0 %v26118_v26  ;;  %23892 = vmatmul.mubr.bf16.gmra.mrb[8].mxu1 %v29132_v46  ;;  %v26124_v26 = vld [vmem:[%s28458_s23 + $0x198] sm:$0xff] }
 0x606   : >> { %23012 = vmatpush3.bf16.msra.mxu0 %v26019_v20  ;;  %23912 = vmatpush3.bf16.msra.mxu1 %v26019_v20  ;;  %v26059_v20 = vld [vmem:[%s30804_s3 + $0x520] sm:$0xff]  }
 0x607   : >> { %22995 = vmatprep.mubr.bf16.mxu0 %v28917_v57  ;;  %23895 = vmatprep.mubr.bf16.mxu1 %v29179_v56  ;;  %v26023_v57 = vld [vmem:[%s30804_s3 + $0x400] sm:$0xff]  }
 0x608   : >> { %23013 = vmatprep.subr.bf16.mxu0 %v26020_v23  ;;  %23913 = vmatprep.subr.bf16.mxu1 %v26020_v23 }
 0x60a   : >> { %23014 = vmatpush3.bf16.msra.mxu0 %v26020_v23  ;;  %23914 = vmatpush3.bf16.msra.mxu1 %v26020_v23  ;;  %v26060_v23 = vld [vmem:[%s30804_s3 + $0x528] sm:$0xff]  }
 0x60b   : >> { %23015 = vmatprep.subr.bf16.mxu0 %v26021_v29  ;;  %23915 = vmatprep.subr.bf16.mxu1 %v26021_v29 }
 0x60d   : >> { %22996 = vmatmul.mubr.bf16.gmra.mrb[12].mxu0 %v28964_v22  ;;  %23896 = vmatmul.mubr.bf16.gmra.mrb[12].mxu1 %v29226_v21  ;;  %v29323_v22 = vld [vmem:[%s28458_s23 + $0x1c0] sm:$0xff] }
 0x60e   : >> { %22999 = vmatprep.mubr.bf16.mxu0 %v29011_v2  ;;  %23016 = vmatpush3.bf16.msra.mxu0 %v26021_v29  ;;  %v29330_v2 = vld [vmem:[%s28458_s23 + $0x1c8] sm:$0xff] }
 0x60f   : >> { %23899 = vmatprep.mubr.bf16.mxu1 %v29273_v47  ;;  %23916 = vmatpush3.bf16.msra.mxu1 %v26021_v29  ;;  %v26061_v29 = vld [vmem:[%s30804_s3 + $0x530] sm:$0xff]  }
 0x610   : >> { %23017 = vmatprep.subr.bf16.mxu0 %v26022_v32  ;;  %23917 = vmatprep.subr.bf16.mxu1 %v26022_v32 }
 0x612   : >> { %23018 = vmatpush3.bf16.msra.mxu0 %v26022_v32 }
 0x613   : >> { %23918 = vmatpush3.bf16.msra.mxu1 %v26022_v32  ;;  %23039 = vmatprep.subr.bf16.mxu0 %v26023_v57  ;;  %v26062_v32 = vld [vmem:[%s30804_s3 + $0x538] sm:$0xff]  }
 0x614   : >> { %23939 = vmatprep.subr.bf16.mxu1 %v26023_v57 }
 0x615   : >> { %23000 = vmatmul.mubr.bf16.gmra.mrb[16].mxu0 %v29058_v3  ;;  %23900 = vmatmul.mubr.bf16.gmra.mrb[16].mxu1 %v29320_v1  ;;  %v26025_v3 = vld [vmem:[%s30804_s3 + $0x410] sm:$0xff]  }
 0x616   : >> { %23019 = vmatprep.mubr.bf16.mxu0 %v29061_v54  ;;  %23919 = vmatprep.mubr.bf16.mxu1 %v29323_v22  ;;  %v29346_v54 = vld [vmem:[%s28458_s23 + $0x1d8] sm:$0xff] }
 0x61d   : >> { %23020 = vmatmul.mubr.bf16.vlgmr.msra.gmra.mrb[0].mxu0 %v29068_v18  ;;  %23920 = vmatmul.mubr.bf16.vlgmr.msra.gmra.mrb[0].mxu1 %v29330_v2 }
 0x61e   : >> { %23040 = vmatpush3.bf16.msra.mxu0 %v26023_v57  ;;  %23940 = vmatpush3.bf16.msra.mxu1 %v26023_v57  ;;  %v29582_v57 = vld [vmem:[%s28458_s23 + $0x228] sm:$0xff] }
 0x61f   : >> { %23041 = vmatprep.subr.bf16.mxu0 %v26024_v6  ;;  %23941 = vmatprep.subr.bf16.mxu1 %v26024_v6 }
 0x620   : >> { %23023 = vmatprep.mubr.bf16.mxu0 %v29076_v7  ;;  %23923 = vmatprep.mubr.bf16.mxu1 %v29338_v8 }
 0x622   : >> { %23042 = vmatpush3.bf16.msra.mxu0 %v26024_v6  ;;  %23942 = vmatpush3.bf16.msra.mxu1 %v26024_v6  ;;  %v26064_v6 = vld [vmem:[%s30804_s3 + $0x548] sm:$0xff]  }
 0x623   : >> { %23043 = vmatprep.subr.bf16.mxu0 %v26025_v3  ;;  %23943 = vmatprep.subr.bf16.mxu1 %v26025_v3 }
 0x625   : >> { %23024 = vmatmul.mubr.bf16.gmra.mrb[4].mxu0 %v29084_v9  ;;  %23924 = vmatmul.mubr.bf16.gmra.mrb[4].mxu1 %v29346_v54 }
 0x626   : >> { %23044 = vmatpush3.bf16.msra.mxu0 %v26025_v3  ;;  %23944 = vmatpush3.bf16.msra.mxu1 %v26025_v3  ;;  %v29597_v3 = vld [vmem:[%s28458_s23 + $0x240] sm:$0xff] }
 0x627   : >> { %23027 = vmatprep.mubr.bf16.mxu0 %v29092_v12  ;;  %23045 = vmatprep.subr.bf16.mxu0 %v26026_v10 }
 0x628   : >> { %23927 = vmatprep.mubr.bf16.mxu1 %v29354_v13  ;;  %23945 = vmatprep.subr.bf16.mxu1 %v26026_v10 }
 0x62a   : >> { %23046 = vmatpush3.bf16.msra.mxu0 %v26026_v10  ;;  %23946 = vmatpush3.bf16.msra.mxu1 %v26026_v10  ;;  %v26066_v10 = vld [vmem:[%s30804_s3 + $0x558] sm:$0xff]  }
 0x62b   : >> { %23047 = vmatprep.subr.bf16.mxu0 %v26027_v35  ;;  %23947 = vmatprep.subr.bf16.mxu1 %v26027_v35 }
 0x62d   : >> { %23028 = vmatmul.mubr.bf16.gmra.mrb[8].mxu0 %v29100_v15  ;;  %23928 = vmatmul.mubr.bf16.gmra.mrb[8].mxu1 %v29362_v36 }
 0x62e   : >> { %23048 = vmatpush3.bf16.msra.mxu0 %v26027_v35  ;;  %23948 = vmatpush3.bf16.msra.mxu1 %v26027_v35  ;;  %v29613_v35 = vld [vmem:[%s28458_s23 + $0x250] sm:$0xff] }
 0x62f   : >> { %23031 = vmatprep.mubr.bf16.mxu0 %v29103_v33  ;;  %23931 = vmatprep.mubr.bf16.mxu1 %v29365_v42 }
 0x630   : >> { %23049 = vmatprep.subr.bf16.mxu0 %v26028_v45  ;;  %23949 = vmatprep.subr.bf16.mxu1 %v26028_v45 }
 0x632   : >> { %23050 = vmatpush3.bf16.msra.mxu0 %v26028_v45  ;;  %23950 = vmatpush3.bf16.msra.mxu1 %v26028_v45  ;;  %v26067_v45 = vld [vmem:[%s30804_s3 + $0x560] sm:$0xff]  }
 0x633   : >> { %23051 = vmatprep.subr.bf16.mxu0 %v26029_v48  ;;  %23951 = vmatprep.subr.bf16.mxu1 %v26029_v48 }
 0x635   : >> { %23032 = vmatmul.mubr.bf16.gmra.mrb[12].mxu0 %v29116_v38  ;;  %23932 = vmatmul.mubr.bf16.gmra.mrb[12].mxu1 %v29378_v49 }
 0x636   : >> { %23035 = vmatprep.mubr.bf16.mxu0 %v29119_v41  ;;  %23052 = vmatpush3.bf16.msra.mxu0 %v26029_v48 }
 0x637   : >> { %23935 = vmatprep.mubr.bf16.mxu1 %v29381_v11  ;;  %23952 = vmatpush3.bf16.msra.mxu1 %v26029_v48  ;;  %v29621_v48 = vld [vmem:[%s28458_s23 + $0x258] sm:$0xff] }
 0x638   : >> { %23053 = vmatprep.subr.bf16.mxu0 %v26030_v50  ;;  %23953 = vmatprep.subr.bf16.mxu1 %v26030_v50 }
 0x63a   : >> { %23054 = vmatpush3.bf16.msra.mxu0 %v26030_v50 }
 0x63b   : >> { %23954 = vmatpush3.bf16.msra.mxu1 %v26030_v50  ;;  %23075 = vmatprep.subr.bf16.mxu0 %v26031_v51  ;;  %v29624_v50 = vld [vmem:[%s28458_s23 + $0x260] sm:$0xff] }
 0x63c   : >> { %23975 = vmatprep.subr.bf16.mxu1 %v26031_v51 }
 0x63d   : >> { %23036 = vmatmul.mubr.bf16.gmra.mrb[16].mxu0 %v29132_v46  ;;  %23936 = vmatmul.mubr.bf16.gmra.mrb[16].mxu1 %v29394_v52 }
 0x63e   : >> { %23055 = vmatprep.mubr.bf16.mxu0 %v29068_v18  ;;  %23955 = vmatprep.mubr.bf16.mxu1 %v29330_v2  ;;  %v26034_v18 = vld [vmem:[%s30804_s3 + $0x458] sm:$0xff]  }
 0x645   : >> { %23056 = vmatmul.mubr.bf16.vlgmr.msra.gmra.mrb[0].mxu0 %v29076_v7  ;;  %23956 = vmatmul.mubr.bf16.vlgmr.msra.gmra.mrb[0].mxu1 %v29338_v8 }
 0x646   : >> { %23076 = vmatpush3.bf16.msra.mxu0 %v26031_v51  ;;  %23976 = vmatpush3.bf16.msra.mxu1 %v26031_v51  ;;  %v26068_v51 = vld [vmem:[%s30804_s3 + $0x568] sm:$0xff]  }
 0x647   : >> { %23077 = vmatprep.subr.bf16.mxu0 %v26032_v53  ;;  %23977 = vmatprep.subr.bf16.mxu1 %v26032_v53 }
 0x648   : >> { %23059 = vmatprep.mubr.bf16.mxu0 %v29084_v9  ;;  %23959 = vmatprep.mubr.bf16.mxu1 %v29346_v54 }
 0x64a   : >> { %23078 = vmatpush3.bf16.msra.mxu0 %v26032_v53  ;;  %23978 = vmatpush3.bf16.msra.mxu1 %v26032_v53  ;;  %v26069_v53 = vld [vmem:[%s30804_s3 + $0x570] sm:$0xff]  }
 0x64b   : >> { %23079 = vmatprep.subr.bf16.mxu0 %v26033_v55  ;;  %23979 = vmatprep.subr.bf16.mxu1 %v26033_v55 }
 0x64d   : >> { %23060 = vmatmul.mubr.bf16.gmra.mrb[4].mxu0 %v29092_v12  ;;  %23960 = vmatmul.mubr.bf16.gmra.mrb[4].mxu1 %v29354_v13 }
 0x64e   : >> { %23080 = vmatpush3.bf16.msra.mxu0 %v26033_v55  ;;  %23980 = vmatpush3.bf16.msra.mxu1 %v26033_v55  ;;  %v29637_v55 = vld [vmem:[%s28458_s23 + $0x268] sm:$0xff] }
 0x64f   : >> { %23063 = vmatprep.mubr.bf16.mxu0 %v29100_v15  ;;  %23081 = vmatprep.subr.bf16.mxu0 %v26034_v18 }
 0x650   : >> { %23963 = vmatprep.mubr.bf16.mxu1 %v29362_v36  ;;  %23981 = vmatprep.subr.bf16.mxu1 %v26034_v18 }
 0x652   : >> { %23082 = vmatpush3.bf16.msra.mxu0 %v26034_v18  ;;  %23982 = vmatpush3.bf16.msra.mxu1 %v26034_v18  ;;  %v29640_v18 = vld [vmem:[%s28458_s23 + $0x270] sm:$0xff] }
 0x653   : >> { %23083 = vmatprep.subr.bf16.mxu0 %v26035_v58  ;;  %23983 = vmatprep.subr.bf16.mxu1 %v26035_v58 }
 0x655   : >> { %23064 = vmatmul.mubr.bf16.gmra.mrb[8].mxu0 %v29103_v33  ;;  %23964 = vmatmul.mubr.bf16.gmra.mrb[8].mxu1 %v29365_v42 }
 0x656   : >> { %23084 = vmatpush3.bf16.msra.mxu0 %v26035_v58  ;;  %23984 = vmatpush3.bf16.msra.mxu1 %v26035_v58  ;;  %v26070_v58 = vld [vmem:[%s30804_s3 + $0x578] sm:$0xff]  }
 0x657   : >> { %23067 = vmatprep.mubr.bf16.mxu0 %v29116_v38  ;;  %23967 = vmatprep.mubr.bf16.mxu1 %v29378_v49 }
 0x658   : >> { %23085 = vmatprep.subr.bf16.mxu0 %v26036_v59  ;;  %23985 = vmatprep.subr.bf16.mxu1 %v26036_v59 }
 0x65a   : >> { %23086 = vmatpush3.bf16.msra.mxu0 %v26036_v59  ;;  %23986 = vmatpush3.bf16.msra.mxu1 %v26036_v59  ;;  %v26071_v59 = vld [vmem:[%s30804_s3 + $0x580] sm:$0xff]  }
 0x65b   : >> { %23087 = vmatprep.subr.bf16.mxu0 %v26037_v14  ;;  %23987 = vmatprep.subr.bf16.mxu1 %v26037_v14 }
 0x65d   : >> { %23068 = vmatmul.mubr.bf16.gmra.mrb[12].mxu0 %v29119_v41  ;;  %23968 = vmatmul.mubr.bf16.gmra.mrb[12].mxu1 %v29381_v11 }
 0x65e   : >> { %23071 = vmatprep.mubr.bf16.mxu0 %v29132_v46  ;;  %23088 = vmatpush3.bf16.msra.mxu0 %v26037_v14 }
 0x65f   : >> { %23971 = vmatprep.mubr.bf16.mxu1 %v29394_v52  ;;  %23988 = vmatpush3.bf16.msra.mxu1 %v26037_v14  ;;  %v29653_v14 = vld [vmem:[%s28458_s23 + $0x278] sm:$0xff] }
 0x660   : >> { %23089 = vmatprep.subr.bf16.mxu0 %v26038_v60  ;;  %23989 = vmatprep.subr.bf16.mxu1 %v26038_v60 }
 0x662   : >> { %23090 = vmatpush3.bf16.msra.mxu0 %v26038_v60 }
 0x663   : >> { %23990 = vmatpush3.bf16.msra.mxu1 %v26038_v60  ;;  %23111 = vmatprep.subr.bf16.mxu0 %v26039_v62  ;;  %v26072_v60 = vld [vmem:[%s30804_s3 + $0x588] sm:$0xff]  }
 0x664   : >> { %24011 = vmatprep.subr.bf16.mxu1 %v26039_v62 }
 0x665   : >> { %23072 = vmatmul.mubr.bf16.gmra.mrb[16].mxu0 %v29179_v56  ;;  %23972 = vmatmul.mubr.bf16.gmra.mrb[16].mxu1 %v29441_v16 }
 0x666   : >> { %23091 = vmatprep.mubr.bf16.mxu0 %v29076_v7  ;;  %23991 = vmatprep.mubr.bf16.mxu1 %v29338_v8  ;;  %v26042_v7 = vld [vmem:[%s30804_s3 + $0x498] sm:$0xff]  }
 0x66d   : >> { %23092 = vmatmul.mubr.bf16.vlgmr.msra.gmra.mrb[0].mxu0 %v29084_v9  ;;  %23992 = vmatmul.mubr.bf16.vlgmr.msra.gmra.mrb[0].mxu1 %v29346_v54 }
 0x66e   : >> { %23112 = vmatpush3.bf16.msra.mxu0 %v26039_v62  ;;  %24012 = vmatpush3.bf16.msra.mxu1 %v26039_v62  ;;  %v26073_v62 = vld [vmem:[%s30804_s3 + $0x590] sm:$0xff]  }
 0x66f   : >> { %23113 = vmatprep.subr.bf16.mxu0 %v26040_v17  ;;  %24013 = vmatprep.subr.bf16.mxu1 %v26040_v17 }
 0x670   : >> { %23095 = vmatprep.mubr.bf16.mxu0 %v29092_v12  ;;  %23995 = vmatprep.mubr.bf16.mxu1 %v29354_v13 }
 0x672   : >> { %23114 = vmatpush3.bf16.msra.mxu0 %v26040_v17  ;;  %24014 = vmatpush3.bf16.msra.mxu1 %v26040_v17  ;;  %v26075_v17 = vld [vmem:[%s30804_s3 + $0x5a0] sm:$0xff]  }
 0x673   : >> { %23115 = vmatprep.subr.bf16.mxu0 %v26041_v19  ;;  %24015 = vmatprep.subr.bf16.mxu1 %v26041_v19 }
 0x675   : >> { %23096 = vmatmul.mubr.bf16.gmra.mrb[4].mxu0 %v29100_v15  ;;  %23996 = vmatmul.mubr.bf16.gmra.mrb[4].mxu1 %v29362_v36 }
 0x676   : >> { %23116 = vmatpush3.bf16.msra.mxu0 %v26041_v19  ;;  %24016 = vmatpush3.bf16.msra.mxu1 %v26041_v19  ;;  %v26076_v19 = vld [vmem:[%s30804_s3 + $0x5a8] sm:$0xff]  }
 0x677   : >> { %23099 = vmatprep.mubr.bf16.mxu0 %v29103_v33  ;;  %23117 = vmatprep.subr.bf16.mxu0 %v26042_v7 }
 0x678   : >> { %23999 = vmatprep.mubr.bf16.mxu1 %v29365_v42  ;;  %24017 = vmatprep.subr.bf16.mxu1 %v26042_v7 }
 0x67a   : >> { %23118 = vmatpush3.bf16.msra.mxu0 %v26042_v7  ;;  %24018 = vmatpush3.bf16.msra.mxu1 %v26042_v7  ;;  %v26077_v7 = vld [vmem:[%s30804_s3 + $0x5b0] sm:$0xff]  }
 0x67b   : >> { %23119 = vmatprep.subr.bf16.mxu0 %v26043_v24  ;;  %24019 = vmatprep.subr.bf16.mxu1 %v26043_v24 }
 0x67d   : >> { %23100 = vmatmul.mubr.bf16.gmra.mrb[8].mxu0 %v29116_v38  ;;  %24000 = vmatmul.mubr.bf16.gmra.mrb[8].mxu1 %v29378_v49 }
 0x67e   : >> { %23120 = vmatpush3.bf16.msra.mxu0 %v26043_v24  ;;  %24020 = vmatpush3.bf16.msra.mxu1 %v26043_v24  ;;  %v26078_v24 = vld [vmem:[%s30804_s3 + $0x5b8] sm:$0xff]  }
 0x67f   : >> { %23103 = vmatprep.mubr.bf16.mxu0 %v29119_v41  ;;  %24003 = vmatprep.mubr.bf16.mxu1 %v29381_v11 }
 0x680   : >> { %23121 = vmatprep.subr.bf16.mxu0 %v26044_v25  ;;  %24021 = vmatprep.subr.bf16.mxu1 %v26044_v25 }
 0x682   : >> { %23122 = vmatpush3.bf16.msra.mxu0 %v26044_v25  ;;  %24022 = vmatpush3.bf16.msra.mxu1 %v26044_v25  ;;  %v26079_v25 = vld [vmem:[%s30804_s3 + $0x5c0] sm:$0xff]  }
 0x683   : >> { %23123 = vmatprep.subr.bf16.mxu0 %v26045_v34  ;;  %24023 = vmatprep.subr.bf16.mxu1 %v26045_v34 }
 0x685   : >> { %23104 = vmatmul.mubr.bf16.gmra.mrb[12].mxu0 %v29132_v46  ;;  %24004 = vmatmul.mubr.bf16.gmra.mrb[12].mxu1 %v29394_v52 }
 0x686   : >> { %23107 = vmatprep.mubr.bf16.mxu0 %v29179_v56  ;;  %23124 = vmatpush3.bf16.msra.mxu0 %v26045_v34 }
 0x687   : >> { %24007 = vmatprep.mubr.bf16.mxu1 %v29441_v16  ;;  %24024 = vmatpush3.bf16.msra.mxu1 %v26045_v34  ;;  %v29700_v34 = vld [vmem:[%s28458_s23 + $0x280] sm:$0xff] }
 0x688   : >> { %23125 = vmatprep.subr.bf16.mxu0 %v26046_v37  ;;  %24025 = vmatprep.subr.bf16.mxu1 %v26046_v37 }
 0x68a   : >> { %23126 = vmatpush3.bf16.msra.mxu0 %v26046_v37 }
 0x68b   : >> { %24026 = vmatpush3.bf16.msra.mxu1 %v26046_v37  ;;  %23147 = vmatprep.subr.bf16.mxu0 %v26047_v39  ;;  %v26080_v37 = vld [vmem:[%s30804_s3 + $0x5c8] sm:$0xff]  }
 0x68c   : >> { %24047 = vmatprep.subr.bf16.mxu1 %v26047_v39 }
 0x68d   : >> { %23108 = vmatmul.mubr.bf16.gmra.mrb[16].mxu0 %v29226_v21  ;;  %24008 = vmatmul.mubr.bf16.gmra.mrb[16].mxu1 %v29488_v40 }
 0x68e   : >> { %23127 = vmatprep.mubr.bf16.mxu0 %v29084_v9  ;;  %24027 = vmatprep.mubr.bf16.mxu1 %v29346_v54  ;;  %v26050_v9 = vld [vmem:[%s30804_s3 + $0x4d8] sm:$0xff]  }
 0x695   : >> { %23128 = vmatmul.mubr.bf16.vlgmr.msra.gmra.mrb[0].mxu0 %v29092_v12  ;;  %24028 = vmatmul.mubr.bf16.vlgmr.msra.gmra.mrb[0].mxu1 %v29354_v13  ;;  %v26051_v12 = vld [vmem:[%s30804_s3 + $0x4e0] sm:$0xff]  }
 0x696   : >> { %23148 = vmatpush3.bf16.msra.mxu0 %v26047_v39  ;;  %24048 = vmatpush3.bf16.msra.mxu1 %v26047_v39  ;;  %v26081_v39 = vld [vmem:[%s30804_s3 + $0x5d0] sm:$0xff]  }
 0x697   : >> { %23149 = vmatprep.subr.bf16.mxu0 %v26048_v43  ;;  %24049 = vmatprep.subr.bf16.mxu1 %v26048_v43 }
 0x698   : >> { %23131 = vmatprep.mubr.bf16.mxu0 %v29100_v15  ;;  %24031 = vmatprep.mubr.bf16.mxu1 %v29362_v36  ;;  %v26052_v15 = vld [vmem:[%s30804_s3 + $0x4e8] sm:$0xff]  }
 0x69a   : >> { %23150 = vmatpush3.bf16.msra.mxu0 %v26048_v43  ;;  %24050 = vmatpush3.bf16.msra.mxu1 %v26048_v43  ;;  %v26083_v43 = vld [vmem:[%s30804_s3 + $0x5e0] sm:$0xff]  }
 0x69b   : >> { %23151 = vmatprep.subr.bf16.mxu0 %v26049_v44  ;;  %24051 = vmatprep.subr.bf16.mxu1 %v26049_v44 }
 0x69d   : >> { %23132 = vmatmul.mubr.bf16.gmra.mrb[4].mxu0 %v29103_v33  ;;  %24032 = vmatmul.mubr.bf16.gmra.mrb[4].mxu1 %v29365_v42  ;;  %v26053_v33 = vld [vmem:[%s30804_s3 + $0x4f0] sm:$0xff]  }
 0x69e   : >> { %23152 = vmatpush3.bf16.msra.mxu0 %v26049_v44  ;;  %24052 = vmatpush3.bf16.msra.mxu1 %v26049_v44  ;;  %v26084_v44 = vld [vmem:[%s30804_s3 + $0x5e8] sm:$0xff]  }
 0x69f   : >> { %23135 = vmatprep.mubr.bf16.mxu0 %v29116_v38  ;;  %23153 = vmatprep.subr.bf16.mxu0 %v26050_v9  ;;  %v26054_v38 = vld [vmem:[%s30804_s3 + $0x4f8] sm:$0xff]  }
 0x6a0   : >> { %24035 = vmatprep.mubr.bf16.mxu1 %v29378_v49  ;;  %24053 = vmatprep.subr.bf16.mxu1 %v26050_v9 }
 0x6a2   : >> { %23154 = vmatpush3.bf16.msra.mxu0 %v26050_v9  ;;  %24054 = vmatpush3.bf16.msra.mxu1 %v26050_v9  ;;  %v26085_v9 = vld [vmem:[%s30804_s3 + $0x5f0] sm:$0xff]  }
 0x6a3   : >> { %23155 = vmatprep.subr.bf16.mxu0 %v26051_v12  ;;  %24055 = vmatprep.subr.bf16.mxu1 %v26051_v12 }
 0x6a5   : >> { %23136 = vmatmul.mubr.bf16.gmra.mrb[8].mxu0 %v29119_v41  ;;  %24036 = vmatmul.mubr.bf16.gmra.mrb[8].mxu1 %v29381_v11  ;;  %v26055_v41 = vld [vmem:[%s30804_s3 + $0x500] sm:$0xff]  }
 0x6a6   : >> { %23156 = vmatpush3.bf16.msra.mxu0 %v26051_v12  ;;  %24056 = vmatpush3.bf16.msra.mxu1 %v26051_v12  ;;  %v26086_v12 = vld [vmem:[%s30804_s3 + $0x5f8] sm:$0xff]  }
 0x6a7   : >> { %23139 = vmatprep.mubr.bf16.mxu0 %v29132_v46  ;;  %24039 = vmatprep.mubr.bf16.mxu1 %v29394_v52  ;;  %v29535_v46 = vld [vmem:[%s28458_s23 + $0x220] sm:$0xff] }
 0x6a8   : >> { %23157 = vmatprep.subr.bf16.mxu0 %v26052_v15  ;;  %24057 = vmatprep.subr.bf16.mxu1 %v26052_v15 }
 0x6aa   : >> { %23158 = vmatpush3.bf16.msra.mxu0 %v26052_v15  ;;  %24058 = vmatpush3.bf16.msra.mxu1 %v26052_v15  ;;  %v26087_v15 = vld [vmem:[%s30804_s3 + $0x600] sm:$0xff]  }
 0x6ab   : >> { %23159 = vmatprep.subr.bf16.mxu0 %v26053_v33  ;;  %24059 = vmatprep.subr.bf16.mxu1 %v26053_v33 }
 0x6ad   : >> { %23140 = vmatmul.mubr.bf16.gmra.mrb[12].mxu0 %v29179_v56  ;;  %24040 = vmatmul.mubr.bf16.gmra.mrb[12].mxu1 %v29441_v16 }
 0x6ae   : >> { %23143 = vmatprep.mubr.bf16.mxu0 %v29226_v21  ;;  %23160 = vmatpush3.bf16.msra.mxu0 %v26053_v33 }
 0x6af   : >> { %24043 = vmatprep.mubr.bf16.mxu1 %v29488_v40  ;;  %24060 = vmatpush3.bf16.msra.mxu1 %v26053_v33  ;;  %v29747_v33 = vld [vmem:[%s28458_s23 + $0x288] sm:$0xff] }
 0x6b0   : >> { %23161 = vmatprep.subr.bf16.mxu0 %v26054_v38  ;;  %24061 = vmatprep.subr.bf16.mxu1 %v26054_v38 }
 0x6b2   : >> { %23162 = vmatpush3.bf16.msra.mxu0 %v26054_v38 }
 0x6b3   : >> { %24062 = vmatpush3.bf16.msra.mxu1 %v26054_v38  ;;  %23183 = vmatprep.subr.bf16.mxu0 %v26055_v41  ;;  %v26088_v38 = vld [vmem:[%s30804_s3 + $0x608] sm:$0xff]  }
 0x6b4   : >> { %24083 = vmatprep.subr.bf16.mxu1 %v26055_v41 }
 0x6b5   : >> { %23144 = vmatmul.mubr.bf16.gmra.mrb[16].mxu0 %v29273_v47  ;;  %24044 = vmatmul.mubr.bf16.gmra.mrb[16].mxu1 %v29535_v46 }
 0x6b6   : >> { %23163 = vmatprep.mubr.bf16.mxu0 %v26119_v27  ;;  %24063 = vmatprep.mubr.bf16.mxu1 %v29354_v13  ;;  %v26125_v27 = vld [vmem:[%s28458_s23 + $0x1e0] sm:$0xff] }
 0x6bd   : >> { %23164 = vmatmul.mubr.bf16.vlgmr.msra.gmra.mrb[0].mxu0 %v26120_v30  ;;  %24064 = vmatmul.mubr.bf16.vlgmr.msra.gmra.mrb[0].mxu1 %v29362_v36  ;;  %v26127_v30 = vld [vmem:[%s28458_s23 + $0x1f0] sm:$0xff] }
 0x6be   : >> { %23184 = vmatpush3.bf16.msra.mxu0 %v26055_v41  ;;  %24084 = vmatpush3.bf16.msra.mxu1 %v26055_v41  ;;  %v26089_v41 = vld [vmem:[%s30804_s3 + $0x610] sm:$0xff]  }
 0x6bf   : >> { %23185 = vmatprep.subr.bf16.mxu0 %v26056_v28  ;;  %24085 = vmatprep.subr.bf16.mxu1 %v26056_v28 }
 0x6c0   : >> { %23167 = vmatprep.mubr.bf16.mxu0 %v26121_v63  ;;  %24067 = vmatprep.mubr.bf16.mxu1 %v29365_v42  ;;  %v26129_v63 = vld [vmem:[%s28458_s23 + $0x200] sm:$0xff] }
 0x6c2   : >> { %23186 = vmatpush3.bf16.msra.mxu0 %v26056_v28  ;;  %24086 = vmatpush3.bf16.msra.mxu1 %v26056_v28  ;;  %v26126_v28 = vld [vmem:[%s28458_s23 + $0x1e8] sm:$0xff] }
 0x6c3   : >> { %23187 = vmatprep.subr.bf16.mxu0 %v26057_v31  ;;  %24087 = vmatprep.subr.bf16.mxu1 %v26057_v31 }
 0x6c5   : >> { %23168 = vmatmul.mubr.bf16.gmra.mrb[4].mxu0 %v26122_v4  ;;  %24068 = vmatmul.mubr.bf16.gmra.mrb[4].mxu1 %v29378_v49 }
 0x6c6   : >> { %23188 = vmatpush3.bf16.msra.mxu0 %v26057_v31  ;;  %24088 = vmatpush3.bf16.msra.mxu1 %v26057_v31  ;;  %v26128_v31 = vld [vmem:[%s28458_s23 + $0x1f8] sm:$0xff] }
 0x6c7   : >> { %23171 = vmatprep.mubr.bf16.mxu0 %v26123_v5  ;;  %23189 = vmatprep.subr.bf16.mxu0 %v26058_v0 }
 0x6c8   : >> { %24071 = vmatprep.mubr.bf16.mxu1 %v29381_v11  ;;  %24089 = vmatprep.subr.bf16.mxu1 %v26058_v0 }
 0x6ca   : >> { %23190 = vmatpush3.bf16.msra.mxu0 %v26058_v0  ;;  %24090 = vmatpush3.bf16.msra.mxu1 %v26058_v0  ;;  %v20492_v0 = vld [vmem:[%s28458_s23 + $0x298] sm:$0xff] }
 0x6cb   : >> { %23191 = vmatprep.subr.bf16.mxu0 %v26059_v20  ;;  %24091 = vmatprep.subr.bf16.mxu1 %v26059_v20 }
 0x6cd   : >> { %23172 = vmatmul.mubr.bf16.gmra.mrb[8].mxu0 %v26124_v26  ;;  %24072 = vmatmul.mubr.bf16.gmra.mrb[8].mxu1 %v29394_v52 }
 0x6ce   : >> { %23192 = vmatpush3.bf16.msra.mxu0 %v26059_v20  ;;  %24092 = vmatpush3.bf16.msra.mxu1 %v26059_v20 }
 0x6cf   : >> { %23175 = vmatprep.mubr.bf16.mxu0 %v29179_v56  ;;  %24075 = vmatprep.mubr.bf16.mxu1 %v29441_v16  ;;  %v26063_v56 = vld [vmem:[%s30804_s3 + $0x540] sm:$0xff]  }
 0x6d0   : >> { %23193 = vmatprep.subr.bf16.mxu0 %v26060_v23  ;;  %24093 = vmatprep.subr.bf16.mxu1 %v26060_v23 }
 0x6d2   : >> { %23194 = vmatpush3.bf16.msra.mxu0 %v26060_v23  ;;  %24094 = vmatpush3.bf16.msra.mxu1 %v26060_v23 }
 0x6d3   : >> { %23195 = vmatprep.subr.bf16.mxu0 %v26061_v29  ;;  %24095 = vmatprep.subr.bf16.mxu1 %v26061_v29 }
 0x6d5   : >> { %23176 = vmatmul.mubr.bf16.gmra.mrb[12].mxu0 %v29226_v21  ;;  %24076 = vmatmul.mubr.bf16.gmra.mrb[12].mxu1 %v29488_v40  ;;  %v20479_v21 = vld [vmem:[%s28458_s23 + $0x230] sm:$0xff] }
 0x6d6   : >> { %23179 = vmatprep.mubr.bf16.mxu0 %v29273_v47  ;;  %23196 = vmatpush3.bf16.msra.mxu0 %v26061_v29  ;;  %v29589_v47 = vld [vmem:[%s28458_s23 + $0x238] sm:$0xff] }
 0x6d7   : >> { %24079 = vmatprep.mubr.bf16.mxu1 %v29535_v46  ;;  %24096 = vmatpush3.bf16.msra.mxu1 %v26061_v29 }
 0x6d8   : >> { %23197 = vmatprep.subr.bf16.mxu0 %v26062_v32  ;;  %24097 = vmatprep.subr.bf16.mxu1 %v26062_v32 }
 0x6da   : >> { %23198 = vmatpush3.bf16.msra.mxu0 %v26062_v32 }
 0x6db   : >> { %24098 = vmatpush3.bf16.msra.mxu1 %v26062_v32  ;;  %23219 = vmatprep.subr.bf16.mxu0 %v26063_v56 }
 0x6dc   : >> { %24119 = vmatprep.subr.bf16.mxu1 %v26063_v56 }
 0x6dd   : >> { %23180 = vmatmul.mubr.bf16.gmra.mrb[16].mxu0 %v29320_v1  ;;  %24080 = vmatmul.mubr.bf16.gmra.mrb[16].mxu1 %v29582_v57  ;;  %v26065_v1 = vld [vmem:[%s30804_s3 + $0x550] sm:$0xff]  }
 0x6de   : >> { %23199 = vmatprep.mubr.bf16.mxu0 %v29323_v22  ;;  %24099 = vmatprep.mubr.bf16.mxu1 %v20479_v21  ;;  %v29605_v22 = vld [vmem:[%s28458_s23 + $0x248] sm:$0xff] }
 0x6e5   : >> { %23200 = vmatmul.mubr.bf16.vlgmr.msra.gmra.mrb[0].mxu0 %v29330_v2  ;;  %24100 = vmatmul.mubr.bf16.vlgmr.msra.gmra.mrb[0].mxu1 %v29589_v47 }
 0x6e6   : >> { %23220 = vmatpush3.bf16.msra.mxu0 %v26063_v56  ;;  %24120 = vmatpush3.bf16.msra.mxu1 %v26063_v56 }
 0x6e7   : >> { %23221 = vmatprep.subr.bf16.mxu0 %v26064_v6  ;;  %24121 = vmatprep.subr.bf16.mxu1 %v26064_v6 }
 0x6e8   : >> { %23203 = vmatprep.mubr.bf16.mxu0 %v29338_v8  ;;  %24103 = vmatprep.mubr.bf16.mxu1 %v29597_v3 }
 0x6ea   : >> { %23222 = vmatpush3.bf16.msra.mxu0 %v26064_v6  ;;  %24122 = vmatpush3.bf16.msra.mxu1 %v26064_v6 }
 0x6eb   : >> { %23223 = vmatprep.subr.bf16.mxu0 %v26065_v1  ;;  %24123 = vmatprep.subr.bf16.mxu1 %v26065_v1 }
 0x6ed   : >> { %23204 = vmatmul.mubr.bf16.gmra.mrb[4].mxu0 %v29346_v54  ;;  %24104 = vmatmul.mubr.bf16.gmra.mrb[4].mxu1 %v29605_v22 }
 0x6ee   : >> { %23224 = vmatpush3.bf16.msra.mxu0 %v26065_v1  ;;  %24124 = vmatpush3.bf16.msra.mxu1 %v26065_v1 }
 0x6ef   : >> { %23207 = vmatprep.mubr.bf16.mxu0 %v29354_v13  ;;  %23225 = vmatprep.subr.bf16.mxu0 %v26066_v10 }
 0x6f0   : >> { %24107 = vmatprep.mubr.bf16.mxu1 %v29613_v35  ;;  %24125 = vmatprep.subr.bf16.mxu1 %v26066_v10 }
 0x6f2   : >> { %23226 = vmatpush3.bf16.msra.mxu0 %v26066_v10  ;;  %24126 = vmatpush3.bf16.msra.mxu1 %v26066_v10 }
 0x6f3   : >> { %23227 = vmatprep.subr.bf16.mxu0 %v26067_v45  ;;  %24127 = vmatprep.subr.bf16.mxu1 %v26067_v45 }
 0x6f5   : >> { %23208 = vmatmul.mubr.bf16.gmra.mrb[8].mxu0 %v29362_v36  ;;  %24108 = vmatmul.mubr.bf16.gmra.mrb[8].mxu1 %v29621_v48 }
 0x6f6   : >> { %23228 = vmatpush3.bf16.msra.mxu0 %v26067_v45  ;;  %24128 = vmatpush3.bf16.msra.mxu1 %v26067_v45 }
 0x6f7   : >> { %23211 = vmatprep.mubr.bf16.mxu0 %v29365_v42  ;;  %24111 = vmatprep.mubr.bf16.mxu1 %v29624_v50 }
 0x6f8   : >> { %23229 = vmatprep.subr.bf16.mxu0 %v26068_v51  ;;  %24129 = vmatprep.subr.bf16.mxu1 %v26068_v51 }
 0x6fa   : >> { %23230 = vmatpush3.bf16.msra.mxu0 %v26068_v51  ;;  %24130 = vmatpush3.bf16.msra.mxu1 %v26068_v51 }
 0x6fb   : >> { %23231 = vmatprep.subr.bf16.mxu0 %v26069_v53  ;;  %24131 = vmatprep.subr.bf16.mxu1 %v26069_v53 }
 0x6fd   : >> { %23212 = vmatmul.mubr.bf16.gmra.mrb[12].mxu0 %v29378_v49  ;;  %24112 = vmatmul.mubr.bf16.gmra.mrb[12].mxu1 %v29637_v55 }
 0x6fe   : >> { %23215 = vmatprep.mubr.bf16.mxu0 %v29381_v11  ;;  %23232 = vmatpush3.bf16.msra.mxu0 %v26069_v53 }
 0x6ff   : >> { %24115 = vmatprep.mubr.bf16.mxu1 %v29640_v18  ;;  %24132 = vmatpush3.bf16.msra.mxu1 %v26069_v53 }
 0x700   : >> { %23233 = vmatprep.subr.bf16.mxu0 %v26070_v58  ;;  %24133 = vmatprep.subr.bf16.mxu1 %v26070_v58 }
 0x702   : >> { %23234 = vmatpush3.bf16.msra.mxu0 %v26070_v58 }
 0x703   : >> { %24134 = vmatpush3.bf16.msra.mxu1 %v26070_v58  ;;  %23255 = vmatprep.subr.bf16.mxu0 %v26071_v59 }
 0x704   : >> { %24155 = vmatprep.subr.bf16.mxu1 %v26071_v59 }
 0x705   : >> { %23216 = vmatmul.mubr.bf16.gmra.mrb[16].mxu0 %v29394_v52  ;;  %24116 = vmatmul.mubr.bf16.gmra.mrb[16].mxu1 %v29653_v14 }
 0x706   : >> { %23235 = vmatprep.mubr.bf16.mxu0 %v29330_v2  ;;  %24135 = vmatprep.mubr.bf16.mxu1 %v29589_v47  ;;  %v26074_v2 = vld [vmem:[%s30804_s3 + $0x598] sm:$0xff]  }
 0x70d   : >> { %23236 = vmatmul.mubr.bf16.vlgmr.msra.gmra.mrb[0].mxu0 %v29338_v8  ;;  %24136 = vmatmul.mubr.bf16.vlgmr.msra.gmra.mrb[0].mxu1 %v29597_v3 }
 0x70e   : >> { %23256 = vmatpush3.bf16.msra.mxu0 %v26071_v59  ;;  %24156 = vmatpush3.bf16.msra.mxu1 %v26071_v59 }
 0x70f   : >> { %23257 = vmatprep.subr.bf16.mxu0 %v26072_v60  ;;  %24157 = vmatprep.subr.bf16.mxu1 %v26072_v60 }
 0x710   : >> { %23239 = vmatprep.mubr.bf16.mxu0 %v29346_v54  ;;  %24139 = vmatprep.mubr.bf16.mxu1 %v29605_v22 }
 0x712   : >> { %23258 = vmatpush3.bf16.msra.mxu0 %v26072_v60  ;;  %24158 = vmatpush3.bf16.msra.mxu1 %v26072_v60 }
 0x713   : >> { %23259 = vmatprep.subr.bf16.mxu0 %v26073_v62  ;;  %24159 = vmatprep.subr.bf16.mxu1 %v26073_v62 }
 0x715   : >> { %23240 = vmatmul.mubr.bf16.gmra.mrb[4].mxu0 %v29354_v13  ;;  %24140 = vmatmul.mubr.bf16.gmra.mrb[4].mxu1 %v29613_v35 }
 0x716   : >> { %23260 = vmatpush3.bf16.msra.mxu0 %v26073_v62  ;;  %24160 = vmatpush3.bf16.msra.mxu1 %v26073_v62 }
 0x717   : >> { %23243 = vmatprep.mubr.bf16.mxu0 %v29362_v36  ;;  %23261 = vmatprep.subr.bf16.mxu0 %v26074_v2 }
 0x718   : >> { %24143 = vmatprep.mubr.bf16.mxu1 %v29621_v48  ;;  %24161 = vmatprep.subr.bf16.mxu1 %v26074_v2 }
 0x71a   : >> { %23262 = vmatpush3.bf16.msra.mxu0 %v26074_v2  ;;  %24162 = vmatpush3.bf16.msra.mxu1 %v26074_v2 }
 0x71b   : >> { %23263 = vmatprep.subr.bf16.mxu0 %v26075_v17  ;;  %24163 = vmatprep.subr.bf16.mxu1 %v26075_v17 }
 0x71d   : >> { %23244 = vmatmul.mubr.bf16.gmra.mrb[8].mxu0 %v29365_v42  ;;  %24144 = vmatmul.mubr.bf16.gmra.mrb[8].mxu1 %v29624_v50 }
 0x71e   : >> { %23264 = vmatpush3.bf16.msra.mxu0 %v26075_v17  ;;  %24164 = vmatpush3.bf16.msra.mxu1 %v26075_v17 }
 0x71f   : >> { %23247 = vmatprep.mubr.bf16.mxu0 %v29378_v49  ;;  %24147 = vmatprep.mubr.bf16.mxu1 %v29637_v55 }
 0x720   : >> { %23265 = vmatprep.subr.bf16.mxu0 %v26076_v19  ;;  %24165 = vmatprep.subr.bf16.mxu1 %v26076_v19 }
 0x722   : >> { %23266 = vmatpush3.bf16.msra.mxu0 %v26076_v19  ;;  %24166 = vmatpush3.bf16.msra.mxu1 %v26076_v19 }
 0x723   : >> { %23267 = vmatprep.subr.bf16.mxu0 %v26077_v7  ;;  %24167 = vmatprep.subr.bf16.mxu1 %v26077_v7 }
 0x725   : >> { %23248 = vmatmul.mubr.bf16.gmra.mrb[12].mxu0 %v29381_v11  ;;  %24148 = vmatmul.mubr.bf16.gmra.mrb[12].mxu1 %v29640_v18 }
 0x726   : >> { %23251 = vmatprep.mubr.bf16.mxu0 %v29394_v52  ;;  %23268 = vmatpush3.bf16.msra.mxu0 %v26077_v7 }
 0x727   : >> { %24151 = vmatprep.mubr.bf16.mxu1 %v29653_v14  ;;  %24168 = vmatpush3.bf16.msra.mxu1 %v26077_v7 }
 0x728   : >> { %23269 = vmatprep.subr.bf16.mxu0 %v26078_v24  ;;  %24169 = vmatprep.subr.bf16.mxu1 %v26078_v24 }
 0x72a   : >> { %23270 = vmatpush3.bf16.msra.mxu0 %v26078_v24 }
 0x72b   : >> { %24170 = vmatpush3.bf16.msra.mxu1 %v26078_v24  ;;  %23291 = vmatprep.subr.bf16.mxu0 %v26079_v25 }
 0x72c   : >> { %24191 = vmatprep.subr.bf16.mxu1 %v26079_v25 }
 0x72d   : >> { %23252 = vmatmul.mubr.bf16.gmra.mrb[16].mxu0 %v29441_v16  ;;  %24152 = vmatmul.mubr.bf16.gmra.mrb[16].mxu1 %v29700_v34 }
 0x72e   : >> { %23271 = vmatprep.mubr.bf16.mxu0 %v29338_v8  ;;  %24171 = vmatprep.mubr.bf16.mxu1 %v29597_v3  ;;  %v26082_v8 = vld [vmem:[%s30804_s3 + $0x5d8] sm:$0xff]  }
 0x735   : >> { %23272 = vmatmul.mubr.bf16.vlgmr.msra.gmra.mrb[0].mxu0 %v29346_v54  ;;  %24172 = vmatmul.mubr.bf16.vlgmr.msra.gmra.mrb[0].mxu1 %v29605_v22 }
 0x736   : >> { %23292 = vmatpush3.bf16.msra.mxu0 %v26079_v25  ;;  %24192 = vmatpush3.bf16.msra.mxu1 %v26079_v25 }
 0x737   : >> { %23293 = vmatprep.subr.bf16.mxu0 %v26080_v37  ;;  %24193 = vmatprep.subr.bf16.mxu1 %v26080_v37 }
 0x738   : >> { %23275 = vmatprep.mubr.bf16.mxu0 %v29354_v13  ;;  %24175 = vmatprep.mubr.bf16.mxu1 %v29613_v35 }
 0x73a   : >> { %23294 = vmatpush3.bf16.msra.mxu0 %v26080_v37  ;;  %24194 = vmatpush3.bf16.msra.mxu1 %v26080_v37 }
 0x73b   : >> { %23295 = vmatprep.subr.bf16.mxu0 %v26081_v39  ;;  %24195 = vmatprep.subr.bf16.mxu1 %v26081_v39 }
 0x73d   : >> { %23276 = vmatmul.mubr.bf16.gmra.mrb[4].mxu0 %v29362_v36  ;;  %24176 = vmatmul.mubr.bf16.gmra.mrb[4].mxu1 %v29621_v48 }
 0x73e   : >> { %23296 = vmatpush3.bf16.msra.mxu0 %v26081_v39  ;;  %24196 = vmatpush3.bf16.msra.mxu1 %v26081_v39 }
 0x73f   : >> { %23279 = vmatprep.mubr.bf16.mxu0 %v29365_v42  ;;  %23297 = vmatprep.subr.bf16.mxu0 %v26082_v8 }
 0x740   : >> { %24179 = vmatprep.mubr.bf16.mxu1 %v29624_v50  ;;  %24197 = vmatprep.subr.bf16.mxu1 %v26082_v8 }
 0x742   : >> { %23298 = vmatpush3.bf16.msra.mxu0 %v26082_v8  ;;  %24198 = vmatpush3.bf16.msra.mxu1 %v26082_v8 }
 0x743   : >> { %23299 = vmatprep.subr.bf16.mxu0 %v26083_v43  ;;  %24199 = vmatprep.subr.bf16.mxu1 %v26083_v43 }
 0x745   : >> { %23280 = vmatmul.mubr.bf16.gmra.mrb[8].mxu0 %v29378_v49  ;;  %24180 = vmatmul.mubr.bf16.gmra.mrb[8].mxu1 %v29637_v55 }
 0x746   : >> { %23300 = vmatpush3.bf16.msra.mxu0 %v26083_v43  ;;  %24200 = vmatpush3.bf16.msra.mxu1 %v26083_v43 }
 0x747   : >> { %23283 = vmatprep.mubr.bf16.mxu0 %v29381_v11  ;;  %24183 = vmatprep.mubr.bf16.mxu1 %v29640_v18 }
 0x748   : >> { %23301 = vmatprep.subr.bf16.mxu0 %v26084_v44  ;;  %24201 = vmatprep.subr.bf16.mxu1 %v26084_v44 }
 0x74a   : >> { %23302 = vmatpush3.bf16.msra.mxu0 %v26084_v44  ;;  %24202 = vmatpush3.bf16.msra.mxu1 %v26084_v44 }
 0x74b   : >> { %23303 = vmatprep.subr.bf16.mxu0 %v26085_v9  ;;  %24203 = vmatprep.subr.bf16.mxu1 %v26085_v9 }
 0x74d   : >> { %23284 = vmatmul.mubr.bf16.gmra.mrb[12].mxu0 %v29394_v52  ;;  %24184 = vmatmul.mubr.bf16.gmra.mrb[12].mxu1 %v29653_v14 }
 0x74e   : >> { %23287 = vmatprep.mubr.bf16.mxu0 %v29441_v16  ;;  %23304 = vmatpush3.bf16.msra.mxu0 %v26085_v9 }
 0x74f   : >> { %24187 = vmatprep.mubr.bf16.mxu1 %v29700_v34  ;;  %24204 = vmatpush3.bf16.msra.mxu1 %v26085_v9 }
 0x750   : >> { %23305 = vmatprep.subr.bf16.mxu0 %v26086_v12  ;;  %24205 = vmatprep.subr.bf16.mxu1 %v26086_v12 }
 0x752   : >> { %23306 = vmatpush3.bf16.msra.mxu0 %v26086_v12 }
 0x753   : >> { %24206 = vmatpush3.bf16.msra.mxu1 %v26086_v12  ;;  %23327 = vmatprep.subr.bf16.mxu0 %v26087_v15 }
 0x754   : >> { %24227 = vmatprep.subr.bf16.mxu1 %v26087_v15 }
 0x755   : >> { %23288 = vmatmul.mubr.bf16.gmra.mrb[16].mxu0 %v29488_v40  ;;  %24188 = vmatmul.mubr.bf16.gmra.mrb[16].mxu1 %v29747_v33 }
 0x756   : >> { %23307 = vmatprep.mubr.bf16.mxu0 %v29346_v54  ;;  %24207 = vmatprep.mubr.bf16.mxu1 %v29605_v22  ;;  %v26090_v54 = vld [vmem:[%s30804_s3 + $0x618] sm:$0xff]  }
 0x75d   : >> { %23308 = vmatmul.mubr.bf16.vlgmr.msra.gmra.mrb[0].mxu0 %v29354_v13  ;;  %24208 = vmatmul.mubr.bf16.vlgmr.msra.gmra.mrb[0].mxu1 %v29613_v35  ;;  %v26091_v13 = vld [vmem:[%s30804_s3 + $0x620] sm:$0xff]  }
 0x75e   : >> { %23328 = vmatpush3.bf16.msra.mxu0 %v26087_v15  ;;  %24228 = vmatpush3.bf16.msra.mxu1 %v26087_v15 }
 0x75f   : >> { %23329 = vmatprep.subr.bf16.mxu0 %v26088_v38  ;;  %24229 = vmatprep.subr.bf16.mxu1 %v26088_v38 }
 0x760   : >> { %23311 = vmatprep.mubr.bf16.mxu0 %v29362_v36  ;;  %24211 = vmatprep.mubr.bf16.mxu1 %v29621_v48  ;;  %v26092_v36 = vld [vmem:[%s30804_s3 + $0x628] sm:$0xff]  }
 0x762   : >> { %23330 = vmatpush3.bf16.msra.mxu0 %v26088_v38  ;;  %24230 = vmatpush3.bf16.msra.mxu1 %v26088_v38 }
 0x763   : >> { %23331 = vmatprep.subr.bf16.mxu0 %v26089_v41  ;;  %24231 = vmatprep.subr.bf16.mxu1 %v26089_v41 }
 0x765   : >> { %23312 = vmatmul.mubr.bf16.gmra.mrb[4].mxu0 %v29365_v42  ;;  %24212 = vmatmul.mubr.bf16.gmra.mrb[4].mxu1 %v29624_v50  ;;  %v26093_v42 = vld [vmem:[%s30804_s3 + $0x630] sm:$0xff]  }
 0x766   : >> { %23332 = vmatpush3.bf16.msra.mxu0 %v26089_v41  ;;  %24232 = vmatpush3.bf16.msra.mxu1 %v26089_v41 }
 0x767   : >> { %23315 = vmatprep.mubr.bf16.mxu0 %v29378_v49  ;;  %23333 = vmatprep.subr.bf16.mxu0 %v26090_v54  ;;  %v26094_v49 = vld [vmem:[%s30804_s3 + $0x638] sm:$0xff]  }
 0x768   : >> { %24215 = vmatprep.mubr.bf16.mxu1 %v29637_v55  ;;  %24233 = vmatprep.subr.bf16.mxu1 %v26090_v54 }
 0x76a   : >> { %23334 = vmatpush3.bf16.msra.mxu0 %v26090_v54  ;;  %24234 = vmatpush3.bf16.msra.mxu1 %v26090_v54 }
 0x76b   : >> { %23335 = vmatprep.subr.bf16.mxu0 %v26091_v13  ;;  %24235 = vmatprep.subr.bf16.mxu1 %v26091_v13 }
 0x76d   : >> { %23316 = vmatmul.mubr.bf16.gmra.mrb[8].mxu0 %v29381_v11  ;;  %24216 = vmatmul.mubr.bf16.gmra.mrb[8].mxu1 %v29640_v18  ;;  %v20491_v11 = vld [vmem:[%s28458_s23 + $0x290] sm:$0xff]  ;;  %s21103_s23 = smul.u32 40, %s26416_s22  ;;  %s8156_s22 = sadd.s32 1, %s26416_s22  }
 0x76e   : >> { %23336 = vmatpush3.bf16.msra.mxu0 %v26091_v13  ;;  %24236 = vmatpush3.bf16.msra.mxu1 %v26091_v13  ;;  %p8153_p12 = scmp.ge.s32.totalorder %s8156_s22, 5  }
 0x76f   : >> { %23319 = vmatprep.mubr.bf16.mxu0 %v29394_v52  ;;  %24219 = vmatprep.mubr.bf16.mxu1 %v29653_v14  ;;  %s29828_s29 = scalar_lea.vmem [#allocation3], %s21103_s23  ;;  %vm26419_vm0 = vmmov (%p8153_p12), 0  }
 0x770   : >> { %23337 = vmatprep.subr.bf16.mxu0 %v26092_v36  ;;  %24237 = vmatprep.subr.bf16.mxu1 %v26092_v36 }
 0x772   : >> { %23338 = vmatpush3.bf16.msra.mxu0 %v26092_v36  ;;  %24238 = vmatpush3.bf16.msra.mxu1 %v26092_v36 }
 0x773   : >> { %23339 = vmatprep.subr.bf16.mxu0 %v26093_v42  ;;  %24239 = vmatprep.subr.bf16.mxu1 %v26093_v42 }
 0x775   : >> { %23320 = vmatmul.mubr.bf16.gmra.mrb[12].mxu0 %v29441_v16  ;;  %24220 = vmatmul.mubr.bf16.gmra.mrb[12].mxu1 %v29700_v34 }
 0x776   : >> { %23323 = vmatprep.mubr.bf16.mxu0 %v29488_v40  ;;  %23340 = vmatpush3.bf16.msra.mxu0 %v26093_v42 }
 0x777   : >> { %24223 = vmatprep.mubr.bf16.mxu1 %v29747_v33  ;;  %24240 = vmatpush3.bf16.msra.mxu1 %v26093_v42 }
 0x778   : >> { %23341 = vmatprep.subr.bf16.mxu0 %v26094_v49  ;;  %24241 = vmatprep.subr.bf16.mxu1 %v26094_v49 }
 0x77a   : >> { %23342 = vmatpush3.bf16.msra.mxu0 %v26094_v49 }
 0x77b   : >> { %24242 = vmatpush3.bf16.msra.mxu1 %v26094_v49 }
 0x77d   : >> { %23324 = vmatmul.mubr.bf16.gmra.mrb[16].mxu0 %v29535_v46  ;;  %24224 = vmatmul.mubr.bf16.gmra.mrb[16].mxu1 %v20491_v11 }
 0x77e   : >> { %23343 = vmatprep.mubr.bf16.mxu0 %v26125_v27  ;;  %24243 = vmatprep.mubr.bf16.mxu1 %v29613_v35 }
 0x785   : >> { %23344 = vmatmul.mubr.bf16.vlgmr.msra.gmra.mrb[0].mxu0 %v26126_v28  ;;  %24244 = vmatmul.mubr.bf16.vlgmr.msra.gmra.mrb[0].mxu1 %v29621_v48 }
 0x786   : >> { %23347 = vmatprep.mubr.bf16.mxu0 %v26127_v30  ;;  %24247 = vmatprep.mubr.bf16.mxu1 %v29624_v50 }
 0x78d   : >> { %23348 = vmatmul.mubr.bf16.gmra.mrb[4].mxu0 %v26128_v31  ;;  %24248 = vmatmul.mubr.bf16.gmra.mrb[4].mxu1 %v29637_v55 }
 0x78e   : >> { %23351 = vmatprep.mubr.bf16.mxu0 %v26129_v63  ;;  %24251 = vmatprep.mubr.bf16.mxu1 %v29640_v18 }
 0x795   : >> { %23352 = vmatmul.mubr.bf16.gmra.mrb[8].mxu0 %v29394_v52  ;;  %24252 = vmatmul.mubr.bf16.gmra.mrb[8].mxu1 %v29653_v14 }
 0x796   : >> { %23355 = vmatprep.mubr.bf16.mxu0 %v29441_v16  ;;  %24255 = vmatprep.mubr.bf16.mxu1 %v29700_v34 }
 0x79d   : >> { %23356 = vmatmul.mubr.bf16.gmra.mrb[12].mxu0 %v29488_v40  ;;  %24256 = vmatmul.mubr.bf16.gmra.mrb[12].mxu1 %v29747_v33 }
 0x79e   : >> { %23359 = vmatprep.mubr.bf16.mxu0 %v29535_v46  ;;  %24259 = vmatprep.mubr.bf16.mxu1 %v20491_v11 }
 0x7a5   : >> { %23360 = vmatmul.mubr.bf16.gmra.mrb[16].mxu0 %v29582_v57  ;;  %24260 = vmatmul.mubr.bf16.gmra.mrb[16].mxu1 %v20492_v0 }
 0x858   : >> { %v23345_v4 = vpop.f32.mrb[0].mxu0  ;;  %v24245_v5 = vpop.f32.mrb[0].mxu1 }
 0x859   : >> { %v13164_v52 = vadd.f32 %v23345_v4, %v28438_v61  ;;  %v16517_v20 = vadd.f32 %v24245_v5, %v28438_v61  ;;  %v13057_v16 = vpop.f32.mrb[1].mxu0  ;;  %v16416_v23 = vpop.f32.mrb[1].mxu1 }
 0x85a   : >> { %v13162_v26 = vadd.f32 %v28438_v61, %v13057_v16  ;;  %v16515_v40 = vadd.f32 %v28438_v61, %v16416_v23  ;;  %v23346_v29 = vpop.f32.mrb[2].mxu0  ;;  %v24246_v32 = vpop.f32.mrb[2].mxu1 }
 0x85b   : >> { %v13184_v46 = vmax.f32 %v13164_v52, 0.0  ;;  %v16537_v56 = vmax.f32 %v16517_v20, 0.0  ;;  %v13165_v57 = vadd.f32 %v23346_v29, %v28438_v61  ;;  %v16518_v21 = vadd.f32 %v24246_v32, %v28438_v61  ;;  %v13060_v47 = vpop.f32.mrb[3].mxu0  ;;  %v16419_v6 = vpop.f32.mrb[3].mxu1 }
 0x85c   : >> { %v13182_v3 = vmax.f32 %v13162_v26, 0.0  ;;  %v16535_v1 = vmax.f32 %v16515_v40, 0.0  ;;  %v13163_v22 = vadd.f32 %v28438_v61, %v13060_v47  ;;  %v16516_v10 = vadd.f32 %v28438_v61, %v16419_v6 }
 0x85d   : >> { %v13185_v35 = vmax.f32 %v13165_v57, 0.0  ;;  %v16538_v45 = vmax.f32 %v16518_v21, 0.0 }
 0x85e   : >> { %v13202_v48 = vmax.f32 %v13182_v3, %v13184_v46  ;;  %v16555_v50 = vmax.f32 %v16535_v1, %v16537_v56  ;;  %v13183_v51 = vmax.f32 %v13163_v22, 0.0  ;;  %v16536_v53 = vmax.f32 %v16516_v10, 0.0 }
 0x860   : >> { %v16565_v55 = vmax.f32 %v13202_v48, %v16555_v50  ;;  %v13203_v18 = vmax.f32 %v13183_v51, %v13185_v35  ;;  %v16556_v58 = vmax.f32 %v16536_v53, %v16538_v45  ;;  %v23349_v59 = vpop.f32.mrb[4].mxu0  ;;  %v24249_v14 = vpop.f32.mrb[4].mxu1 }
 0x861   : >> { %v13168_v60 = vadd.f32 %v23349_v59, %v28438_v61  ;;  %v16521_v62 = vadd.f32 %v24249_v14, %v28438_v61  ;;  %v13073_v2 = vpop.f32.mrb[5].mxu0  ;;  %v16432_v17 = vpop.f32.mrb[5].mxu1 }
 0x862   : >> { %v16566_v19 = vmax.f32 %v13203_v18, %v16556_v58  ;;  %v13166_v7 = vadd.f32 %v28438_v61, %v13073_v2  ;;  %v16519_v24 = vadd.f32 %v28438_v61, %v16432_v17  ;;  %v23350_v25 = vpop.f32.mrb[6].mxu0  ;;  %v24250_v34 = vpop.f32.mrb[6].mxu1 }
 0x863   : >> { %v13188_v37 = vmax.f32 %v13168_v60, 0.0  ;;  %v16541_v39 = vmax.f32 %v16521_v62, 0.0  ;;  %v13169_v8 = vadd.f32 %v23350_v25, %v28438_v61  ;;  %v16522_v43 = vadd.f32 %v24250_v34, %v28438_v61  ;;  %v13076_v44 = vpop.f32.mrb[7].mxu0  ;;  %v16435_v9 = vpop.f32.mrb[7].mxu1 }
 0x864   : >> { %v16575_v12 = vpack.c.bf16 %v16566_v19, %v16565_v55  ;;  %v13186_v15 = vmax.f32 %v13166_v7, 0.0  ;;  %v16539_v33 = vmax.f32 %v16519_v24, 0.0  ;;  %v13167_v38 = vadd.f32 %v28438_v61, %v13076_v44 }
 0x865   : >> { %v13189_v41 = vmax.f32 %v13169_v8, 0.0  ;;  %v16542_v54 = vmax.f32 %v16522_v43, 0.0  ;;  %v16520_v13 = vadd.f32 %v28438_v61, %v16435_v9 }
 0x866   : >> { %16583 = vst [vmem:[%s29828_s29] sm:$0xff] %v16575_v12  ;;  %v13204_v36 = vmax.f32 %v13186_v15, %v13188_v37  ;;  %v16557_v42 = vmax.f32 %v16539_v33, %v16541_v39  ;;  %v13187_v49 = vmax.f32 %v13167_v38, 0.0 }
 0x867   : >> { %v16540_v11 = vmax.f32 %v16520_v13, 0.0 }
 0x868   : >> { %v16567_v27 = vmax.f32 %v13204_v36, %v16557_v42  ;;  %v13205_v28 = vmax.f32 %v13187_v49, %v13189_v41  ;;  %v23353_v30 = vpop.f32.mrb[8].mxu0  ;;  %v24253_v31 = vpop.f32.mrb[8].mxu1 }
 0x869   : >> { %v16558_v63 = vmax.f32 %v16540_v11, %v16542_v54  ;;  %v13172_v0 = vadd.f32 %v23353_v30, %v28438_v61  ;;  %v16525_v4 = vadd.f32 %v24253_v31, %v28438_v61  ;;  %v13089_v5 = vpop.f32.mrb[9].mxu0  ;;  %v16448_v52 = vpop.f32.mrb[9].mxu1 }
 0x86a   : >> { %v13170_v20 = vadd.f32 %v28438_v61, %v13089_v5  ;;  %v16523_v16 = vadd.f32 %v28438_v61, %v16448_v52  ;;  %v23354_v23 = vpop.f32.mrb[10].mxu0  ;;  %v24254_v26 = vpop.f32.mrb[10].mxu1 }
 0x86b   : >> { %v16568_v40 = vmax.f32 %v13205_v28, %v16558_v63  ;;  %v13192_v29 = vmax.f32 %v13172_v0, 0.0  ;;  %v16545_v32 = vmax.f32 %v16525_v4, 0.0  ;;  %v13173_v46 = vadd.f32 %v23354_v23, %v28438_v61  ;;  %v13092_v56 = vpop.f32.mrb[11].mxu0  ;;  %v16451_v57 = vpop.f32.mrb[11].mxu1 }
 0x86c   : >> { %v13190_v21 = vmax.f32 %v13170_v20, 0.0  ;;  %v16543_v47 = vmax.f32 %v16523_v16, 0.0  ;;  %v16526_v6 = vadd.f32 %v24254_v26, %v28438_v61  ;;  %v13171_v3 = vadd.f32 %v28438_v61, %v13092_v56 }
 0x86d   : >> { %v16576_v1 = vpack.c.bf16 %v16568_v40, %v16567_v27  ;;  %v13193_v22 = vmax.f32 %v13173_v46, 0.0  ;;  %v16524_v10 = vadd.f32 %v28438_v61, %v16451_v57 }
 0x86e   : >> { %v13206_v35 = vmax.f32 %v13190_v21, %v13192_v29  ;;  %v16559_v45 = vmax.f32 %v16543_v47, %v16545_v32  ;;  %v16546_v48 = vmax.f32 %v16526_v6, 0.0  ;;  %v13191_v50 = vmax.f32 %v13171_v3, 0.0 }
 0x86f   : >> { %16584 = vst [vmem:[%s29828_s29 + $0x8] sm:$0xff] %v16576_v1  ;;  %v16544_v51 = vmax.f32 %v16524_v10, 0.0 }
 0x870   : >> { %v16569_v53 = vmax.f32 %v13206_v35, %v16559_v45  ;;  %v13207_v55 = vmax.f32 %v13191_v50, %v13193_v22  ;;  %v23357_v18 = vpop.f32.mrb[12].mxu0  ;;  %v24257_v58 = vpop.f32.mrb[12].mxu1 }
 0x871   : >> { %v16560_v59 = vmax.f32 %v16544_v51, %v16546_v48  ;;  %v13176_v14 = vadd.f32 %v23357_v18, %v28438_v61  ;;  %v16529_v60 = vadd.f32 %v24257_v58, %v28438_v61  ;;  %v13105_v62 = vpop.f32.mrb[13].mxu0  ;;  %v16464_v2 = vpop.f32.mrb[13].mxu1 }
 0x872   : >> { %v13174_v17 = vadd.f32 %v28438_v61, %v13105_v62  ;;  %v16527_v19 = vadd.f32 %v28438_v61, %v16464_v2  ;;  %v23358_v7 = vpop.f32.mrb[14].mxu0  ;;  %v24258_v24 = vpop.f32.mrb[14].mxu1  ;;  %v26132_v62 = vld [vmem:[%s30806_s5 + $0x48] sm:$0xff] (%p8153_p12)   ;;  %v26134_v2 = vld [vmem:[%s30806_s5 + $0x50] sm:$0xff] (%p8153_p12)  }
 0x873   : >> { %v16570_v25 = vmax.f32 %v13207_v55, %v16560_v59  ;;  %v13196_v34 = vmax.f32 %v13176_v14, 0.0  ;;  %v16549_v37 = vmax.f32 %v16529_v60, 0.0  ;;  %v13177_v39 = vadd.f32 %v23358_v7, %v28438_v61  ;;  %v13108_v8 = vpop.f32.mrb[15].mxu0  ;;  %v16467_v43 = vpop.f32.mrb[15].mxu1  ;;  %v26130_v59 = vld [vmem:[%s30806_s5 + $0x40] sm:$0xff] (%p8153_p12)   ;;  %v26137_v7 = vld [vmem:[%s30806_s5 + $0x18] sm:$0xff] (%p8153_p12)  }
 0x874   : >> { %v13194_v44 = vmax.f32 %v13174_v17, 0.0  ;;  %v16547_v9 = vmax.f32 %v16527_v19, 0.0  ;;  %v16530_v12 = vadd.f32 %v24258_v24, %v28438_v61  ;;  %v13175_v15 = vadd.f32 %v28438_v61, %v13108_v8  ;;  %v26131_v60 = vld [vmem:[%s30806_s5] sm:$0xff] (%p8153_p12)   ;;  %v26135_v17 = vld [vmem:[%s30806_s5 + $0x10] sm:$0xff] (%p8153_p12)   ;;  %v26136_v19 = vld [vmem:[%s30806_s5 + $0x58] sm:$0xff] (%p8153_p12)  }
 0x875   : >> { %v16577_v33 = vpack.c.bf16 %v16570_v25, %v16569_v53  ;;  %v13197_v38 = vmax.f32 %v13177_v39, 0.0  ;;  %v16528_v41 = vadd.f32 %v28438_v61, %v16467_v43  ;;  %v26418_v14 = vmov (%p8153_p12), 0.0   ;;  %v26138_v24 = vld [vmem:[%s30806_s5 + $0x60] sm:$0xff] (%p8153_p12)   ;;  %v26142_v39 = vld [vmem:[%s30806_s5 + $0x70] sm:$0xff] (%p8153_p12)   ;;  %v26144_v43 = vld [vmem:[%s30806_s5 + $0x78] sm:$0xff] (%p8153_p12)  }
 0x876   : >> { %v13208_v54 = vmax.f32 %v13194_v44, %v13196_v34  ;;  %v16561_v13 = vmax.f32 %v16547_v9, %v16549_v37  ;;  %v16550_v36 = vmax.f32 %v16530_v12, 0.0  ;;  %v13195_v42 = vmax.f32 %v13175_v15, 0.0  ;;  %24263 = vmatprep.subr.bf16.mxu0 (%p8153_p12), %v26418_v14  ;;  %24283 = vmatprep.subr.bf16.mxu1 (%p8153_p12), %v26418_v14  ;;  %v26139_v25 = vld [vmem:[%s30806_s5 + $0x20] sm:$0xff] (%p8153_p12)   ;;  %v26140_v34 = vld [vmem:[%s30806_s5 + $0x68] sm:$0xff] (%p8153_p12)   ;;  %v26143_v8 = vld [vmem:[%s30806_s5 + $0x30] sm:$0xff] (%p8153_p12)  }
 0x877   : >> { %16585 = vst [vmem:[%s29828_s29 + $0x10] sm:$0xff] %v16577_v33  ;;  %v16548_v49 = vmax.f32 %v16528_v41, 0.0  ;;  %24264 = vmatpush3.bf16.msra.mxu0 (%p8153_p12), %v26130_v59  ;;  %24279 = vmatprep.mubr.msk.bf16.mxu0 (%p8153_p12), %vm26419_vm0, %v26418_v14  ;;  %v26141_v37 = vld [vmem:[%s30806_s5 + $0x28] sm:$0xff] (%p8153_p12)   ;;  %v26145_v44 = vld [vmem:[%s30806_s5 + $0x38] sm:$0xff] (%p8153_p12)   ;;  %v26146_v15 = vld [vmem:[%s30806_s5 + $0x80] sm:$0xff] (%p8153_p12)  }
 0x878   : >> { %v16571_v11 = vmax.f32 %v13208_v54, %v16561_v13  ;;  %v13209_v27 = vmax.f32 %v13195_v42, %v13197_v38  ;;  %v23361_v28 = vpop.f32.mrb[16].mxu0  ;;  %v24261_v30 = vpop.f32.mrb[16].mxu1  ;;  %24284 = vmatpush3.bf16.msra.mxu1 (%p8153_p12), %v26131_v60  ;;  %24265 = vmatprep.subr.bf16.mxu0 (%p8153_p12), %v26418_v14  ;;  %v26147_v33 = vld [vmem:[%s30806_s5 + $0xc0] sm:$0xff] (%p8153_p12)   ;;  %v26148_v38 = vld [vmem:[%s30806_s5 + $0x88] sm:$0xff] (%p8153_p12)   ;;  %v26150_v54 = vld [vmem:[%s30806_s5 + $0x90] sm:$0xff] (%p8153_p12)  }
 0x879   : >> { %v16562_v31 = vmax.f32 %v16548_v49, %v16550_v36  ;;  %v13180_v63 = vadd.f32 %v23361_v28, %v28438_v61  ;;  %v16533_v0 = vadd.f32 %v24261_v30, %v28438_v61  ;;  %v13121_v4 = vpop.f32.mrb[17].mxu0  ;;  %v16480_v5 = vpop.f32.mrb[17].mxu1  ;;  %24285 = vmatprep.subr.bf16.mxu1 (%p8153_p12), %v26418_v14  ;;  %24299 = vmatprep.mubr.msk.bf16.mxu1 (%p8153_p12), %vm26419_vm0, %v26418_v14  ;;  %v26149_v41 = vld [vmem:[%s30806_s5 + $0xc8] sm:$0xff] (%p8153_p12)   ;;  %v26151_v13 = vld [vmem:[%s30806_s5 + $0xd0] sm:$0xff] (%p8153_p12)   ;;  %v26152_v36 = vld [vmem:[%s30806_s5 + $0x98] sm:$0xff] (%p8153_p12)  }
 0x87a   : >> { %v13178_v52 = vadd.f32 %v28438_v61, %v13121_v4  ;;  %v16531_v20 = vadd.f32 %v28438_v61, %v16480_v5  ;;  %v23362_v16 = vpop.f32.mrb[18].mxu0  ;;  %v24262_v23 = vpop.f32.mrb[18].mxu1  ;;  %v26153_v42 = vld [vmem:[%s30806_s5 + $0xd8] sm:$0xff] (%p8153_p12)   ;;  %v26154_v49 = vld [vmem:[%s30806_s5 + $0xa0] sm:$0xff] (%p8153_p12)   ;;  %v26157_v28 = vld [vmem:[%s30806_s5 + $0xe8] sm:$0xff] (%p8153_p12)  }
 0x87b   : >> { %v16572_v26 = vmax.f32 %v13209_v27, %v16562_v31  ;;  %v13200_v40 = vmax.f32 %v13180_v63, 0.0  ;;  %v16553_v29 = vmax.f32 %v16533_v0, 0.0  ;;  %v13181_v32 = vadd.f32 %v23362_v16, %v28438_v61  ;;  %v13124_v46 = vpop.f32.mrb[19].mxu0  ;;  %v16483_v56 = vpop.f32.mrb[19].mxu1  ;;  %24266 = vmatpush3.bf16.msra.mxu0 (%p8153_p12), %v26132_v62  ;;  %v26156_v27 = vld [vmem:[%s30806_s5 + $0xa8] sm:$0xff] (%p8153_p12)   ;;  %v26158_v30 = vld [vmem:[%s30806_s5 + $0xb0] sm:$0xff] (%p8153_p12)  }
 0x87c   : >> { %v13198_v57 = vmax.f32 %v13178_v52, 0.0  ;;  %v16551_v21 = vmax.f32 %v16531_v20, 0.0  ;;  %v16534_v47 = vadd.f32 %v24262_v23, %v28438_v61  ;;  %v13179_v6 = vadd.f32 %v28438_v61, %v13124_v46  ;;  %24267 = vmatprep.subr.bf16.mxu0 (%p8153_p12), %v26418_v14  ;;  %v26159_v31 = vld [vmem:[%s30806_s5 + $0xf0] sm:$0xff] (%p8153_p12)   ;;  %v26160_v63 = vld [vmem:[%s30806_s5 + $0xb8] sm:$0xff] (%p8153_p12)   ;;  %v26162_v5 = vld [vmem:[%s30806_s5 + $0x100] sm:$0xff] (%p8153_p12)  }
 0x87d   : >> { %v16578_v3 = vpack.c.bf16 %v16572_v26, %v16571_v11  ;;  %v13201_v1 = vmax.f32 %v13181_v32, 0.0  ;;  %v16532_v22 = vadd.f32 %v28438_v61, %v16483_v56  ;;  %v26133_v61 = vld [vmem:[%s30806_s5 + $0x8] sm:$0xff] (%p8153_p12)   ;;  %v26155_v11 = vld [vmem:[%s30806_s5 + $0xe0] sm:$0xff] (%p8153_p12)   ;;  %v26161_v0 = vld [vmem:[%s30806_s5 + $0xf8] sm:$0xff] (%p8153_p12)  }
 0x87e   : >> { %v13210_v10 = vmax.f32 %v13198_v57, %v13200_v40  ;;  %v16563_v35 = vmax.f32 %v16551_v21, %v16553_v29  ;;  %v16554_v45 = vmax.f32 %v16534_v47, 0.0  ;;  %v13199_v48 = vmax.f32 %v13179_v6, 0.0  ;;  %24286 = vmatpush3.bf16.msra.mxu1 (%p8153_p12), %v26133_v61  ;;  %v26163_v20 = vld [vmem:[%s30806_s5 + $0x140] sm:$0xff] (%p8153_p12)   ;;  %v26164_v16 = vld [vmem:[%s30806_s5 + $0x108] sm:$0xff] (%p8153_p12)   ;;  %v26166_v26 = vld [vmem:[%s30806_s5 + $0x110] sm:$0xff] (%p8153_p12)  }
 0x87f   : >> { %16586 = vst [vmem:[%s29828_s29 + $0x18] sm:$0xff] %v16578_v3  ;;  %v16552_v50 = vmax.f32 %v16532_v22, 0.0  ;;  %24287 = vmatprep.subr.bf16.mxu1 (%p8153_p12), %v26418_v14  ;;  %24268 = vmatpush3.bf16.msra.mxu0 (%p8153_p12), %v26134_v2  ;;  %v26165_v23 = vld [vmem:[%s30806_s5 + $0x148] sm:$0xff] (%p8153_p12)   ;;  %v26167_v40 = vld [vmem:[%s30806_s5 + $0x150] sm:$0xff] (%p8153_p12)   ;;  %v26168_v29 = vld [vmem:[%s30806_s5 + $0x118] sm:$0xff] (%p8153_p12)  }
 0x880   : >> { %v16573_v51 = vmax.f32 %v13210_v10, %v16563_v35  ;;  %v13211_v53 = vmax.f32 %v13199_v48, %v13201_v1  ;;  %24269 = vmatprep.subr.bf16.mxu0 (%p8153_p12), %v26418_v14  ;;  %v26169_v32 = vld [vmem:[%s30806_s5 + $0x158] sm:$0xff] (%p8153_p12)   ;;  %v26170_v46 = vld [vmem:[%s30806_s5 + $0x120] sm:$0xff] (%p8153_p12)   ;;  %v26172_v57 = vld [vmem:[%s30806_s5 + $0x128] sm:$0xff] (%p8153_p12)  }
 0x881   : >> { %v16564_v55 = vmax.f32 %v16552_v50, %v16554_v45  ;;  %8155 = sbr.rel (!%p8153_p12) target bundleno = 932 (0x3a4), region = 249  ;;  %v26171_v56 = vld [vmem:[%s30806_s5 + $0x160] sm:$0xff] (%p8153_p12)   ;;  %v26173_v21 = vld [vmem:[%s30806_s5 + $0x168] sm:$0xff] (%p8153_p12)   ;;  %v26174_v47 = vld [vmem:[%s30806_s5 + $0x130] sm:$0xff] (%p8153_p12)  }
 0x882   : > { %24288 = vmatpush3.bf16.msra.mxu1 (%p8153_p12), %v26135_v17  ;;  %v26175_v6 = vld [vmem:[%s30806_s5 + $0x170] sm:$0xff] (%p8153_p12)   ;;  %v26176_v3 = vld [vmem:[%s30806_s5 + $0x138] sm:$0xff] (%p8153_p12)   ;;  %v26178_v10 = vld [vmem:[%s30806_s5 + $0x180] sm:$0xff] (%p8153_p12)  }
 0x883   : >> { %v16574_v18 = vmax.f32 %v13211_v53, %v16564_v55  ;;  %24289 = vmatprep.subr.bf16.mxu1 (%p8153_p12), %v26418_v14  ;;  %24270 = vmatpush3.bf16.msra.mxu0 (%p8153_p12), %v26136_v19  ;;  %v26177_v1 = vld [vmem:[%s30806_s5 + $0x178] sm:$0xff] (%p8153_p12)   ;;  %v26179_v45 = vld [vmem:[%s30806_s5 + $0x1c0] sm:$0xff] (%p8153_p12)   ;;  %v26180_v48 = vld [vmem:[%s30806_s5 + $0x188] sm:$0xff] (%p8153_p12)  }
 0x884   : > { %24271 = vmatprep.subr.bf16.mxu0 (%p8153_p12), %v26418_v14  ;;  %v26181_v50 = vld [vmem:[%s30806_s5 + $0x1c8] sm:$0xff] (%p8153_p12)   ;;  %v26183_v53 = vld [vmem:[%s30806_s5 + $0x1d0] sm:$0xff] (%p8153_p12)   ;;  %v26184_v55 = vld [vmem:[%s30806_s5 + $0x198] sm:$0xff] (%p8153_p12)  }
 0x885   : >> { %v16579_v58 = vpack.c.bf16 %v16574_v18, %v16573_v51  ;;  %v26182_v51 = vld [vmem:[%s30806_s5 + $0x190] sm:$0xff] (%p8153_p12)   ;;  %v26185_v18 = vld [vmem:[%s30806_s5 + $0x1d8] sm:$0xff] (%p8153_p12)   ;;  %v26187_v59 = vld [vmem:[%s30806_s5 + $0x1e0] sm:$0xff] (%p8153_p12)  }
 0x886   : > { %24290 = vmatpush3.bf16.msra.mxu1 (%p8153_p12), %v26137_v7  ;;  %v26188_v60 = vld [vmem:[%s30806_s5 + $0x1a8] sm:$0xff] (%p8153_p12)   ;;  %v26190_v61 = vld [vmem:[%s30806_s5 + $0x1b0] sm:$0xff] (%p8153_p12)   ;;  %v26192_v17 = vld [vmem:[%s30806_s5 + $0x1b8] sm:$0xff] (%p8153_p12)  }
 0x887   : >> { %16587 = vst [vmem:[%s29828_s29 + $0x20] sm:$0xff] %v16579_v58  ;;  %24291 = vmatprep.subr.bf16.mxu1 (%p8153_p12), %v26418_v14  ;;  %24272 = vmatpush3.bf16.msra.mxu0 (%p8153_p12), %v26138_v24  ;;  %v26186_v58 = vld [vmem:[%s30806_s5 + $0x1a0] sm:$0xff] (%p8153_p12)   ;;  %v26189_v62 = vld [vmem:[%s30806_s5 + $0x1e8] sm:$0xff] (%p8153_p12)   ;;  %v26191_v2 = vld [vmem:[%s30806_s5 + $0x1f0] sm:$0xff] (%p8153_p12)  }
 0x888   : > { %24273 = vmatprep.subr.bf16.mxu0 %v26418_v14  ;;  %v26193_v19 = vld [vmem:[%s30806_s5 + $0x1f8] sm:$0xff]   ;;  %v26194_v24 = vld [vmem:[%s30806_s5 + $0x200] sm:$0xff]  }
 0x88a   : > { %24292 = vmatpush3.bf16.msra.mxu1 %v26139_v25 }
 0x88b   : > { %24293 = vmatprep.subr.bf16.mxu1 %v26418_v14  ;;  %24274 = vmatpush3.bf16.msra.mxu0 %v26140_v34  ;;  %v26195_v34 = vld [vmem:[%s30806_s5 + $0x240] sm:$0xff]  }
 0x88c   : > { %24275 = vmatprep.subr.bf16.mxu0 %v26418_v14 }
 0x88e   : > { %24294 = vmatpush3.bf16.msra.mxu1 %v26141_v37  ;;  %v16589_v9 = vld [vmem:[#allocation3 + $0x8] sm:$0xff]  ;;  %v16588_v12 = vld [vmem:[#allocation3] sm:$0xff]  ;;  %v16590_v4 = vld [vmem:[#allocation3 + $0x10] sm:$0xff] }
 0x88f   : > { %24295 = vmatprep.subr.bf16.mxu1 %v26418_v14  ;;  %24276 = vmatpush3.bf16.msra.mxu0 %v26142_v39  ;;  %v16591_v52 = vld [vmem:[#allocation3 + $0x18] sm:$0xff]  ;;  %v16592_v22 = vld [vmem:[#allocation3 + $0x20] sm:$0xff]  ;;  %v16593_v35 = vld [vmem:[#allocation3 + $0x28] sm:$0xff] }
 0x890   : > { %24277 = vmatprep.subr.bf16.mxu0 %v26418_v14  ;;  %v16594_v7 = vld [vmem:[#allocation3 + $0x30] sm:$0xff]  ;;  %v16595_v25 = vld [vmem:[#allocation3 + $0x38] sm:$0xff]  ;;  %v26196_v37 = vld [vmem:[%s30806_s5 + $0x208] sm:$0xff]  }
 0x891   : > { %v26197_v39 = vld [vmem:[%s30806_s5 + $0x248] sm:$0xff]  }
 0x892   : > { %24296 = vmatpush3.bf16.msra.mxu1 %v26143_v8  ;;  %v26198_v8 = vld [vmem:[%s30806_s5 + $0x210] sm:$0xff]  }
 0x893   : > { %24297 = vmatprep.subr.bf16.mxu1 %v26418_v14  ;;  %24278 = vmatpush3.bf16.msra.mxu0 %v26144_v43  ;;  %v26199_v43 = vld [vmem:[%s30806_s5 + $0x250] sm:$0xff]  }
 0x894   : > { %24303 = vmatprep.subr.bf16.mxu0 %v26418_v14 }
 0x896   : > { %24298 = vmatpush3.bf16.msra.mxu1 %v26145_v44  ;;  %24280 = vmatmul.mubr.bf16.vlgmr.msra.gmra.mrb[0].mxu0 %v16589_v9  ;;  %v26200_v44 = vld [vmem:[%s30806_s5 + $0x218] sm:$0xff]  }
 0x897   : > { %24323 = vmatprep.subr.bf16.mxu1 %v26418_v14  ;;  %24304 = vmatpush3.bf16.msra.mxu0 %v26146_v15  ;;  %v26201_v9 = vld [vmem:[%s30806_s5 + $0x258] sm:$0xff]   ;;  %v26203_v15 = vld [vmem:[%s30806_s5 + $0x260] sm:$0xff]  }
 0x898   : > { %24305 = vmatprep.subr.bf16.mxu0 %v26418_v14  ;;  %24319 = vmatprep.mubr.msk.bf16.mxu0 %vm26419_vm0, %v26418_v14 }
 0x899   : > { %24300 = vmatmul.mubr.bf16.vlgmr.msra.gmra.mrb[0].mxu1 %v16588_v12  ;;  %v26202_v12 = vld [vmem:[%s30806_s5 + $0x220] sm:$0xff]  }
 0x89a   : > { %24324 = vmatpush3.bf16.msra.mxu1 %v26147_v33  ;;  %24339 = vmatprep.mubr.msk.bf16.mxu1 %vm26419_vm0, %v26418_v14  ;;  %v26204_v33 = vld [vmem:[%s30806_s5 + $0x228] sm:$0xff]  }
 0x89b   : > { %24325 = vmatprep.subr.bf16.mxu1 %v26418_v14  ;;  %24306 = vmatpush3.bf16.msra.mxu0 %v26148_v38  ;;  %v26205_v38 = vld [vmem:[%s30806_s5 + $0x268] sm:$0xff]  }
 0x89c   : > { %24307 = vmatprep.subr.bf16.mxu0 %v26418_v14 }
 0x89e   : > { %24326 = vmatpush3.bf16.msra.mxu1 %v26149_v41  ;;  %v26206_v41 = vld [vmem:[%s30806_s5 + $0x230] sm:$0xff]  }
 0x89f   : > { %24327 = vmatprep.subr.bf16.mxu1 %v26418_v14  ;;  %24308 = vmatpush3.bf16.msra.mxu0 %v26150_v54  ;;  %v26207_v54 = vld [vmem:[%s30806_s5 + $0x270] sm:$0xff]  }
 0x8a0   : > { %24309 = vmatprep.subr.bf16.mxu0 %v26418_v14 }
 0x8a2   : > { %24328 = vmatpush3.bf16.msra.mxu1 %v26151_v13  ;;  %v26208_v13 = vld [vmem:[%s30806_s5 + $0x238] sm:$0xff]  }
 0x8a3   : > { %24329 = vmatprep.subr.bf16.mxu1 %v26418_v14  ;;  %24310 = vmatpush3.bf16.msra.mxu0 %v26152_v36  ;;  %v26209_v36 = vld [vmem:[%s30806_s5 + $0x278] sm:$0xff]  }
 0x8a4   : > { %24311 = vmatprep.subr.bf16.mxu0 %v26418_v14 }
 0x8a6   : > { %24330 = vmatpush3.bf16.msra.mxu1 %v26153_v42  ;;  %v16596_v42 = vld [vmem:[#allocation3 + $0x40] sm:$0xff] }
 0x8a7   : > { %24331 = vmatprep.subr.bf16.mxu1 %v26418_v14  ;;  %24312 = vmatpush3.bf16.msra.mxu0 %v26154_v49  ;;  %v26210_v49 = vld [vmem:[%s30806_s5 + $0x280] sm:$0xff]  }
 0x8a8   : > { %24313 = vmatprep.subr.bf16.mxu0 %v26418_v14 }
 0x8aa   : > { %24332 = vmatpush3.bf16.msra.mxu1 %v26155_v11  ;;  %v16597_v11 = vld [vmem:[#allocation3 + $0x48] sm:$0xff] }
 0x8ab   : > { %24333 = vmatprep.subr.bf16.mxu1 %v26418_v14  ;;  %24314 = vmatpush3.bf16.msra.mxu0 %v26156_v27  ;;  %v26211_v27 = vld [vmem:[%s30806_s5 + $0x2c0] sm:$0xff]  }
 0x8ac   : > { %24315 = vmatprep.subr.bf16.mxu0 %v26418_v14 }
 0x8ae   : > { %24334 = vmatpush3.bf16.msra.mxu1 %v26157_v28  ;;  %v26212_v28 = vld [vmem:[%s30806_s5 + $0x288] sm:$0xff]  }
 0x8af   : > { %24335 = vmatprep.subr.bf16.mxu1 %v26418_v14  ;;  %24316 = vmatpush3.bf16.msra.mxu0 %v26158_v30  ;;  %v26213_v30 = vld [vmem:[%s30806_s5 + $0x2c8] sm:$0xff]  }
 0x8b0   : > { %24317 = vmatprep.subr.bf16.mxu0 %v26418_v14 }
 0x8b2   : > { %24336 = vmatpush3.bf16.msra.mxu1 %v26159_v31  ;;  %v26214_v31 = vld [vmem:[%s30806_s5 + $0x290] sm:$0xff]  }
 0x8b3   : > { %24337 = vmatprep.subr.bf16.mxu1 %v26418_v14  ;;  %24318 = vmatpush3.bf16.msra.mxu0 %v26160_v63  ;;  %v26215_v63 = vld [vmem:[%s30806_s5 + $0x2d0] sm:$0xff]  }
 0x8b4   : > { %24343 = vmatprep.subr.bf16.mxu0 %v26418_v14 }
 0x8b6   : > { %24338 = vmatpush3.bf16.msra.mxu1 %v26161_v0  ;;  %24320 = vmatmul.mubr.bf16.vlgmr.msra.gmra.mrb[4].mxu0 %v16590_v4  ;;  %v26216_v0 = vld [vmem:[%s30806_s5 + $0x298] sm:$0xff]  }
 0x8b7   : > { %24363 = vmatprep.subr.bf16.mxu1 %v26418_v14  ;;  %24344 = vmatpush3.bf16.msra.mxu0 %v26162_v5  ;;  %v26217_v4 = vld [vmem:[%s30806_s5 + $0x2d8] sm:$0xff]   ;;  %v26218_v5 = vld [vmem:[%s30806_s5 + $0x2a0] sm:$0xff]  }
 0x8b8   : > { %24345 = vmatprep.subr.bf16.mxu0 %v26418_v14  ;;  %24359 = vmatprep.mubr.msk.bf16.mxu0 %vm26419_vm0, %v26418_v14 }
 0x8b9   : > { %24340 = vmatmul.mubr.bf16.vlgmr.msra.gmra.mrb[4].mxu1 %v16591_v52  ;;  %v26219_v52 = vld [vmem:[%s30806_s5 + $0x2e0] sm:$0xff]  }
 0x8ba   : > { %24364 = vmatpush3.bf16.msra.mxu1 %v26163_v20  ;;  %24379 = vmatprep.mubr.msk.bf16.mxu1 %vm26419_vm0, %v26418_v14  ;;  %v26220_v20 = vld [vmem:[%s30806_s5 + $0x2a8] sm:$0xff]  }
 0x8bb   : > { %24365 = vmatprep.subr.bf16.mxu1 %v26418_v14  ;;  %24346 = vmatpush3.bf16.msra.mxu0 %v26164_v16  ;;  %v26221_v16 = vld [vmem:[%s30806_s5 + $0x2e8] sm:$0xff]  }
 0x8bc   : > { %24347 = vmatprep.subr.bf16.mxu0 %v26418_v14 }
 0x8be   : > { %24366 = vmatpush3.bf16.msra.mxu1 %v26165_v23  ;;  %v26222_v23 = vld [vmem:[%s30806_s5 + $0x2b0] sm:$0xff]  }
 0x8bf   : > { %24367 = vmatprep.subr.bf16.mxu1 %v26418_v14  ;;  %24348 = vmatpush3.bf16.msra.mxu0 %v26166_v26  ;;  %v26223_v26 = vld [vmem:[%s30806_s5 + $0x2f0] sm:$0xff]  }
 0x8c0   : > { %24349 = vmatprep.subr.bf16.mxu0 %v26418_v14 }
 0x8c2   : > { %24368 = vmatpush3.bf16.msra.mxu1 %v26167_v40  ;;  %v26224_v40 = vld [vmem:[%s30806_s5 + $0x2b8] sm:$0xff]  }
 0x8c3   : > { %24369 = vmatprep.subr.bf16.mxu1 %v26418_v14  ;;  %24350 = vmatpush3.bf16.msra.mxu0 %v26168_v29  ;;  %v26225_v29 = vld [vmem:[%s30806_s5 + $0x2f8] sm:$0xff]  }
 0x8c4   : > { %24351 = vmatprep.subr.bf16.mxu0 %v26418_v14 }
 0x8c6   : > { %24370 = vmatpush3.bf16.msra.mxu1 %v26169_v32  ;;  %v16598_v32 = vld [vmem:[#allocation3 + $0x50] sm:$0xff] }
 0x8c7   : > { %24371 = vmatprep.subr.bf16.mxu1 %v26418_v14  ;;  %24352 = vmatpush3.bf16.msra.mxu0 %v26170_v46  ;;  %v26226_v46 = vld [vmem:[%s30806_s5 + $0x300] sm:$0xff]  }
 0x8c8   : > { %24353 = vmatprep.subr.bf16.mxu0 %v26418_v14 }
 0x8ca   : > { %24372 = vmatpush3.bf16.msra.mxu1 %v26171_v56  ;;  %v16599_v56 = vld [vmem:[#allocation3 + $0x58] sm:$0xff] }
 0x8cb   : > { %24373 = vmatprep.subr.bf16.mxu1 %v26418_v14  ;;  %24354 = vmatpush3.bf16.msra.mxu0 %v26172_v57  ;;  %v26227_v57 = vld [vmem:[%s30806_s5 + $0x340] sm:$0xff]  }
 0x8cc   : > { %24355 = vmatprep.subr.bf16.mxu0 %v26418_v14 }
 0x8ce   : > { %24374 = vmatpush3.bf16.msra.mxu1 %v26173_v21  ;;  %v26228_v21 = vld [vmem:[%s30806_s5 + $0x308] sm:$0xff]  }
 0x8cf   : > { %24375 = vmatprep.subr.bf16.mxu1 %v26418_v14  ;;  %24356 = vmatpush3.bf16.msra.mxu0 %v26174_v47  ;;  %v26229_v47 = vld [vmem:[%s30806_s5 + $0x348] sm:$0xff]  }
 0x8d0   : > { %24357 = vmatprep.subr.bf16.mxu0 %v26418_v14 }
 0x8d2   : > { %24376 = vmatpush3.bf16.msra.mxu1 %v26175_v6  ;;  %v26230_v6 = vld [vmem:[%s30806_s5 + $0x310] sm:$0xff]  }
 0x8d3   : > { %24377 = vmatprep.subr.bf16.mxu1 %v26418_v14  ;;  %24358 = vmatpush3.bf16.msra.mxu0 %v26176_v3  ;;  %v26231_v3 = vld [vmem:[%s30806_s5 + $0x350] sm:$0xff]  }
 0x8d4   : > { %24383 = vmatprep.subr.bf16.mxu0 %v26418_v14 }
 0x8d6   : > { %24378 = vmatpush3.bf16.msra.mxu1 %v26177_v1  ;;  %24360 = vmatmul.mubr.bf16.vlgmr.msra.gmra.mrb[8].mxu0 %v16592_v22  ;;  %v26232_v1 = vld [vmem:[%s30806_s5 + $0x318] sm:$0xff]  }
 0x8d7   : > { %24403 = vmatprep.subr.bf16.mxu1 %v26418_v14  ;;  %24384 = vmatpush3.bf16.msra.mxu0 %v26178_v10  ;;  %v26233_v22 = vld [vmem:[%s30806_s5 + $0x358] sm:$0xff]   ;;  %v26234_v10 = vld [vmem:[%s30806_s5 + $0x320] sm:$0xff]  }
 0x8d8   : > { %24385 = vmatprep.subr.bf16.mxu0 %v26418_v14  ;;  %24399 = vmatprep.mubr.msk.bf16.mxu0 %vm26419_vm0, %v26418_v14 }
 0x8d9   : > { %24380 = vmatmul.mubr.bf16.vlgmr.msra.gmra.mrb[8].mxu1 %v16593_v35  ;;  %v26235_v35 = vld [vmem:[%s30806_s5 + $0x360] sm:$0xff]  }
 0x8da   : > { %24404 = vmatpush3.bf16.msra.mxu1 %v26179_v45  ;;  %24419 = vmatprep.mubr.msk.bf16.mxu1 %vm26419_vm0, %v26418_v14  ;;  %v26236_v45 = vld [vmem:[%s30806_s5 + $0x328] sm:$0xff]  }
 0x8db   : > { %24405 = vmatprep.subr.bf16.mxu1 %v26418_v14  ;;  %24386 = vmatpush3.bf16.msra.mxu0 %v26180_v48  ;;  %v26237_v48 = vld [vmem:[%s30806_s5 + $0x368] sm:$0xff]  }
 0x8dc   : > { %24387 = vmatprep.subr.bf16.mxu0 %v26418_v14 }
 0x8de   : > { %24406 = vmatpush3.bf16.msra.mxu1 %v26181_v50  ;;  %v26238_v50 = vld [vmem:[%s30806_s5 + $0x330] sm:$0xff]  }
 0x8df   : > { %24407 = vmatprep.subr.bf16.mxu1 %v26418_v14  ;;  %24388 = vmatpush3.bf16.msra.mxu0 %v26182_v51  ;;  %v26239_v51 = vld [vmem:[%s30806_s5 + $0x370] sm:$0xff]  }
 0x8e0   : > { %24389 = vmatprep.subr.bf16.mxu0 %v26418_v14 }
 0x8e2   : > { %24408 = vmatpush3.bf16.msra.mxu1 %v26183_v53  ;;  %v26240_v53 = vld [vmem:[%s30806_s5 + $0x338] sm:$0xff]  }
 0x8e3   : > { %24409 = vmatprep.subr.bf16.mxu1 %v26418_v14  ;;  %24390 = vmatpush3.bf16.msra.mxu0 %v26184_v55  ;;  %v26241_v55 = vld [vmem:[%s30806_s5 + $0x378] sm:$0xff]  }
 0x8e4   : > { %24391 = vmatprep.subr.bf16.mxu0 %v26418_v14 }
 0x8e6   : > { %24410 = vmatpush3.bf16.msra.mxu1 %v26185_v18  ;;  %v16600_v18 = vld [vmem:[#allocation3 + $0x60] sm:$0xff] }
 0x8e7   : > { %24411 = vmatprep.subr.bf16.mxu1 %v26418_v14  ;;  %24392 = vmatpush3.bf16.msra.mxu0 %v26186_v58  ;;  %v26242_v58 = vld [vmem:[%s30806_s5 + $0x380] sm:$0xff]  }
 0x8e8   : > { %24393 = vmatprep.subr.bf16.mxu0 %v26418_v14 }
 0x8ea   : > { %24412 = vmatpush3.bf16.msra.mxu1 %v26187_v59  ;;  %v16601_v59 = vld [vmem:[#allocation3 + $0x68] sm:$0xff] }
 0x8eb   : > { %24413 = vmatprep.subr.bf16.mxu1 %v26418_v14  ;;  %24394 = vmatpush3.bf16.msra.mxu0 %v26188_v60  ;;  %v26243_v60 = vld [vmem:[%s30806_s5 + $0x3c0] sm:$0xff]  }
 0x8ec   : > { %24395 = vmatprep.subr.bf16.mxu0 %v26418_v14 }
 0x8ee   : > { %24414 = vmatpush3.bf16.msra.mxu1 %v26189_v62  ;;  %v26244_v62 = vld [vmem:[%s30806_s5 + $0x388] sm:$0xff]  }
 0x8ef   : > { %24415 = vmatprep.subr.bf16.mxu1 %v26418_v14  ;;  %24396 = vmatpush3.bf16.msra.mxu0 %v26190_v61  ;;  %v26245_v61 = vld [vmem:[%s30806_s5 + $0x3c8] sm:$0xff]  }
 0x8f0   : > { %24397 = vmatprep.subr.bf16.mxu0 %v26418_v14 }
 0x8f2   : > { %24416 = vmatpush3.bf16.msra.mxu1 %v26191_v2  ;;  %v26246_v2 = vld [vmem:[%s30806_s5 + $0x390] sm:$0xff]  }
 0x8f3   : > { %24417 = vmatprep.subr.bf16.mxu1 %v26418_v14  ;;  %24398 = vmatpush3.bf16.msra.mxu0 %v26192_v17  ;;  %v26247_v17 = vld [vmem:[%s30806_s5 + $0x3d0] sm:$0xff]  }
 0x8f4   : > { %24423 = vmatprep.subr.bf16.mxu0 %v26418_v14 }
 0x8f6   : > { %24418 = vmatpush3.bf16.msra.mxu1 %v26193_v19  ;;  %24400 = vmatmul.mubr.bf16.vlgmr.msra.gmra.mrb[12].mxu0 %v16594_v7  ;;  %v26248_v19 = vld [vmem:[%s30806_s5 + $0x398] sm:$0xff]  }
 0x8f7   : > { %24443 = vmatprep.subr.bf16.mxu1 %v26418_v14  ;;  %24424 = vmatpush3.bf16.msra.mxu0 %v26194_v24  ;;  %v26249_v7 = vld [vmem:[%s30806_s5 + $0x3d8] sm:$0xff]   ;;  %v26250_v24 = vld [vmem:[%s30806_s5 + $0x3a0] sm:$0xff]  }
 0x8f8   : > { %24425 = vmatprep.subr.bf16.mxu0 %v26418_v14  ;;  %24439 = vmatprep.mubr.msk.bf16.mxu0 %vm26419_vm0, %v26418_v14 }
 0x8f9   : > { %24420 = vmatmul.mubr.bf16.vlgmr.msra.gmra.mrb[12].mxu1 %v16595_v25  ;;  %v26251_v25 = vld [vmem:[%s30806_s5 + $0x3e0] sm:$0xff]  }
 0x8fa   : > { %24444 = vmatpush3.bf16.msra.mxu1 %v26195_v34  ;;  %24459 = vmatprep.mubr.msk.bf16.mxu1 %vm26419_vm0, %v26418_v14  ;;  %v26252_v34 = vld [vmem:[%s30806_s5 + $0x3a8] sm:$0xff]  }
 0x8fb   : > { %24445 = vmatprep.subr.bf16.mxu1 %v26418_v14  ;;  %24426 = vmatpush3.bf16.msra.mxu0 %v26196_v37  ;;  %v26253_v37 = vld [vmem:[%s30806_s5 + $0x3e8] sm:$0xff]  }
 0x8fc   : > { %24427 = vmatprep.subr.bf16.mxu0 %v26418_v14 }
 0x8fe   : > { %24446 = vmatpush3.bf16.msra.mxu1 %v26197_v39 }
 0x8ff   : > { %24447 = vmatprep.subr.bf16.mxu1 %v26418_v14  ;;  %24428 = vmatpush3.bf16.msra.mxu0 %v26198_v8 }
 0x900   : > { %24429 = vmatprep.subr.bf16.mxu0 %v26418_v14 }
 0x902   : > { %24448 = vmatpush3.bf16.msra.mxu1 %v26199_v43 }
 0x903   : > { %24449 = vmatprep.subr.bf16.mxu1 %v26418_v14  ;;  %24430 = vmatpush3.bf16.msra.mxu0 %v26200_v44 }
 0x904   : > { %24431 = vmatprep.subr.bf16.mxu0 %v26418_v14 }
 0x906   : > { %24450 = vmatpush3.bf16.msra.mxu1 %v26201_v9 }
 0x907   : > { %24451 = vmatprep.subr.bf16.mxu1 %v26418_v14  ;;  %24432 = vmatpush3.bf16.msra.mxu0 %v26202_v12 }
 0x908   : > { %24433 = vmatprep.subr.bf16.mxu0 %v26418_v14 }
 0x90a   : > { %24452 = vmatpush3.bf16.msra.mxu1 %v26203_v15  ;;  %v26254_v15 = vld [vmem:[%s30806_s5 + $0x3b0] sm:$0xff]  }
 0x90b   : > { %24453 = vmatprep.subr.bf16.mxu1 %v26418_v14  ;;  %24434 = vmatpush3.bf16.msra.mxu0 %v26204_v33 }
 0x90c   : > { %24435 = vmatprep.subr.bf16.mxu0 %v26418_v14 }
 0x90e   : > { %24454 = vmatpush3.bf16.msra.mxu1 %v26205_v38 }
 0x90f   : > { %24455 = vmatprep.subr.bf16.mxu1 %v26418_v14  ;;  %24436 = vmatpush3.bf16.msra.mxu0 %v26206_v41  ;;  %v26255_v41 = vld [vmem:[%s30806_s5 + $0x3f0] sm:$0xff]  }
 0x910   : > { %24437 = vmatprep.subr.bf16.mxu0 %v26418_v14 }
 0x912   : > { %24456 = vmatpush3.bf16.msra.mxu1 %v26207_v54 }
 0x913   : > { %24457 = vmatprep.subr.bf16.mxu1 %v26418_v14  ;;  %24438 = vmatpush3.bf16.msra.mxu0 %v26208_v13 }
 0x914   : > { %24463 = vmatprep.subr.bf16.mxu0 %v26418_v14 }
 0x916   : > { %24458 = vmatpush3.bf16.msra.mxu1 %v26209_v36  ;;  %24440 = vmatmul.mubr.bf16.vlgmr.msra.gmra.mrb[16].mxu0 %v16596_v42  ;;  %v26256_v36 = vld [vmem:[%s30806_s5 + $0x3b8] sm:$0xff]  }
 0x917   : > { %24483 = vmatprep.subr.bf16.mxu1 %v26418_v14  ;;  %24464 = vmatpush3.bf16.msra.mxu0 %v26210_v49  ;;  %v26257_v42 = vld [vmem:[%s30806_s5 + $0x3f8] sm:$0xff]   ;;  %v16602_v49 = vld [vmem:[#allocation3 + $0x70] sm:$0xff] }
 0x918   : > { %24465 = vmatprep.subr.bf16.mxu0 %v26418_v14  ;;  %24479 = vmatprep.mubr.msk.bf16.mxu0 %vm26419_vm0, %v26418_v14 }
 0x919   : > { %24460 = vmatmul.mubr.bf16.vlgmr.msra.gmra.mrb[16].mxu1 %v16597_v11  ;;  %v26258_v11 = vld [vmem:[%s30806_s5 + $0x400] sm:$0xff]  }
 0x91a   : > { %24484 = vmatpush3.bf16.msra.mxu1 %v26211_v27  ;;  %24499 = vmatprep.mubr.msk.bf16.mxu1 %vm26419_vm0, %v26418_v14  ;;  %v16603_v27 = vld [vmem:[#allocation3 + $0x78] sm:$0xff] }
 0x91b   : > { %24485 = vmatprep.subr.bf16.mxu1 %v26418_v14  ;;  %24466 = vmatpush3.bf16.msra.mxu0 %v26212_v28  ;;  %v26259_v28 = vld [vmem:[%s30806_s5 + $0x440] sm:$0xff]  }
 0x91c   : > { %24467 = vmatprep.subr.bf16.mxu0 %v26418_v14 }
 0x91e   : > { %24486 = vmatpush3.bf16.msra.mxu1 %v26213_v30  ;;  %v26260_v30 = vld [vmem:[%s30806_s5 + $0x408] sm:$0xff]  }
 0x91f   : > { %24487 = vmatprep.subr.bf16.mxu1 %v26418_v14  ;;  %24468 = vmatpush3.bf16.msra.mxu0 %v26214_v31  ;;  %v26261_v31 = vld [vmem:[%s30806_s5 + $0x448] sm:$0xff]  }
 0x920   : > { %24469 = vmatprep.subr.bf16.mxu0 %v26418_v14 }
 0x922   : > { %24488 = vmatpush3.bf16.msra.mxu1 %v26215_v63  ;;  %v26262_v63 = vld [vmem:[%s30806_s5 + $0x410] sm:$0xff]  }
 0x923   : > { %24489 = vmatprep.subr.bf16.mxu1 %v26418_v14  ;;  %24470 = vmatpush3.bf16.msra.mxu0 %v26216_v0  ;;  %v26263_v0 = vld [vmem:[%s30806_s5 + $0x450] sm:$0xff]  }
 0x924   : > { %24471 = vmatprep.subr.bf16.mxu0 %v26418_v14 }
 0x926   : > { %24490 = vmatpush3.bf16.msra.mxu1 %v26217_v4  ;;  %v26264_v4 = vld [vmem:[%s30806_s5 + $0x418] sm:$0xff]  }
 0x927   : > { %24491 = vmatprep.subr.bf16.mxu1 %v26418_v14  ;;  %24472 = vmatpush3.bf16.msra.mxu0 %v26218_v5  ;;  %v26265_v5 = vld [vmem:[%s30806_s5 + $0x458] sm:$0xff]  }
 0x928   : > { %24473 = vmatprep.subr.bf16.mxu0 %v26418_v14 }
 0x92a   : > { %24492 = vmatpush3.bf16.msra.mxu1 %v26219_v52  ;;  %v26266_v52 = vld [vmem:[%s30806_s5 + $0x420] sm:$0xff]  }
 0x92b   : > { %24493 = vmatprep.subr.bf16.mxu1 %v26418_v14  ;;  %24474 = vmatpush3.bf16.msra.mxu0 %v26220_v20  ;;  %v26267_v20 = vld [vmem:[%s30806_s5 + $0x460] sm:$0xff]  }
 0x92c   : > { %24475 = vmatprep.subr.bf16.mxu0 %v26418_v14 }
 0x92e   : > { %24494 = vmatpush3.bf16.msra.mxu1 %v26221_v16  ;;  %v26268_v16 = vld [vmem:[%s30806_s5 + $0x428] sm:$0xff]  }
 0x92f   : > { %24495 = vmatprep.subr.bf16.mxu1 %v26418_v14  ;;  %24476 = vmatpush3.bf16.msra.mxu0 %v26222_v23  ;;  %v26269_v23 = vld [vmem:[%s30806_s5 + $0x468] sm:$0xff]  }
 0x930   : > { %24477 = vmatprep.subr.bf16.mxu0 %v26418_v14 }
 0x932   : > { %24496 = vmatpush3.bf16.msra.mxu1 %v26223_v26 }
 0x933   : > { %24497 = vmatprep.subr.bf16.mxu1 %v26418_v14  ;;  %24478 = vmatpush3.bf16.msra.mxu0 %v26224_v40 }
 0x934   : > { %24503 = vmatprep.subr.bf16.mxu0 %v26418_v14 }
 0x936   : > { %24498 = vmatpush3.bf16.msra.mxu1 %v26225_v29  ;;  %24480 = vmatmul.mubr.bf16.vlgmr.msra.gmra.mrb[20].mxu0 %v16598_v32 }
 0x937   : > { %24523 = vmatprep.subr.bf16.mxu1 %v26418_v14  ;;  %24504 = vmatpush3.bf16.msra.mxu0 %v26226_v46 }
 0x938   : > { %24505 = vmatprep.subr.bf16.mxu0 %v26418_v14  ;;  %24519 = vmatprep.mubr.msk.bf16.mxu0 %vm26419_vm0, %v26418_v14 }
 0x939   : > { %24500 = vmatmul.mubr.bf16.vlgmr.msra.gmra.mrb[20].mxu1 %v16599_v56 }
 0x93a   : > { %24524 = vmatpush3.bf16.msra.mxu1 %v26227_v57  ;;  %24539 = vmatprep.mubr.msk.bf16.mxu1 %vm26419_vm0, %v26418_v14  ;;  %v26270_v57 = vld [vmem:[%s30806_s5 + $0x430] sm:$0xff]  }
 0x93b   : > { %24525 = vmatprep.subr.bf16.mxu1 %v26418_v14  ;;  %24506 = vmatpush3.bf16.msra.mxu0 %v26228_v21 }
 0x93c   : > { %24507 = vmatprep.subr.bf16.mxu0 %v26418_v14 }
 0x93e   : > { %24526 = vmatpush3.bf16.msra.mxu1 %v26229_v47 }
 0x93f   : > { %24527 = vmatprep.subr.bf16.mxu1 %v26418_v14  ;;  %24508 = vmatpush3.bf16.msra.mxu0 %v26230_v6 }
 0x940   : > { %24509 = vmatprep.subr.bf16.mxu0 %v26418_v14 }
 0x942   : > { %24528 = vmatpush3.bf16.msra.mxu1 %v26231_v3 }
 0x943   : > { %24529 = vmatprep.subr.bf16.mxu1 %v26418_v14  ;;  %24510 = vmatpush3.bf16.msra.mxu0 %v26232_v1  ;;  %v26271_v1 = vld [vmem:[%s30806_s5 + $0x470] sm:$0xff]  }
 0x944   : > { %24511 = vmatprep.subr.bf16.mxu0 %v26418_v14 }
 0x946   : > { %24530 = vmatpush3.bf16.msra.mxu1 %v26233_v22 }
 0x947   : > { %24531 = vmatprep.subr.bf16.mxu1 %v26418_v14  ;;  %24512 = vmatpush3.bf16.msra.mxu0 %v26234_v10 }
 0x948   : > { %24513 = vmatprep.subr.bf16.mxu0 %v26418_v14 }
 0x94a   : > { %24532 = vmatpush3.bf16.msra.mxu1 %v26235_v35  ;;  %v26272_v35 = vld [vmem:[%s30806_s5 + $0x438] sm:$0xff]  }
 0x94b   : > { %24533 = vmatprep.subr.bf16.mxu1 %v26418_v14  ;;  %24514 = vmatpush3.bf16.msra.mxu0 %v26236_v45  ;;  %v26273_v45 = vld [vmem:[%s30806_s5 + $0x478] sm:$0xff]  }
 0x94c   : > { %24515 = vmatprep.subr.bf16.mxu0 %v26418_v14 }
 0x94e   : > { %24534 = vmatpush3.bf16.msra.mxu1 %v26237_v48  ;;  %v16604_v48 = vld [vmem:[#allocation3 + $0x80] sm:$0xff] }
 0x94f   : > { %24535 = vmatprep.subr.bf16.mxu1 %v26418_v14  ;;  %24516 = vmatpush3.bf16.msra.mxu0 %v26238_v50  ;;  %v26274_v50 = vld [vmem:[%s30806_s5 + $0x480] sm:$0xff]  }
 0x950   : > { %24517 = vmatprep.subr.bf16.mxu0 %v26418_v14 }
 0x952   : > { %24536 = vmatpush3.bf16.msra.mxu1 %v26239_v51  ;;  %v16605_v51 = vld [vmem:[#allocation3 + $0x88] sm:$0xff] }
 0x953   : > { %24537 = vmatprep.subr.bf16.mxu1 %v26418_v14  ;;  %24518 = vmatpush3.bf16.msra.mxu0 %v26240_v53  ;;  %v26275_v53 = vld [vmem:[%s30806_s5 + $0x4c0] sm:$0xff]  }
 0x954   : > { %24543 = vmatprep.subr.bf16.mxu0 %v26418_v14 }
 0x956   : > { %24538 = vmatpush3.bf16.msra.mxu1 %v26241_v55  ;;  %24520 = vmatmul.mubr.bf16.vlgmr.msra.gmra.mrb[24].mxu0 %v16600_v18  ;;  %v26276_v55 = vld [vmem:[%s30806_s5 + $0x488] sm:$0xff]  }
 0x957   : > { %24563 = vmatprep.subr.bf16.mxu1 %v26418_v14  ;;  %24544 = vmatpush3.bf16.msra.mxu0 %v26242_v58  ;;  %v26277_v18 = vld [vmem:[%s30806_s5 + $0x4c8] sm:$0xff]   ;;  %v26278_v58 = vld [vmem:[%s30806_s5 + $0x490] sm:$0xff]  }
 0x958   : > { %24545 = vmatprep.subr.bf16.mxu0 %v26418_v14  ;;  %24559 = vmatprep.mubr.msk.bf16.mxu0 %vm26419_vm0, %v26418_v14 }
 0x959   : > { %24540 = vmatmul.mubr.bf16.vlgmr.msra.gmra.mrb[24].mxu1 %v16601_v59  ;;  %v26279_v59 = vld [vmem:[%s30806_s5 + $0x4d0] sm:$0xff]  }
 0x95a   : > { %24564 = vmatpush3.bf16.msra.mxu1 %v26243_v60  ;;  %24579 = vmatprep.mubr.msk.bf16.mxu1 %vm26419_vm0, %v26418_v14  ;;  %v26280_v60 = vld [vmem:[%s30806_s5 + $0x498] sm:$0xff]  }
 0x95b   : > { %24565 = vmatprep.subr.bf16.mxu1 %v26418_v14  ;;  %24546 = vmatpush3.bf16.msra.mxu0 %v26244_v62  ;;  %v26281_v62 = vld [vmem:[%s30806_s5 + $0x4d8] sm:$0xff]  }
 0x95c   : > { %24547 = vmatprep.subr.bf16.mxu0 %v26418_v14 }
 0x95e   : > { %24566 = vmatpush3.bf16.msra.mxu1 %v26245_v61  ;;  %v26282_v61 = vld [vmem:[%s30806_s5 + $0x4a0] sm:$0xff]  }
 0x95f   : > { %24567 = vmatprep.subr.bf16.mxu1 %v26418_v14  ;;  %24548 = vmatpush3.bf16.msra.mxu0 %v26246_v2  ;;  %v26283_v2 = vld [vmem:[%s30806_s5 + $0x4e0] sm:$0xff]  }
 0x960   : > { %24549 = vmatprep.subr.bf16.mxu0 %v26418_v14 }
 0x962   : > { %24568 = vmatpush3.bf16.msra.mxu1 %v26247_v17  ;;  %v26284_v17 = vld [vmem:[%s30806_s5 + $0x4a8] sm:$0xff]  }
 0x963   : > { %24569 = vmatprep.subr.bf16.mxu1 %v26418_v14  ;;  %24550 = vmatpush3.bf16.msra.mxu0 %v26248_v19  ;;  %v26285_v19 = vld [vmem:[%s30806_s5 + $0x4e8] sm:$0xff]  }
 0x964   : > { %24551 = vmatprep.subr.bf16.mxu0 %v26418_v14 }
 0x966   : > { %24570 = vmatpush3.bf16.msra.mxu1 %v26249_v7 }
 0x967   : > { %24571 = vmatprep.subr.bf16.mxu1 %v26418_v14  ;;  %24552 = vmatpush3.bf16.msra.mxu0 %v26250_v24 }
 0x968   : > { %24553 = vmatprep.subr.bf16.mxu0 %v26418_v14 }
 0x969   : > { %v16728_v39 = vpop.f32.mrb[0].mxu0 }
 0x96a   : > { %24572 = vmatpush3.bf16.msra.mxu1 %v26251_v25  ;;  %v24281_v43 = vpop.f32.mrb[1].mxu0 }
 0x96b   : > { %24573 = vmatprep.subr.bf16.mxu1 %v26418_v14  ;;  %v16731_v12 = vpop.f32.mrb[2].mxu0  ;;  %24554 = vmatpush3.bf16.msra.mxu0 %v26252_v34 }
 0x96c   : > { %v16817_v8 = vpop.f32.mrb[0].mxu1  ;;  %v24282_v38 = vpop.f32.mrb[3].mxu0  ;;  %24555 = vmatprep.subr.bf16.mxu0 %v26418_v14 }
 0x96d   : > { %v16818_v44 = vadd.f32 %v16817_v8, %v16728_v39  ;;  %v24301_v9 = vpop.f32.mrb[1].mxu1  ;;  %v26286_v8 = vld [vmem:[%s30806_s5 + $0x4b0] sm:$0xff]  }
 0x96e   : > { %v16820_v33 = vpop.f32.mrb[2].mxu1  ;;  %24574 = vmatpush3.bf16.msra.mxu1 %v26253_v37 }
 0x96f   : > { %v16821_v54 = vadd.f32 %v16820_v33, %v16731_v12  ;;  %24575 = vmatprep.subr.bf16.mxu1 %v26418_v14  ;;  %v24302_v13 = vpop.f32.mrb[3].mxu1  ;;  %24556 = vmatpush3.bf16.msra.mxu0 %v26254_v15  ;;  %v26287_v15 = vld [vmem:[%s30806_s5 + $0x4f0] sm:$0xff]  }
 0x970   : > { %24557 = vmatprep.subr.bf16.mxu0 %v26418_v14  ;;  %v16606_v13 = vld [vmem:[#allocation3 + $0x90] sm:$0xff] }
 0x972   : > { %24576 = vmatpush3.bf16.msra.mxu1 %v26255_v41  ;;  %v26288_v41 = vld [vmem:[%s30806_s5 + $0x4b8] sm:$0xff]  }
 0x973   : > { %24577 = vmatprep.subr.bf16.mxu1 %v26418_v14  ;;  %24558 = vmatpush3.bf16.msra.mxu0 %v26256_v36  ;;  %v26290_v36 = vld [vmem:[%s30806_s5 + $0x500] sm:$0xff]  }
 0x974   : > { %24583 = vmatprep.subr.bf16.mxu0 %v26418_v14 }
 0x976   : > { %24578 = vmatpush3.bf16.msra.mxu1 %v26257_v42  ;;  %24560 = vmatmul.mubr.bf16.vlgmr.msra.gmra.mrb[28].mxu0 %v16602_v49  ;;  %v16607_v42 = vld [vmem:[#allocation3 + $0x98] sm:$0xff]  ;;  %v26291_v49 = vld [vmem:[%s30806_s5 + $0x540] sm:$0xff]  }
 0x977   : > { %24603 = vmatprep.subr.bf16.mxu1 %v26418_v14  ;;  %24584 = vmatpush3.bf16.msra.mxu0 %v26258_v11  ;;  %v26292_v11 = vld [vmem:[%s30806_s5 + $0x508] sm:$0xff]  }
 0x978   : > { %24585 = vmatprep.subr.bf16.mxu0 %v26418_v14  ;;  %24599 = vmatprep.mubr.msk.bf16.mxu0 %vm26419_vm0, %v26418_v14 }
 0x979   : > { %24580 = vmatmul.mubr.bf16.vlgmr.msra.gmra.mrb[28].mxu1 %v16603_v27  ;;  %v26293_v27 = vld [vmem:[%s30806_s5 + $0x548] sm:$0xff]  }
 0x97a   : > { %24604 = vmatpush3.bf16.msra.mxu1 %v26259_v28  ;;  %24619 = vmatprep.mubr.msk.bf16.mxu1 %vm26419_vm0, %v26418_v14  ;;  %v26294_v28 = vld [vmem:[%s30806_s5 + $0x510] sm:$0xff]  }
 0x97b   : > { %24605 = vmatprep.subr.bf16.mxu1 %v26418_v14  ;;  %24586 = vmatpush3.bf16.msra.mxu0 %v26260_v30  ;;  %v26295_v30 = vld [vmem:[%s30806_s5 + $0x550] sm:$0xff]  }
 0x97c   : > { %24587 = vmatprep.subr.bf16.mxu0 %v26418_v14 }
 0x97e   : > { %24606 = vmatpush3.bf16.msra.mxu1 %v26261_v31  ;;  %v26296_v31 = vld [vmem:[%s30806_s5 + $0x518] sm:$0xff]  }
 0x97f   : > { %24607 = vmatprep.subr.bf16.mxu1 %v26418_v14  ;;  %24588 = vmatpush3.bf16.msra.mxu0 %v26262_v63  ;;  %v26297_v63 = vld [vmem:[%s30806_s5 + $0x558] sm:$0xff]  }
 0x980   : > { %24589 = vmatprep.subr.bf16.mxu0 %v26418_v14 }
 0x982   : > { %24608 = vmatpush3.bf16.msra.mxu1 %v26263_v0  ;;  %v26298_v0 = vld [vmem:[%s30806_s5 + $0x520] sm:$0xff]  }
 0x983   : > { %24609 = vmatprep.subr.bf16.mxu1 %v26418_v14  ;;  %24590 = vmatpush3.bf16.msra.mxu0 %v26264_v4  ;;  %v26299_v4 = vld [vmem:[%s30806_s5 + $0x560] sm:$0xff]  }
 0x984   : > { %24591 = vmatprep.subr.bf16.mxu0 %v26418_v14 }
 0x986   : > { %24610 = vmatpush3.bf16.msra.mxu1 %v26265_v5  ;;  %v26300_v5 = vld [vmem:[%s30806_s5 + $0x528] sm:$0xff]  }
 0x987   : > { %24611 = vmatprep.subr.bf16.mxu1 %v26418_v14  ;;  %24592 = vmatpush3.bf16.msra.mxu0 %v26266_v52  ;;  %v26301_v52 = vld [vmem:[%s30806_s5 + $0x568] sm:$0xff]  }
 0x988   : > { %24593 = vmatprep.subr.bf16.mxu0 %v26418_v14 }
 0x989   : > { %v16923_v26 = vpop.f32.mrb[4].mxu0 }
 0x98a   : > { %24612 = vmatpush3.bf16.msra.mxu1 %v26267_v20  ;;  %v16930_v40 = vadd.f32 %v16923_v26, %v16818_v44  ;;  %v24321_v29 = vpop.f32.mrb[5].mxu0 }
 0x98b   : > { %24613 = vmatprep.subr.bf16.mxu1 %v26418_v14  ;;  %v16926_v46 = vpop.f32.mrb[6].mxu0  ;;  %24594 = vmatpush3.bf16.msra.mxu0 %v26268_v16 }
 0x98c   : > { %v17031_v32 = vpop.f32.mrb[4].mxu1  ;;  %v16931_v21 = vadd.f32 %v16926_v46, %v16821_v54  ;;  %v24322_v6 = vpop.f32.mrb[7].mxu0  ;;  %24595 = vmatprep.subr.bf16.mxu0 %v26418_v14  ;;  %v26289_v54 = vld [vmem:[%s30806_s5 + $0x4f8] sm:$0xff]  }
 0x98d   : > { %v24341_v56 = vpop.f32.mrb[5].mxu1  ;;  %v17038_v47 = vadd.f32 %v17031_v32, %v16930_v40  ;;  %v26302_v32 = vld [vmem:[%s30806_s5 + $0x530] sm:$0xff]  }
 0x98e   : > { %v17034_v3 = vpop.f32.mrb[6].mxu1  ;;  %24614 = vmatpush3.bf16.msra.mxu1 %v26269_v23 }
 0x98f   : > { %24615 = vmatprep.subr.bf16.mxu1 %v26418_v14  ;;  %v24342_v22 = vpop.f32.mrb[7].mxu1  ;;  %v17039_v10 = vadd.f32 %v17034_v3, %v16931_v21  ;;  %24596 = vmatpush3.bf16.msra.mxu0 %v26270_v57 }
 0x990   : > { %24597 = vmatprep.subr.bf16.mxu0 %v26418_v14  ;;  %v26305_v22 = vld [vmem:[%s30806_s5 + $0x578] sm:$0xff]  }
 0x992   : > { %24616 = vmatpush3.bf16.msra.mxu1 %v26271_v1  ;;  %v26304_v1 = vld [vmem:[%s30806_s5 + $0x538] sm:$0xff]  }
 0x993   : > { %24617 = vmatprep.subr.bf16.mxu1 %v26418_v14  ;;  %24598 = vmatpush3.bf16.msra.mxu0 %v26272_v35  ;;  %v26306_v35 = vld [vmem:[%s30806_s5 + $0x580] sm:$0xff]  }
 0x994   : > { %24623 = vmatprep.subr.bf16.mxu0 %v26418_v14 }
 0x996   : > { %24618 = vmatpush3.bf16.msra.mxu1 %v26273_v45  ;;  %24600 = vmatmul.mubr.bf16.vlgmr.msra.gmra.mrb[32].mxu0 %v16604_v48  ;;  %v16609_v45 = vld [vmem:[#allocation3 + $0xa8] sm:$0xff]  ;;  %v26307_v48 = vld [vmem:[%s30806_s5 + $0x5c0] sm:$0xff]  }
 0x997   : > { %24643 = vmatprep.subr.bf16.mxu1 %v26418_v14  ;;  %24624 = vmatpush3.bf16.msra.mxu0 %v26274_v50  ;;  %v26308_v50 = vld [vmem:[%s30806_s5 + $0x588] sm:$0xff]  }
 0x998   : > { %24625 = vmatprep.subr.bf16.mxu0 %v26418_v14  ;;  %24639 = vmatprep.mubr.msk.bf16.mxu0 %vm26419_vm0, %v26418_v14 }
 0x999   : > { %24620 = vmatmul.mubr.bf16.vlgmr.msra.gmra.mrb[32].mxu1 %v16605_v51  ;;  %v26309_v51 = vld [vmem:[%s30806_s5 + $0x5c8] sm:$0xff]  }
 0x99a   : > { %24644 = vmatpush3.bf16.msra.mxu1 %v26275_v53  ;;  %24659 = vmatprep.mubr.msk.bf16.mxu1 %vm26419_vm0, %v26418_v14  ;;  %v26310_v53 = vld [vmem:[%s30806_s5 + $0x590] sm:$0xff]  }
 0x99b   : > { %24645 = vmatprep.subr.bf16.mxu1 %v26418_v14  ;;  %24626 = vmatpush3.bf16.msra.mxu0 %v26276_v55  ;;  %v26311_v55 = vld [vmem:[%s30806_s5 + $0x5d0] sm:$0xff]  }
 0x99c   : > { %24627 = vmatprep.subr.bf16.mxu0 %v26418_v14 }
 0x99e   : > { %24646 = vmatpush3.bf16.msra.mxu1 %v26277_v18  ;;  %v26312_v18 = vld [vmem:[%s30806_s5 + $0x598] sm:$0xff]  }
 0x99f   : > { %24647 = vmatprep.subr.bf16.mxu1 %v26418_v14  ;;  %24628 = vmatpush3.bf16.msra.mxu0 %v26278_v58  ;;  %v26313_v58 = vld [vmem:[%s30806_s5 + $0x5d8] sm:$0xff]  }
 0x9a0   : > { %24629 = vmatprep.subr.bf16.mxu0 %v26418_v14 }
 0x9a2   : > { %24648 = vmatpush3.bf16.msra.mxu1 %v26279_v59  ;;  %v26314_v59 = vld [vmem:[%s30806_s5 + $0x5a0] sm:$0xff]  }
 0x9a3   : > { %24649 = vmatprep.subr.bf16.mxu1 %v26418_v14  ;;  %24630 = vmatpush3.bf16.msra.mxu0 %v26280_v60  ;;  %v26315_v60 = vld [vmem:[%s30806_s5 + $0x5e0] sm:$0xff]  }
 0x9a4   : > { %24631 = vmatprep.subr.bf16.mxu0 %v26418_v14 }
 0x9a6   : > { %24650 = vmatpush3.bf16.msra.mxu1 %v26281_v62  ;;  %v26316_v62 = vld [vmem:[%s30806_s5 + $0x5a8] sm:$0xff]  }
 0x9a7   : > { %24651 = vmatprep.subr.bf16.mxu1 %v26418_v14  ;;  %24632 = vmatpush3.bf16.msra.mxu0 %v26282_v61  ;;  %v26317_v61 = vld [vmem:[%s30806_s5 + $0x5e8] sm:$0xff]  }
 0x9a8   : > { %24633 = vmatprep.subr.bf16.mxu0 %v26418_v14 }
 0x9a9   : > { %v17139_v7 = vpop.f32.mrb[8].mxu0 }
 0x9aa   : > { %24652 = vmatpush3.bf16.msra.mxu1 %v26283_v2  ;;  %v17146_v24 = vadd.f32 %v17139_v7, %v17038_v47  ;;  %v24361_v25 = vpop.f32.mrb[9].mxu0  ;;  %v26303_v47 = vld [vmem:[%s30806_s5 + $0x570] sm:$0xff]  }
 0x9ab   : > { %24653 = vmatprep.subr.bf16.mxu1 %v26418_v14  ;;  %v17142_v37 = vpop.f32.mrb[10].mxu0  ;;  %24634 = vmatpush3.bf16.msra.mxu0 %v26284_v17 }
 0x9ac   : > { %v17247_v34 = vpop.f32.mrb[8].mxu1  ;;  %v17147_v43 = vadd.f32 %v17142_v37, %v17039_v10  ;;  %v24362_v9 = vpop.f32.mrb[11].mxu0  ;;  %24635 = vmatprep.subr.bf16.mxu0 %v26418_v14  ;;  %v16608_v10 = vld [vmem:[#allocation3 + $0xa0] sm:$0xff] }
 0x9ad   : > { %v24381_v39 = vpop.f32.mrb[9].mxu1  ;;  %v17254_v44 = vadd.f32 %v17247_v34, %v17146_v24  ;;  %v26318_v34 = vld [vmem:[%s30806_s5 + $0x5b0] sm:$0xff]  }
 0x9ae   : > { %v17250_v12 = vpop.f32.mrb[10].mxu1  ;;  %24654 = vmatpush3.bf16.msra.mxu1 %v26285_v19 }
 0x9af   : > { %24655 = vmatprep.subr.bf16.mxu1 %v26418_v14  ;;  %v24382_v33 = vpop.f32.mrb[11].mxu1  ;;  %v17255_v38 = vadd.f32 %v17250_v12, %v17147_v43  ;;  %24636 = vmatpush3.bf16.msra.mxu0 %v26286_v8 }
 0x9b0   : > { %24637 = vmatprep.subr.bf16.mxu0 %v26418_v14  ;;  %v26321_v33 = vld [vmem:[%s30806_s5 + $0x5f8] sm:$0xff]  }
 0x9b2   : > { %24656 = vmatpush3.bf16.msra.mxu1 %v26287_v15  ;;  %v26320_v15 = vld [vmem:[%s30806_s5 + $0x5b8] sm:$0xff]  }
 0x9b3   : > { %24657 = vmatprep.subr.bf16.mxu1 %v26418_v14  ;;  %24638 = vmatpush3.bf16.msra.mxu0 %v26288_v41  ;;  %v26322_v41 = vld [vmem:[%s30806_s5 + $0x600] sm:$0xff]  }
 0x9b4   : > { %24663 = vmatprep.subr.bf16.mxu0 %v26418_v14 }
 0x9b6   : > { %24658 = vmatpush3.bf16.msra.mxu1 %v26289_v54  ;;  %24640 = vmatmul.mubr.bf16.vlgmr.msra.gmra.mrb[36].mxu0 %v16606_v13  ;;  %v16611_v54 = vld [vmem:[#allocation3 + $0xb8] sm:$0xff]  ;;  %v26323_v13 = vld [vmem:[%s30806_s5 + $0x608] sm:$0xff]  }
 0x9b7   : > { %24683 = vmatprep.subr.bf16.mxu1 %v26418_v14  ;;  %24664 = vmatpush3.bf16.msra.mxu0 %v26290_v36  ;;  %v26324_v36 = vld [vmem:[%s30806_s5 + $0x610] sm:$0xff]  }
 0x9b8   : > { %24665 = vmatprep.subr.bf16.mxu0 %v26418_v14  ;;  %24679 = vmatprep.mubr.msk.bf16.mxu0 %vm26419_vm0, %v26418_v14 }
 0x9b9   : > { %24660 = vmatmul.mubr.bf16.vlgmr.msra.gmra.mrb[36].mxu1 %v16607_v42  ;;  %v26325_v42 = vld [vmem:[%s30806_s5 + $0x618] sm:$0xff]  }
 0x9ba   : > { %24684 = vmatpush3.bf16.msra.mxu1 %v26291_v49  ;;  %24699 = vmatprep.mubr.msk.bf16.mxu1 %vm26419_vm0, %v26418_v14  ;;  %v26326_v49 = vld [vmem:[%s30806_s5 + $0x620] sm:$0xff]  }
 0x9bb   : > { %24685 = vmatprep.subr.bf16.mxu1 %v26418_v14  ;;  %24666 = vmatpush3.bf16.msra.mxu0 %v26292_v11  ;;  %v26327_v11 = vld [vmem:[%s30806_s5 + $0x628] sm:$0xff]  }
 0x9bc   : > { %24667 = vmatprep.subr.bf16.mxu0 %v26418_v14 }
 0x9be   : > { %24686 = vmatpush3.bf16.msra.mxu1 %v26293_v27 }
 0x9bf   : > { %24687 = vmatprep.subr.bf16.mxu1 %v26418_v14  ;;  %24668 = vmatpush3.bf16.msra.mxu0 %v26294_v28 }
 0x9c0   : > { %24669 = vmatprep.subr.bf16.mxu0 %v26418_v14 }
 0x9c2   : > { %24688 = vmatpush3.bf16.msra.mxu1 %v26295_v30 }
 0x9c3   : > { %24689 = vmatprep.subr.bf16.mxu1 %v26418_v14  ;;  %24670 = vmatpush3.bf16.msra.mxu0 %v26296_v31 }
 0x9c4   : > { %24671 = vmatprep.subr.bf16.mxu0 %v26418_v14 }
 0x9c6   : > { %24690 = vmatpush3.bf16.msra.mxu1 %v26297_v63 }
 0x9c7   : > { %24691 = vmatprep.subr.bf16.mxu1 %v26418_v14  ;;  %24672 = vmatpush3.bf16.msra.mxu0 %v26298_v0 }
 0x9c8   : > { %24673 = vmatprep.subr.bf16.mxu0 %v26418_v14 }
 0x9c9   : > { %v17355_v20 = vpop.f32.mrb[12].mxu0 }
 0x9ca   : > { %24692 = vmatpush3.bf16.msra.mxu1 %v26299_v4  ;;  %v17362_v16 = vadd.f32 %v17355_v20, %v17254_v44  ;;  %v24401_v23 = vpop.f32.mrb[13].mxu0  ;;  %v26319_v44 = vld [vmem:[%s30806_s5 + $0x5f0] sm:$0xff]  }
 0x9cb   : > { %24693 = vmatprep.subr.bf16.mxu1 %v26418_v14  ;;  %v17358_v40 = vpop.f32.mrb[14].mxu0  ;;  %24674 = vmatpush3.bf16.msra.mxu0 %v26300_v5  ;;  %v26328_v4 = vld [vmem:[%s30806_s5 + $0x630] sm:$0xff]  }
 0x9cc   : > { %v17463_v26 = vpop.f32.mrb[12].mxu1  ;;  %v17363_v46 = vadd.f32 %v17358_v40, %v17255_v38  ;;  %v24402_v57 = vpop.f32.mrb[15].mxu0  ;;  %24675 = vmatprep.subr.bf16.mxu0 %v26418_v14  ;;  %v16610_v38 = vld [vmem:[#allocation3 + $0xb0] sm:$0xff]  ;;  %v26329_v40 = vld [vmem:[%s30806_s5 + $0x638] sm:$0xff]  }
 0x9cd   : > { %v24421_v29 = vpop.f32.mrb[13].mxu1  ;;  %v17470_v56 = vadd.f32 %v17463_v26, %v17362_v16 }
 0x9ce   : > { %v17466_v21 = vpop.f32.mrb[14].mxu1  ;;  %24694 = vmatpush3.bf16.msra.mxu1 %v26301_v52  ;;  %v16612_v29 = vld [vmem:[#allocation3 + $0xc0] sm:$0xff] }
 0x9cf   : > { %24695 = vmatprep.subr.bf16.mxu1 %v26418_v14  ;;  %v24422_v6 = vpop.f32.mrb[15].mxu1  ;;  %v17471_v3 = vadd.f32 %v17466_v21, %v17363_v46  ;;  %24676 = vmatpush3.bf16.msra.mxu0 %v26302_v32 }
 0x9d0   : > { %24677 = vmatprep.subr.bf16.mxu0 %v26418_v14 }
 0x9d2   : > { %24696 = vmatpush3.bf16.msra.mxu1 %v26303_v47 }
 0x9d3   : > { %24697 = vmatprep.subr.bf16.mxu1 %v26418_v14  ;;  %24678 = vmatpush3.bf16.msra.mxu0 %v26304_v1 }
 0x9d4   : > { %24703 = vmatprep.subr.bf16.mxu0 %v26418_v14 }
 0x9d6   : > { %24698 = vmatpush3.bf16.msra.mxu1 %v26305_v22  ;;  %24680 = vmatmul.mubr.bf16.vlgmr.msra.gmra.mrb[40].mxu0 %v16608_v10 }
 0x9d7   : > { %24723 = vmatprep.subr.bf16.mxu1 %v26418_v14  ;;  %24704 = vmatpush3.bf16.msra.mxu0 %v26306_v35 }
 0x9d8   : > { %24705 = vmatprep.subr.bf16.mxu0 %v26418_v14  ;;  %24719 = vmatprep.mubr.msk.bf16.mxu0 %vm26419_vm0, %v26418_v14 }
 0x9d9   : > { %24700 = vmatmul.mubr.bf16.vlgmr.msra.gmra.mrb[40].mxu1 %v16609_v45 }
 0x9da   : > { %24724 = vmatpush3.bf16.msra.mxu1 %v26307_v48  ;;  %24739 = vmatprep.mubr.msk.bf16.mxu1 %vm26419_vm0, %v26418_v14 }
 0x9db   : > { %24725 = vmatprep.subr.bf16.mxu1 %v26418_v14  ;;  %24706 = vmatpush3.bf16.msra.mxu0 %v26308_v50 }
 0x9dc   : > { %24707 = vmatprep.subr.bf16.mxu0 %v26418_v14 }
 0x9de   : > { %24726 = vmatpush3.bf16.msra.mxu1 %v26309_v51 }
 0x9df   : > { %24727 = vmatprep.subr.bf16.mxu1 %v26418_v14  ;;  %24708 = vmatpush3.bf16.msra.mxu0 %v26310_v53 }
 0x9e0   : > { %24709 = vmatprep.subr.bf16.mxu0 %v26418_v14 }
 0x9e2   : > { %24728 = vmatpush3.bf16.msra.mxu1 %v26311_v55 }
 0x9e3   : > { %24729 = vmatprep.subr.bf16.mxu1 %v26418_v14  ;;  %24710 = vmatpush3.bf16.msra.mxu0 %v26312_v18 }
 0x9e4   : > { %24711 = vmatprep.subr.bf16.mxu0 %v26418_v14 }
 0x9e6   : > { %24730 = vmatpush3.bf16.msra.mxu1 %v26313_v58 }
 0x9e7   : > { %24731 = vmatprep.subr.bf16.mxu1 %v26418_v14  ;;  %24712 = vmatpush3.bf16.msra.mxu0 %v26314_v59 }
 0x9e8   : > { %24713 = vmatprep.subr.bf16.mxu0 %v26418_v14 }
 0x9e9   : > { %v17571_v2 = vpop.f32.mrb[16].mxu0 }
 0x9ea   : > { %24732 = vmatpush3.bf16.msra.mxu1 %v26315_v60  ;;  %v17578_v17 = vadd.f32 %v17571_v2, %v17470_v56  ;;  %v24441_v19 = vpop.f32.mrb[17].mxu0  ;;  %v26330_v2 = vld [vmem:[%s30808_s7] sm:$0xff]  }
 0x9eb   : > { %24733 = vmatprep.subr.bf16.mxu1 %v26418_v14  ;;  %v17574_v24 = vpop.f32.mrb[18].mxu0  ;;  %24714 = vmatpush3.bf16.msra.mxu0 %v26316_v62  ;;  %v26332_v19 = vld [vmem:[%s30808_s7 + $0x10] sm:$0xff]  }
 0x9ec   : > { %v17679_v7 = vpop.f32.mrb[16].mxu1  ;;  %v17579_v37 = vadd.f32 %v17574_v24, %v17471_v3  ;;  %v24442_v8 = vpop.f32.mrb[19].mxu0  ;;  %24715 = vmatprep.subr.bf16.mxu0 %v26418_v14  ;;  %v26334_v24 = vld [vmem:[%s30808_s7 + $0x20] sm:$0xff]  }
 0x9ed   : > { %v24461_v25 = vpop.f32.mrb[17].mxu1  ;;  %v17686_v39 = vadd.f32 %v17679_v7, %v17578_v17  ;;  %v26331_v17 = vld [vmem:[%s30808_s7 + $0x8] sm:$0xff]   ;;  %v26333_v7 = vld [vmem:[%s30808_s7 + $0x18] sm:$0xff]  }
 0x9ee   : > { %v17682_v43 = vpop.f32.mrb[18].mxu1  ;;  %24734 = vmatpush3.bf16.msra.mxu1 %v26317_v61  ;;  %v26335_v25 = vld [vmem:[%s30808_s7 + $0x28] sm:$0xff]  }
 0x9ef   : > { %24735 = vmatprep.subr.bf16.mxu1 %v26418_v14  ;;  %v24462_v9 = vpop.f32.mrb[19].mxu1  ;;  %v17687_v12 = vadd.f32 %v17682_v43, %v17579_v37  ;;  %24716 = vmatpush3.bf16.msra.mxu0 %v26318_v34 }
 0x9f0   : > { %24717 = vmatprep.subr.bf16.mxu0 %v26418_v14 }
 0x9f2   : > { %24736 = vmatpush3.bf16.msra.mxu1 %v26319_v44 }
 0x9f3   : > { %24737 = vmatprep.subr.bf16.mxu1 %v26418_v14  ;;  %24718 = vmatpush3.bf16.msra.mxu0 %v26320_v15 }
 0x9f4   : > { %24743 = vmatprep.subr.bf16.mxu0 %v26418_v14 }
 0x9f6   : > { %24738 = vmatpush3.bf16.msra.mxu1 %v26321_v33  ;;  %24720 = vmatmul.mubr.bf16.vlgmr.msra.gmra.mrb[44].mxu0 %v16610_v38  ;;  %v26336_v38 = vld [vmem:[%s30808_s7 + $0x30] sm:$0xff]  }
 0x9f7   : > { %24763 = vmatprep.subr.bf16.mxu1 %v26418_v14  ;;  %24744 = vmatpush3.bf16.msra.mxu0 %v26322_v41 }
 0x9f8   : > { %24745 = vmatprep.subr.bf16.mxu0 %v26418_v14  ;;  %24759 = vmatprep.mubr.msk.bf16.mxu0 %vm26419_vm0, %v26418_v14 }
 0x9f9   : > { %24740 = vmatmul.mubr.bf16.vlgmr.msra.gmra.mrb[44].mxu1 %v16611_v54 }
 0x9fa   : > { %24779 = vmatprep.mubr.msk.bf16.mxu1 %vm26419_vm0, %v26418_v14  ;;  %24764 = vmatpush3.bf16.msra.mxu1 %v26330_v2  ;;  %v21078_v2 = vld [vmem:[%s30807_s6] ss:$0 sm:$0xff] }
 0x9fb   : > { %24746 = vmatpush3.bf16.msra.mxu0 %v26323_v13  ;;  %24765 = vmatprep.subr.bf16.mxu1 %v26418_v14  ;;  %v26337_v13 = vld [vmem:[%s30808_s7 + $0x38] sm:$0xff]  }
 0x9fc   : > { %24747 = vmatprep.subr.bf16.mxu0 %v26418_v14 }
 0x9fe   : > { %24766 = vmatpush3.bf16.msra.mxu1 %v26331_v17 }
 0x9ff   : > { %24748 = vmatpush3.bf16.msra.mxu0 %v26324_v36  ;;  %24767 = vmatprep.subr.bf16.mxu1 %v26418_v14  ;;  %v26338_v36 = vld [vmem:[%s30810_s9] sm:$0xff]  }
 0xa00   : > { %24749 = vmatprep.subr.bf16.mxu0 %v26418_v14 }
 0xa02   : > { %24768 = vmatpush3.bf16.msra.mxu1 %v26332_v19 }
 0xa03   : > { %24750 = vmatpush3.bf16.msra.mxu0 %v26325_v42  ;;  %24769 = vmatprep.subr.bf16.mxu1 %v26418_v14  ;;  %v26339_v42 = vld [vmem:[%s30810_s9 + $0x8] sm:$0xff]  }
 0xa04   : > { %24751 = vmatprep.subr.bf16.mxu0 %v26418_v14 }
 0xa06   : > { %24770 = vmatpush3.bf16.msra.mxu1 %v26333_v7 }
 0xa07   : > { %24752 = vmatpush3.bf16.msra.mxu0 %v26326_v49  ;;  %24771 = vmatprep.subr.bf16.mxu1 %v26418_v14  ;;  %v26340_v49 = vld [vmem:[%s30810_s9 + $0x10] sm:$0xff]  }
 0xa08   : > { %24753 = vmatprep.subr.bf16.mxu0 %v26418_v14 }
 0xa09   : > { %v17787_v27 = vpop.f32.mrb[20].mxu0 }
 0xa0a   : > { %v17794_v28 = vadd.f32 %v17787_v27, %v17686_v39  ;;  %v24481_v30 = vpop.f32.mrb[21].mxu0  ;;  %24772 = vmatpush3.bf16.msra.mxu1 %v26334_v24  ;;  %v26342_v27 = vld [vmem:[%s30810_s9 + $0x20] sm:$0xff]  }
 0xa0b   : > { %v17790_v63 = vpop.f32.mrb[22].mxu0  ;;  %24754 = vmatpush3.bf16.msra.mxu0 %v26327_v11  ;;  %24773 = vmatprep.subr.bf16.mxu1 %v26418_v14  ;;  %v26341_v11 = vld [vmem:[%s30810_s9 + $0x18] sm:$0xff]  }
 0xa0c   : > { %v17895_v31 = vpop.f32.mrb[20].mxu1  ;;  %v17795_v5 = vadd.f32 %v17790_v63, %v17687_v12  ;;  %v24482_v20 = vpop.f32.mrb[23].mxu0  ;;  %24755 = vmatprep.subr.bf16.mxu0 %v26418_v14 }
 0xa0d   : > { %v24501_v0 = vpop.f32.mrb[21].mxu1  ;;  %v17902_v52 = vadd.f32 %v17895_v31, %v17794_v28  ;;  %v26343_v28 = vld [vmem:[%s30810_s9 + $0x28] sm:$0xff]  }
 0xa0e   : > { %v17898_v16 = vpop.f32.mrb[22].mxu1  ;;  %24774 = vmatpush3.bf16.msra.mxu1 %v26335_v25 }
 0xa0f   : > { %v24502_v23 = vpop.f32.mrb[23].mxu1  ;;  %v17903_v26 = vadd.f32 %v17898_v16, %v17795_v5  ;;  %24756 = vmatpush3.bf16.msra.mxu0 %v26328_v4  ;;  %24775 = vmatprep.subr.bf16.mxu1 %v26418_v14 }
 0xa10   : > { %24757 = vmatprep.subr.bf16.mxu0 %v26418_v14 }
 0xa12   : > { %24776 = vmatpush3.bf16.msra.mxu1 %v26336_v38 }
 0xa13   : > { %24758 = vmatpush3.bf16.msra.mxu0 %v26329_v40  ;;  %24777 = vmatprep.subr.bf16.mxu1 %v26418_v14 }
 0xa14   : > { %24783 = vmatprep.subr.bf16.mxu0 %v26418_v14 }
 0xa16   : > { %24760 = vmatmul.mubr.bf16.vlgmr.msra.gmra.mrb[48].mxu0 %v16612_v29  ;;  %24778 = vmatpush3.bf16.msra.mxu1 %v26337_v13 }
 0xa17   : > { %24799 = vmatprep.mubr.msk.bf16.mxu0 %vm26419_vm0, %v26418_v14  ;;  %24784 = vmatpush3.bf16.msra.mxu0 %v26338_v36 }
 0xa18   : > { %24785 = vmatprep.subr.bf16.mxu0 %v26418_v14 }
 0xa1b   : > { %24786 = vmatpush3.bf16.msra.mxu0 %v26339_v42 }
 0xa1c   : > { %24787 = vmatprep.subr.bf16.mxu0 %v26418_v14 }
 0xa1f   : > { %24788 = vmatpush3.bf16.msra.mxu0 %v26340_v49  ;;  %v21088_v49 = vld [vmem:[%s30811_s10] ss:$0 sm:$0xff] }
 0xa20   : > { %24789 = vmatprep.subr.bf16.mxu0 %v26418_v14 }
 0xa23   : > { %24790 = vmatpush3.bf16.msra.mxu0 %v26341_v11 }
 0xa24   : > { %24791 = vmatprep.subr.bf16.mxu0 %v26418_v14 }
 0xa27   : > { %24792 = vmatpush3.bf16.msra.mxu0 %v26342_v27 }
 0xa28   : > { %24793 = vmatprep.subr.bf16.mxu0 %v26418_v14 }
 0xa29   : > { %v18003_v32 = vpop.f32.mrb[24].mxu0 }
 0xa2a   : > { %v18010_v46 = vadd.f32 %v18003_v32, %v17902_v52  ;;  %v24521_v56 = vpop.f32.mrb[25].mxu0 }
 0xa2b   : > { %v18006_v21 = vpop.f32.mrb[26].mxu0  ;;  %24794 = vmatpush3.bf16.msra.mxu0 %v26343_v28 }
 0xa2c   : > { %v18111_v57 = vpop.f32.mrb[24].mxu1  ;;  %v18011_v6 = vadd.f32 %v18006_v21, %v17903_v26  ;;  %v24522_v1 = vpop.f32.mrb[27].mxu0  ;;  %24795 = vmatprep.subr.bf16.mxu0 %v26418_v14 }
 0xa2d   : > { %v24541_v47 = vpop.f32.mrb[25].mxu1  ;;  %v18118_v3 = vadd.f32 %v18111_v57, %v18010_v46 }
 0xa2e   : > { %v18114_v22 = vpop.f32.mrb[26].mxu1 }
 0xa2f   : > { %v24542_v10 = vpop.f32.mrb[27].mxu1  ;;  %v18119_v35 = vadd.f32 %v18114_v22, %v18011_v6 }
 0xa49   : > { %v18219_v45 = vpop.f32.mrb[28].mxu0 }
 0xa4a   : > { %v18226_v48 = vadd.f32 %v18219_v45, %v18118_v3  ;;  %v24561_v50 = vpop.f32.mrb[29].mxu0 }
 0xa4b   : > { %v18222_v53 = vpop.f32.mrb[30].mxu0 }
 0xa4c   : > { %v18327_v51 = vpop.f32.mrb[28].mxu1  ;;  %v18227_v18 = vadd.f32 %v18222_v53, %v18119_v35  ;;  %v24562_v59 = vpop.f32.mrb[31].mxu0 }
 0xa4d   : > { %v24581_v55 = vpop.f32.mrb[29].mxu1  ;;  %v18334_v58 = vadd.f32 %v18327_v51, %v18226_v48 }
 0xa4e   : > { %v18330_v60 = vpop.f32.mrb[30].mxu1 }
 0xa4f   : > { %v24582_v62 = vpop.f32.mrb[31].mxu1  ;;  %v18335_v61 = vadd.f32 %v18330_v60, %v18227_v18 }
 0xa69   : > { %v18435_v34 = vpop.f32.mrb[32].mxu0 }
 0xa6a   : > { %v18442_v37 = vadd.f32 %v18435_v34, %v18334_v58  ;;  %v24601_v39 = vpop.f32.mrb[33].mxu0 }
 0xa6b   : > { %v18438_v43 = vpop.f32.mrb[34].mxu0 }
 0xa6c   : > { %v18543_v8 = vpop.f32.mrb[32].mxu1  ;;  %v18443_v9 = vadd.f32 %v18438_v43, %v18335_v61  ;;  %v24602_v15 = vpop.f32.mrb[35].mxu0 }
 0xa6d   : > { %v24621_v44 = vpop.f32.mrb[33].mxu1  ;;  %v18550_v12 = vadd.f32 %v18543_v8, %v18442_v37 }
 0xa6e   : > { %v18546_v33 = vpop.f32.mrb[34].mxu1  ;;  %v26344_v44 = vld [vmem:[%s30810_s9 + $0x30] sm:$0xff]  }
 0xa6f   : > { %v24622_v41 = vpop.f32.mrb[35].mxu1  ;;  %v18551_v54 = vadd.f32 %v18546_v33, %v18443_v9  ;;  %24796 = vmatpush3.bf16.msra.mxu0 %v26344_v44  ;;  %v26345_v9 = vld [vmem:[%s30810_s9 + $0x38] sm:$0xff]  }
 0xa70   : > { %24797 = vmatprep.subr.bf16.mxu0 %v26418_v14 }
 0xa73   : > { %24798 = vmatpush3.bf16.msra.mxu0 %v26345_v9 }
 0xa89   : > { %v18651_v30 = vpop.f32.mrb[36].mxu0 }
 0xa8a   : > { %v18658_v31 = vadd.f32 %v18651_v30, %v18550_v12  ;;  %v24641_v63 = vpop.f32.mrb[37].mxu0  ;;  %v21079_v12 = vld [vmem:[%s30809_s8] ss:$0 sm:$0xff] }
 0xa8b   : > { %v18654_v4 = vpop.f32.mrb[38].mxu0 }
 0xa8c   : > { %v18759_v0 = vpop.f32.mrb[36].mxu1  ;;  %v18659_v52 = vadd.f32 %v18654_v4, %v18551_v54  ;;  %v24642_v16 = vpop.f32.mrb[39].mxu0 }
 0xa8d   : > { %v24661_v5 = vpop.f32.mrb[37].mxu1  ;;  %v18766_v20 = vadd.f32 %v18759_v0, %v18658_v31 }
 0xa8e   : > { %v18762_v23 = vpop.f32.mrb[38].mxu1 }
 0xa8f   : > { %v24662_v26 = vpop.f32.mrb[39].mxu1  ;;  %v18767_v40 = vadd.f32 %v18762_v23, %v18659_v52 }
 0xaa9   : > { %v18867_v29 = vpop.f32.mrb[40].mxu0 }
 0xaaa   : > { %v18874_v32 = vadd.f32 %v18867_v29, %v18766_v20  ;;  %v24681_v46 = vpop.f32.mrb[41].mxu0 }
 0xaab   : > { %v18870_v57 = vpop.f32.mrb[42].mxu0 }
 0xaac   : > { %v18975_v56 = vpop.f32.mrb[40].mxu1  ;;  %v18875_v47 = vadd.f32 %v18870_v57, %v18767_v40  ;;  %v24682_v3 = vpop.f32.mrb[43].mxu0 }
 0xaad   : > { %v24701_v21 = vpop.f32.mrb[41].mxu1  ;;  %v18982_v6 = vadd.f32 %v18975_v56, %v18874_v32 }
 0xaae   : > { %v18978_v1 = vpop.f32.mrb[42].mxu1 }
 0xaaf   : > { %v24702_v22 = vpop.f32.mrb[43].mxu1  ;;  %v18983_v10 = vadd.f32 %v18978_v1, %v18875_v47 }
 0xac9   : > { %v19083_v35 = vpop.f32.mrb[44].mxu0 }
 0xaca   : > { %v19090_v45 = vadd.f32 %v19083_v35, %v18982_v6  ;;  %v24721_v48 = vpop.f32.mrb[45].mxu0 }
 0xacb   : > { %v19086_v51 = vpop.f32.mrb[46].mxu0 }
 0xacc   : > { %v19191_v50 = vpop.f32.mrb[44].mxu1  ;;  %v19091_v55 = vadd.f32 %v19086_v51, %v18983_v10  ;;  %v24722_v58 = vpop.f32.mrb[47].mxu0 }
 0xacd   : > { %v24741_v53 = vpop.f32.mrb[45].mxu1  ;;  %v19198_v18 = vadd.f32 %v19191_v50, %v19090_v45 }
 0xace   : > { %v19194_v59 = vpop.f32.mrb[46].mxu1 }
 0xacf   : > { %v24742_v60 = vpop.f32.mrb[47].mxu1  ;;  %v19199_v62 = vadd.f32 %v19194_v59, %v19091_v55 }
 0xae9   : > { %v19299_v61 = vpop.f32.mrb[48].mxu0 }
 0xaea   : > { %v19306_v17 = vadd.f32 %v19299_v61, %v19198_v18  ;;  %v24761_v19 = vpop.f32.mrb[49].mxu0 }
 0xaeb   : > { %v19302_v7 = vpop.f32.mrb[50].mxu0 }
 0xaec   : > { %v19315_v24 = vadd.f32 %v21078_v2, %v19306_v17  ;;  %v19307_v25 = vadd.f32 %v19302_v7, %v19199_v62  ;;  %v24762_v34 = vpop.f32.mrb[51].mxu0 }
 0xaee   : > { %v19316_v37 = vadd.f32 %v21078_v2, %v19307_v25  ;;  %v19317_v39 = vmax.f32 %v19315_v24, 0.0 }
 0xaf0   : > { %v19318_v8 = vmax.f32 %v19316_v37, 0.0 }
 0xaf2   : > { %v19319_v43 = vpack.c.bf16 %v19318_v8, %v19317_v39 }
 0xaf4   : > { %24780 = vmatmul.mubr.bf16.vlgmr.msra.gmra.mrb[48].mxu1 %v19319_v43 }
 0xbc7   : > { %v19425_v15 = vpop.f32.mrb[48].mxu1 }
 0xbc8   : > { %v19426_v33 = vadd.f32 %v21079_v12, %v19425_v15  ;;  %v24781_v38 = vpop.f32.mrb[49].mxu1 }
 0xbc9   : > { %v19428_v41 = vpop.f32.mrb[50].mxu1 }
 0xbca   : > { %v19429_v54 = vadd.f32 %v21079_v12, %v19428_v41  ;;  %v24782_v13 = vpop.f32.mrb[51].mxu1  ;;  %v19432_v36 = vmax.f32 %v19426_v33, 0.0 }
 0xbcc   : > { %v19433_v42 = vmax.f32 %v19429_v54, 0.0 }
 0xbce   : > { %v19434_v14 = vpack.c.bf16 %v19433_v42, %v19432_v36 }
 0xbd0   : > { %24800 = vmatmul.mubr.bf16.vlgmr.msra.gmra.mrb[52].mxu0 %v19434_v14 }
 0xca3   : > { %v19540_v11 = vpop.f32.mrb[52].mxu0 }
 0xca4   : > { %v19541_v27 = vadd.f32 %v21088_v49, %v19540_v11  ;;  %v24801_v28 = vpop.f32.mrb[53].mxu0 }
 0xca5   : > { %v19543_v30 = vpop.f32.mrb[54].mxu0 }
 0xca6   : > { %19547 = vst [vmem:[%s28213_s19] sm:$0xff] %v19541_v27  ;;  %v19544_v31 = vadd.f32 %v21088_v49, %v19543_v30  ;;  %v24802_v63 = vpop.f32.mrb[55].mxu0 }
 0xca8   : > { %19548 = vst [vmem:[%s28213_s19 + $0x8] sm:$0xff] %v19544_v31 }
 0xca9 PF: > { %p18_p13 = scmp.ge.s32.totalorder %s26497_s21, 4   ;;  %s30816_s17 = smov %s26388_s18 }
 0xcaa   : > { %s30817_s18 = smov %s26506_s24  ;;  %s30818_s19 = smov %s26497_s21 }
 0xcab   :  { %20 = sbr.rel (!%p18_p13) target bundleno = 2 (0x2), region = 260 }

</bundles_post_ra>
